<compile_context>
chip_gen: v5e
topology: v5e:2x2
jax: 0.10.0
libtpu: 0.0.40
codegen_flags: <defaults>
</compile_context>

<pallas_src>
import functools

import jax
import jax.numpy as jnp
from jax.experimental import pallas as pl
from jax.experimental.pallas import tpu as pltpu

LANE = 128


def _pick_tile(m, preferred=1024, min_steps=2):
    """Largest multiple-of-8 divisor of m that is <= preferred, leaves at
    least `min_steps` grid steps (both v7x TensorCores usable), and is capped
    at 2048 so an awkward production-size m can never blow the VMEM budget."""
    cap = min(preferred, 2048)
    if m <= 8 or m % 8 != 0:
        return m                       # full-array block is always legal
    cap = min(cap, max(8, m // min_steps))
    cap -= cap % 8
    t = cap
    while t >= 8:
        if m % t == 0:
            return t
        t -= 8
    return 8


# ----------------------------------------------------------------------------
# Fused kernel: 4x (branch 1x1 conv K=3, ReLU) -> 4x MXU matmul vs W1 row-slice
#               -> +b1, ReLU -> MXU matmul vs W2 (padded to 128 lanes) -> +b2
#               -> optional bf16 heatmap store -> per-tile MSE partial scalar.
# ----------------------------------------------------------------------------
def _fused_kernel(z1_ref, z2_ref, z3_ref, z4_ref,
                  wc1_ref, bc1_ref, wc2_ref, bc2_ref,
                  wc3_ref, bc3_ref, wc4_ref, bc4_ref,
                  w1_ref, b1_ref, w2_ref, b2_ref, tgt_ref,
                  *out_refs, w1_splits, store_heatmap):
    if store_heatmap:
        hm_ref, part_ref = out_refs
    else:
        (part_ref,) = out_refs

    def branch_feat(z_ref, w_ref, b_ref):
        # relu(z @ w + b) with K=3: VPU broadcast-FMAs, not the MXU.
        z = z_ref[...]                               # (tm, 3)  f32
        w = w_ref[...]                               # (3,  c)  f32
        acc = b_ref[...]                             # (1,  c)  f32, broadcasts
        for k in range(w.shape[0]):                  # K == 3, static
            acc = acc + z[:, k:k + 1] * w[k:k + 1, :]
        return jnp.maximum(acc, 0.0)                 # (tm, c)

    z_refs = (z1_ref, z2_ref, z3_ref, z4_ref)
    wc_refs = (wc1_ref, wc2_ref, wc3_ref, wc4_ref)
    bc_refs = (bc1_ref, bc2_ref, bc3_ref, bc4_ref)

    # h = relu( sum_b y_b @ W1[lo_b:hi_b, :] + b1 )   (bf16 MXU, f32 acc)
    acc = None
    for z_ref, w_ref, b_ref, (lo, hi) in zip(z_refs, wc_refs, bc_refs, w1_splits):
        y = branch_feat(z_ref, w_ref, b_ref).astype(jnp.bfloat16)   # (tm, c_b)
        p = jnp.dot(y, w1_ref[lo:hi, :], preferred_element_type=jnp.float32)
        acc = p if acc is None else acc + p
    h = jnp.maximum(acc + b1_ref[...], 0.0)                         # (tm, F) f32

    # heatmap = h @ W2 + b2 ; W2/b2 are zero-padded 3 -> 128 lanes, so the
    # padded heatmap lanes are exactly zero.
    hm = jnp.dot(h.astype(jnp.bfloat16), w2_ref[...],
                 preferred_element_type=jnp.float32) + b2_ref[...]  # (tm, 128)

    if store_heatmap:
        hm_ref[...] = hm.astype(hm_ref.dtype)        # bf16, 128-lane dense

    # MSE partial: real channels only (padded lanes are exactly zero on both
    # sides so dropping them is exact).  One scalar per tile, written into the
    # tile's private output block -> the grid axis stays fully "parallel".
    tgt = tgt_ref[...]                               # (tm, 3) f32
    d = hm[:, :tgt.shape[1]] - tgt
    part_ref[...] = jnp.broadcast_to(jnp.sum(d * d), part_ref.shape)


def fused_backbone_head(zs, tgt_flat, params, *, store_heatmap, tm_preferred=1024):
    """zs: list of 4 (M, 3) f32 resolution-matched inputs; tgt_flat: (M, C) f32.
    Returns (heatmap_padded_or_None, sum of squared errors)."""
    M, Cin = zs[0].shape
    C = tgt_flat.shape[1]
    branch_w = [w for (w, _) in params["branches"]]
    branch_b = [b for (_, b) in params["branches"]]
    chans = [w.shape[1] for w in branch_w]
    K = sum(chans)                                   # 480
    F = params["w1"].shape[1]                        # 256
    Cp = LANE                                        # 3 -> 128 lane-dense

    w1 = params["w1"].astype(jnp.bfloat16)                                  # (K, F)
    b1 = params["b1"].reshape(1, F).astype(jnp.float32)
    w2 = jnp.pad(params["w2"], ((0, 0), (0, Cp - C))).astype(jnp.bfloat16)  # (F, Cp)
    b2 = jnp.pad(params["b2"], (0, Cp - C)).reshape(1, Cp).astype(jnp.float32)

    w1_splits, off = [], 0
    for c in chans:
        w1_splits.append((off, off + c))
        off += c
    w1_splits = tuple(w1_splits)

    tm = _pick_tile(M, tm_preferred)
    nsteps = M // tm
    grid = (nsteps,)

    in_specs, inputs = [], []
    for z in zs:                                     # streamed (tm, 3) tiles
        in_specs.append(pl.BlockSpec((tm, Cin), lambda i: (i, 0)))
        inputs.append(z)
    for w, b, c in zip(branch_w, branch_b, chans):   # resident branch weights
        in_specs.append(pl.BlockSpec((Cin, c), lambda i: (0, 0)))
        inputs.append(w.astype(jnp.float32))
        in_specs.append(pl.BlockSpec((1, c), lambda i: (0, 0)))
        inputs.append(b.reshape(1, c).astype(jnp.float32))
    in_specs += [
        pl.BlockSpec((K, F), lambda i: (0, 0)),      # W1 resident (bf16)
        pl.BlockSpec((1, F), lambda i: (0, 0)),      # b1
        pl.BlockSpec((F, Cp), lambda i: (0, 0)),     # W2 resident (bf16)
        pl.BlockSpec((1, Cp), lambda i: (0, 0)),     # b2
        pl.BlockSpec((tm, C), lambda i: (i, 0)),     # target tile (unpadded!)
    ]
    inputs += [w1, b1, w2, b2, tgt_flat]

    part_shape = jax.ShapeDtypeStruct((nsteps * 8, Cp), jnp.float32)
    part_spec = pl.BlockSpec((8, Cp), lambda i: (i, 0))
    if store_heatmap:
        out_shape = (jax.ShapeDtypeStruct((M, Cp), jnp.bfloat16), part_shape)
        out_specs = (pl.BlockSpec((tm, Cp), lambda i: (i, 0)), part_spec)
    else:
        out_shape = part_shape
        out_specs = part_spec

    cost = pl.CostEstimate(
        flops=2 * M * (K * F + F * Cp),
        transcendentals=0,
        bytes_accessed=(M * Cin * 4 * len(zs)            # z streams
                        + M * C * 4                      # target
                        + (M * Cp * 2 if store_heatmap else 0)
                        + K * F * 2 + F * Cp * 2         # resident weights
                        + nsteps * 8 * Cp * 4))          # partial sums

    kernel = functools.partial(_fused_kernel, w1_splits=w1_splits,
                               store_heatmap=store_heatmap)

    out = pl.pallas_call(
        kernel,
        out_shape=out_shape,
        grid=grid,
        in_specs=in_specs,
        out_specs=out_specs,
        compiler_params=pltpu.CompilerParams(
            dimension_semantics=("parallel",),
            vmem_limit_bytes=48 * 1024 * 1024),          # headroom past v5e's 16 MiB default
        cost_estimate=cost,
    )(*inputs)

    if store_heatmap:
        hm_pad, partials = out
    else:
        hm_pad, partials = None, out
    sq_err = jnp.sum(partials.reshape(nsteps, 8, Cp)[:, 0, 0])
    return hm_pad, sq_err


# ----------------------------------------------------------------------------
# JAX glue: pooling / upsampling (3-channel only!) / parameters / forward
# ----------------------------------------------------------------------------
def avg_pool_nhwc(x, k):
    if k == 1:
        return x
    B, H, W, C = x.shape
    return x.reshape(B, H // k, k, W // k, k, C).mean(axis=(2, 4))


def upsample_nearest_nhwc(x, k):
    if k == 1:
        return x
    return jnp.repeat(jnp.repeat(x, k, axis=1), k, axis=2)


def init_params(key, width=32, feat_channels=256, num_cpoints=3, in_ch=3):
    branch_channels = [width, width * 2, width * 4, width * 8]   # sum = width*15
    keys = jax.random.split(key, 2 * len(branch_channels) + 4)
    params = {"branches": []}
    ki = 0
    for c in branch_channels:
        w = jax.random.normal(keys[ki], (in_ch, c), jnp.float32) * 0.1; ki += 1
        b = jax.random.normal(keys[ki], (c,), jnp.float32) * 0.01;      ki += 1
        params["branches"].append((w, b))
    K = width * 15
    params["w1"] = jax.random.normal(keys[ki], (K, feat_channels), jnp.float32) * 0.05; ki += 1
    params["b1"] = jax.random.normal(keys[ki], (feat_channels,), jnp.float32) * 0.01;   ki += 1
    params["w2"] = jax.random.normal(keys[ki], (feat_channels, num_cpoints), jnp.float32) * 0.05; ki += 1
    params["b2"] = jax.random.normal(keys[ki], (num_cpoints,), jnp.float32) * 0.01
    return params


def keypoint_model_forward(params, img_nchw, target_nchw, is_train=True,
                           return_heatmap=False):
    """Mirrors KeypointModel.forward(img, target, is_train=True) -> loss.
    return_heatmap=True additionally streams the (bf16) heatmap out of the
    kernel (used for verification; the pure train path skips that HBM write)."""
    img = jnp.transpose(img_nchw, (0, 2, 3, 1)).astype(jnp.float32)   # NCHW->NHWC
    tgt = jnp.transpose(target_nchw, (0, 2, 3, 1)).astype(jnp.float32)
    B, H, W, Cin = img.shape
    C = tgt.shape[-1]
    M = B * H * W

    # Resolution-matched 3-channel inputs per branch.  Because nearest
    # upsample commutes with per-pixel 1x1 convs + ReLU, upsampling the
    # 3-channel pooled image here is mathematically identical to the original
    # conv -> upsample -> concat pipeline, but moves 48 B/row instead of
    # ~3 KB/row of wide features through HBM.
    strides = (1, 2, 4, 8)
    zs = [upsample_nearest_nhwc(avg_pool_nhwc(img, s), s).reshape(M, Cin)
          for s in strides]

    hm_pad, sq_err = fused_backbone_head(zs, tgt.reshape(M, C), params,
                                         store_heatmap=return_heatmap)
    loss = sq_err / (M * C)
    if not return_heatmap:
        # train path of the PyTorch module returns the loss only
        return loss
    heatmaps = hm_pad[:, :C].astype(jnp.float32).reshape(B, H, W, C)
    # TODO(synk): eval path (flip_test, heatmap->pose decoding with img_metas)
    # depends on the external KeypointHead decode code and is not reproduced.
    return loss, heatmaps


def reference_forward(params, img_nchw, target_nchw):
    """Pure-JAX f32 reference (conv -> upsample -> concat order, as in the
    original module) for a numerical sanity check."""
    img = jnp.transpose(img_nchw, (0, 2, 3, 1))
    tgt = jnp.transpose(target_nchw, (0, 2, 3, 1))
    feats = []
    for (w, b), s in zip(params["branches"], [1, 2, 4, 8]):
        xs = avg_pool_nhwc(img, s)
        y = jnp.maximum(xs @ w + b, 0.0)
        feats.append(upsample_nearest_nhwc(y, s))
    x = jnp.concatenate(feats, axis=-1)
    h = jnp.maximum(x @ params["w1"] + params["b1"], 0.0)
    hm = h @ params["w2"] + params["b2"]
    loss = jnp.mean((hm - tgt) ** 2)
    return loss, hm


if __name__ == "__main__":
    key = jax.random.PRNGKey(0)
    k_img, k_tgt, k_par = jax.random.split(key, 3)

    B, C_in, Hs, Ws = 2, 3, 16, 16
    num_cpoints, width, feat_channels = 3, 32, 256

    img = jax.random.normal(k_img, (B, C_in, Hs, Ws), jnp.float32)     # NCHW
    target = jax.random.uniform(k_tgt, (B, num_cpoints, Hs, Ws), jnp.float32)

    params = init_params(k_par, width=width, feat_channels=feat_channels,
                         num_cpoints=num_cpoints, in_ch=C_in)

    fwd = jax.jit(keypoint_model_forward,
                  static_argnames=("is_train", "return_heatmap"))

    # Train path (PyTorch semantics): loss only, no heatmap HBM writeback.
    loss_train = jax.block_until_ready(fwd(params, img, target))

    # Verification path: also stream the bf16, 128-lane-dense heatmap out.
    loss, heatmaps = fwd(params, img, target, return_heatmap=True)
    loss = jax.block_until_ready(loss)
    heatmaps = jax.block_until_ready(heatmaps)

    ref_loss, _ = reference_forward(params, img, target)
    ref_loss = float(jax.block_until_ready(ref_loss))

    assert heatmaps.shape == (B, Hs, Ws, num_cpoints)
    assert jnp.isfinite(loss)
    assert abs(float(loss) - ref_loss) <= 0.05 * abs(ref_loss) + 1e-3, (
        float(loss), ref_loss)
    assert abs(float(loss_train) - float(loss)) <= 1e-5 * max(1.0, abs(float(loss))), (
        float(loss_train), float(loss))
    print("KERNEL_OK")
</pallas_src>

<mosaic_0001>
module attributes {stable_mosaic.version = 11 : i64} {
  func.func @_fused_kernel(%arg0: i32, %arg1: memref<256x3xf32, #tpu.memory_space<vmem>>, %arg2: memref<256x3xf32, #tpu.memory_space<vmem>>, %arg3: memref<256x3xf32, #tpu.memory_space<vmem>>, %arg4: memref<256x3xf32, #tpu.memory_space<vmem>>, %arg5: memref<3x32xf32, #tpu.memory_space<vmem>>, %arg6: memref<1x32xf32, #tpu.memory_space<vmem>>, %arg7: memref<3x64xf32, #tpu.memory_space<vmem>>, %arg8: memref<1x64xf32, #tpu.memory_space<vmem>>, %arg9: memref<3x128xf32, #tpu.memory_space<vmem>>, %arg10: memref<1x128xf32, #tpu.memory_space<vmem>>, %arg11: memref<3x256xf32, #tpu.memory_space<vmem>>, %arg12: memref<1x256xf32, #tpu.memory_space<vmem>>, %arg13: memref<480x256xbf16, #tpu.memory_space<vmem>>, %arg14: memref<1x256xf32, #tpu.memory_space<vmem>>, %arg15: memref<256x128xbf16, #tpu.memory_space<vmem>>, %arg16: memref<1x128xf32, #tpu.memory_space<vmem>>, %arg17: memref<256x3xf32, #tpu.memory_space<vmem>>, %arg18: memref<8x128xf32, #tpu.memory_space<vmem>>) attributes {dimension_semantics = [#tpu.dimension_semantics<parallel>], iteration_bounds = array<i64: 2>, scalar_prefetch = 0 : i64, scratch_operands = 0 : i64, tpu.core_type = #tpu.core_type<tc>, window_params = [{transform_indices = @transform_0, window_bounds = array<i64: 256, 3>}, {transform_indices = @transform_1, window_bounds = array<i64: 256, 3>}, {transform_indices = @transform_2, window_bounds = array<i64: 256, 3>}, {transform_indices = @transform_3, window_bounds = array<i64: 256, 3>}, {pipeline_mode = #tpu.pipeline_mode<synchronous>, transform_indices = @transform_4, window_bounds = array<i64: 3, 32>}, {pipeline_mode = #tpu.pipeline_mode<synchronous>, transform_indices = @transform_5, window_bounds = array<i64: 1, 32>}, {pipeline_mode = #tpu.pipeline_mode<synchronous>, transform_indices = @transform_6, window_bounds = array<i64: 3, 64>}, {pipeline_mode = #tpu.pipeline_mode<synchronous>, transform_indices = @transform_7, window_bounds = array<i64: 1, 64>}, {pipeline_mode = #tpu.pipeline_mode<synchronous>, transform_indices = @transform_8, window_bounds = array<i64: 3, 128>}, {pipeline_mode = #tpu.pipeline_mode<synchronous>, transform_indices = @transform_9, window_bounds = array<i64: 1, 128>}, {pipeline_mode = #tpu.pipeline_mode<synchronous>, transform_indices = @transform_10, window_bounds = array<i64: 3, 256>}, {pipeline_mode = #tpu.pipeline_mode<synchronous>, transform_indices = @transform_11, window_bounds = array<i64: 1, 256>}, {pipeline_mode = #tpu.pipeline_mode<synchronous>, transform_indices = @transform_12, window_bounds = array<i64: 480, 256>}, {pipeline_mode = #tpu.pipeline_mode<synchronous>, transform_indices = @transform_13, window_bounds = array<i64: 1, 256>}, {pipeline_mode = #tpu.pipeline_mode<synchronous>, transform_indices = @transform_14, window_bounds = array<i64: 256, 128>}, {pipeline_mode = #tpu.pipeline_mode<synchronous>, transform_indices = @transform_15, window_bounds = array<i64: 1, 128>}, {transform_indices = @transform_16, window_bounds = array<i64: 256, 3>}, {transform_indices = @transform_17, window_bounds = array<i64: 8, 128>}]} {
    %c0 = arith.constant 0 : index
    %c0_0 = arith.constant 0 : index
    %0 = vector.load %arg1[%c0, %c0_0] : memref<256x3xf32, #tpu.memory_space<vmem>>, vector<256x3xf32>
    %c0_1 = arith.constant 0 : index
    %c0_2 = arith.constant 0 : index
    %1 = vector.load %arg5[%c0_1, %c0_2] : memref<3x32xf32, #tpu.memory_space<vmem>>, vector<3x32xf32>
    %c0_3 = arith.constant 0 : index
    %c0_4 = arith.constant 0 : index
    %2 = vector.load %arg6[%c0_3, %c0_4] : memref<1x32xf32, #tpu.memory_space<vmem>>, vector<1x32xf32>
    %3 = vector.extract_strided_slice %0 {offsets = [0, 0], sizes = [256, 1], strides = [1, 1]} : vector<256x3xf32> to vector<256x1xf32>
    %4 = vector.extract_strided_slice %1 {offsets = [0, 0], sizes = [1, 32], strides = [1, 1]} : vector<3x32xf32> to vector<1x32xf32>
    %5 = vector.broadcast %3 : vector<256x1xf32> to vector<256x32xf32>
    %6 = vector.broadcast %4 : vector<1x32xf32> to vector<256x32xf32>
    %7 = arith.mulf %5, %6 : vector<256x32xf32>
    %8 = vector.broadcast %2 : vector<1x32xf32> to vector<256x32xf32>
    %9 = arith.addf %8, %7 : vector<256x32xf32>
    %10 = vector.extract_strided_slice %0 {offsets = [0, 1], sizes = [256, 1], strides = [1, 1]} : vector<256x3xf32> to vector<256x1xf32>
    %11 = vector.extract_strided_slice %1 {offsets = [1, 0], sizes = [1, 32], strides = [1, 1]} : vector<3x32xf32> to vector<1x32xf32>
    %12 = vector.broadcast %10 : vector<256x1xf32> to vector<256x32xf32>
    %13 = vector.broadcast %11 : vector<1x32xf32> to vector<256x32xf32>
    %14 = arith.mulf %12, %13 : vector<256x32xf32>
    %15 = arith.addf %9, %14 : vector<256x32xf32>
    %16 = vector.extract_strided_slice %0 {offsets = [0, 2], sizes = [256, 1], strides = [1, 1]} : vector<256x3xf32> to vector<256x1xf32>
    %17 = vector.extract_strided_slice %1 {offsets = [2, 0], sizes = [1, 32], strides = [1, 1]} : vector<3x32xf32> to vector<1x32xf32>
    %18 = vector.broadcast %16 : vector<256x1xf32> to vector<256x32xf32>
    %19 = vector.broadcast %17 : vector<1x32xf32> to vector<256x32xf32>
    %20 = arith.mulf %18, %19 : vector<256x32xf32>
    %21 = arith.addf %15, %20 : vector<256x32xf32>
    %cst = arith.constant 0.000000e+00 : f32
    %22 = vector.broadcast %cst : f32 to vector<256x32xf32>
    %23 = arith.maximumf %21, %22 : vector<256x32xf32>
    %24 = arith.truncf %23 : vector<256x32xf32> to vector<256x32xbf16>
    %c0_5 = arith.constant 0 : index
    %c0_6 = arith.constant 0 : index
    %25 = vector.load %arg13[%c0_5, %c0_6] : memref<480x256xbf16, #tpu.memory_space<vmem>>, vector<32x256xbf16>
    %cst_7 = arith.constant dense<0.000000e+00> : vector<256x256xf32>
    %26 = tpu.matmul %24, %25, %cst_7 {dimension_numbers = #tpu.dot_dimension_numbers<[1], [0], [0], [1], [0, 0, 1, 1], [], []>} : vector<256x32xbf16>, vector<32x256xbf16>, vector<256x256xf32> -> vector<256x256xf32>
    %c0_8 = arith.constant 0 : index
    %c0_9 = arith.constant 0 : index
    %27 = vector.load %arg2[%c0_8, %c0_9] : memref<256x3xf32, #tpu.memory_space<vmem>>, vector<256x3xf32>
    %c0_10 = arith.constant 0 : index
    %c0_11 = arith.constant 0 : index
    %28 = vector.load %arg7[%c0_10, %c0_11] : memref<3x64xf32, #tpu.memory_space<vmem>>, vector<3x64xf32>
    %c0_12 = arith.constant 0 : index
    %c0_13 = arith.constant 0 : index
    %29 = vector.load %arg8[%c0_12, %c0_13] : memref<1x64xf32, #tpu.memory_space<vmem>>, vector<1x64xf32>
    %30 = vector.extract_strided_slice %27 {offsets = [0, 0], sizes = [256, 1], strides = [1, 1]} : vector<256x3xf32> to vector<256x1xf32>
    %31 = vector.extract_strided_slice %28 {offsets = [0, 0], sizes = [1, 64], strides = [1, 1]} : vector<3x64xf32> to vector<1x64xf32>
    %32 = vector.broadcast %30 : vector<256x1xf32> to vector<256x64xf32>
    %33 = vector.broadcast %31 : vector<1x64xf32> to vector<256x64xf32>
    %34 = arith.mulf %32, %33 : vector<256x64xf32>
    %35 = vector.broadcast %29 : vector<1x64xf32> to vector<256x64xf32>
    %36 = arith.addf %35, %34 : vector<256x64xf32>
    %37 = vector.extract_strided_slice %27 {offsets = [0, 1], sizes = [256, 1], strides = [1, 1]} : vector<256x3xf32> to vector<256x1xf32>
    %38 = vector.extract_strided_slice %28 {offsets = [1, 0], sizes = [1, 64], strides = [1, 1]} : vector<3x64xf32> to vector<1x64xf32>
    %39 = vector.broadcast %37 : vector<256x1xf32> to vector<256x64xf32>
    %40 = vector.broadcast %38 : vector<1x64xf32> to vector<256x64xf32>
    %41 = arith.mulf %39, %40 : vector<256x64xf32>
    %42 = arith.addf %36, %41 : vector<256x64xf32>
    %43 = vector.extract_strided_slice %27 {offsets = [0, 2], sizes = [256, 1], strides = [1, 1]} : vector<256x3xf32> to vector<256x1xf32>
    %44 = vector.extract_strided_slice %28 {offsets = [2, 0], sizes = [1, 64], strides = [1, 1]} : vector<3x64xf32> to vector<1x64xf32>
    %45 = vector.broadcast %43 : vector<256x1xf32> to vector<256x64xf32>
    %46 = vector.broadcast %44 : vector<1x64xf32> to vector<256x64xf32>
    %47 = arith.mulf %45, %46 : vector<256x64xf32>
    %48 = arith.addf %42, %47 : vector<256x64xf32>
    %cst_14 = arith.constant 0.000000e+00 : f32
    %49 = vector.broadcast %cst_14 : f32 to vector<256x64xf32>
    %50 = arith.maximumf %48, %49 : vector<256x64xf32>
    %51 = arith.truncf %50 : vector<256x64xf32> to vector<256x64xbf16>
    %c32 = arith.constant 32 : index
    %c0_15 = arith.constant 0 : index
    %52 = vector.load %arg13[%c32, %c0_15] : memref<480x256xbf16, #tpu.memory_space<vmem>>, vector<64x256xbf16>
    %cst_16 = arith.constant dense<0.000000e+00> : vector<256x256xf32>
    %53 = tpu.matmul %51, %52, %cst_16 {dimension_numbers = #tpu.dot_dimension_numbers<[1], [0], [0], [1], [0, 0, 1, 1], [], []>} : vector<256x64xbf16>, vector<64x256xbf16>, vector<256x256xf32> -> vector<256x256xf32>
    %54 = arith.addf %26, %53 : vector<256x256xf32>
    %c0_17 = arith.constant 0 : index
    %c0_18 = arith.constant 0 : index
    %55 = vector.load %arg3[%c0_17, %c0_18] : memref<256x3xf32, #tpu.memory_space<vmem>>, vector<256x3xf32>
    %c0_19 = arith.constant 0 : index
    %c0_20 = arith.constant 0 : index
    %56 = vector.load %arg9[%c0_19, %c0_20] : memref<3x128xf32, #tpu.memory_space<vmem>>, vector<3x128xf32>
    %c0_21 = arith.constant 0 : index
    %c0_22 = arith.constant 0 : index
    %57 = vector.load %arg10[%c0_21, %c0_22] : memref<1x128xf32, #tpu.memory_space<vmem>>, vector<1x128xf32>
    %58 = vector.extract_strided_slice %55 {offsets = [0, 0], sizes = [256, 1], strides = [1, 1]} : vector<256x3xf32> to vector<256x1xf32>
    %59 = vector.extract_strided_slice %56 {offsets = [0, 0], sizes = [1, 128], strides = [1, 1]} : vector<3x128xf32> to vector<1x128xf32>
    %60 = vector.broadcast %58 : vector<256x1xf32> to vector<256x128xf32>
    %61 = vector.broadcast %59 : vector<1x128xf32> to vector<256x128xf32>
    %62 = arith.mulf %60, %61 : vector<256x128xf32>
    %63 = vector.broadcast %57 : vector<1x128xf32> to vector<256x128xf32>
    %64 = arith.addf %63, %62 : vector<256x128xf32>
    %65 = vector.extract_strided_slice %55 {offsets = [0, 1], sizes = [256, 1], strides = [1, 1]} : vector<256x3xf32> to vector<256x1xf32>
    %66 = vector.extract_strided_slice %56 {offsets = [1, 0], sizes = [1, 128], strides = [1, 1]} : vector<3x128xf32> to vector<1x128xf32>
    %67 = vector.broadcast %65 : vector<256x1xf32> to vector<256x128xf32>
    %68 = vector.broadcast %66 : vector<1x128xf32> to vector<256x128xf32>
    %69 = arith.mulf %67, %68 : vector<256x128xf32>
    %70 = arith.addf %64, %69 : vector<256x128xf32>
    %71 = vector.extract_strided_slice %55 {offsets = [0, 2], sizes = [256, 1], strides = [1, 1]} : vector<256x3xf32> to vector<256x1xf32>
    %72 = vector.extract_strided_slice %56 {offsets = [2, 0], sizes = [1, 128], strides = [1, 1]} : vector<3x128xf32> to vector<1x128xf32>
    %73 = vector.broadcast %71 : vector<256x1xf32> to vector<256x128xf32>
    %74 = vector.broadcast %72 : vector<1x128xf32> to vector<256x128xf32>
    %75 = arith.mulf %73, %74 : vector<256x128xf32>
    %76 = arith.addf %70, %75 : vector<256x128xf32>
    %cst_23 = arith.constant 0.000000e+00 : f32
    %77 = vector.broadcast %cst_23 : f32 to vector<256x128xf32>
    %78 = arith.maximumf %76, %77 : vector<256x128xf32>
    %79 = arith.truncf %78 : vector<256x128xf32> to vector<256x128xbf16>
    %c96 = arith.constant 96 : index
    %c0_24 = arith.constant 0 : index
    %80 = vector.load %arg13[%c96, %c0_24] : memref<480x256xbf16, #tpu.memory_space<vmem>>, vector<128x256xbf16>
    %cst_25 = arith.constant dense<0.000000e+00> : vector<256x256xf32>
    %81 = tpu.matmul %79, %80, %cst_25 {dimension_numbers = #tpu.dot_dimension_numbers<[1], [0], [0], [1], [0, 0, 1, 1], [], []>} : vector<256x128xbf16>, vector<128x256xbf16>, vector<256x256xf32> -> vector<256x256xf32>
    %82 = arith.addf %54, %81 : vector<256x256xf32>
    %c0_26 = arith.constant 0 : index
    %c0_27 = arith.constant 0 : index
    %83 = vector.load %arg4[%c0_26, %c0_27] : memref<256x3xf32, #tpu.memory_space<vmem>>, vector<256x3xf32>
    %c0_28 = arith.constant 0 : index
    %c0_29 = arith.constant 0 : index
    %84 = vector.load %arg11[%c0_28, %c0_29] : memref<3x256xf32, #tpu.memory_space<vmem>>, vector<3x256xf32>
    %c0_30 = arith.constant 0 : index
    %c0_31 = arith.constant 0 : index
    %85 = vector.load %arg12[%c0_30, %c0_31] : memref<1x256xf32, #tpu.memory_space<vmem>>, vector<1x256xf32>
    %86 = vector.extract_strided_slice %83 {offsets = [0, 0], sizes = [256, 1], strides = [1, 1]} : vector<256x3xf32> to vector<256x1xf32>
    %87 = vector.extract_strided_slice %84 {offsets = [0, 0], sizes = [1, 256], strides = [1, 1]} : vector<3x256xf32> to vector<1x256xf32>
    %88 = vector.broadcast %86 : vector<256x1xf32> to vector<256x256xf32>
    %89 = vector.broadcast %87 : vector<1x256xf32> to vector<256x256xf32>
    %90 = arith.mulf %88, %89 : vector<256x256xf32>
    %91 = vector.broadcast %85 : vector<1x256xf32> to vector<256x256xf32>
    %92 = arith.addf %91, %90 : vector<256x256xf32>
    %93 = vector.extract_strided_slice %83 {offsets = [0, 1], sizes = [256, 1], strides = [1, 1]} : vector<256x3xf32> to vector<256x1xf32>
    %94 = vector.extract_strided_slice %84 {offsets = [1, 0], sizes = [1, 256], strides = [1, 1]} : vector<3x256xf32> to vector<1x256xf32>
    %95 = vector.broadcast %93 : vector<256x1xf32> to vector<256x256xf32>
    %96 = vector.broadcast %94 : vector<1x256xf32> to vector<256x256xf32>
    %97 = arith.mulf %95, %96 : vector<256x256xf32>
    %98 = arith.addf %92, %97 : vector<256x256xf32>
    %99 = vector.extract_strided_slice %83 {offsets = [0, 2], sizes = [256, 1], strides = [1, 1]} : vector<256x3xf32> to vector<256x1xf32>
    %100 = vector.extract_strided_slice %84 {offsets = [2, 0], sizes = [1, 256], strides = [1, 1]} : vector<3x256xf32> to vector<1x256xf32>
    %101 = vector.broadcast %99 : vector<256x1xf32> to vector<256x256xf32>
    %102 = vector.broadcast %100 : vector<1x256xf32> to vector<256x256xf32>
    %103 = arith.mulf %101, %102 : vector<256x256xf32>
    %104 = arith.addf %98, %103 : vector<256x256xf32>
    %cst_32 = arith.constant 0.000000e+00 : f32
    %105 = vector.broadcast %cst_32 : f32 to vector<256x256xf32>
    %106 = arith.maximumf %104, %105 : vector<256x256xf32>
    %107 = arith.truncf %106 : vector<256x256xf32> to vector<256x256xbf16>
    %c224 = arith.constant 224 : index
    %c0_33 = arith.constant 0 : index
    %108 = vector.load %arg13[%c224, %c0_33] : memref<480x256xbf16, #tpu.memory_space<vmem>>, vector<256x256xbf16>
    %cst_34 = arith.constant dense<0.000000e+00> : vector<256x256xf32>
    %109 = tpu.matmul %107, %108, %cst_34 {dimension_numbers = #tpu.dot_dimension_numbers<[1], [0], [0], [1], [0, 0, 1, 1], [], []>} : vector<256x256xbf16>, vector<256x256xbf16>, vector<256x256xf32> -> vector<256x256xf32>
    %110 = arith.addf %82, %109 : vector<256x256xf32>
    %c0_35 = arith.constant 0 : index
    %c0_36 = arith.constant 0 : index
    %111 = vector.load %arg14[%c0_35, %c0_36] : memref<1x256xf32, #tpu.memory_space<vmem>>, vector<1x256xf32>
    %112 = vector.broadcast %111 : vector<1x256xf32> to vector<256x256xf32>
    %113 = arith.addf %110, %112 : vector<256x256xf32>
    %cst_37 = arith.constant 0.000000e+00 : f32
    %114 = vector.broadcast %cst_37 : f32 to vector<256x256xf32>
    %115 = arith.maximumf %113, %114 : vector<256x256xf32>
    %116 = arith.truncf %115 : vector<256x256xf32> to vector<256x256xbf16>
    %c0_38 = arith.constant 0 : index
    %c0_39 = arith.constant 0 : index
    %117 = vector.load %arg15[%c0_38, %c0_39] : memref<256x128xbf16, #tpu.memory_space<vmem>>, vector<256x128xbf16>
    %cst_40 = arith.constant dense<0.000000e+00> : vector<256x128xf32>
    %118 = tpu.matmul %116, %117, %cst_40 {dimension_numbers = #tpu.dot_dimension_numbers<[1], [0], [0], [1], [0, 0, 1, 1], [], []>} : vector<256x256xbf16>, vector<256x128xbf16>, vector<256x128xf32> -> vector<256x128xf32>
    %c0_41 = arith.constant 0 : index
    %c0_42 = arith.constant 0 : index
    %119 = vector.load %arg16[%c0_41, %c0_42] : memref<1x128xf32, #tpu.memory_space<vmem>>, vector<1x128xf32>
    %120 = vector.broadcast %119 : vector<1x128xf32> to vector<256x128xf32>
    %121 = arith.addf %118, %120 : vector<256x128xf32>
    %c0_43 = arith.constant 0 : index
    %c0_44 = arith.constant 0 : index
    %122 = vector.load %arg17[%c0_43, %c0_44] : memref<256x3xf32, #tpu.memory_space<vmem>>, vector<256x3xf32>
    %123 = vector.extract_strided_slice %121 {offsets = [0, 0], sizes = [256, 3], strides = [1, 1]} : vector<256x128xf32> to vector<256x3xf32>
    %124 = arith.subf %123, %122 : vector<256x3xf32>
    %125 = arith.mulf %124, %124 : vector<256x3xf32>
    %126 = vector.shape_cast %125 : vector<256x3xf32> to vector<1x256x3xf32>
    %cst_45 = arith.constant dense<0.000000e+00> : vector<1xf32>
    %127 = vector.multi_reduction <add>, %126, %cst_45 [1, 2] : vector<1x256x3xf32> to vector<1xf32>
    %128 = vector.shape_cast %127 : vector<1xf32> to vector<1x1x1xf32>
    %129 = vector.extract %128[0, 0, 0] : f32 from vector<1x1x1xf32>
    %130 = vector.broadcast %129 : f32 to vector<8x128xf32>
    %c0_46 = arith.constant 0 : index
    %c0_47 = arith.constant 0 : index
    %131 = vector.load %arg18[%c0_46, %c0_47] : memref<8x128xf32, #tpu.memory_space<vmem>>, vector<8x128xf32>
    tpu.vector_store %arg18[%c0_46, %c0_47], %130 {strides = array<i32>} : memref<8x128xf32, #tpu.memory_space<vmem>>, vector<8x128xf32>,
    return
  }
  func.func @transform_0(%arg0: i32) -> (i32, i32) {
    %c0_i32 = arith.constant 0 : i32
    %c0_i32_0 = arith.constant 0 : i32
    return %arg0, %c0_i32 : i32, i32
  }
  func.func @transform_1(%arg0: i32) -> (i32, i32) {
    %c0_i32 = arith.constant 0 : i32
    %c0_i32_0 = arith.constant 0 : i32
    return %arg0, %c0_i32 : i32, i32
  }
  func.func @transform_2(%arg0: i32) -> (i32, i32) {
    %c0_i32 = arith.constant 0 : i32
    %c0_i32_0 = arith.constant 0 : i32
    return %arg0, %c0_i32 : i32, i32
  }
  func.func @transform_3(%arg0: i32) -> (i32, i32) {
    %c0_i32 = arith.constant 0 : i32
    %c0_i32_0 = arith.constant 0 : i32
    return %arg0, %c0_i32 : i32, i32
  }
  func.func @transform_4(%arg0: i32) -> (i32, i32) {
    %c0_i32 = arith.constant 0 : i32
    %c0_i32_0 = arith.constant 0 : i32
    %c0_i32_1 = arith.constant 0 : i32
    return %c0_i32, %c0_i32_0 : i32, i32
  }
  func.func @transform_5(%arg0: i32) -> (i32, i32) {
    %c0_i32 = arith.constant 0 : i32
    %c0_i32_0 = arith.constant 0 : i32
    %c0_i32_1 = arith.constant 0 : i32
    return %c0_i32, %c0_i32_0 : i32, i32
  }
  func.func @transform_6(%arg0: i32) -> (i32, i32) {
    %c0_i32 = arith.constant 0 : i32
    %c0_i32_0 = arith.constant 0 : i32
    %c0_i32_1 = arith.constant 0 : i32
    return %c0_i32, %c0_i32_0 : i32, i32
  }
  func.func @transform_7(%arg0: i32) -> (i32, i32) {
    %c0_i32 = arith.constant 0 : i32
    %c0_i32_0 = arith.constant 0 : i32
    %c0_i32_1 = arith.constant 0 : i32
    return %c0_i32, %c0_i32_0 : i32, i32
  }
  func.func @transform_8(%arg0: i32) -> (i32, i32) {
    %c0_i32 = arith.constant 0 : i32
    %c0_i32_0 = arith.constant 0 : i32
    %c0_i32_1 = arith.constant 0 : i32
    return %c0_i32, %c0_i32_0 : i32, i32
  }
  func.func @transform_9(%arg0: i32) -> (i32, i32) {
    %c0_i32 = arith.constant 0 : i32
    %c0_i32_0 = arith.constant 0 : i32
    %c0_i32_1 = arith.constant 0 : i32
    return %c0_i32, %c0_i32_0 : i32, i32
  }
  func.func @transform_10(%arg0: i32) -> (i32, i32) {
    %c0_i32 = arith.constant 0 : i32
    %c0_i32_0 = arith.constant 0 : i32
    %c0_i32_1 = arith.constant 0 : i32
    return %c0_i32, %c0_i32_0 : i32, i32
  }
  func.func @transform_11(%arg0: i32) -> (i32, i32) {
    %c0_i32 = arith.constant 0 : i32
    %c0_i32_0 = arith.constant 0 : i32
    %c0_i32_1 = arith.constant 0 : i32
    return %c0_i32, %c0_i32_0 : i32, i32
  }
  func.func @transform_12(%arg0: i32) -> (i32, i32) {
    %c0_i32 = arith.constant 0 : i32
    %c0_i32_0 = arith.constant 0 : i32
    %c0_i32_1 = arith.constant 0 : i32
    return %c0_i32, %c0_i32_0 : i32, i32
  }
  func.func @transform_13(%arg0: i32) -> (i32, i32) {
    %c0_i32 = arith.constant 0 : i32
    %c0_i32_0 = arith.constant 0 : i32
    %c0_i32_1 = arith.constant 0 : i32
    return %c0_i32, %c0_i32_0 : i32, i32
  }
  func.func @transform_14(%arg0: i32) -> (i32, i32) {
    %c0_i32 = arith.constant 0 : i32
    %c0_i32_0 = arith.constant 0 : i32
    %c0_i32_1 = arith.constant 0 : i32
    return %c0_i32, %c0_i32_0 : i32, i32
  }
  func.func @transform_15(%arg0: i32) -> (i32, i32) {
    %c0_i32 = arith.constant 0 : i32
    %c0_i32_0 = arith.constant 0 : i32
    %c0_i32_1 = arith.constant 0 : i32
    return %c0_i32, %c0_i32_0 : i32, i32
  }
  func.func @transform_16(%arg0: i32) -> (i32, i32) {
    %c0_i32 = arith.constant 0 : i32
    %c0_i32_0 = arith.constant 0 : i32
    return %arg0, %c0_i32 : i32, i32
  }
  func.func @transform_17(%arg0: i32) -> (i32, i32) {
    %c0_i32 = arith.constant 0 : i32
    %c0_i32_0 = arith.constant 0 : i32
    return %arg0, %c0_i32 : i32, i32
  }
}

</mosaic_0001>

<bundles_post_ra>
// kernel: keypoint_model_forward.1
= control target key start
LH: loop header
LB: loop body
LE: loop exit
PB: predicated region body
PF: predicated region fallthrough
CT: control target
= control target key end

     0   :  { %s6636_s24 = smov 0   ;;  %s10690_s0 = inlined_call_operand.vmem [shape: f32[512,3], index: 0, kind: input, shape index: {}]   ;;  %s10691_s1 = inlined_call_operand.vmem [shape: f32[512,3], index: 1, kind: input, shape index: {}]   ;;  %s10692_s2 = inlined_call_operand.vmem [shape: f32[512,3], index: 2, kind: input, shape index: {}]   ;;  %s10693_s3 = inlined_call_operand.vmem [shape: f32[512,3], index: 3, kind: input, shape index: {}]   ;;  %s10694_s4 = inlined_call_operand.vmem [shape: f32[3,32], index: 4, kind: input, shape index: {}]   ;;  %s10695_s5 = inlined_call_operand.vmem [shape: f32[1,32], index: 5, kind: input, shape index: {}]   ;;  %s10696_s6 = inlined_call_operand.vmem [shape: f32[3,64], index: 6, kind: input, shape index: {}]   ;;  %s10697_s7 = inlined_call_operand.vmem [shape: f32[1,64], index: 7, kind: input, shape index: {}]   ;;  %s10698_s8 = inlined_call_operand.vmem [shape: f32[3,128], index: 8, kind: input, shape index: {}]   ;;  %s10699_s9 = inlined_call_operand.vmem [shape: f32[1,128], index: 9, kind: input, shape index: {}]   ;;  %s10700_s10 = inlined_call_operand.vmem [shape: f32[3,256], index: 10, kind: input, shape index: {}]   ;;  %s10701_s11 = inlined_call_operand.vmem [shape: f32[1,256], index: 11, kind: input, shape index: {}]   ;;  %s10702_s12 = inlined_call_operand.vmem [shape: bf16[480,256], index: 12, kind: input, shape index: {}]   ;;  %s10703_s13 = inlined_call_operand.vmem [shape: f32[1,256], index: 13, kind: input, shape index: {}]   ;;  %s10704_s14 = inlined_call_operand.vmem [shape: bf16[256,128], index: 14, kind: input, shape index: {}]   ;;  %s10705_s15 = inlined_call_operand.vmem [shape: f32[1,128], index: 15, kind: input, shape index: {}]   ;;  %s10706_s16 = inlined_call_operand.vmem [shape: f32[512,3], index: 16, kind: input, shape index: {}]   ;;  %s10707_s17 = inlined_call_operand.vmem [shape: f32[16,128], index: 17, kind: output, shape index: {}]  }
   0x1   :  { %10740 = sst [smem:[#allocation129_spill]] %s10690_s0 }
   0x2   :  { %10741 = sst [smem:[#allocation130_spill]] %s10691_s1 }
   0x3 LB: > { %s6642_s25 = sadd.s32 4294967295, %s6541_s24   ;;  %p5908_p0 = scmp.ge.s32.totalorder %s6541_s24, 1  ;;  %s6541_s24 = sphi %s6636_s24, %s27_s24  }
   0x4   : > { %p532_p1 = scmp.lt.s32.totalorder %s6541_s24, 3 }
   0x6   : > { %p533_p2 = pnand %p5908_p0, %p532_p1 }
   0x8   : > { %536 = sbr.rel (%p533_p2) target bundleno = 1887 (0x75f), region = 88 }
   0xd   : > { %s5909_s26 = sshll.u32 %s6642_s25, 5  ;;  %v10708_v0 = vmov 1   ;;  %v10710_v1 = vmov 0   ;;  %s10742_s0 = sld [smem:[#allocation129_spill]]  ;;  %vm2329_vm0 = vcmask 261120   ;;  %vm2082_vm1 = vcmask 523264  }
   0xe   : > { %6382 = vset.pattern.permute.xlu0 %v10708_v0  ;;  %6380 = vset.pattern.permute.xlu2 %v10710_v1  ;;  %p604_p3 = scmp.lt.s32.totalorder %s5909_s26, 63  ;;  %s10748_s1 = sld [smem:[#allocation130_spill]]  ;;  %vm5728_vm2 = vcmask 23552  }
   0xf   : > { %6379 = vset.pattern.permute.xlu1 %v10710_v1  ;;  %p633_p4 = scmp.lt.s32.totalorder %s6642_s25, 1 }
  0x10   : > { %s11358_s26 = smov (!%p604_p3, %s5909_s26), 63 }
  0x11   : > { %s6650_s27 = sshll.u32 %s11358_s26, 3  ;;  %s11360_s25 = smov (!%p633_p4, %s6642_s25), 1 }
  0x12   : > { %s6937_s23 = scalar_lea.vmem %s10692_s2, %s6650_s27  ;;  %s8170_s21 = scalar_lea.vmem %s10693_s3, %s6650_s27 }
  0x13   : > { %s6656_s30 = scalar_lea.vmem %s10742_s0, %s6650_s27  ;;  %s10465_s26 = scalar_lea.vmem %s10706_s16, %s6650_s27 }
  0x14   : > { %v6659_v2 = vld [vmem:[%s6656_s30 + $0x20] sm:$0xff]  ;;  %v6662_v3 = vld [vmem:[%s6656_s30 + $0x10] sm:$0xff]  ;;  %v6665_v4 = vld [vmem:[%s6656_s30 + $0x8] sm:$0xff]  ;;  %s6809_s20 = scalar_lea.vmem %s10748_s1, %s6650_s27  ;;  %s5919_s27 = sshll.u32 %s11360_s25, 3 }
  0x15   : > { %694 = vperm.xlu2 %6380, %v6659_v2   ;;  %684 = vperm.xlu1 %6379, %v6662_v3   ;;  %v6671_v5 = vld [vmem:[%s6656_s30 + $0x28] sm:$0xff]  ;;  %v6674_v6 = vld [vmem:[%s6656_s30 + $0x18] sm:$0xff]  ;;  %v6677_v7 = vld [vmem:[%s6656_s30 + $0x30] sm:$0xff]  ;;  %s636_s0 = scalar_lea.vmem %s10707_s17, %s5919_s27 }
  0x16   : > { %905 = vperm.xlu0 %6382, %v6665_v4   ;;  %v6683_v8 = vld [vmem:[%s6656_s30 + $0x40] sm:$0xff]  ;;  %v6686_v9 = vld [vmem:[%s6656_s30 + $0x38] sm:$0xff]  ;;  %v6689_v10 = vld [vmem:[%s6656_s30 + $0x48] sm:$0xff] }
  0x17   : > { %v6695_v11 = vld [vmem:[%s6656_s30 + $0x58] sm:$0xff]  ;;  %v6698_v12 = vld [vmem:[%s6656_s30 + $0x50] sm:$0xff]  ;;  %v6701_v13 = vld [vmem:[%s6656_s30] sm:$0xff] }
  0x18   : > { %v6708_v14 = vld [vmem:[%s6656_s30 + $0x70] sm:$0xff]  ;;  %v6711_v15 = vld [vmem:[%s6656_s30 + $0x68] sm:$0xff]  ;;  %v6720_v17 = vld [vmem:[%s6656_s30 + $0x80] sm:$0xff] }
  0x19   : > { %v6717_v16 = vld [vmem:[%s6656_s30 + $0x88] sm:$0xff]  ;;  %v6726_v18 = vld [vmem:[%s6656_s30 + $0xa0] sm:$0xff]  ;;  %v6729_v19 = vld [vmem:[%s6656_s30 + $0x98] sm:$0xff] }
  0x1a   : > { %v6735_v20 = vld [vmem:[%s6656_s30 + $0xb8] sm:$0xff]  ;;  %v6738_v21 = vld [vmem:[%s6656_s30 + $0xb0] sm:$0xff]  ;;  %v6741_v22 = vld [vmem:[%s6656_s30 + $0x60] sm:$0xff] }
  0x1b   : > { %v6747_v23 = vld [vmem:[%s6656_s30 + $0xd0] sm:$0xff]  ;;  %v6750_v24 = vld [vmem:[%s6656_s30 + $0xc8] sm:$0xff]  ;;  %v6753_v25 = vld [vmem:[%s6656_s30 + $0x78] sm:$0xff] }
  0x1c   : > { %v6759_v26 = vld [vmem:[%s6656_s30 + $0xe8] sm:$0xff]  ;;  %v6762_v27 = vld [vmem:[%s6656_s30 + $0xe0] sm:$0xff]  ;;  %v6765_v28 = vld [vmem:[%s6656_s30 + $0x90] sm:$0xff] }
  0x1d   : > { %699 = vperm.xlu2 %6380, %v6671_v5   ;;  %689 = vperm.xlu1 %6379, %v6674_v6   ;;  %10743 = vst [vmem:[#allocation2_spill] sm:$0xff] %v6765_v28  ;;  %v6771_v29 = vld [vmem:[%s6656_s30 + $0xf8] sm:$0xff]  ;;  %v6774_v30 = vld [vmem:[%s6656_s30 + $0xa8] sm:$0xff]  ;;  %v6781_v31 = vld [vmem:[%s6656_s30 + $0xc0] sm:$0xff] }
  0x1e   : > { %925 = vperm.xlu0 %6382, %v6677_v7   ;;  %10744 = vst [vmem:[#allocation3_spill] sm:$0xff] %v6774_v30  ;;  %v6790_v33 = vld [vmem:[%s6656_s30 + $0xd8] sm:$0xff]  ;;  %v6798_v35 = vld [vmem:[%s6656_s30 + $0xf0] sm:$0xff]  ;;  %v6812_v37 = vld [vmem:[%s6809_s20 + $0x8] sm:$0xff] }
  0x1f   : > { %10745 = vst [vmem:[#allocation4_spill] sm:$0xff] %v6781_v31  ;;  %v6824_v41 = vld [vmem:[%s6809_s20 + $0x30] sm:$0xff]  ;;  %v6836_v45 = vld [vmem:[%s6809_s20 + $0x48] sm:$0xff]  ;;  %v6848_v49 = vld [vmem:[%s6809_s20 + $0x60] sm:$0xff] }
  0x20   : > { %10746 = vst [vmem:[#allocation5_spill] sm:$0xff] %v6790_v33  ;;  %v6860_v53 = vld [vmem:[%s6809_s20 + $0x78] sm:$0xff]  ;;  %v6872_v57 = vld [vmem:[%s6809_s20 + $0x90] sm:$0xff]  ;;  %v6884_v61 = vld [vmem:[%s6809_s20 + $0xa8] sm:$0xff] }
  0x21   : > { %10747 = vst [vmem:[#allocation6_spill] sm:$0xff] %v6798_v35 }
  0x22   : > { %10749 = vst [vmem:[#allocation7_spill] sm:$0xff] %v6812_v37 }
  0x23   : > { %10751 = vst [vmem:[#allocation9_spill] sm:$0xff] %v6824_v41 }
  0x24   : > { %10753 = vst [vmem:[#allocation11_spill] sm:$0xff] %v6836_v45 }
  0x25   : > { %714 = vperm.xlu2 %6380, %v6683_v8   ;;  %709 = vperm.xlu1 %6379, %v6686_v9   ;;  %10755 = vst [vmem:[#allocation13_spill] sm:$0xff] %v6848_v49 }
  0x26   : > { %937 = vperm.xlu0 %6382, %v6689_v10   ;;  %10757 = vst [vmem:[#allocation15_spill] sm:$0xff] %v6860_v53 }
  0x2d   : > { %729 = vperm.xlu2 %6380, %v6695_v11   ;;  %724 = vperm.xlu1 %6379, %v6698_v12  }
  0x2e   : > { %6384 = vset.pattern.permute.xlu0 %v10710_v1  ;;  %v6896_v1 = vld [vmem:[%s6809_s20 + $0xc0] sm:$0xff] }
  0x2f   : > { %674 = vperm.xlu0 %6384, %v6701_v13  }
  0x35   : > { %744 = vperm.xlu2 %6380, %v6708_v14   ;;  %739 = vperm.xlu1 %6379, %v6711_v15  }
  0x37   : > { %679 = vperm.xlu0 %6384, %v6665_v4  }
  0x3d   : > { %759 = vperm.xlu2 %6380, %v6717_v16   ;;  %754 = vperm.xlu1 %6379, %v6720_v17  }
  0x3f   : > { %704 = vperm.xlu0 %6384, %v6677_v7  }
  0x45   : > { %774 = vperm.xlu2 %6380, %v6726_v18   ;;  %769 = vperm.xlu1 %6379, %v6729_v19  }
  0x47   : > { %719 = vperm.xlu0 %6384, %v6689_v10  }
  0x4d   : > { %789 = vperm.xlu2 %6380, %v6735_v20   ;;  %784 = vperm.xlu1 %6379, %v6738_v21  }
  0x4f   : > { %734 = vperm.xlu0 %6384, %v6741_v22  }
  0x55   : > { %804 = vperm.xlu2 %6380, %v6747_v23   ;;  %799 = vperm.xlu1 %6379, %v6750_v24  }
  0x57   : > { %749 = vperm.xlu0 %6384, %v6753_v25  }
  0x5d   : > { %819 = vperm.xlu2 %6380, %v6759_v26   ;;  %814 = vperm.xlu1 %6379, %v6762_v27  }
  0x5f   : > { %764 = vperm.xlu0 %6384, %v6765_v28  }
  0x65   : > { %6381 = vset.pattern.permute.xlu2 %v10708_v0  ;;  %829 = vperm.xlu1 %6379, %v6771_v29  }
  0x66   : > { %901 = vperm.xlu2 %6381, %v6701_v13  }
  0x67   : > { %779 = vperm.xlu0 %6384, %v6774_v30  }
  0x6d   : > { %6383 = vset.pattern.permute.xlu1 %v10708_v0 }
  0x6e   : > { %909 = vperm.xlu1 %6383, %v6662_v3   ;;  %913 = vperm.xlu2 %6381, %v6674_v6  }
  0x6f   : > { %794 = vperm.xlu0 %6384, %v6781_v31   ;;  %v6787_v32 = vpop.permute.xlu2 %694 }
  0x76   : > { %917 = vperm.xlu1 %6383, %v6659_v2   ;;  %921 = vperm.xlu2 %6381, %v6671_v5  }
  0x77   : > { %809 = vperm.xlu0 %6384, %v6790_v33   ;;  %v6795_v34 = vpop.permute.xlu2 %699 }
  0x7e   : > { %929 = vperm.xlu1 %6383, %v6686_v9   ;;  %933 = vperm.xlu2 %6381, %v6683_v8  }
  0x7f   : > { %824 = vperm.xlu0 %6384, %v6798_v35   ;;  %v6803_v36 = vpop.permute.xlu2 %714 }
  0x86   : > { %941 = vperm.xlu1 %6383, %v6698_v12   ;;  %945 = vperm.xlu2 %6381, %v6695_v11  }
  0x87   : > { %1379 = vperm.xlu0 %6384, %v6812_v37   ;;  %v6817_v38 = vpop.permute.xlu2 %729  ;;  %v6819_v39 = vpop.permute.xlu1 %684 }
  0x88   : > { %10750 = vst [vmem:[#allocation8_spill] sm:$0xff] %v6817_v38  ;;  %v6821_v40 = vpop.permute.xlu0 %905 }
  0x8e   : > { %953 = vperm.xlu1 %6383, %v6711_v15   ;;  %957 = vperm.xlu2 %6381, %v6708_v14  }
  0x8f   : > { %1404 = vperm.xlu0 %6384, %v6824_v41   ;;  %v6829_v42 = vpop.permute.xlu2 %744  ;;  %v6831_v43 = vpop.permute.xlu1 %689 }
  0x90   : > { %10752 = vst [vmem:[#allocation10_spill] sm:$0xff] %v6829_v42  ;;  %v6833_v44 = vpop.permute.xlu0 %925 }
  0x96   : > { %965 = vperm.xlu1 %6383, %v6720_v17   ;;  %969 = vperm.xlu2 %6381, %v6717_v16  }
  0x97   : > { %1419 = vperm.xlu0 %6384, %v6836_v45   ;;  %v6841_v46 = vpop.permute.xlu2 %759  ;;  %v6843_v47 = vpop.permute.xlu1 %709 }
  0x98   : > { %10754 = vst [vmem:[#allocation12_spill] sm:$0xff] %v6841_v46  ;;  %v6845_v48 = vpop.permute.xlu0 %937 }
  0x9e   : > { %977 = vperm.xlu1 %6383, %v6729_v19   ;;  %981 = vperm.xlu2 %6381, %v6726_v18  }
  0x9f   : > { %1434 = vperm.xlu0 %6384, %v6848_v49   ;;  %v6853_v50 = vpop.permute.xlu2 %774  ;;  %v6855_v51 = vpop.permute.xlu1 %724 }
  0xa0   : > { %10756 = vst [vmem:[#allocation14_spill] sm:$0xff] %v6853_v50 }
  0xa1   : > { %v6857_v52 = vpop.permute.xlu0 %674 }
  0xa6   : > { %989 = vperm.xlu1 %6383, %v6738_v21   ;;  %993 = vperm.xlu2 %6381, %v6735_v20  }
  0xa7   : > { %1449 = vperm.xlu0 %6384, %v6860_v53   ;;  %v6865_v54 = vpop.permute.xlu2 %789  ;;  %v6867_v55 = vpop.permute.xlu1 %739 }
  0xa8   : > { %10758 = vst [vmem:[#allocation16_spill] sm:$0xff] %v6865_v54 }
  0xa9   : > { %10759 = vst [vmem:[#allocation17_spill] sm:$0xff] %v6867_v55  ;;  %v6869_v56 = vpop.permute.xlu0 %679 }
  0xae   : > { %1001 = vperm.xlu1 %6383, %v6750_v24   ;;  %1005 = vperm.xlu2 %6381, %v6747_v23  }
  0xaf   : > { %1464 = vperm.xlu0 %6384, %v6872_v57   ;;  %v6877_v58 = vpop.permute.xlu2 %804  ;;  %v6879_v59 = vpop.permute.xlu1 %754 }
  0xb0   : > { %10760 = vst [vmem:[#allocation18_spill] sm:$0xff] %v6877_v58  ;;  %v10712_v58 = vmov 2  }
  0xb1   : > { %10761 = vst [vmem:[#allocation19_spill] sm:$0xff] %v6879_v59  ;;  %v6881_v60 = vpop.permute.xlu0 %704  ;;  %v6922_v59 = vld [vmem:[%s6809_s20 + $0xf0] sm:$0xff] }
  0xb6   : > { %1013 = vperm.xlu1 %6383, %v6762_v27   ;;  %1017 = vperm.xlu2 %6381, %v6759_v26  }
  0xb7   : > { %1479 = vperm.xlu0 %6384, %v6884_v61   ;;  %v6889_v62 = vpop.permute.xlu2 %819  ;;  %v6891_v63 = vpop.permute.xlu1 %769 }
  0xb8   : > { %10762 = vst [vmem:[#allocation20_spill] sm:$0xff] %v6889_v62 }
  0xb9   : > { %10763 = vst [vmem:[#allocation21_spill] sm:$0xff] %v6891_v63  ;;  %v6893_v0 = vpop.permute.xlu0 %719  ;;  %v6909_v63 = vld [vmem:[%s6809_s20 + $0xd8] sm:$0xff] }
  0xbe   : > { %1025 = vperm.xlu1 %6383, %v6771_v29   ;;  %6385 = vset.pattern.permute.xlu2 %v10712_v58 }
  0xbf   : > { %1494 = vperm.xlu0 %6384, %v6896_v1   ;;  %v6901_v54 = vpop.permute.xlu1 %784  ;;  %1094 = vperm.xlu2 %6385, %v6701_v13  }
  0xc0   : > { %10764 = vst [vmem:[#allocation22_spill] sm:$0xff] %v6901_v54  ;;  %v6904_v50 = vpop.permute.xlu2 %901 }
  0xc1   : > { %v6906_v62 = vpop.permute.xlu0 %734 }
  0xc2   : > { %10765 = vst [vmem:[#allocation23_spill] sm:$0xff] %v6906_v62 }
  0xc6   : > { %6386 = vset.pattern.permute.xlu1 %v10712_v58 }
  0xc7   : > { %1509 = vperm.xlu0 %6384, %v6909_v63   ;;  %1102 = vperm.xlu1 %6386, %v6662_v3   ;;  %v6914_v46 = vpop.permute.xlu1 %799 }
  0xc8   : > { %10766 = vst [vmem:[#allocation24_spill] sm:$0xff] %v6914_v46  ;;  %1106 = vperm.xlu2 %6385, %v6674_v6   ;;  %v6917_v54 = vpop.permute.xlu2 %913  ;;  %v6940_v6 = vld [vmem:[%s6937_s23 + $0x8] sm:$0xff]  ;;  %v10773_v46 = vmov 2  }
  0xc9   : > { %v6919_v13 = vpop.permute.xlu0 %749  ;;  %10770 = vst [vmem:[#allocation28_spill] sm:$0xff] %v6940_v6 }
  0xca   : > { %10767 = vst [vmem:[#allocation25_spill] sm:$0xff] %v6919_v13  ;;  %v5986_v13 = vld [vmem:[%s10702_s12] sm:$0xf] }
  0xcf   : > { %1524 = vperm.xlu0 %6384, %v6922_v59   ;;  %1110 = vperm.xlu1 %6386, %v6659_v2   ;;  %v6926_v42 = vpop.permute.xlu1 %814 }
  0xd0   : > { %10768 = vst [vmem:[#allocation26_spill] sm:$0xff] %v6926_v42  ;;  %1114 = vperm.xlu2 %6385, %v6671_v5   ;;  %v6929_v58 = vpop.permute.xlu2 %921 }
  0xd1   : > { %v6931_v3 = vpop.permute.xlu0 %764 }
  0xd2   : > { %10769 = vst [vmem:[#allocation27_spill] sm:$0xff] %v6931_v3 }
  0xd7   : > { %2597 = vperm.xlu0 %6384, %v6940_v6   ;;  %1122 = vperm.xlu1 %6386, %v6686_v9   ;;  %v6944_v2 = vpop.permute.xlu1 %829 }
  0xd8   : > { %10771 = vst [vmem:[#allocation29_spill] sm:$0xff] %v6944_v2  ;;  %1126 = vperm.xlu2 %6385, %v6683_v8   ;;  %v6947_v5 = vpop.permute.xlu2 %933 }
  0xd9   : > { %v6949_v42 = vpop.permute.xlu0 %779 }
  0xda   : > { %10772 = vst [vmem:[#allocation30_spill] sm:$0xff] %v6949_v42  ;;  %v7063_v42 = vld [vmem:[%s6809_s20 + $0x40] sm:$0xff] }
  0xdf   : > { %6394 = vset.pattern.permute.xlu0 %v10773_v46  ;;  %1134 = vperm.xlu1 %6386, %v6698_v12  }
  0xe0   : > { %1098 = vperm.xlu0 %6394, %v6665_v4   ;;  %1138 = vperm.xlu2 %6385, %v6695_v11   ;;  %v6955_v3 = vpop.permute.xlu1 %909  ;;  %v6957_v6 = vpop.permute.xlu2 %945 }
  0xe1   : > { %10774 = vst [vmem:[#allocation31_spill] sm:$0xff] %v6957_v6  ;;  %v6959_v9 = vpop.permute.xlu0 %794 }
  0xe2   : > { %10775 = vst [vmem:[#allocation32_spill] sm:$0xff] %v6959_v9  ;;  %v7045_v9 = vld [vmem:[%s6809_s20 + $0x20] sm:$0xff] }
  0xe7   : > { %1146 = vperm.xlu1 %6386, %v6711_v15  }
  0xe8   : > { %1118 = vperm.xlu0 %6394, %v6677_v7   ;;  %1150 = vperm.xlu2 %6385, %v6708_v14   ;;  %v6964_v8 = vpop.permute.xlu1 %917  ;;  %v6966_v2 = vpop.permute.xlu2 %957 }
  0xe9   : > { %10776 = vst [vmem:[#allocation33_spill] sm:$0xff] %v6966_v2  ;;  %v6968_v12 = vpop.permute.xlu0 %809  ;;  %v7087_v2 = vld [vmem:[%s6809_s20 + $0x50] sm:$0xff] }
  0xea   : > { %10777 = vst [vmem:[#allocation34_spill] sm:$0xff] %v6968_v12 }
  0xef   : > { %1158 = vperm.xlu1 %6386, %v6720_v17  }
  0xf0   : > { %1130 = vperm.xlu0 %6394, %v6689_v10   ;;  %1162 = vperm.xlu2 %6385, %v6717_v16   ;;  %v6973_v4 = vpop.permute.xlu1 %929  ;;  %v6975_v11 = vpop.permute.xlu2 %969 }
  0xf1   : > { %10778 = vst [vmem:[#allocation35_spill] sm:$0xff] %v6975_v11  ;;  %v6977_v15 = vpop.permute.xlu0 %824 }
  0xf2   : > { %10779 = vst [vmem:[#allocation36_spill] sm:$0xff] %v6977_v15 }
  0xf7   : > { %1170 = vperm.xlu1 %6386, %v6729_v19  }
  0xf8   : > { %1142 = vperm.xlu0 %6394, %v6741_v22   ;;  %1174 = vperm.xlu2 %6385, %v6726_v18   ;;  %v6982_v7 = vpop.permute.xlu1 %941  ;;  %v6984_v14 = vpop.permute.xlu2 %981 }
  0xf9   : > { %10780 = vst [vmem:[#allocation37_spill] sm:$0xff] %v6982_v7  ;;  %v6986_v17 = vpop.permute.xlu0 %1379  ;;  %v7184_v7 = vld [vmem:[%s6809_s20 + $0xb0] sm:$0xff] }
  0xfa   : > { %10781 = vst [vmem:[#allocation38_spill] sm:$0xff] %v6984_v14 }
  0xfb   : > { %10782 = vst [vmem:[#allocation39_spill] sm:$0xff] %v6986_v17 }
  0xff   : > { %1182 = vperm.xlu1 %6386, %v6738_v21  }
 0x100   : > { %1154 = vperm.xlu0 %6394, %v6753_v25   ;;  %1186 = vperm.xlu2 %6385, %v6735_v20   ;;  %v6991_v10 = vpop.permute.xlu1 %953  ;;  %v6993_v16 = vpop.permute.xlu2 %993 }
 0x101   : > { %10783 = vst [vmem:[#allocation40_spill] sm:$0xff] %v6991_v10  ;;  %v6995_v19 = vpop.permute.xlu0 %1404  ;;  %v6291_v10 = vld [vmem:[%s10702_s12 + $0x4] sm:$0xf0] }
 0x102   : > { %10784 = vst [vmem:[#allocation41_spill] sm:$0xff] %v6993_v16  ;;  %v7048_v16 = vld [vmem:[%s6809_s20 + $0x28] sm:$0xff] }
 0x103   : > { %10785 = vst [vmem:[#allocation42_spill] sm:$0xff] %v6995_v19 }
 0x107   : > { %1194 = vperm.xlu1 %6386, %v6750_v24  }
 0x108   : > { %1166 = vperm.xlu0 %6394, %v6765_v28   ;;  %1198 = vperm.xlu2 %6385, %v6747_v23   ;;  %v7000_v18 = vpop.permute.xlu1 %965  ;;  %v7002_v21 = vpop.permute.xlu2 %1005  ;;  %v7016_v23 = vld [vmem:[%s6809_s20] sm:$0xff] }
 0x109   : > { %10786 = vst [vmem:[#allocation43_spill] sm:$0xff] %v7000_v18  ;;  %v7004_v15 = vpop.permute.xlu0 %1419  ;;  %v5996_v18 = vld [vmem:[%s10702_s12 + $0x18] sm:$0xf0] }
 0x10a   : > { %10787 = vst [vmem:[#allocation44_spill] sm:$0xff] %v7002_v21 }
 0x10b   : > { %10788 = vst [vmem:[#allocation45_spill] sm:$0xff] %v7004_v15  ;;  %v10792_v15 = vmov 0  }
 0x10f   : > { %1206 = vperm.xlu1 %6386, %v6762_v27  }
 0x110   : > { %1178 = vperm.xlu0 %6394, %v6774_v30   ;;  %1210 = vperm.xlu2 %6385, %v6759_v26   ;;  %v7009_v20 = vpop.permute.xlu1 %977  ;;  %v7011_v24 = vpop.permute.xlu2 %1017 }
 0x111   : > { %10789 = vst [vmem:[#allocation46_spill] sm:$0xff] %v7009_v20  ;;  %v7013_v12 = vpop.permute.xlu0 %1434  ;;  %v6293_v20 = vld [vmem:[%s10702_s12 + $0x14] sm:$0xf0] }
 0x112   : > { %10790 = vst [vmem:[#allocation47_spill] sm:$0xff] %v7011_v24  ;;  %v7029_v24 = vld [vmem:[%s6809_s20 + $0x10] sm:$0xff] }
 0x113   : > { %10791 = vst [vmem:[#allocation48_spill] sm:$0xff] %v7013_v12  ;;  %v7032_v12 = vld [vmem:[%s6809_s20 + $0x18] sm:$0xff] }
 0x117   : > { %1218 = vperm.xlu1 %6386, %v6771_v29  }
 0x118   : > { %1190 = vperm.xlu0 %6394, %v6781_v31   ;;  %6387 = vset.pattern.permute.xlu2 %v10792_v15  ;;  %v7021_v27 = vpop.permute.xlu1 %989 }
 0x119   : > { %10793 = vst [vmem:[#allocation49_spill] sm:$0xff] %v7021_v27  ;;  %1374 = vperm.xlu2 %6387, %v7016_v23   ;;  %v7024_v26 = vpop.permute.xlu0 %1449  ;;  %v7026_v21 = vpop.permute.xlu2 %1094 }
 0x11a   : > { %10794 = vst [vmem:[#allocation50_spill] sm:$0xff] %v7024_v26 }
 0x11f   : > { %6388 = vset.pattern.permute.xlu1 %v10792_v15  ;;  %v6292_v15 = vld [vmem:[%s10702_s12 + $0x14] sm:$0xf] }
 0x120   : > { %1202 = vperm.xlu0 %6394, %v6790_v33   ;;  %1384 = vperm.xlu1 %6388, %v7029_v24   ;;  %v7037_v29 = vpop.permute.xlu1 %1001 }
 0x121   : > { %10795 = vst [vmem:[#allocation51_spill] sm:$0xff] %v7037_v29  ;;  %1389 = vperm.xlu2 %6387, %v7032_v12   ;;  %v7040_v19 = vpop.permute.xlu0 %1464 }
 0x122   : > { %10796 = vst [vmem:[#allocation52_spill] sm:$0xff] %v7040_v19  ;;  %v7042_v26 = vpop.permute.xlu2 %1106  ;;  %v7060_v19 = vld [vmem:[%s6809_s20 + $0x38] sm:$0xff] }
 0x128   : > { %1214 = vperm.xlu0 %6394, %v6798_v35   ;;  %1394 = vperm.xlu1 %6388, %v7045_v9   ;;  %v7052_v27 = vpop.permute.xlu1 %1013 }
 0x129   : > { %10797 = vst [vmem:[#allocation53_spill] sm:$0xff] %v7052_v27  ;;  %1399 = vperm.xlu2 %6387, %v7048_v16   ;;  %v7055_v14 = vpop.permute.xlu0 %1479 }
 0x12a   : > { %10798 = vst [vmem:[#allocation54_spill] sm:$0xff] %v7055_v14  ;;  %v7057_v29 = vpop.permute.xlu2 %1114  ;;  %v5994_v14 = vld [vmem:[%s10702_s12 + $0x10] sm:$0xf] }
 0x130   : > { %1798 = vperm.xlu0 %6394, %v6812_v37   ;;  %1409 = vperm.xlu1 %6388, %v7060_v19   ;;  %v7067_v17 = vpop.permute.xlu1 %1025 }
 0x131   : > { %10799 = vst [vmem:[#allocation55_spill] sm:$0xff] %v7067_v17  ;;  %1414 = vperm.xlu2 %6387, %v7063_v42   ;;  %v7070_v27 = vpop.permute.xlu0 %1494  ;;  %v5995_v17 = vor.u32 %v6293_v20, %v5994_v14  ;;  %v6290_v14 = vld [vmem:[%s10702_s12 + $0x4] sm:$0xf]  ;;  %v7099_v20 = vld [vmem:[%s6809_s20 + $0x58] sm:$0xff] }
 0x132   : > { %10800 = vst [vmem:[#allocation56_spill] sm:$0xff] %v7070_v27  ;;  %v7081_v11 = vpop.permute.xlu2 %1126  ;;  %v5999_v27 = vor.u32 %v6292_v15, %v5996_v18  ;;  %v5987_v15 = vor.u32 %v6291_v10, %v5986_v13  ;;  %v7114_v13 = vld [vmem:[%s6809_s20 + $0x68] sm:$0xff]  ;;  %v7117_v10 = vld [vmem:[%s6809_s20 + $0x70] sm:$0xff] }
 0x133   : > { %2384 = vmatpush.bf16.msra.mxu2 %v5995_v17  ;;  %v5988_v17 = vld [vmem:[%s10702_s12 + $0x8] sm:$0xf0] }
 0x134   : > { %2473 = vmatpush.bf16.msra.mxu3 %v5999_v27  ;;  %v5991_v18 = vor.u32 %v6290_v14, %v5988_v17 }
 0x137   : > { %2385 = vmatpush.bf16.msra.mxu2 %v5987_v15  ;;  %v670_v15 = vld [vmem:[%s10694_s4] sm:$0x7] }
 0x138   : > { %1818 = vperm.xlu0 %6394, %v6824_v41   ;;  %1424 = vperm.xlu1 %6388, %v7087_v2   ;;  %v7137_v46 = vperm.slane %v670_v15, 0  ;;  %v7157_v33 = vperm.slane %v670_v15, 1  ;;  %v7159_v31 = vperm.slane %v670_v15, 2 }
 0x139   : > { %1429 = vperm.xlu2 %6387, %v7099_v20   ;;  %v7107_v27 = vpop.permute.xlu1 %1102  ;;  %v7109_v62 = vpop.permute.xlu0 %1509  ;;  %2474 = vmatpush.bf16.msra.mxu3 %v5991_v18  ;;  %v7132_v18 = vld [vmem:[%s6809_s20 + $0x80] sm:$0xff] }
 0x13a   : > { %10801 = vst [vmem:[#allocation57_spill] sm:$0xff] %v7109_v62  ;;  %v7111_v55 = vpop.permute.xlu2 %1138  ;;  %v7135_v62 = vld [vmem:[%s6809_s20 + $0x88] sm:$0xff]  ;;  %v1222_v15 = vmul.f32 %v7159_v31, %v7026_v21  ;;  %v7187_v21 = vld [vmem:[%s6809_s20 + $0xb8] sm:$0xff] }
 0x13b   : > { %10802 = vst [vmem:[#allocation58_spill] sm:$0xff] %v7111_v55 }
 0x13c   : > { %10805 = vst [vmem:[#allocation61_spill] sm:$0xff] %v7132_v18 }
 0x13d   : > { %10806 = vst [vmem:[#allocation62_spill] sm:$0xff] %v7135_v62 }
 0x140   : > { %1830 = vperm.xlu0 %6394, %v6836_v45   ;;  %1439 = vperm.xlu1 %6388, %v7114_v13  }
 0x141   : > { %1444 = vperm.xlu2 %6387, %v7117_v10   ;;  %v7122_v14 = vpop.permute.xlu1 %1110  ;;  %v7124_v17 = vpop.permute.xlu0 %1524 }
 0x142   : > { %10803 = vst [vmem:[#allocation59_spill] sm:$0xff] %v7124_v17  ;;  %v7126_v41 = vpop.permute.xlu2 %1150  ;;  %v833_v17 = vmul.f32 %v7137_v46, %v6857_v52  ;;  %v1030_v52 = vmul.f32 %v7157_v33, %v6821_v40 }
 0x143   : > { %10804 = vst [vmem:[#allocation60_spill] sm:$0xff] %v7126_v41  ;;  %v834_v41 = vmul.f32 %v7137_v46, %v6869_v56 }
 0x148   : > { %1842 = vperm.xlu0 %6394, %v6848_v49   ;;  %1454 = vperm.xlu1 %6388, %v7132_v18   ;;  %v7155_v49 = vld [vmem:[%s10695_s5] ss:$0 sm:$0xff] }
 0x149   : > { %1459 = vperm.xlu2 %6387, %v7135_v62   ;;  %v7146_v45 = vpop.permute.xlu1 %1122  ;;  %v7148_v37 = vpop.permute.xlu0 %2597  ;;  %v868_v56 = vadd.f32 %v7155_v49, %v833_v17  ;;  %v869_v30 = vadd.f32 %v7155_v49, %v834_v41  ;;  %v7171_v62 = vld [vmem:[%s6809_s20 + $0xa0] sm:$0xff] }
 0x14a   : > { %10807 = vst [vmem:[#allocation63_spill] sm:$0xff] %v7148_v37  ;;  %v7150_v35 = vpop.permute.xlu2 %1162  ;;  %v1029_v37 = vmul.f32 %v7157_v33, %v6904_v50 }
 0x14b   : > { %10808 = vst [vmem:[#allocation64_spill] sm:$0xff] %v7150_v35  ;;  %v7168_v35 = vld [vmem:[%s6809_s20 + $0x98] sm:$0xff]  ;;  %v1062_v17 = vadd.f32 %v1030_v52, %v869_v30  ;;  %v835_v30 = vmul.f32 %v7137_v46, %v6819_v39 }
 0x14c   : > { %v1061_v40 = vadd.f32 %v1029_v37, %v868_v56  ;;  %v1032_v56 = vmul.f32 %v7157_v33, %v6917_v54 }
 0x14d   : > { %v870_v39 = vadd.f32 %v7155_v49, %v835_v30 }
 0x14e   : > { %v1254_v28 = vadd.f32 %v1222_v15, %v1061_v40  ;;  %v1225_v40 = vmul.f32 %v7159_v31, %v7042_v26 }
 0x150   : > { %1854 = vperm.xlu0 %6394, %v6860_v53   ;;  %1469 = vperm.xlu1 %6388, %v7168_v35   ;;  %v1286_v53 = vmax.f32 %v1254_v28, 0.0  ;;  %v836_v28 = vmul.f32 %v7137_v46, %v6831_v43  ;;  %v7215_v43 = vld [vmem:[%s6809_s20 + $0xd0] sm:$0xff] }
 0x151   : > { %1474 = vperm.xlu2 %6387, %v7171_v62   ;;  %v7178_v41 = vpop.permute.xlu1 %1134 }
 0x152   : > { %v1099_v18 = vpop.permute.xlu0 %1098  ;;  %v7180_v50 = vpop.permute.xlu2 %1174 }
 0x153   : > { %10809 = vst [vmem:[#allocation65_spill] sm:$0xff] %v7180_v50  ;;  %v1223_v55 = vmul.f32 %v7159_v31, %v1099_v18 }
 0x155   : > { %v1255_v6 = vadd.f32 %v1223_v55, %v1062_v17 }
 0x157   : > { %v1287_v38 = vmax.f32 %v1255_v6, 0.0  ;;  %v1031_v6 = vmul.f32 %v7157_v33, %v6955_v3  ;;  %v871_v3 = vadd.f32 %v7155_v49, %v836_v28 }
 0x158   : > { %1866 = vperm.xlu0 %6394, %v6872_v57   ;;  %1484 = vperm.xlu1 %6388, %v7184_v7  }
 0x159   : > { %1489 = vperm.xlu2 %6387, %v7187_v21   ;;  %v7194_v37 = vpop.permute.xlu1 %1146  ;;  %v1318_v55 = vpack.c.bf16 %v1287_v38, %v1286_v53  ;;  %v1224_v38 = vmul.f32 %v7159_v31, %v7107_v27  ;;  %v7212_v53 = vld [vmem:[%s6809_s20 + $0xc8] sm:$0xff]  ;;  %v1063_v15 = vadd.f32 %v1031_v6, %v870_v39  ;;  %v1064_v54 = vadd.f32 %v1032_v56, %v871_v3  ;;  %v7230_v6 = vld [vmem:[%s6809_s20 + $0xe0] sm:$0xff] }
 0x15a   : > { %v7196_v18 = vpop.permute.xlu0 %1118  ;;  %v7198_v52 = vpop.permute.xlu2 %1186  ;;  %v7233_v39 = vld [vmem:[%s6809_s20 + $0xe8] sm:$0xff]  ;;  %v837_v56 = vmul.f32 %v7137_v46, %v6787_v32 }
 0x15b   : > { %10810 = vst [vmem:[#allocation66_spill] sm:$0xff] %v7198_v52  ;;  %6000 = vmatmul.msk.bf16.vlgmr.msra.gmra.mxu2 %vm2329_vm0, %v1318_v55  ;;  %6016 = vmatmul.msk.bf16.vlgmr.msra.gmra.mxu3 %vm2329_vm0, %v1318_v55  ;;  %v1256_v17 = vadd.f32 %v1224_v38, %v1063_v15  ;;  %v1257_v52 = vadd.f32 %v1225_v40, %v1064_v54 }
 0x15c   : > { %v1033_v54 = vmul.f32 %v7157_v33, %v6964_v8  ;;  %v872_v32 = vadd.f32 %v7155_v49, %v837_v56  ;;  %v1227_v8 = vmul.f32 %v7159_v31, %v7057_v29  ;;  %v839_v29 = vmul.f32 %v7137_v46, %v6881_v60 }
 0x15d   : > { %v1288_v28 = vmax.f32 %v1256_v17, 0.0  ;;  %v1289_v26 = vmax.f32 %v1257_v52, 0.0  ;;  %v838_v52 = vmul.f32 %v7137_v46, %v6795_v34  ;;  %v1034_v17 = vmul.f32 %v7157_v33, %v6929_v58 }
 0x15e   : > { %v1065_v34 = vadd.f32 %v1033_v54, %v872_v32 }
 0x15f   : > { %v1319_v3 = vpack.c.bf16 %v1289_v26, %v1288_v28  ;;  %v1226_v28 = vmul.f32 %v7159_v31, %v7122_v14  ;;  %v7258_v26 = vld [vmem:[%s6809_s20 + $0xf8] sm:$0xff] }
 0x160   : > { %1878 = vperm.xlu0 %6394, %v6884_v61   ;;  %1499 = vperm.xlu1 %6388, %v7212_v53  }
 0x161   : > { %1504 = vperm.xlu2 %6387, %v7215_v43   ;;  %v7223_v27 = vpop.permute.xlu1 %1158  ;;  %v1258_v56 = vadd.f32 %v1226_v28, %v1065_v34 }
 0x162   : > { %v7225_v30 = vpop.permute.xlu0 %1130  ;;  %v7227_v55 = vpop.permute.xlu2 %1198 }
 0x163   : > { %10811 = vst [vmem:[#allocation67_spill] sm:$0xff] %v7227_v55  ;;  %v10813_v55 = vmov 1   ;;  %v1290_v54 = vmax.f32 %v1258_v56, 0.0  ;;  %v1228_v56 = vmul.f32 %v7159_v31, %v7196_v18 }
 0x168   : > { %1890 = vperm.xlu0 %6394, %v6896_v1   ;;  %1514 = vperm.xlu1 %6388, %v7230_v6  }
 0x169   : > { %1519 = vperm.xlu2 %6387, %v7233_v39   ;;  %v7240_v38 = vpop.permute.xlu1 %1170 }
 0x16a   : > { %v7242_v15 = vpop.permute.xlu2 %1210  ;;  %v7244_v40 = vpop.permute.xlu0 %1142 }
 0x16b   : > { %10812 = vst [vmem:[#allocation68_spill] sm:$0xff] %v7242_v15  ;;  %6001 = vmatmul.msk.bf16.gmra.mxu2 %vm2329_vm0, %v1319_v3  ;;  %6017 = vmatmul.msk.bf16.gmra.mxu3 %vm2329_vm0, %v1319_v3  ;;  %v873_v15 = vadd.f32 %v7155_v49, %v838_v52 }
 0x16d   : > { %v1066_v3 = vadd.f32 %v1034_v17, %v873_v15  ;;  %v1035_v15 = vmul.f32 %v7157_v33, %v6833_v44  ;;  %v874_v17 = vadd.f32 %v7155_v49, %v839_v29  ;;  %v1036_v44 = vmul.f32 %v7157_v33, %v6973_v4  ;;  %v7297_v29 = vld [vmem:[%s6937_s23] sm:$0xff] }
 0x16f   : > { %v1259_v50 = vadd.f32 %v1227_v8, %v1066_v3  ;;  %v1067_v3 = vadd.f32 %v1035_v15, %v874_v17  ;;  %v842_v17 = vmul.f32 %v7137_v46, %v6893_v0  ;;  %v841_v0 = vmul.f32 %v7137_v46, %v6803_v36 }
 0x170   : > { %1902 = vperm.xlu0 %6394, %v6909_v63   ;;  %1529 = vperm.xlu1 %6388, %v7258_v26  }
 0x171   : > { %6389 = vset.pattern.permute.xlu2 %v10813_v55  ;;  %v7266_v58 = vpop.permute.xlu1 %1182  ;;  %v1291_v32 = vmax.f32 %v1259_v50, 0.0  ;;  %v840_v50 = vmul.f32 %v7137_v46, %v6843_v47  ;;  %v1229_v47 = vmul.f32 %v7159_v31, %v7146_v45  ;;  %v7314_v45 = vld [vmem:[%s6937_s23 + $0x48] sm:$0xff] }
 0x172   : > { %10814 = vst [vmem:[#allocation69_spill] sm:$0xff] %v7266_v58  ;;  %1601 = vperm.xlu2 %6389, %v7016_v23   ;;  %v7269_v14 = vpop.permute.xlu0 %1154 }
 0x173   : > { %v7271_v52 = vpop.permute.xlu2 %1374  ;;  %v1320_v34 = vpack.c.bf16 %v1291_v32, %v1290_v54  ;;  %v875_v54 = vadd.f32 %v7155_v49, %v840_v50 }
 0x175   : > { %v1068_v32 = vadd.f32 %v1036_v44, %v875_v54  ;;  %v1038_v44 = vmul.f32 %v7157_v33, %v6845_v48  ;;  %v1037_v48 = vmul.f32 %v7157_v33, %v6947_v5 }
 0x177   : > { %v1261_v18 = vadd.f32 %v1229_v47, %v1068_v32 }
 0x178   : > { %1914 = vperm.xlu0 %6394, %v6922_v59   ;;  %6390 = vset.pattern.permute.xlu1 %v10813_v55 }
 0x179   : > { %1609 = vperm.xlu1 %6390, %v7029_v24   ;;  %v7281_v28 = vpop.permute.xlu1 %1194  ;;  %v1293_v58 = vmax.f32 %v1261_v18, 0.0  ;;  %v876_v18 = vadd.f32 %v7155_v49, %v841_v0 }
 0x17a   : > { %10815 = vst [vmem:[#allocation70_spill] sm:$0xff] %v7281_v28  ;;  %1613 = vperm.xlu2 %6389, %v7032_v12   ;;  %v7284_v60 = vpop.permute.xlu0 %1166 }
 0x17b   : > { %6002 = vmatmul.msk.bf16.gmra.mxu2 %vm2329_vm0, %v1320_v34  ;;  %6018 = vmatmul.msk.bf16.gmra.mxu3 %vm2329_vm0, %v1320_v34  ;;  %v7290_v8 = vpop.permute.xlu2 %1389  ;;  %v1260_v34 = vadd.f32 %v1228_v56, %v1067_v3  ;;  %v877_v3 = vadd.f32 %v7155_v49, %v842_v17  ;;  %v1230_v17 = vmul.f32 %v7159_v31, %v7081_v11 }
 0x17c   : > { %v1069_v36 = vadd.f32 %v1037_v48, %v876_v18  ;;  %v843_v11 = vmul.f32 %v7137_v46, %v6855_v51 }
 0x17d   : > { %v1292_v50 = vmax.f32 %v1260_v34, 0.0  ;;  %v1070_v34 = vadd.f32 %v1038_v44, %v877_v3 }
 0x17e   : > { %v878_v51 = vadd.f32 %v7155_v49, %v843_v11 }
 0x17f   : > { %v1321_v54 = vpack.c.bf16 %v1293_v58, %v1292_v50  ;;  %v1231_v58 = vmul.f32 %v7159_v31, %v7225_v30  ;;  %v1262_v30 = vadd.f32 %v1230_v17, %v1069_v36  ;;  %v10821_v17 = vld [vmem:[#allocation37_spill] sm:$0xff] }
 0x180   : > { %3012 = vperm.xlu0 %6394, %v7297_v29   ;;  %v1039_v36 = vmul.f32 %v7157_v33, %v10821_v17 }
 0x181   : > { %1617 = vperm.xlu1 %6390, %v7045_v9   ;;  %v7304_v28 = vpop.permute.xlu1 %1206  ;;  %v1263_v50 = vadd.f32 %v1231_v58, %v1070_v34  ;;  %v1294_v0 = vmax.f32 %v1262_v30, 0.0  ;;  %v10820_v58 = vld [vmem:[#allocation8_spill] sm:$0xff] }
 0x182   : > { %10816 = vst [vmem:[#allocation71_spill] sm:$0xff] %v7304_v28  ;;  %1621 = vperm.xlu2 %6389, %v7048_v16   ;;  %v7307_v4 = vpop.permute.xlu0 %1178  ;;  %v844_v18 = vmul.f32 %v7137_v46, %v10820_v58  ;;  %v1071_v58 = vadd.f32 %v1039_v36, %v878_v51  ;;  %v10825_v28 = vld [vmem:[#allocation2_spill] sm:$0xff]  ;;  %v10829_v51 = vld [vmem:[#allocation3_spill] sm:$0xff] }
 0x183   : > { %v7309_v15 = vpop.permute.xlu2 %1399 }
 0x188   : > { %3048 = vperm.xlu0 %6394, %v7314_v45  }
 0x189   : > { %1629 = vperm.xlu1 %6390, %v7060_v19   ;;  %v7321_v56 = vpop.permute.xlu1 %1218 }
 0x18a   : > { %10817 = vst [vmem:[#allocation72_spill] sm:$0xff] %v7321_v56  ;;  %1633 = vperm.xlu2 %6389, %v7063_v42   ;;  %v7324_v47 = vpop.permute.xlu0 %1190  ;;  %v10824_v56 = vld [vmem:[#allocation58_spill] sm:$0xff] }
 0x18b   : > { %6003 = vmatmul.msk.bf16.gmra.mxu2 %vm2329_vm0, %v1321_v54  ;;  %6019 = vmatmul.msk.bf16.gmra.mxu3 %vm2329_vm0, %v1321_v54  ;;  %v7330_v32 = vpop.permute.xlu2 %1414  ;;  %v1295_v54 = vmax.f32 %v1263_v50, 0.0  ;;  %v10823_v50 = vld [vmem:[#allocation31_spill] sm:$0xff]  ;;  %v1233_v17 = vmul.f32 %v7159_v31, %v10824_v56 }
 0x18c   : > { %v1040_v30 = vmul.f32 %v7157_v33, %v10823_v50 }
 0x190   : > { %6401 = vset.pattern.permute.xlu0 %v10813_v55 }
 0x191   : > { %949 = vperm.xlu0 %6401, %v6741_v22   ;;  %1641 = vperm.xlu1 %6390, %v7087_v2   ;;  %v1322_v22 = vpack.c.bf16 %v1295_v54, %v1294_v0  ;;  %v1232_v54 = vmul.f32 %v7159_v31, %v7178_v41  ;;  %v879_v0 = vadd.f32 %v7155_v49, %v844_v18 }
 0x192   : > { %1645 = vperm.xlu2 %6389, %v7099_v20   ;;  %v7343_v5 = vpop.permute.xlu1 %1384  ;;  %v7345_v44 = vpop.permute.xlu0 %1202 }
 0x193   : > { %v7347_v3 = vpop.permute.xlu2 %1429 }
 0x194   : > { %10818 = vst [vmem:[#allocation73_spill] sm:$0xff] %v7347_v3  ;;  %v1264_v3 = vadd.f32 %v1232_v54, %v1071_v58  ;;  %v10831_v54 = vld [vmem:[#allocation4_spill] sm:$0xff]  ;;  %v10833_v58 = vld [vmem:[#allocation5_spill] sm:$0xff] }
 0x196   : > { %v1296_v18 = vmax.f32 %v1264_v3, 0.0 }
 0x199   : > { %961 = vperm.xlu0 %6401, %v6753_v25   ;;  %1653 = vperm.xlu1 %6390, %v7114_v13  }
 0x19a   : > { %1657 = vperm.xlu2 %6389, %v7117_v10   ;;  %v7354_v48 = vpop.permute.xlu1 %1394  ;;  %v7356_v34 = vpop.permute.xlu0 %1214 }
 0x19b   : > { %10819 = vst [vmem:[#allocation74_spill] sm:$0xff] %v7356_v34  ;;  %6004 = vmatmul.msk.bf16.gmra.mxu2 %vm2329_vm0, %v1322_v22  ;;  %6020 = vmatmul.msk.bf16.gmra.mxu3 %vm2329_vm0, %v1322_v22  ;;  %v7364_v25 = vpop.permute.xlu2 %1444  ;;  %v1072_v34 = vadd.f32 %v1040_v30, %v879_v0  ;;  %v10826_v22 = vld [vmem:[#allocation61_spill] sm:$0xff] }
 0x19c   : > { %10822 = vst [vmem:[#allocation8_spill] sm:$0xff] %v7364_v25  ;;  %v10827_v25 = vld [vmem:[#allocation62_spill] sm:$0xff] }
 0x19d   : > { %v1265_v55 = vadd.f32 %v1233_v17, %v1072_v34 }
 0x19f   : > { %v1297_v36 = vmax.f32 %v1265_v55, 0.0 }
 0x1a1   : > { %973 = vperm.xlu0 %6401, %v10825_v28   ;;  %1665 = vperm.xlu1 %6390, %v10826_v22   ;;  %v1323_v56 = vpack.c.bf16 %v1297_v36, %v1296_v18 }
 0x1a2   : > { %1669 = vperm.xlu2 %6389, %v10827_v25   ;;  %v7377_v11 = vpop.permute.xlu1 %1409  ;;  %v7379_v50 = vpop.permute.xlu0 %1798 }
 0x1a3   : > { %v7381_v41 = vpop.permute.xlu2 %1459 }
 0x1a4   : > { %10828 = vst [vmem:[#allocation37_spill] sm:$0xff] %v7381_v41 }
 0x1a9   : > { %985 = vperm.xlu0 %6401, %v10829_v51   ;;  %1677 = vperm.xlu1 %6390, %v7168_v35   ;;  %v10837_v51 = vld [vmem:[#allocation6_spill] sm:$0xff] }
 0x1aa   : > { %1681 = vperm.xlu2 %6389, %v7171_v62   ;;  %v7386_v28 = vpop.permute.xlu1 %1424  ;;  %v7388_v30 = vpop.permute.xlu0 %1818 }
 0x1ab   : > { %6005 = vmatmul.msk.bf16.gmra.mxu2 %vm2329_vm0, %v1323_v56  ;;  %6021 = vmatmul.msk.bf16.gmra.mxu3 %vm2329_vm0, %v1323_v56  ;;  %v7392_v34 = vpop.permute.xlu2 %1474 }
 0x1ac   : > { %10830 = vst [vmem:[#allocation31_spill] sm:$0xff] %v7392_v34  ;;  %v10842_v34 = vmov 2  }
 0x1b1   : > { %997 = vperm.xlu0 %6401, %v10831_v54   ;;  %1689 = vperm.xlu1 %6390, %v7184_v7  }
 0x1b2   : > { %1693 = vperm.xlu2 %6389, %v7187_v21   ;;  %v7397_v55 = vpop.permute.xlu1 %1439  ;;  %v7399_v3 = vpop.permute.xlu0 %1830 }
 0x1b3   : > { %v7401_v0 = vpop.permute.xlu2 %1489 }
 0x1b4   : > { %10832 = vst [vmem:[#allocation58_spill] sm:$0xff] %v7401_v0  ;;  %v10841_v0 = vld [vmem:[#allocation7_spill] sm:$0xff] }
 0x1b9   : > { %1009 = vperm.xlu0 %6401, %v10833_v58   ;;  %1701 = vperm.xlu1 %6390, %v7212_v53  }
 0x1ba   : > { %1705 = vperm.xlu2 %6389, %v7215_v43   ;;  %v7406_v17 = vpop.permute.xlu1 %1454  ;;  %v7408_v18 = vpop.permute.xlu0 %1842 }
 0x1bb   : > { %10834 = vst [vmem:[#allocation2_spill] sm:$0xff] %v7406_v17  ;;  %v7410_v36 = vpop.permute.xlu2 %1504  ;;  %v10845_v17 = vld [vmem:[#allocation9_spill] sm:$0xff] }
 0x1bc   : > { %10835 = vst [vmem:[#allocation61_spill] sm:$0xff] %v7408_v18 }
 0x1bd   : > { %10836 = vst [vmem:[#allocation62_spill] sm:$0xff] %v7410_v36 }
 0x1c1   : > { %1021 = vperm.xlu0 %6401, %v10837_v51   ;;  %1713 = vperm.xlu1 %6390, %v7230_v6  }
 0x1c2   : > { %1717 = vperm.xlu2 %6389, %v7233_v39   ;;  %v7415_v56 = vpop.permute.xlu1 %1469  ;;  %v7417_v54 = vpop.permute.xlu0 %1854 }
 0x1c3   : > { %10838 = vst [vmem:[#allocation3_spill] sm:$0xff] %v7415_v56  ;;  %v7419_v58 = vpop.permute.xlu2 %1519 }
 0x1c4   : > { %10839 = vst [vmem:[#allocation4_spill] sm:$0xff] %v7417_v54 }
 0x1c5   : > { %10840 = vst [vmem:[#allocation5_spill] sm:$0xff] %v7419_v58 }
 0x1c9   : > { %1605 = vperm.xlu0 %6401, %v10841_v0   ;;  %1725 = vperm.xlu1 %6390, %v7258_v26  }
 0x1ca   : > { %6391 = vset.pattern.permute.xlu2 %v10842_v34  ;;  %v7424_v41 = vpop.permute.xlu1 %1484  ;;  %v7426_v36 = vpop.permute.xlu0 %1866 }
 0x1cb   : > { %10843 = vst [vmem:[#allocation6_spill] sm:$0xff] %v7424_v41  ;;  %1794 = vperm.xlu2 %6391, %v7016_v23   ;;  %v10848_v41 = vld [vmem:[#allocation11_spill] sm:$0xff] }
 0x1cc   : > { %10844 = vst [vmem:[#allocation7_spill] sm:$0xff] %v7426_v36  ;;  %v7429_v51 = vpop.permute.xlu2 %1601 }
 0x1d1   : > { %1625 = vperm.xlu0 %6401, %v10845_v17   ;;  %6392 = vset.pattern.permute.xlu1 %v10842_v34 }
 0x1d2   : > { %1802 = vperm.xlu1 %6392, %v7029_v24   ;;  %v7434_v58 = vpop.permute.xlu1 %1499  ;;  %v7436_v0 = vpop.permute.xlu0 %1878  ;;  %v10851_v24 = vld [vmem:[#allocation13_spill] sm:$0xff] }
 0x1d3   : > { %10846 = vst [vmem:[#allocation9_spill] sm:$0xff] %v7434_v58  ;;  %1806 = vperm.xlu2 %6391, %v7032_v12  }
 0x1d4   : > { %10847 = vst [vmem:[#allocation75_spill] sm:$0xff] %v7436_v0  ;;  %v7439_v56 = vpop.permute.xlu2 %1613 }
 0x1d9   : > { %1637 = vperm.xlu0 %6401, %v10848_v41  }
 0x1da   : > { %1810 = vperm.xlu1 %6392, %v7045_v9   ;;  %v7443_v23 = vpop.permute.xlu1 %1514  ;;  %v7445_v36 = vpop.permute.xlu0 %1890  ;;  %v10854_v9 = vld [vmem:[#allocation15_spill] sm:$0xff] }
 0x1db   : > { %10849 = vst [vmem:[#allocation11_spill] sm:$0xff] %v7443_v23  ;;  %1814 = vperm.xlu2 %6391, %v7048_v16  }
 0x1dc   : > { %10850 = vst [vmem:[#allocation76_spill] sm:$0xff] %v7445_v36  ;;  %v7448_v17 = vpop.permute.xlu2 %1621 }
 0x1e1   : > { %1649 = vperm.xlu0 %6401, %v10851_v24  }
 0x1e2   : > { %1822 = vperm.xlu1 %6392, %v7060_v19   ;;  %v7452_v58 = vpop.permute.xlu1 %1529  ;;  %v7454_v12 = vpop.permute.xlu0 %1902 }
 0x1e3   : > { %10852 = vst [vmem:[#allocation13_spill] sm:$0xff] %v7452_v58  ;;  %1826 = vperm.xlu2 %6391, %v7063_v42  }
 0x1e4   : > { %10853 = vst [vmem:[#allocation77_spill] sm:$0xff] %v7454_v12  ;;  %v7457_v41 = vpop.permute.xlu2 %1633  ;;  %v10862_v12 = vld [vmem:[#allocation40_spill] sm:$0xff] }
 0x1e9   : > { %1661 = vperm.xlu0 %6401, %v10854_v9  }
 0x1ea   : > { %1834 = vperm.xlu1 %6392, %v7087_v2   ;;  %v7461_v23 = vpop.permute.xlu0 %1914 }
 0x1eb   : > { %10855 = vst [vmem:[#allocation15_spill] sm:$0xff] %v7461_v23  ;;  %1838 = vperm.xlu2 %6391, %v7099_v20   ;;  %v7464_v16 = vpop.permute.xlu1 %1609 }
 0x1ec   : > { %v7466_v24 = vpop.permute.xlu2 %1645 }
 0x1f1   : > { %1673 = vperm.xlu0 %6401, %v6872_v57  }
 0x1f2   : > { %1846 = vperm.xlu1 %6392, %v7114_v13   ;;  %v7470_v19 = vpop.permute.xlu0 %3012  ;;  %v10860_v13 = vld [vmem:[#allocation17_spill] sm:$0xff] }
 0x1f3   : > { %10856 = vst [vmem:[#allocation78_spill] sm:$0xff] %v7470_v19  ;;  %1850 = vperm.xlu2 %6391, %v7117_v10   ;;  %v7473_v42 = vpop.permute.xlu1 %1617  ;;  %v846_v23 = vmul.f32 %v7137_v46, %v10860_v13  ;;  %v10861_v10 = vld [vmem:[#allocation23_spill] sm:$0xff]  ;;  %v1042_v19 = vmul.f32 %v7157_v33, %v10862_v12  ;;  %v1234_v12 = vmul.f32 %v7159_v31, %v7244_v40 }
 0x1f4   : > { %v7475_v9 = vpop.permute.xlu2 %1657  ;;  %v845_v58 = vmul.f32 %v7137_v46, %v10861_v10 }
 0x1f5   : > { %10857 = vst [vmem:[#allocation79_spill] sm:$0xff] %v7475_v9 }
 0x1f6   : > { %v880_v13 = vadd.f32 %v7155_v49, %v845_v58 }
 0x1f9   : > { %1685 = vperm.xlu0 %6401, %v6884_v61   ;;  %v881_v61 = vadd.f32 %v7155_v49, %v846_v23 }
 0x1fa   : > { %1858 = vperm.xlu1 %6392, %v10826_v22   ;;  %v7479_v2 = vpop.permute.xlu0 %3048 }
 0x1fb   : > { %10858 = vst [vmem:[#allocation80_spill] sm:$0xff] %v7479_v2  ;;  %1862 = vperm.xlu2 %6391, %v10827_v25   ;;  %v7482_v20 = vpop.permute.xlu1 %1629  ;;  %v1235_v25 = vmul.f32 %v7159_v31, %v7194_v37  ;;  %v1074_v10 = vadd.f32 %v1042_v19, %v881_v61 }
 0x1fc   : > { %v7484_v57 = vpop.permute.xlu2 %1669 }
 0x1fd   : > { %10859 = vst [vmem:[#allocation81_spill] sm:$0xff] %v7484_v57  ;;  %v1267_v23 = vadd.f32 %v1235_v25, %v1074_v10  ;;  %v10864_v57 = vld [vmem:[#allocation25_spill] sm:$0xff] }
 0x201   : > { %1697 = vperm.xlu0 %6401, %v6896_v1  }
 0x202   : > { %1870 = vperm.xlu1 %6392, %v7168_v35   ;;  %v848_v35 = vmul.f32 %v7137_v46, %v10864_v57 }
 0x203   : > { %v950_v22 = vpop.permute.xlu0 %949  ;;  %1874 = vperm.xlu2 %6391, %v7171_v62   ;;  %v7498_v2 = vpop.permute.xlu1 %1641  ;;  %v1299_v62 = vmax.f32 %v1267_v23, 0.0 }
 0x204   : > { %v1041_v1 = vmul.f32 %v7157_v33, %v950_v22  ;;  %v7504_v36 = vpop.permute.xlu2 %1681 }
 0x205   : > { %10863 = vst [vmem:[#allocation17_spill] sm:$0xff] %v7504_v36 }
 0x206   : > { %v1073_v0 = vadd.f32 %v1041_v1, %v880_v13  ;;  %v10867_v13 = vld [vmem:[#allocation10_spill] sm:$0xff]  ;;  %v10869_v1 = vld [vmem:[#allocation60_spill] sm:$0xff] }
 0x207   : > { %v847_v57 = vmul.f32 %v7137_v46, %v10867_v13  ;;  %v1236_v23 = vmul.f32 %v7159_v31, %v10869_v1 }
 0x208   : > { %v1266_v37 = vadd.f32 %v1234_v12, %v1073_v0  ;;  %v883_v0 = vadd.f32 %v7155_v49, %v848_v35 }
 0x209   : > { %1709 = vperm.xlu0 %6401, %v6909_v63   ;;  %v1237_v63 = vmul.f32 %v7159_v31, %v7269_v14  ;;  %v882_v12 = vadd.f32 %v7155_v49, %v847_v57  ;;  %v5938_v57 = vld [vmem:[%s10702_s12 + $0x40] sm:$0xf] }
 0x20a   : > { %1882 = vperm.xlu1 %6392, %v7184_v7   ;;  %v1298_v58 = vmax.f32 %v1266_v37, 0.0 }
 0x20b   : > { %v962_v19 = vpop.permute.xlu0 %961  ;;  %1886 = vperm.xlu2 %6391, %v7187_v21   ;;  %v7511_v40 = vpop.permute.xlu1 %1653  ;;  %v10868_v21 = vld [vmem:[#allocation33_spill] sm:$0xff] }
 0x20c   : > { %10865 = vst [vmem:[#allocation23_spill] sm:$0xff] %v7511_v40  ;;  %v1044_v61 = vmul.f32 %v7157_v33, %v962_v19  ;;  %v7514_v22 = vpop.permute.xlu2 %1693  ;;  %v1324_v25 = vpack.c.bf16 %v1299_v62, %v1298_v58  ;;  %v1043_v10 = vmul.f32 %v7157_v33, %v10868_v21  ;;  %v6301_v19 = vld [vmem:[%s10702_s12 + $0x54] sm:$0xf0]  ;;  %v10872_v21 = vld [vmem:[#allocation28_spill] sm:$0xff] }
 0x20d   : > { %10866 = vst [vmem:[#allocation40_spill] sm:$0xff] %v7514_v22 }
 0x20e   : > { %6006 = vmatmul.msk.bf16.gmra.mxu2 %vm2329_vm0, %v1324_v25  ;;  %6022 = vmatmul.msk.bf16.gmra.mxu3 %vm2329_vm0, %v1324_v25  ;;  %v1076_v7 = vadd.f32 %v1044_v61, %v883_v0  ;;  %v1075_v14 = vadd.f32 %v1043_v10, %v882_v12  ;;  %v5940_v12 = vld [vmem:[%s10702_s12 + $0x48] sm:$0xf0] }
 0x210   : > { %v1269_v37 = vadd.f32 %v1237_v63, %v1076_v7  ;;  %v1268_v25 = vadd.f32 %v1236_v23, %v1075_v14  ;;  %v6299_v63 = vld [vmem:[%s10702_s12 + $0x44] sm:$0xf0]  ;;  %v6298_v7 = vld [vmem:[%s10702_s12 + $0x44] sm:$0xf] }
 0x211   : > { %1721 = vperm.xlu0 %6401, %v6922_v59   ;;  %v5946_v59 = vld [vmem:[%s10702_s12 + $0x50] sm:$0xf]  ;;  %v5939_v10 = vor.u32 %v6299_v63, %v5938_v57  ;;  %v5943_v23 = vor.u32 %v6298_v7, %v5940_v12  ;;  %v10877_v63 = vld [vmem:[#allocation43_spill] sm:$0xff] }
 0x212   : > { %1894 = vperm.xlu1 %6392, %v7212_v53   ;;  %v6300_v53 = vld [vmem:[%s10702_s12 + $0x54] sm:$0xf]  ;;  %v5947_v61 = vor.u32 %v6301_v19, %v5946_v59  ;;  %v1301_v13 = vmax.f32 %v1269_v37, 0.0  ;;  %v1300_v1 = vmax.f32 %v1268_v25, 0.0  ;;  %v10874_v59 = vld [vmem:[#allocation19_spill] sm:$0xff]  ;;  %v1045_v7 = vmul.f32 %v7157_v33, %v10877_v63 }
 0x213   : > { %v7530_v35 = vpop.permute.xlu0 %973  ;;  %1898 = vperm.xlu2 %6391, %v7215_v43   ;;  %v7533_v62 = vpop.permute.xlu1 %1665  ;;  %v5948_v43 = vld [vmem:[%s10702_s12 + $0x58] sm:$0xf0]  ;;  %v849_v19 = vmul.f32 %v7137_v46, %v10874_v59  ;;  %v10876_v57 = vld [vmem:[#allocation12_spill] sm:$0xff]  ;;  %v1238_v59 = vmul.f32 %v7159_v31, %v7223_v27  ;;  %v5924_v27 = vld [vmem:[%s10702_s12 + $0x28] sm:$0xf0] }
 0x214   : > { %10870 = vst [vmem:[#allocation25_spill] sm:$0xff] %v7533_v62  ;;  %v7535_v58 = vpop.permute.xlu2 %1705  ;;  %v5951_v0 = vor.u32 %v6300_v53, %v5948_v43  ;;  %2135 = vmatpush.bf16.msra.mxu0 %v5947_v61  ;;  %v1325_v61 = vpack.c.bf16 %v1301_v13, %v1300_v1  ;;  %v6297_v43 = vld [vmem:[%s10702_s12 + $0x34] sm:$0xf0]  ;;  %v850_v13 = vmul.f32 %v7137_v46, %v10876_v57  ;;  %v10879_v1 = vld [vmem:[#allocation35_spill] sm:$0xff] }
 0x215   : > { %10871 = vst [vmem:[#allocation10_spill] sm:$0xff] %v7535_v58  ;;  %v884_v12 = vadd.f32 %v7155_v49, %v849_v19  ;;  %v7686_v62 = vld [vmem:[%s6937_s23 + $0x78] sm:$0xff] }
 0x216   : > { %2224 = vmatpush.bf16.msra.mxu1 %v5951_v0  ;;  %v5932_v0 = vld [vmem:[%s10702_s12 + $0x38] sm:$0xf0] }
 0x218   : > { %2136 = vmatpush.bf16.msra.mxu0 %v5939_v10 }
 0x219   : > { %2823 = vperm.xlu0 %6401, %v10872_v21   ;;  %v7591_v21 = vld [vmem:[%s6937_s23 + $0x38] sm:$0xff] }
 0x21a   : > { %1906 = vperm.xlu1 %6392, %v7230_v6   ;;  %2225 = vmatpush.bf16.msra.mxu1 %v5943_v23  ;;  %v5930_v6 = vld [vmem:[%s10702_s12 + $0x30] sm:$0xf]  ;;  %10878 = vst [vmem:[#allocation28_spill] sm:$0xff] %v7591_v21  ;;  %v1046_v23 = vmul.f32 %v7157_v33, %v10879_v1  ;;  %v10881_v1 = vmov 0  }
 0x21b   : > { %v7563_v37 = vpop.permute.xlu0 %985  ;;  %1910 = vperm.xlu2 %6391, %v7233_v39   ;;  %v7566_v14 = vpop.permute.xlu1 %1677  ;;  %v6296_v39 = vld [vmem:[%s10702_s12 + $0x34] sm:$0xf]  ;;  %v5931_v25 = vor.u32 %v6297_v43, %v5930_v6  ;;  %v5922_v6 = vld [vmem:[%s10702_s12 + $0x20] sm:$0xf]  ;;  %v6294_v43 = vld [vmem:[%s10702_s12 + $0x24] sm:$0xf] }
 0x21c   : > { %10873 = vst [vmem:[#allocation33_spill] sm:$0xff] %v7566_v14  ;;  %v7570_v53 = vpop.permute.xlu2 %1717  ;;  %v5935_v10 = vor.u32 %v6296_v39, %v5932_v0  ;;  %v885_v39 = vadd.f32 %v7155_v49, %v850_v13  ;;  %v10880_v0 = vld [vmem:[#allocation64_spill] sm:$0xff]  ;;  %v5927_v63 = vor.u32 %v6294_v43, %v5924_v27  ;;  %v7629_v43 = vld [vmem:[%s6937_s23 + $0x18] sm:$0xff]  ;;  %v10884_v27 = vld [vmem:[#allocation27_spill] sm:$0xff] }
 0x21d   : > { %10875 = vst [vmem:[#allocation60_spill] sm:$0xff] %v7570_v53  ;;  %2137 = vmatpush.bf16.msra.mxu0 %v5931_v25  ;;  %v1077_v25 = vadd.f32 %v1045_v7, %v884_v12  ;;  %v1239_v57 = vmul.f32 %v7159_v31, %v10880_v0  ;;  %v7622_v12 = vld [vmem:[%s6937_s23 + $0x40] sm:$0xff] }
 0x21e   : > { %6007 = vmatmul.msk.bf16.gmra.mxu2 %vm2329_vm0, %v1325_v61  ;;  %6023 = vmatmul.msk.bf16.gmra.mxu3 %vm2329_vm0, %v1325_v61  ;;  %v6295_v61 = vld [vmem:[%s10702_s12 + $0x24] sm:$0xf0]  ;;  %10883 = vst [vmem:[#allocation12_spill] sm:$0xff] %v7622_v12 }
 0x21f   : > { %2226 = vmatpush.bf16.msra.mxu1 %v5935_v10  ;;  %v5923_v19 = vor.u32 %v6295_v61, %v5922_v6  ;;  %v1078_v61 = vadd.f32 %v1046_v23, %v885_v39  ;;  %v1270_v53 = vadd.f32 %v1238_v59, %v1077_v25  ;;  %v1047_v59 = vmul.f32 %v7157_v33, %v7530_v35  ;;  %v1370_v35 = vld [vmem:[%s10696_s6] sm:$0x7] }
 0x220   : > { %v7669_v22 = vperm.slane %v1370_v35, 0  ;;  %v7683_v14 = vperm.slane %v1370_v35, 2 }
 0x221   : > { %2847 = vperm.xlu0 %6401, %v7591_v21   ;;  %2138 = vmatpush.bf16.msra.mxu0 %v5923_v19  ;;  %v1271_v7 = vadd.f32 %v1239_v57, %v1078_v61  ;;  %v1302_v0 = vmax.f32 %v1270_v53, 0.0  ;;  %v851_v19 = vmul.f32 %v7137_v46, %v10884_v27  ;;  %v10886_v57 = vld [vmem:[#allocation21_spill] sm:$0xff]  ;;  %v10887_v27 = vld [vmem:[#allocation46_spill] sm:$0xff] }
 0x222   : > { %1918 = vperm.xlu1 %6392, %v7258_v26   ;;  %v7625_v26 = vld [vmem:[%s6937_s23 + $0x10] sm:$0xff] }
 0x223   : > { %v7615_v10 = vpop.permute.xlu0 %997  ;;  %6393 = vset.pattern.permute.xlu2 %v10881_v1  ;;  %v7618_v6 = vpop.permute.xlu1 %1689  ;;  %2227 = vmatpush.bf16.msra.mxu1 %v5927_v63  ;;  %v1303_v23 = vmax.f32 %v1271_v7, 0.0  ;;  %v852_v63 = vmul.f32 %v7137_v46, %v10886_v57  ;;  %v886_v61 = vadd.f32 %v7155_v49, %v851_v19  ;;  %v7650_v7 = vld [vmem:[%s6937_s23 + $0x60] sm:$0xff]  ;;  %v7663_v19 = vld [vmem:[%s6937_s23 + $0x28] sm:$0xff] }
 0x224   : > { %10882 = vst [vmem:[#allocation19_spill] sm:$0xff] %v7618_v6  ;;  %2592 = vperm.xlu2 %6393, %v7297_v29   ;;  %v7660_v57 = vld [vmem:[%s6937_s23 + $0x20] sm:$0xff] }
 0x225   : > { %v1795_v13 = vpop.permute.xlu2 %1794  ;;  %v1326_v39 = vpack.c.bf16 %v1303_v23, %v1302_v0  ;;  %v1048_v0 = vmul.f32 %v7157_v33, %v10887_v27  ;;  %v1240_v23 = vmul.f32 %v7159_v31, %v7284_v60  ;;  %v1079_v58 = vadd.f32 %v1047_v59, %v886_v61 }
 0x226   : > { %v7676_v61 = vperm.slane %v1370_v35, 1  ;;  %v1922_v54 = vmul.f32 %v7683_v14, %v1795_v13  ;;  %v10892_v13 = vld [vmem:[#allocation14_spill] sm:$0xff] }
 0x227   : > { %v1272_v27 = vadd.f32 %v1240_v23, %v1079_v58 }
 0x228   : > { %v1729_v23 = vmul.f32 %v7676_v61, %v7429_v51 }
 0x229   : > { %2851 = vperm.xlu0 %6401, %v7622_v12  }
 0x22a   : > { %6395 = vset.pattern.permute.xlu1 %v10881_v1 }
 0x22b   : > { %v7634_v29 = vpop.permute.xlu0 %1009  ;;  %2602 = vperm.xlu1 %6395, %v7625_v26   ;;  %v7637_v53 = vpop.permute.xlu1 %1701 }
 0x22c   : > { %10885 = vst [vmem:[#allocation43_spill] sm:$0xff] %v7637_v53  ;;  %2607 = vperm.xlu2 %6393, %v7629_v43   ;;  %v1241_v53 = vmul.f32 %v7159_v31, %v7240_v38  ;;  %v1533_v38 = vmul.f32 %v7669_v22, %v7271_v52 }
 0x22d   : > { %v7642_v25 = vpop.permute.xlu2 %1806 }
 0x22e   : > { %6008 = vmatmul.msk.bf16.gmra.mxu2 %vm2329_vm0, %v1326_v39  ;;  %6024 = vmatmul.msk.bf16.gmra.mxu3 %vm2329_vm0, %v1326_v39  ;;  %v887_v39 = vadd.f32 %v7155_v49, %v852_v63 }
 0x230   : > { %v1080_v59 = vadd.f32 %v1048_v0, %v887_v39  ;;  %v10889_v0 = vld [vmem:[#allocation39_spill] sm:$0xff]  ;;  %v1304_v39 = vmax.f32 %v1272_v27, 0.0  ;;  %v1050_v27 = vmul.f32 %v7157_v33, %v7563_v37  ;;  %v10893_v37 = vld [vmem:[#allocation38_spill] sm:$0xff] }
 0x231   : > { %2867 = vperm.xlu0 %6401, %v7650_v7   ;;  %v1534_v58 = vmul.f32 %v7669_v22, %v10889_v0 }
 0x232   : > { %v1273_v63 = vadd.f32 %v1241_v53, %v1080_v59  ;;  %v10890_v53 = vld [vmem:[#allocation30_spill] sm:$0xff] }
 0x233   : > { %v7671_v6 = vpop.permute.xlu0 %1021  ;;  %2612 = vperm.xlu1 %6395, %v7660_v57   ;;  %v7674_v60 = vpop.permute.xlu1 %1713  ;;  %v854_v59 = vmul.f32 %v7137_v46, %v10890_v53 }
 0x234   : > { %10888 = vst [vmem:[#allocation35_spill] sm:$0xff] %v7674_v60  ;;  %2617 = vperm.xlu2 %6393, %v7663_v19   ;;  %v7691_v60 = vld [vmem:[%s10697_s7] ss:$0 sm:$0xff]  ;;  %v1305_v52 = vmax.f32 %v1273_v63, 0.0 }
 0x235   : > { %v7679_v36 = vpop.permute.xlu2 %1814  ;;  %v1568_v35 = vadd.f32 %v7691_v60, %v1533_v38  ;;  %v1569_v9 = vadd.f32 %v7691_v60, %v1534_v58  ;;  %v853_v38 = vmul.f32 %v7137_v46, %v10892_v13  ;;  %v889_v58 = vadd.f32 %v7155_v49, %v854_v59 }
 0x236   : > { %v1327_v63 = vpack.c.bf16 %v1305_v52, %v1304_v39  ;;  %v1049_v39 = vmul.f32 %v7157_v33, %v10893_v37  ;;  %v1243_v52 = vmul.f32 %v7159_v31, %v7307_v4  ;;  %v1535_v4 = vmul.f32 %v7669_v22, %v7343_v5  ;;  %v7746_v5 = vld [vmem:[%s6937_s23 + $0x30] sm:$0xff] }
 0x237   : > { %v1761_v51 = vadd.f32 %v1729_v23, %v1568_v35  ;;  %v1923_v23 = vmul.f32 %v7683_v14, %v7379_v50  ;;  %v1082_v13 = vadd.f32 %v1050_v27, %v889_v58  ;;  %v888_v50 = vadd.f32 %v7155_v49, %v853_v38 }
 0x238   : > { %v1731_v37 = vmul.f32 %v7676_v61, %v7464_v16 }
 0x239   : > { %2879 = vperm.xlu0 %6401, %v7686_v62   ;;  %v1954_v35 = vadd.f32 %v1922_v54, %v1761_v51  ;;  %v10894_v54 = vld [vmem:[#allocation65_spill] sm:$0xff] }
 0x23b   : > { %v1606_v18 = vpop.permute.xlu0 %1605  ;;  %2627 = vperm.xlu1 %6395, %v7591_v21   ;;  %v7704_v0 = vpop.permute.xlu1 %1725  ;;  %v7728_v21 = vld [vmem:[%s6937_s23 + $0x58] sm:$0xff]  ;;  %v1986_v51 = vmax.f32 %v1954_v35, 0.0  ;;  %v1536_v35 = vmul.f32 %v7669_v22, %v7290_v8  ;;  %v7756_v8 = vld [vmem:[%s6937_s23 + $0x70] sm:$0xff] }
 0x23c   : > { %10891 = vst [vmem:[#allocation64_spill] sm:$0xff] %v7704_v0  ;;  %v1730_v53 = vmul.f32 %v7676_v61, %v1606_v18  ;;  %2632 = vperm.xlu2 %6393, %v7622_v12   ;;  %v2572_v18 = vld [vmem:[%s6937_s23 + $0x80] sm:$0xff]  ;;  %v7725_v12 = vld [vmem:[%s6937_s23 + $0x50] sm:$0xff] }
 0x23d   : > { %v7713_v40 = vpop.permute.xlu2 %1826 }
 0x23e   : > { %v1762_v0 = vadd.f32 %v1730_v53, %v1569_v9  ;;  %6009 = vmatmul.msk.bf16.gmra.mxu2 %vm2329_vm0, %v1327_v63  ;;  %6025 = vmatmul.msk.bf16.gmra.mxu3 %vm2329_vm0, %v1327_v63  ;;  %v1242_v9 = vmul.f32 %v7159_v31, %v10894_v54  ;;  %v1081_v63 = vadd.f32 %v1049_v39, %v888_v50 }
 0x23f   : > { %v1570_v39 = vadd.f32 %v7691_v60, %v1535_v4  ;;  %v1571_v54 = vadd.f32 %v7691_v60, %v1536_v35 }
 0x240   : > { %v1955_v59 = vadd.f32 %v1923_v23, %v1762_v0  ;;  %v1275_v0 = vadd.f32 %v1243_v52, %v1082_v13  ;;  %v1274_v23 = vadd.f32 %v1242_v9, %v1081_v63  ;;  %v1732_v52 = vmul.f32 %v7676_v61, %v7439_v56  ;;  %v10895_v56 = vld [vmem:[#allocation22_spill] sm:$0xff] }
 0x241   : > { %2883 = vperm.xlu0 %6401, %v2572_v18   ;;  %v1763_v9 = vadd.f32 %v1731_v37, %v1570_v39 }
 0x242   : > { %v1987_v53 = vmax.f32 %v1955_v59, 0.0  ;;  %v7753_v59 = vld [vmem:[%s6937_s23 + $0x68] sm:$0xff]  ;;  %v1307_v50 = vmax.f32 %v1275_v0, 0.0  ;;  %v1306_v16 = vmax.f32 %v1274_v23, 0.0  ;;  %v1764_v63 = vadd.f32 %v1732_v52, %v1571_v54  ;;  %v10896_v23 = vld [vmem:[#allocation16_spill] sm:$0xff] }
 0x243   : > { %2642 = vperm.xlu1 %6395, %v7725_v12   ;;  %v856_v35 = vmul.f32 %v7137_v46, %v10896_v23 }
 0x244   : > { %2647 = vperm.xlu2 %6393, %v7728_v21   ;;  %v1803_v27 = vpop.permute.xlu1 %1802  ;;  %v2018_v38 = vpack.c.bf16 %v1987_v53, %v1986_v51  ;;  %v1925_v51 = vmul.f32 %v7683_v14, %v7642_v25  ;;  %v855_v53 = vmul.f32 %v7137_v46, %v10895_v56  ;;  %v10897_v25 = vld [vmem:[#allocation49_spill] sm:$0xff]  ;;  %v7781_v56 = vld [vmem:[%s6937_s23 + $0x88] sm:$0xff] }
 0x245   : > { %v7737_v58 = vpop.permute.xlu2 %1838  ;;  %v1924_v13 = vmul.f32 %v7683_v14, %v1803_v27  ;;  %v1328_v27 = vpack.c.bf16 %v1307_v50, %v1306_v16  ;;  %v1051_v37 = vmul.f32 %v7157_v33, %v10897_v25  ;;  %v891_v23 = vadd.f32 %v7155_v49, %v856_v35  ;;  %v10900_v25 = vld [vmem:[#allocation66_spill] sm:$0xff] }
 0x246   : > { %5952 = vmatmul.msk.bf16.vlgmr.msra.gmra.mxu0 %vm2082_vm1, %v2018_v38  ;;  %5968 = vmatmul.msk.bf16.vlgmr.msra.gmra.mxu1 %vm2082_vm1, %v2018_v38  ;;  %v1957_v39 = vadd.f32 %v1925_v51, %v1764_v63  ;;  %v890_v52 = vadd.f32 %v7155_v49, %v855_v53  ;;  %v1245_v51 = vmul.f32 %v7159_v31, %v10900_v25 }
 0x247   : > { %v1956_v4 = vadd.f32 %v1924_v13, %v1763_v9  ;;  %v10898_v13 = vld [vmem:[#allocation41_spill] sm:$0xff] }
 0x248   : > { %v1052_v54 = vmul.f32 %v7157_v33, %v10898_v13  ;;  %v10899_v9 = vld [vmem:[#allocation69_spill] sm:$0xff]  ;;  %v1989_v63 = vmax.f32 %v1957_v39, 0.0  ;;  %v1537_v13 = vmul.f32 %v7669_v22, %v7354_v48  ;;  %v1538_v39 = vmul.f32 %v7669_v22, %v7309_v15  ;;  %v7802_v48 = vpop.f32.mrf.mxu3 }
 0x249   : > { %6409 = vset.pattern.permute.xlu0 %v10881_v1  ;;  %v1244_v50 = vmul.f32 %v7159_v31, %v10899_v9  ;;  %v1988_v16 = vmax.f32 %v1956_v4, 0.0  ;;  %v1083_v1 = vadd.f32 %v1051_v37, %v890_v52  ;;  %10902 = vst [vmem:[#allocation21_spill] sm:$0xff] %v7802_v48  ;;  %v7809_v15 = vld [vmem:[%s6937_s23 + $0x98] sm:$0xff] }
 0x24a   : > { %2622 = vperm.xlu0 %6409, %v7746_v5   ;;  %v1084_v53 = vadd.f32 %v1052_v54, %v891_v23  ;;  %v1572_v52 = vadd.f32 %v7691_v60, %v1537_v13  ;;  %v1734_v54 = vmul.f32 %v7676_v61, %v7448_v17  ;;  %v1573_v25 = vadd.f32 %v7691_v60, %v1538_v39  ;;  %v7830_v39 = vld [vmem:[%s10695_s5] ss:$0 sm:$0xff] }
 0x24b   : > { %2657 = vperm.xlu1 %6395, %v7753_v59   ;;  %v2019_v49 = vpack.c.bf16 %v1989_v63, %v1988_v16  ;;  %v1927_v63 = vmul.f32 %v7683_v14, %v7679_v36 }
 0x24c   : > { %2662 = vperm.xlu2 %6393, %v7756_v8   ;;  %v1811_v0 = vpop.permute.xlu1 %1810  ;;  %v1277_v37 = vadd.f32 %v1245_v51, %v1084_v53  ;;  %v1766_v17 = vadd.f32 %v1734_v54, %v1573_v25  ;;  %v1246_v54 = vmul.f32 %v7159_v31, %v7324_v47  ;;  %v1626_v47 = vpop.permute.xlu0 %1625 }
 0x24d   : > { %v7767_v38 = vpop.permute.xlu2 %1850  ;;  %v1926_v9 = vmul.f32 %v7683_v14, %v1811_v0  ;;  %v1053_v0 = vmul.f32 %v7157_v33, %v7615_v10 }
 0x24e   : > { %6010 = vmatmul.msk.bf16.gmra.mxu2 %vm2329_vm0, %v1328_v27  ;;  %6026 = vmatmul.msk.bf16.gmra.mxu3 %vm2329_vm0, %v1328_v27  ;;  %v1276_v27 = vadd.f32 %v1244_v50, %v1083_v1  ;;  %v1733_v1 = vmul.f32 %v7676_v61, %v7473_v42  ;;  %v10903_v50 = vld [vmem:[#allocation32_spill] sm:$0xff]  ;;  %v2576_v42 = vld [vmem:[%s6937_s23 + $0xa0] sm:$0xff]  ;;  %v1309_v23 = vmax.f32 %v1277_v37, 0.0  ;;  %v1959_v10 = vadd.f32 %v1927_v63, %v1766_v17 }
 0x24f   : > { %v857_v16 = vmul.f32 %v7137_v46, %v10903_v50  ;;  %v10904_v37 = vld [vmem:[#allocation24_spill] sm:$0xff]  ;;  %v10908_v63 = vld [vmem:[#allocation70_spill] sm:$0xff] }
 0x250   : > { %v1765_v51 = vadd.f32 %v1733_v1, %v1572_v52  ;;  %v858_v36 = vmul.f32 %v7137_v46, %v10904_v37  ;;  %v10905_v52 = vld [vmem:[#allocation51_spill] sm:$0xff]  ;;  %v7842_v25 = vpop.f32.mrf.mxu3  ;;  %v1247_v17 = vmul.f32 %v7159_v31, %v10908_v63  ;;  %v10909_v37 = vld [vmem:[#allocation42_spill] sm:$0xff] }
 0x251   : > { %v892_v1 = vadd.f32 %v7830_v39, %v857_v16  ;;  %10907 = vst [vmem:[#allocation39_spill] sm:$0xff] %v7842_v25 }
 0x252   : > { %2637 = vperm.xlu0 %6409, %v7314_v45   ;;  %v7796_v45 = vpop.f32.mrf.mxu2  ;;  %v1958_v53 = vadd.f32 %v1926_v9, %v1765_v51  ;;  %v2579_v51 = vld [vmem:[%s6937_s23 + $0xb8] sm:$0xff]  ;;  %v893_v16 = vadd.f32 %v7830_v39, %v858_v36 }
 0x253   : > { %2672 = vperm.xlu1 %6395, %v2572_v18   ;;  %10901 = vst [vmem:[#allocation27_spill] sm:$0xff] %v7796_v45  ;;  %v1308_v18 = vmax.f32 %v1276_v27, 0.0  ;;  %v1085_v50 = vadd.f32 %v1053_v0, %v892_v1  ;;  %v1540_v0 = vmul.f32 %v7669_v22, %v7377_v11 }
 0x254   : > { %2677 = vperm.xlu2 %6393, %v7781_v56   ;;  %v7790_v4 = vpop.permute.xlu1 %1822 }
 0x255   : > { %v7792_v35 = vpop.permute.xlu2 %1862  ;;  %v1329_v13 = vpack.c.bf16 %v1309_v23, %v1308_v18  ;;  %v1054_v18 = vmul.f32 %v7157_v33, %v10905_v52  ;;  %v2578_v23 = vld [vmem:[%s6937_s23 + $0xb0] sm:$0xff]  ;;  %v1539_v52 = vmul.f32 %v7669_v22, %v10909_v37  ;;  %v1735_v37 = vmul.f32 %v7676_v61, %v1626_v47 }
 0x256   : > { %5953 = vmatmul.msk.bf16.gmra.mxu0 %vm2082_vm1, %v2019_v49  ;;  %5969 = vmatmul.msk.bf16.gmra.mxu1 %vm2082_vm1, %v2019_v49 }
 0x257   : > { %v1574_v11 = vadd.f32 %v7691_v60, %v1539_v52  ;;  %v1928_v52 = vmul.f32 %v7683_v14, %v7388_v30  ;;  %v10914_v30 = vld [vmem:[#allocation44_spill] sm:$0xff] }
 0x258   : > { %v7872_v47 = vpop.f32.mrf.mxu3 }
 0x259   : > { %10912 = vst [vmem:[#allocation14_spill] sm:$0xff] %v7872_v47 }
 0x25a   : > { %2652 = vperm.xlu0 %6409, %v7650_v7   ;;  %v7839_v9 = vpop.f32.mrf.mxu2 }
 0x25b   : > { %2687 = vperm.xlu1 %6395, %v7809_v15   ;;  %10906 = vst [vmem:[#allocation46_spill] sm:$0xff] %v7839_v9  ;;  %v1086_v9 = vadd.f32 %v1054_v18, %v893_v16  ;;  %v1575_v18 = vadd.f32 %v7691_v60, %v1540_v0 }
 0x25c   : > { %2692 = vperm.xlu2 %6393, %v2576_v42   ;;  %v7821_v27 = vpop.permute.xlu1 %1834  ;;  %v1990_v42 = vmax.f32 %v1958_v53, 0.0  ;;  %v1278_v53 = vadd.f32 %v1246_v54, %v1085_v50  ;;  %v1929_v50 = vmul.f32 %v7683_v14, %v7790_v4  ;;  %v1056_v4 = vmul.f32 %v7157_v33, %v7634_v29 }
 0x25d   : > { %v7823_v49 = vpop.permute.xlu2 %1874  ;;  %v1055_v29 = vmul.f32 %v7157_v33, %v10914_v30 }
 0x25e   : > { %6011 = vmatmul.msk.bf16.gmra.mxu2 %vm2329_vm0, %v1329_v13  ;;  %6027 = vmatmul.msk.bf16.gmra.mxu3 %vm2329_vm0, %v1329_v13  ;;  %v1991_v13 = vmax.f32 %v1959_v10, 0.0  ;;  %v1279_v10 = vadd.f32 %v1247_v17, %v1086_v9  ;;  %v1310_v54 = vmax.f32 %v1278_v53, 0.0  ;;  %v10910_v9 = vld [vmem:[#allocation34_spill] sm:$0xff] }
 0x260   : > { %v2020_v1 = vpack.c.bf16 %v1991_v13, %v1990_v42  ;;  %v2581_v42 = vld [vmem:[%s6937_s23 + $0xc8] sm:$0xff]  ;;  %v1767_v13 = vadd.f32 %v1735_v37, %v1574_v11 }
 0x262   : > { %2667 = vperm.xlu0 %6409, %v7686_v62   ;;  %v1736_v62 = vmul.f32 %v7676_v61, %v7482_v20  ;;  %v1311_v20 = vmax.f32 %v1279_v10, 0.0  ;;  %v7870_v16 = vpop.f32.mrf.mxu2 }
 0x263   : > { %2702 = vperm.xlu1 %6395, %v2578_v23   ;;  %v2582_v23 = vld [vmem:[%s6937_s23 + $0xd0] sm:$0xff]  ;;  %10911 = vst [vmem:[#allocation30_spill] sm:$0xff] %v7870_v16 }
 0x264   : > { %2707 = vperm.xlu2 %6393, %v2579_v51   ;;  %v7853_v36 = vpop.permute.xlu1 %1846  ;;  %v860_v51 = vmul.f32 %v7137_v46, %v10910_v9  ;;  %v1768_v17 = vadd.f32 %v1736_v62, %v1575_v18  ;;  %v10913_v62 = vld [vmem:[#allocation18_spill] sm:$0xff]  ;;  %v1960_v18 = vadd.f32 %v1928_v52, %v1767_v13  ;;  %v10915_v9 = vld [vmem:[#allocation45_spill] sm:$0xff]  ;;  %v10916_v13 = vld [vmem:[#allocation67_spill] sm:$0xff] }
 0x265   : > { %v7855_v63 = vpop.permute.xlu2 %1886  ;;  %v859_v37 = vmul.f32 %v7137_v46, %v10913_v62  ;;  %v2585_v62 = vld [vmem:[%s6937_s23 + $0xe8] sm:$0xff]  ;;  %v1248_v52 = vmul.f32 %v7159_v31, %v10916_v13 }
 0x266   : > { %5954 = vmatmul.msk.bf16.gmra.mxu0 %vm2082_vm1, %v2020_v1  ;;  %5970 = vmatmul.msk.bf16.gmra.mxu1 %vm2082_vm1, %v2020_v1  ;;  %v1961_v0 = vadd.f32 %v1929_v50, %v1768_v17  ;;  %v1330_v1 = vpack.c.bf16 %v1311_v20, %v1310_v54  ;;  %v895_v11 = vadd.f32 %v7830_v39, %v860_v51  ;;  %v1638_v17 = vpop.permute.xlu0 %1637 }
 0x267   : > { %v1249_v50 = vmul.f32 %v7159_v31, %v7345_v44  ;;  %v1542_v20 = vmul.f32 %v7669_v22, %v10915_v9  ;;  %v894_v51 = vadd.f32 %v7830_v39, %v859_v37  ;;  %v1738_v44 = vmul.f32 %v7676_v61, %v1638_v17  ;;  %v6317_v37 = vld [vmem:[%s10702_s12 + $0xd4] sm:$0xf0] }
 0x268   : > { %v1993_v54 = vmax.f32 %v1961_v0, 0.0  ;;  %v1541_v17 = vmul.f32 %v7669_v22, %v7330_v32  ;;  %v1931_v32 = vmul.f32 %v7683_v14, %v7399_v3  ;;  %v10922_v3 = vld [vmem:[#allocation53_spill] sm:$0xff] }
 0x269   : > { %v1087_v25 = vadd.f32 %v1055_v29, %v894_v51  ;;  %v1577_v29 = vadd.f32 %v7691_v60, %v1542_v20  ;;  %v1737_v20 = vmul.f32 %v7676_v61, %v7457_v41 }
 0x26a   : > { %v7898_v30 = vpop.f32.mrf.mxu2 }
 0x26b   : > { %2717 = vperm.xlu1 %6395, %v2581_v42   ;;  %v1088_v42 = vadd.f32 %v1056_v4, %v895_v11  ;;  %10917 = vst [vmem:[#allocation38_spill] sm:$0xff] %v7898_v30  ;;  %v6090_v11 = vld [vmem:[%s10702_s12 + $0xd0] sm:$0xf]  ;;  %v1280_v9 = vadd.f32 %v1248_v52, %v1087_v25  ;;  %v1770_v13 = vadd.f32 %v1738_v44, %v1577_v29  ;;  %v6515_v29 = vld [vmem:[%s6937_s23] sm:$0xff] }
 0x26c   : > { %2722 = vperm.xlu2 %6393, %v2582_v23   ;;  %v7878_v53 = vpop.permute.xlu1 %1858  ;;  %v2584_v23 = vld [vmem:[%s6937_s23 + $0xe0] sm:$0xff]  ;;  %v1576_v25 = vadd.f32 %v7691_v60, %v1541_v17  ;;  %v1930_v52 = vmul.f32 %v7683_v14, %v7713_v40  ;;  %v1057_v17 = vmul.f32 %v7157_v33, %v10922_v3 }
 0x26d   : > { %v7880_v10 = vpop.permute.xlu2 %1898  ;;  %v1281_v47 = vadd.f32 %v1249_v50, %v1088_v42  ;;  %v7913_v50 = vpop.f32.mrf.mxu3  ;;  %v1963_v41 = vadd.f32 %v1931_v32, %v1770_v13 }
 0x26e   : > { %6012 = vmatmul.msk.bf16.gmra.mxu2 %vm2329_vm0, %v1330_v1  ;;  %6028 = vmatmul.msk.bf16.gmra.mxu3 %vm2329_vm0, %v1330_v1  ;;  %v1992_v1 = vmax.f32 %v1960_v18, 0.0  ;;  %v6316_v18 = vld [vmem:[%s10702_s12 + $0xd4] sm:$0xf]  ;;  %10918 = vst [vmem:[#allocation65_spill] sm:$0xff] %v7913_v50  ;;  %v7961_v30 = vpop.permute.xlu0 %1649 }
 0x26f   : > { %v1313_v51 = vmax.f32 %v1281_v47, 0.0 }
 0x270   : > { %v2021_v0 = vpack.c.bf16 %v1993_v54, %v1992_v1  ;;  %v6091_v54 = vor.u32 %v6317_v37, %v6090_v11  ;;  %v2587_v1 = vld [vmem:[%s6937_s23 + $0xf8] sm:$0xff]  ;;  %v1312_v11 = vmax.f32 %v1280_v9, 0.0 }
 0x272   : > { %3348 = vmatpush.bf16.msrb.mxu2 %v6091_v54  ;;  %v10920_v54 = vmov 1   ;;  %v1331_v44 = vpack.c.bf16 %v1313_v51, %v1312_v11  ;;  %v7942_v40 = vpop.f32.mrf.mxu2 }
 0x273   : > { %2732 = vperm.xlu1 %6395, %v2584_v23   ;;  %v6092_v23 = vld [vmem:[%s10702_s12 + $0xd8] sm:$0xf0]  ;;  %10923 = vst [vmem:[#allocation22_spill] sm:$0xff] %v7942_v40  ;;  %v10984_v40 = vld [vmem:[#allocation75_spill] sm:$0xff] }
 0x274   : > { %2737 = vperm.xlu2 %6393, %v2585_v62   ;;  %v7901_v4 = vpop.permute.xlu1 %1870  ;;  %v6095_v62 = vor.u32 %v6316_v18, %v6092_v23  ;;  %v1769_v18 = vadd.f32 %v1737_v20, %v1576_v25  ;;  %v10921_v23 = vld [vmem:[#allocation20_spill] sm:$0xff]  ;;  %v10926_v25 = vld [vmem:[#allocation71_spill] sm:$0xff] }
 0x275   : > { %v7915_v42 = vpop.permute.xlu2 %1910  ;;  %v862_v9 = vmul.f32 %v7137_v46, %v10921_v23  ;;  %v7948_v13 = vpop.f32.mrf.mxu3  ;;  %v1250_v32 = vmul.f32 %v7159_v31, %v10926_v25 }
 0x276   : > { %5955 = vmatmul.msk.bf16.gmra.mxu0 %vm2082_vm1, %v2021_v0  ;;  %5971 = vmatmul.msk.bf16.gmra.mxu1 %vm2082_vm1, %v2021_v0  ;;  %v10919_v0 = vld [vmem:[#allocation26_spill] sm:$0xff]  ;;  %10924 = vst [vmem:[#allocation16_spill] sm:$0xff] %v7948_v13 }
 0x277   : > { %3437 = vmatpush.bf16.msrb.mxu3 %v6095_v62  ;;  %v861_v37 = vmul.f32 %v7137_v46, %v10919_v0  ;;  %v1962_v62 = vadd.f32 %v1930_v52, %v1769_v18  ;;  %v1995_v0 = vmax.f32 %v1963_v41, 0.0  ;;  %v10927_v18 = vld [vmem:[#allocation68_spill] sm:$0xff] }
 0x278   : > { %v1251_v23 = vmul.f32 %v7159_v31, %v10927_v18 }
 0x279   : > { %v896_v51 = vadd.f32 %v7830_v39, %v861_v37  ;;  %v1543_v37 = vmul.f32 %v7669_v22, %v7386_v28 }
 0x27b   : > { %2747 = vperm.xlu1 %6395, %v2587_v1   ;;  %v10925_v1 = vld [vmem:[#allocation47_spill] sm:$0xff]  ;;  %v1089_v52 = vadd.f32 %v1057_v17, %v896_v51  ;;  %v10928_v17 = vld [vmem:[#allocation73_spill] sm:$0xff]  ;;  %v1739_v51 = vmul.f32 %v7676_v61, %v7498_v2  ;;  %v1578_v25 = vadd.f32 %v7691_v60, %v1543_v37 }
 0x27c   : > { %6396 = vset.pattern.permute.xlu2 %v10920_v54  ;;  %v7935_v47 = vpop.permute.xlu1 %1882  ;;  %v1058_v11 = vmul.f32 %v7157_v33, %v10925_v1 }
 0x27d   : > { %2819 = vperm.xlu2 %6396, %v6515_v29   ;;  %v897_v29 = vadd.f32 %v7830_v39, %v862_v9  ;;  %v1282_v50 = vadd.f32 %v1250_v32, %v1089_v52  ;;  %v1740_v32 = vmul.f32 %v7676_v61, %v7466_v24  ;;  %v10930_v52 = vld [vmem:[#allocation36_spill] sm:$0xff]  ;;  %v7984_v18 = vpop.f32.mrf.mxu3  ;;  %v1059_v24 = vmul.f32 %v7157_v33, %v7671_v6 }
 0x27e   : > { %6013 = vmatmul.msk.bf16.gmra.mxu2 %vm2329_vm0, %v1331_v44  ;;  %6029 = vmatmul.msk.bf16.gmra.mxu3 %vm2329_vm0, %v1331_v44  ;;  %v7946_v20 = vpop.permute.xlu2 %2592  ;;  %v1994_v44 = vmax.f32 %v1962_v62, 0.0  ;;  %v1544_v62 = vmul.f32 %v7669_v22, %v10928_v17  ;;  %v863_v2 = vmul.f32 %v7137_v46, %v10930_v52  ;;  %10931 = vst [vmem:[#allocation41_spill] sm:$0xff] %v7984_v18  ;;  %v10932_v52 = vld [vmem:[#allocation29_spill] sm:$0xff] }
 0x27f   : > { %v1090_v3 = vadd.f32 %v1058_v11, %v897_v29  ;;  %v1314_v11 = vmax.f32 %v1282_v50, 0.0  ;;  %v1932_v29 = vmul.f32 %v7683_v14, %v7821_v27  ;;  %v1933_v50 = vmul.f32 %v7683_v14, %v7737_v58  ;;  %v10933_v58 = vld [vmem:[#allocation55_spill] sm:$0xff] }
 0x280   : > { %v2022_v41 = vpack.c.bf16 %v1995_v0, %v1994_v44  ;;  %v7978_v0 = vpop.f32.mrf.mxu2  ;;  %v1579_v44 = vadd.f32 %v7691_v60, %v1544_v62  ;;  %v864_v18 = vmul.f32 %v7137_v46, %v10932_v52 }
 0x281   : > { %v1283_v9 = vadd.f32 %v1251_v23, %v1090_v3  ;;  %10929 = vst [vmem:[#allocation49_spill] sm:$0xff] %v7978_v0  ;;  %v1771_v3 = vadd.f32 %v1739_v51, %v1578_v25  ;;  %v7998_v51 = vpop.permute.xlu0 %1661  ;;  %v10934_v25 = vld [vmem:[#allocation74_spill] sm:$0xff]  ;;  %v6517_v0 = vld [vmem:[%s6937_s23 + $0x48] sm:$0xff] }
 0x283   : > { %6397 = vset.pattern.permute.xlu1 %v10920_v54  ;;  %v1315_v23 = vmax.f32 %v1283_v9, 0.0  ;;  %v1964_v17 = vadd.f32 %v1932_v29, %v1771_v3  ;;  %v898_v9 = vadd.f32 %v7830_v39, %v863_v2  ;;  %v6082_v2 = vld [vmem:[%s10702_s12 + $0xc0] sm:$0xf]  ;;  %v10935_v3 = vld [vmem:[#allocation72_spill] sm:$0xff] }
 0x284   : > { %2827 = vperm.xlu1 %6397, %v7625_v26   ;;  %v7964_v1 = vpop.permute.xlu1 %1894 }
 0x285   : > { %2831 = vperm.xlu2 %6396, %v7629_v43   ;;  %v1332_v37 = vpack.c.bf16 %v1315_v23, %v1314_v11  ;;  %v1060_v11 = vmul.f32 %v7157_v33, %v10933_v58  ;;  %v1091_v46 = vadd.f32 %v1059_v24, %v898_v9  ;;  %v1996_v29 = vmax.f32 %v1964_v17, 0.0  ;;  %v10937_v24 = vld [vmem:[#allocation48_spill] sm:$0xff]  ;;  %v8027_v9 = vpop.f32.mrf.mxu3 }
 0x286   : > { %5956 = vmatmul.msk.bf16.gmra.mxu0 %vm2082_vm1, %v2022_v41  ;;  %5972 = vmatmul.msk.bf16.gmra.mxu1 %vm2082_vm1, %v2022_v41  ;;  %v7973_v28 = vpop.permute.xlu2 %2607  ;;  %v1772_v41 = vadd.f32 %v1740_v32, %v1579_v44  ;;  %v1252_v32 = vmul.f32 %v7159_v31, %v10934_v25  ;;  %v899_v23 = vadd.f32 %v7830_v39, %v864_v18  ;;  %v6315_v44 = vld [vmem:[%s10702_s12 + $0xc4] sm:$0xf0]  ;;  %v6314_v39 = vld [vmem:[%s10702_s12 + $0xc4] sm:$0xf]  ;;  %v6084_v18 = vld [vmem:[%s10702_s12 + $0xc8] sm:$0xf0] }
 0x287   : > { %v1545_v17 = vmul.f32 %v7669_v22, %v10937_v24  ;;  %10938 = vst [vmem:[#allocation66_spill] sm:$0xff] %v8027_v9  ;;  %v1546_v58 = vmul.f32 %v7669_v22, %v7397_v55 }
 0x288   : > { %v1965_v62 = vadd.f32 %v1933_v50, %v1772_v41  ;;  %v1253_v50 = vmul.f32 %v7159_v31, %v10935_v3  ;;  %v6083_v41 = vor.u32 %v6315_v44, %v6082_v2  ;;  %v1092_v52 = vadd.f32 %v1060_v11, %v899_v23  ;;  %v6516_v44 = vld [vmem:[%s6937_s23 + $0x8] sm:$0xff] }
 0x289   : > { %v6087_v31 = vor.u32 %v6314_v39, %v6084_v18  ;;  %v10939_v11 = vld [vmem:[#allocation23_spill] sm:$0xff]  ;;  %v1741_v39 = vmul.f32 %v7676_v61, %v7961_v30 }
 0x28a   : > { %v1997_v33 = vmax.f32 %v1965_v62, 0.0  ;;  %v1284_v62 = vadd.f32 %v1252_v32, %v1091_v46  ;;  %3349 = vmatpush.bf16.msrb.mxu2 %v6083_v41  ;;  %v1285_v3 = vadd.f32 %v1253_v50, %v1092_v52  ;;  %v1742_v23 = vmul.f32 %v7676_v61, %v10939_v11  ;;  %v8051_v41 = vld [vmem:[%s6937_s23 + $0x90] sm:$0xff]  ;;  %v10940_v52 = vld [vmem:[#allocation61_spill] sm:$0xff] }
 0x28b   : > { %3438 = vmatpush.bf16.msrb.mxu3 %v6087_v31  ;;  %v1580_v32 = vadd.f32 %v7691_v60, %v1545_v17  ;;  %v1581_v46 = vadd.f32 %v7691_v60, %v1546_v58  ;;  %v1935_v50 = vmul.f32 %v7683_v14, %v7853_v36  ;;  %2682 = vperm.xlu0 %6409, %v8051_v41  }
 0x28c   : > { %2835 = vperm.xlu1 %6397, %v7660_v57   ;;  %v7992_v27 = vpop.permute.xlu1 %1906  ;;  %v2023_v2 = vpack.c.bf16 %v1997_v33, %v1996_v29  ;;  %v1316_v29 = vmax.f32 %v1284_v62, 0.0  ;;  %v8046_v33 = vpop.permute.xlu0 %1673  ;;  %v1317_v30 = vmax.f32 %v1285_v3, 0.0  ;;  %v1934_v31 = vmul.f32 %v7683_v14, %v10940_v52 }
 0x28d   : > { %2839 = vperm.xlu2 %6396, %v7663_v19   ;;  %v1774_v18 = vadd.f32 %v1742_v23, %v1581_v46  ;;  %v1773_v24 = vadd.f32 %v1741_v39, %v1580_v32  ;;  %v8058_v62 = vpop.f32.mrf.mxu3  ;;  %v10943_v23 = vld [vmem:[#allocation50_spill] sm:$0xff] }
 0x28e   : > { %6014 = vmatmul.msk.bf16.gmra.mxu2 %vm2329_vm0, %v1332_v37  ;;  %6030 = vmatmul.msk.bf16.gmra.mxu3 %vm2329_vm0, %v1332_v37  ;;  %v8002_v6 = vpop.permute.xlu2 %2617  ;;  %v8017_v37 = vpop.f32.mrf.mxu2  ;;  %v1333_v58 = vpack.c.bf16 %v1317_v30, %v1316_v29  ;;  %10942 = vst [vmem:[#allocation24_spill] sm:$0xff] %v8058_v62  ;;  %v1548_v39 = vmul.f32 %v7669_v22, %v10943_v23  ;;  %v2580_v62 = vld [vmem:[%s6937_s23 + $0xc0] sm:$0xff] }
 0x28f   : > { %10936 = vst [vmem:[#allocation69_spill] sm:$0xff] %v8017_v37  ;;  %v1967_v17 = vadd.f32 %v1935_v50, %v1774_v18  ;;  %v8076_v50 = vld [vmem:[%s6937_s23 + $0xa8] sm:$0xff]  ;;  %v10944_v18 = vld [vmem:[#allocation8_spill] sm:$0xff] }
 0x291   : > { %v1999_v11 = vmax.f32 %v1967_v17, 0.0 }
 0x293   : > { %2697 = vperm.xlu0 %6409, %v8076_v50  }
 0x294   : > { %6398 = vset.pattern.permute.xlu1 %v10842_v34  ;;  %v8032_v25 = vpop.permute.xlu1 %1918  ;;  %v8071_v32 = vpop.permute.xlu0 %1685 }
 0x295   : > { %2843 = vperm.xlu2 %6396, %v7746_v5   ;;  %3016 = vperm.xlu1 %6398, %v6516_v44   ;;  %v1966_v44 = vadd.f32 %v1934_v31, %v1773_v24  ;;  %v1547_v24 = vmul.f32 %v7669_v22, %v10944_v18  ;;  %v8091_v31 = vpop.f32.mrf.mxu3 }
 0x296   : > { %5957 = vmatmul.msk.bf16.gmra.mxu0 %vm2082_vm1, %v2023_v2  ;;  %5973 = vmatmul.msk.bf16.gmra.mxu1 %vm2082_vm1, %v2023_v2  ;;  %v8042_v55 = vpop.permute.xlu2 %2632  ;;  %v8056_v2 = vpop.f32.mrf.mxu2  ;;  %10946 = vst [vmem:[#allocation70_spill] sm:$0xff] %v8091_v31 }
 0x297   : > { %10941 = vst [vmem:[#allocation32_spill] sm:$0xff] %v8056_v2  ;;  %v1998_v46 = vmax.f32 %v1966_v44, 0.0  ;;  %v1582_v44 = vadd.f32 %v7691_v60, %v1547_v24 }
 0x299   : > { %v2024_v29 = vpack.c.bf16 %v1999_v11, %v1998_v46  ;;  %v10948_v11 = vld [vmem:[#allocation4_spill] sm:$0xff] }
 0x29a   : > { %v1937_v23 = vmul.f32 %v7683_v14, %v10948_v11 }
 0x29b   : > { %2712 = vperm.xlu0 %6409, %v2580_v62   ;;  %v6313_v62 = vld [vmem:[%s10702_s12 + $0xb4] sm:$0xf0] }
 0x29c   : > { %v8101_v18 = vpop.permute.xlu0 %1697 }
 0x29d   : > { %6399 = vset.pattern.permute.xlu2 %v10842_v34  ;;  %3020 = vperm.xlu1 %6398, %v7625_v26   ;;  %v8062_v36 = vpop.permute.xlu1 %2602  ;;  %v1744_v26 = vmul.f32 %v7676_v61, %v7998_v51  ;;  %v8112_v2 = vpop.f32.mrf.mxu3 }
 0x29e   : > { %6015 = vmatmul.msk.bf16.gmra.mxu2 %vm2329_vm0, %v1333_v58  ;;  %6031 = vmatmul.msk.bf16.gmra.mxu3 %vm2329_vm0, %v1333_v58  ;;  %v8066_v3 = vpop.permute.xlu2 %2647  ;;  %v8085_v52 = vpop.f32.mrf.mxu2  ;;  %10952 = vst [vmem:[#allocation18_spill] sm:$0xff] %v8112_v2 }
 0x29f   : > { %3024 = vperm.xlu2 %6399, %v7629_v43   ;;  %v1583_v43 = vadd.f32 %v7691_v60, %v1548_v39  ;;  %10945 = vst [vmem:[#allocation51_spill] sm:$0xff] %v8085_v52  ;;  %v1936_v39 = vmul.f32 %v7683_v14, %v7767_v38  ;;  %v1938_v52 = vmul.f32 %v7683_v14, %v7878_v53 }
 0x2a1   : > { %v1776_v58 = vadd.f32 %v1744_v26, %v1583_v43  ;;  %v10950_v43 = vld [vmem:[#allocation28_spill] sm:$0xff] }
 0x2a5   : > { %3028 = vperm.xlu1 %6398, %v7660_v57   ;;  %v8079_v30 = vpop.permute.xlu1 %2612  ;;  %v10947_v57 = vld [vmem:[#allocation79_spill] sm:$0xff] }
 0x2a6   : > { %5958 = vmatmul.msk.bf16.gmra.mxu0 %vm2082_vm1, %v2024_v29  ;;  %5974 = vmatmul.msk.bf16.gmra.mxu1 %vm2082_vm1, %v2024_v29  ;;  %v8089_v51 = vpop.permute.xlu2 %2662  ;;  %v1743_v17 = vmul.f32 %v7676_v61, %v10947_v57  ;;  %v1969_v29 = vadd.f32 %v1937_v23, %v1776_v58  ;;  %v8110_v24 = vpop.f32.mrf.mxu2  ;;  %v6312_v23 = vld [vmem:[%s10702_s12 + $0xb4] sm:$0xf] }
 0x2a7   : > { %3032 = vperm.xlu2 %6399, %v7663_v19   ;;  %10951 = vst [vmem:[#allocation34_spill] sm:$0xff] %v8110_v24 }
 0x2a8   : > { %v1775_v46 = vadd.f32 %v1743_v17, %v1582_v44  ;;  %v2001_v11 = vmax.f32 %v1969_v29, 0.0  ;;  %v10953_v17 = vld [vmem:[#allocation2_spill] sm:$0xff]  ;;  %v6076_v29 = vld [vmem:[%s10702_s12 + $0xb8] sm:$0xf0] }
 0x2a9   : > { %v1549_v58 = vmul.f32 %v7669_v22, %v10953_v17  ;;  %v8135_v17 = vpop.permute.xlu0 %1709  ;;  %v6079_v24 = vor.u32 %v6312_v23, %v6076_v29 }
 0x2aa   : > { %v1968_v57 = vadd.f32 %v1936_v39, %v1775_v46 }
 0x2ab   : > { %v1584_v31 = vadd.f32 %v7691_v60, %v1549_v58  ;;  %3439 = vmatpush.bf16.msrb.mxu3 %v6079_v24  ;;  %v8154_v58 = vpop.f32.mrf.mxu3  ;;  %v2586_v24 = vld [vmem:[%s6937_s23 + $0xf0] sm:$0xff] }
 0x2ac   : > { %v2000_v38 = vmax.f32 %v1968_v57, 0.0  ;;  %v10954_v57 = vld [vmem:[#allocation37_spill] sm:$0xff]  ;;  %10960 = vst [vmem:[#allocation67_spill] sm:$0xff] %v8154_v58 }
 0x2ad   : > { %3036 = vperm.xlu1 %6398, %v7746_v5   ;;  %v8105_v19 = vpop.permute.xlu1 %2627  ;;  %v6074_v5 = vld [vmem:[%s10702_s12 + $0xb0] sm:$0xf] }
 0x2ae   : > { %v8107_v26 = vpop.permute.xlu2 %2677  ;;  %v2025_v44 = vpack.c.bf16 %v2001_v11, %v2000_v38  ;;  %v6075_v46 = vor.u32 %v6313_v62, %v6074_v5  ;;  %v10955_v11 = vld [vmem:[#allocation25_spill] sm:$0xff]  ;;  %v10957_v62 = vld [vmem:[#allocation12_spill] sm:$0xff]  ;;  %v8150_v29 = vpop.f32.mrf.mxu2 }
 0x2af   : > { %10949 = vst [vmem:[#allocation42_spill] sm:$0xff] %v8107_v26  ;;  %3040 = vperm.xlu2 %6399, %v10950_v43   ;;  %v1550_v43 = vmul.f32 %v7669_v22, %v10954_v57  ;;  %v1745_v38 = vmul.f32 %v7676_v61, %v10955_v11  ;;  %v2583_v5 = vld [vmem:[%s6937_s23 + $0xd8] sm:$0xff] }
 0x2b0   : > { %v10958_v57 = vld [vmem:[#allocation81_spill] sm:$0xff]  ;;  %3350 = vmatpush.bf16.msrb.mxu2 %v6075_v46  ;;  %2727 = vperm.xlu0 %6409, %v2583_v5   ;;  %10959 = vst [vmem:[#allocation45_spill] sm:$0xff] %v8150_v29 }
 0x2b1   : > { %v1746_v11 = vmul.f32 %v7676_v61, %v10958_v57  ;;  %v1777_v23 = vadd.f32 %v1745_v38, %v1584_v31  ;;  %v8163_v46 = vpop.permute.xlu0 %1721  ;;  %v10963_v38 = vld [vmem:[#allocation3_spill] sm:$0xff] }
 0x2b2   : > { %v1552_v5 = vmul.f32 %v7669_v22, %v10963_v38  ;;  %v1941_v38 = vmul.f32 %v7683_v14, %v7901_v4 }
 0x2b3   : > { %v1970_v9 = vadd.f32 %v1938_v52, %v1777_v23  ;;  %v10962_v52 = vld [vmem:[#allocation52_spill] sm:$0xff] }
 0x2b5   : > { %6400 = vset.pattern.permute.xlu1 %v10920_v54  ;;  %v8126_v39 = vpop.permute.xlu1 %2642  ;;  %v2002_v31 = vmax.f32 %v1970_v9, 0.0 }
 0x2b6   : > { %5959 = vmatmul.msk.bf16.gmra.mxu0 %vm2082_vm1, %v2025_v44  ;;  %5975 = vmatmul.msk.bf16.gmra.mxu1 %vm2082_vm1, %v2025_v44  ;;  %v8139_v2 = vpop.permute.xlu2 %2692  ;;  %v1585_v44 = vadd.f32 %v7691_v60, %v1550_v43  ;;  %v1551_v43 = vmul.f32 %v7669_v22, %v10962_v52  ;;  %v8191_v52 = vld [vmem:[%s8170_s21] sm:$0xff] }
 0x2b7   : > { %10956 = vst [vmem:[#allocation44_spill] sm:$0xff] %v8139_v2  ;;  %3044 = vperm.xlu2 %6399, %v10957_v62   ;;  %2855 = vperm.xlu1 %6400, %v6517_v0   ;;  %v1939_v0 = vmul.f32 %v7683_v14, %v7792_v35 }
 0x2b8   : > { %v1778_v62 = vadd.f32 %v1746_v11, %v1585_v44  ;;  %2742 = vperm.xlu0 %6409, %v2586_v24   ;;  %v8176_v11 = vpop.f32.mrf.mxu2  ;;  %v8178_v44 = vpop.f32.mrf.mxu3 }
 0x2b9   : > { %10964 = vst [vmem:[#allocation20_spill] sm:$0xff] %v8176_v11 }
 0x2ba   : > { %v1971_v37 = vadd.f32 %v1939_v0, %v1778_v62  ;;  %10965 = vst [vmem:[#allocation53_spill] sm:$0xff] %v8178_v44  ;;  %v1747_v62 = vmul.f32 %v7676_v61, %v8046_v33 }
 0x2bc   : > { %v2003_v35 = vmax.f32 %v1971_v37, 0.0  ;;  %v10967_v37 = vld [vmem:[#allocation33_spill] sm:$0xff] }
 0x2bd   : > { %v8156_v57 = vpop.permute.xlu1 %2657  ;;  %v1748_v0 = vmul.f32 %v7676_v61, %v10967_v37 }
 0x2be   : > { %v8158_v53 = vpop.permute.xlu2 %2707  ;;  %v2026_v9 = vpack.c.bf16 %v2003_v35, %v2002_v31  ;;  %v1586_v31 = vadd.f32 %v7691_v60, %v1551_v43  ;;  %v1587_v35 = vadd.f32 %v7691_v60, %v1552_v5  ;;  %v8206_v43 = vpop.permute.xlu0 %2823  ;;  %v10971_v5 = vld [vmem:[#allocation7_spill] sm:$0xff] }
 0x2bf   : > { %10961 = vst [vmem:[#allocation26_spill] sm:$0xff] %v8158_v53  ;;  %6402 = vset.pattern.permute.xlu2 %v10920_v54  ;;  %2859 = vperm.xlu1 %6400, %v7725_v12   ;;  %v1940_v11 = vmul.f32 %v7683_v14, %v10971_v5  ;;  %v6311_v5 = vld [vmem:[%s10702_s12 + $0xa4] sm:$0xf0]  ;;  %v1945_v53 = vmul.f32 %v7683_v14, %v7855_v63  ;;  %v6034_v63 = vld [vmem:[%s10702_s12 + $0x60] sm:$0xf] }
 0x2c0   : > { %2863 = vperm.xlu2 %6402, %v7728_v21   ;;  %3626 = vperm.xlu0 %6409, %v8191_v52   ;;  %v1779_v44 = vadd.f32 %v1747_v62, %v1586_v31  ;;  %v8212_v58 = vpop.f32.mrf.mxu3 }
 0x2c1   : > { %10973 = vst [vmem:[#allocation29_spill] sm:$0xff] %v8212_v58 }
 0x2c3   : > { %v8198_v37 = vpop.f32.mrf.mxu0  ;;  %v8202_v33 = vpop.f32.mrf.mxu1 }
 0x2c4   : > { %10969 = vst [vmem:[#allocation68_spill] sm:$0xff] %v8198_v37 }
 0x2c5   : > { %v8180_v23 = vpop.permute.xlu1 %2672  ;;  %10970 = vst [vmem:[#allocation73_spill] sm:$0xff] %v8202_v33 }
 0x2c6   : > { %10966 = vst [vmem:[#allocation47_spill] sm:$0xff] %v8180_v23  ;;  %5960 = vmatmul.msk.bf16.gmra.mxu0 %vm2082_vm1, %v2026_v9  ;;  %5976 = vmatmul.msk.bf16.gmra.mxu1 %vm2082_vm1, %v2026_v9  ;;  %v8188_v24 = vpop.permute.xlu2 %2722  ;;  %v1780_v9 = vadd.f32 %v1748_v0, %v1587_v35  ;;  %v10976_v0 = vld [vmem:[#allocation54_spill] sm:$0xff]  ;;  %v8500_v23 = vld [vmem:[%s8170_s21 + $0x10] sm:$0xff] }
 0x2c7   : > { %10968 = vst [vmem:[#allocation71_spill] sm:$0xff] %v8188_v24  ;;  %6403 = vset.pattern.permute.xlu1 %v10842_v34  ;;  %v8210_v24 = vpop.f32.mrf.mxu2  ;;  %v1554_v62 = vmul.f32 %v7669_v22, %v10976_v0 }
 0x2c8   : > { %6404 = vset.pattern.permute.xlu2 %v10842_v34  ;;  %3052 = vperm.xlu1 %6403, %v7725_v12   ;;  %v1973_v4 = vadd.f32 %v1941_v38, %v1780_v9  ;;  %10972 = vst [vmem:[#allocation36_spill] sm:$0xff] %v8210_v24  ;;  %v1972_v12 = vadd.f32 %v1940_v11, %v1779_v44  ;;  %v8231_v38 = vpop.permute.xlu0 %2847  ;;  %v8254_v24 = vpop.f32.mrf.mxu3 }
 0x2c9   : > { %3056 = vperm.xlu2 %6404, %v7728_v21   ;;  %6414 = vset.pattern.permute.xlu0 %v10842_v34  ;;  %v1750_v11 = vmul.f32 %v7676_v61, %v8071_v32  ;;  %v1589_v32 = vadd.f32 %v7691_v60, %v1554_v62  ;;  %10982 = vst [vmem:[#allocation50_spill] sm:$0xff] %v8254_v24  ;;  %v6518_v24 = vld [vmem:[%s6937_s23 + $0x78] sm:$0xff] }
 0x2ca   : > { %v2005_v21 = vmax.f32 %v1973_v4, 0.0  ;;  %v2004_v31 = vmax.f32 %v1972_v12, 0.0  ;;  %3080 = vperm.xlu0 %6414, %v7781_v56   ;;  %v6310_v4 = vld [vmem:[%s10702_s12 + $0xa4] sm:$0xf] }
 0x2cb   : > { %v8223_v35 = vpop.f32.mrf.mxu0  ;;  %v8228_v44 = vpop.f32.mrf.mxu1  ;;  %v1782_v58 = vadd.f32 %v1750_v11, %v1589_v32  ;;  %v1942_v11 = vmul.f32 %v7683_v14, %v7823_v49 }
 0x2cc   : > { %10977 = vst [vmem:[#allocation72_spill] sm:$0xff] %v8223_v35  ;;  %v2027_v9 = vpack.c.bf16 %v2005_v21, %v2004_v31  ;;  %v6068_v21 = vld [vmem:[%s10702_s12 + $0xa8] sm:$0xf0] }
 0x2cd   : > { %v8214_v29 = vpop.permute.xlu1 %2687  ;;  %10978 = vst [vmem:[#allocation48_spill] sm:$0xff] %v8228_v44  ;;  %v10980_v31 = vld [vmem:[#allocation31_spill] sm:$0xff]  ;;  %v6071_v35 = vor.u32 %v6310_v4, %v6068_v21 }
 0x2ce   : > { %10974 = vst [vmem:[#allocation55_spill] sm:$0xff] %v8214_v29  ;;  %v8216_v13 = vpop.permute.xlu2 %2737  ;;  %v1553_v44 = vmul.f32 %v7669_v22, %v10980_v31  ;;  %v1943_v31 = vmul.f32 %v7683_v14, %v10984_v40  ;;  %v11017_v29 = vmov 0  }
 0x2cf   : > { %10975 = vst [vmem:[#allocation74_spill] sm:$0xff] %v8216_v13  ;;  %v8250_v13 = vpop.f32.mrf.mxu2  ;;  %3440 = vmatpush.bf16.msrb.mxu3 %v6071_v35 }
 0x2d0   : > { %6405 = vset.pattern.permute.xlu1 %v10920_v54  ;;  %10981 = vst [vmem:[#allocation61_spill] sm:$0xff] %v8250_v13  ;;  %v1975_v4 = vadd.f32 %v1943_v31, %v1782_v58  ;;  %v6309_v58 = vld [vmem:[%s10702_s12 + $0x94] sm:$0xf0]  ;;  %v8290_v31 = vpop.f32.mrf.mxu3  ;;  %v10990_v13 = vld [vmem:[#allocation6_spill] sm:$0xff] }
 0x2d1   : > { %3060 = vperm.xlu2 %6404, %v7650_v7   ;;  %2871 = vperm.xlu1 %6405, %v7753_v59   ;;  %v6066_v7 = vld [vmem:[%s10702_s12 + $0xa0] sm:$0xf]  ;;  %10989 = vst [vmem:[#allocation2_spill] sm:$0xff] %v8290_v31 }
 0x2d2   : > { %v6067_v0 = vor.u32 %v6311_v5, %v6066_v7  ;;  %v10983_v7 = vld [vmem:[#allocation17_spill] sm:$0xff] }
 0x2d3   : > { %v1749_v5 = vmul.f32 %v7676_v61, %v10983_v7  ;;  %v8271_v35 = vpop.f32.mrf.mxu1  ;;  %v8275_v7 = vpop.permute.xlu0 %2851 }
 0x2d4   : > { %3351 = vmatpush.bf16.msrb.mxu2 %v6067_v0  ;;  %v8269_v0 = vpop.f32.mrf.mxu0  ;;  %10986 = vst [vmem:[#allocation79_spill] sm:$0xff] %v8271_v35 }
 0x2d5   : > { %v8243_v12 = vpop.permute.xlu1 %2702  ;;  %10985 = vst [vmem:[#allocation8_spill] sm:$0xff] %v8269_v0  ;;  %v6520_v0 = vld [vmem:[%s6937_s23 + $0x80] sm:$0xff] }
 0x2d6   : > { %10979 = vst [vmem:[#allocation23_spill] sm:$0xff] %v8243_v12  ;;  %5961 = vmatmul.msk.bf16.gmra.mxu0 %vm2082_vm1, %v2027_v9  ;;  %5977 = vmatmul.msk.bf16.gmra.mxu1 %vm2082_vm1, %v2027_v9  ;;  %v1588_v9 = vadd.f32 %v7691_v60, %v1553_v44  ;;  %v2007_v60 = vmax.f32 %v1975_v4, 0.0 }
 0x2d7   : > { %v8256_v62 = vpop.permute.xlu2 %2819  ;;  %v8279_v49 = vpop.f32.mrf.mxu2 }
 0x2d8   : > { %v1781_v32 = vadd.f32 %v1749_v5, %v1588_v9  ;;  %10988 = vst [vmem:[#allocation28_spill] sm:$0xff] %v8279_v49  ;;  %v6308_v5 = vld [vmem:[%s10702_s12 + $0x94] sm:$0xf]  ;;  %v1555_v49 = vmul.f32 %v7669_v22, %v10990_v13  ;;  %v6052_v13 = vld [vmem:[%s10702_s12 + $0x88] sm:$0xf0]  ;;  %v8360_v16 = vpop.f32.mrf.mxu3 }
 0x2d9   : > { %6407 = vset.pattern.permute.xlu2 %v10920_v54  ;;  %6406 = vset.pattern.permute.xlu1 %v10842_v34  ;;  %10998 = vst [vmem:[#allocation52_spill] sm:$0xff] %v8360_v16  ;;  %v1753_v16 = vmul.f32 %v7676_v61, %v8101_v18 }
 0x2da   : > { %2875 = vperm.xlu2 %6407, %v7756_v8   ;;  %3064 = vperm.xlu1 %6406, %v7753_v59   ;;  %v1974_v21 = vadd.f32 %v1942_v11, %v1781_v32  ;;  %v6058_v59 = vld [vmem:[%s10702_s12 + $0x90] sm:$0xf]  ;;  %v6060_v11 = vld [vmem:[%s10702_s12 + $0x98] sm:$0xf0] }
 0x2db   : > { %v6059_v9 = vor.u32 %v6309_v58, %v6058_v59  ;;  %v6063_v32 = vor.u32 %v6308_v5, %v6060_v11  ;;  %v6050_v59 = vld [vmem:[%s10702_s12 + $0x80] sm:$0xf] }
 0x2dc   : > { %v2006_v4 = vmax.f32 %v1974_v21, 0.0  ;;  %v6307_v21 = vld [vmem:[%s10702_s12 + $0x84] sm:$0xf0] }
 0x2dd   : > { %v8273_v40 = vpop.permute.xlu1 %2717  ;;  %3352 = vmatpush.bf16.msrb.mxu2 %v6059_v9  ;;  %3441 = vmatpush.bf16.msrb.mxu3 %v6063_v32  ;;  %v6051_v58 = vor.u32 %v6307_v21, %v6050_v59  ;;  %v10993_v9 = vld [vmem:[#allocation19_spill] sm:$0xff]  ;;  %v8320_v32 = vpop.f32.mrf.mxu0 }
 0x2de   : > { %10987 = vst [vmem:[#allocation4_spill] sm:$0xff] %v8273_v40  ;;  %v2028_v40 = vpack.c.bf16 %v2007_v60, %v2006_v4  ;;  %v10992_v60 = vld [vmem:[#allocation58_spill] sm:$0xff]  ;;  %v1751_v11 = vmul.f32 %v7676_v61, %v10993_v9  ;;  %v8318_v4 = vpop.permute.xlu0 %2867  ;;  %v8327_v21 = vpop.f32.mrf.mxu1 }
 0x2df   : > { %v8277_v44 = vpop.permute.xlu2 %2831  ;;  %v1556_v5 = vmul.f32 %v7669_v22, %v10992_v60  ;;  %10994 = vst [vmem:[#allocation25_spill] sm:$0xff] %v8320_v32  ;;  %v8335_v60 = vld [vmem:[%s10697_s7] ss:$0 sm:$0xff]  ;;  %v10996_v32 = vld [vmem:[#allocation40_spill] sm:$0xff]  ;;  %v8357_v12 = vpop.f32.mrf.mxu2 }
 0x2e0   : > { %10995 = vst [vmem:[#allocation12_spill] sm:$0xff] %v8327_v21  ;;  %v1590_v9 = vadd.f32 %v8335_v60, %v1555_v49  ;;  %v6304_v49 = vld [vmem:[%s10702_s12 + $0x74] sm:$0xf] }
 0x2e1   : > { %3353 = vmatpush.bf16.msrb.mxu2 %v6051_v58  ;;  %v6042_v58 = vld [vmem:[%s10702_s12 + $0x70] sm:$0xf]  ;;  %10997 = vst [vmem:[#allocation81_spill] sm:$0xff] %v8357_v12 }
 0x2e2   : > { %6408 = vset.pattern.permute.xlu2 %v10842_v34  ;;  %3068 = vperm.xlu1 %6406, %v7756_v8   ;;  %v6306_v8 = vld [vmem:[%s10702_s12 + $0x84] sm:$0xf] }
 0x2e3   : > { %3072 = vperm.xlu2 %6408, %v6518_v24   ;;  %v6055_v59 = vor.u32 %v6306_v8, %v6052_v13  ;;  %v1944_v8 = vmul.f32 %v7683_v14, %v7935_v47  ;;  %v6305_v13 = vld [vmem:[%s10702_s12 + $0x74] sm:$0xf0]  ;;  %v1591_v47 = vadd.f32 %v8335_v60, %v1556_v5  ;;  %v6303_v5 = vld [vmem:[%s10702_s12 + $0x64] sm:$0xf0] }
 0x2e4   : > { %v6043_v21 = vor.u32 %v6305_v13, %v6042_v58 }
 0x2e5   : > { %v8309_v24 = vpop.permute.xlu1 %2732  ;;  %3442 = vmatpush.bf16.msrb.mxu3 %v6055_v59  ;;  %v1783_v59 = vadd.f32 %v1751_v11, %v1590_v9  ;;  %v6302_v11 = vld [vmem:[%s10702_s12 + $0x64] sm:$0xf] }
 0x2e6   : > { %10991 = vst [vmem:[#allocation37_spill] sm:$0xff] %v8309_v24  ;;  %5962 = vmatmul.msk.bf16.gmra.mxu0 %vm2082_vm1, %v2028_v40  ;;  %5978 = vmatmul.msk.bf16.gmra.mxu1 %vm2082_vm1, %v2028_v40  ;;  %v8325_v24 = vld [vmem:[%s8170_s21 + $0x8] sm:$0xff]  ;;  %v1752_v40 = vmul.f32 %v7676_v61, %v10996_v32  ;;  %v6044_v32 = vld [vmem:[%s10702_s12 + $0x78] sm:$0xf0] }
 0x2e7   : > { %v8329_v31 = vpop.permute.xlu2 %2839  ;;  %4191 = vperm.xlu0 %6414, %v8325_v24   ;;  %v6047_v35 = vor.u32 %v6304_v49, %v6044_v32  ;;  %v1976_v13 = vadd.f32 %v1944_v8, %v1783_v59  ;;  %3354 = vmatpush.bf16.msrb.mxu2 %v6043_v21  ;;  %v8381_v8 = vld [vmem:[%s8170_s21 + $0x18] sm:$0xff]  ;;  %v8383_v32 = vpop.permute.xlu0 %2879 }
 0x2e8   : > { %v1784_v58 = vadd.f32 %v1752_v40, %v1591_v47  ;;  %11000 = vst [vmem:[#allocation33_spill] sm:$0xff] %v8383_v32  ;;  %v8385_v47 = vpop.f32.mrf.mxu0  ;;  %v8387_v59 = vpop.f32.mrf.mxu1 }
 0x2e9   : > { %3443 = vmatpush.bf16.msrb.mxu3 %v6047_v35  ;;  %v2008_v49 = vmax.f32 %v1976_v13, 0.0  ;;  %11001 = vst [vmem:[#allocation7_spill] sm:$0xff] %v8385_v47  ;;  %v11004_v13 = vld [vmem:[#allocation9_spill] sm:$0xff] }
 0x2ea   : > { %6410 = vset.pattern.permute.xlu1 %v10920_v54  ;;  %v1977_v35 = vadd.f32 %v1945_v53, %v1784_v58  ;;  %11002 = vst [vmem:[#allocation54_spill] sm:$0xff] %v8387_v59  ;;  %v11003_v53 = vld [vmem:[#allocation56_spill] sm:$0xff] }
 0x2eb   : > { %3076 = vperm.xlu2 %6408, %v6520_v0   ;;  %2887 = vperm.xlu1 %6410, %v7781_v56   ;;  %v6035_v0 = vor.u32 %v6303_v5, %v6034_v63  ;;  %v6036_v56 = vld [vmem:[%s10702_s12 + $0x68] sm:$0xf0]  ;;  %v1557_v58 = vmul.f32 %v7669_v22, %v11003_v53  ;;  %v1558_v5 = vmul.f32 %v7669_v22, %v11004_v13 }
 0x2ec   : > { %v6039_v21 = vor.u32 %v6302_v11, %v6036_v56  ;;  %v2009_v63 = vmax.f32 %v1977_v35, 0.0  ;;  %v8396_v11 = vpop.f32.mrf.mxu2  ;;  %v8399_v56 = vpop.f32.mrf.mxu3  ;;  %v8410_v13 = vld [vmem:[%s8170_s21 + $0x28] sm:$0xff] }
 0x2ed   : > { %v8373_v9 = vpop.permute.xlu1 %2747  ;;  %3355 = vmatpush.bf16.msrb.mxu2 %v6035_v0  ;;  %11005 = vst [vmem:[#allocation31_spill] sm:$0xff] %v8396_v11  ;;  %v1592_v12 = vadd.f32 %v8335_v60, %v1557_v58 }
 0x2ee   : > { %10999 = vst [vmem:[#allocation3_spill] sm:$0xff] %v8373_v9  ;;  %3444 = vmatpush.bf16.msrb.mxu3 %v6039_v21  ;;  %v2029_v0 = vpack.c.bf16 %v2009_v63, %v2008_v49  ;;  %v11007_v21 = vld [vmem:[#allocation43_spill] sm:$0xff]  ;;  %v1593_v49 = vadd.f32 %v8335_v60, %v1558_v5  ;;  %v1947_v63 = vmul.f32 %v7683_v14, %v7964_v1  ;;  %v11011_v5 = vld [vmem:[#allocation76_spill] sm:$0xff] }
 0x2ef   : > { %v8378_v40 = vpop.permute.xlu2 %2843  ;;  %4199 = vperm.xlu0 %6414, %v8381_v8   ;;  %11006 = vst [vmem:[#allocation17_spill] sm:$0xff] %v8399_v56  ;;  %v1754_v35 = vmul.f32 %v7676_v61, %v11007_v21  ;;  %v2588_v21 = vld [vmem:[%s10698_s8] sm:$0x7]  ;;  %v1785_v9 = vadd.f32 %v1753_v16, %v1592_v12  ;;  %v8422_v56 = vpop.permute.xlu0 %2883  ;;  %v1946_v59 = vmul.f32 %v7683_v14, %v11011_v5  ;;  %v8447_v5 = vld [vmem:[%s8170_s21 + $0x38] sm:$0xff] }
 0x2f0   : > { %11008 = vst [vmem:[#allocation75_spill] sm:$0xff] %v8422_v56  ;;  %v8424_v11 = vpop.f32.mrf.mxu0  ;;  %v8426_v58 = vpop.f32.mrf.mxu1  ;;  %v8429_v1 = vperm.slane %v2588_v21, 0  ;;  %v6333_v56 = vld [vmem:[%s10702_s12 + $0x154] sm:$0xf0] }
 0x2f1   : > { %11009 = vst [vmem:[#allocation6_spill] sm:$0xff] %v8424_v11  ;;  %v1978_v16 = vadd.f32 %v1946_v59, %v1785_v9 }
 0x2f2   : > { %11010 = vst [vmem:[#allocation58_spill] sm:$0xff] %v8426_v58  ;;  %v2751_v12 = vmul.f32 %v8429_v1, %v7946_v20  ;;  %v11014_v20 = vld [vmem:[#allocation57_spill] sm:$0xff] }
 0x2f3   : > { %6411 = vset.pattern.permute.xlu2 %v10920_v54  ;;  %2891 = vperm.xlu1 %6410, %v8051_v41   ;;  %v1560_v59 = vmul.f32 %v7669_v22, %v11014_v20  ;;  %v2010_v2 = vmax.f32 %v1978_v16, 0.0  ;;  %v11020_v16 = vld [vmem:[#allocation78_spill] sm:$0xff] }
 0x2f4   : > { %2895 = vperm.xlu2 %6411, %v7809_v15   ;;  %v8444_v11 = vpop.f32.mrf.mxu3 }
 0x2f5   : > { %11013 = vst [vmem:[#allocation40_spill] sm:$0xff] %v8444_v11 }
 0x2f6   : > { %5963 = vmatmul.msk.bf16.gmra.mxu0 %vm2082_vm1, %v2029_v0  ;;  %5979 = vmatmul.msk.bf16.gmra.mxu1 %vm2082_vm1, %v2029_v0  ;;  %v8407_v53 = vpop.permute.xlu1 %2827  ;;  %v1786_v0 = vadd.f32 %v1754_v35, %v1593_v49  ;;  %v8438_v35 = vperm.slane %v2588_v21, 1  ;;  %v8440_v49 = vpop.f32.mrf.mxu2 }
 0x2f7   : > { %4207 = vperm.xlu0 %6414, %v8410_v13   ;;  %11012 = vst [vmem:[#allocation19_spill] sm:$0xff] %v8440_v49  ;;  %v8463_v49 = vperm.slane %v2588_v21, 2  ;;  %v8470_v20 = vpop.permute.xlu0 %2622  ;;  %v1595_v21 = vadd.f32 %v8335_v60, %v1560_v59 }
 0x2f8   : > { %v1979_v47 = vadd.f32 %v1947_v63, %v1786_v0  ;;  %v2947_v9 = vmul.f32 %v8438_v35, %v8256_v62  ;;  %v11015_v0 = vld [vmem:[#allocation63_spill] sm:$0xff]  ;;  %v2948_v62 = vmul.f32 %v8438_v35, %v8206_v43  ;;  %v8472_v37 = vpop.f32.mrf.mxu0 }
 0x2f9   : > { %v8419_v18 = vpop.permute.xlu2 %3024  ;;  %v2752_v11 = vmul.f32 %v8429_v1, %v11015_v0  ;;  %11016 = vst [vmem:[#allocation56_spill] sm:$0xff] %v8472_v37  ;;  %v8476_v0 = vpop.f32.mrf.mxu1 }
 0x2fa   : > { %11018 = vst [vmem:[#allocation9_spill] sm:$0xff] %v8476_v0 }
 0x2fb   : > { %6412 = vset.pattern.permute.xlu1 %v10842_v34 }
 0x2fc   : > { %6413 = vset.pattern.permute.xlu2 %v10842_v34  ;;  %3084 = vperm.xlu1 %6412, %v8051_v41   ;;  %v8452_v41 = vld [vmem:[%s10699_s9] ss:$0 sm:$0xff] }
 0x2fd   : > { %3088 = vperm.xlu2 %6413, %v7809_v15   ;;  %v2011_v15 = vmax.f32 %v1979_v47, 0.0  ;;  %v2786_v48 = vadd.f32 %v8452_v41, %v2751_v12  ;;  %v1756_v47 = vmul.f32 %v7676_v61, %v8135_v17  ;;  %v11019_v17 = vld [vmem:[#allocation62_spill] sm:$0xff] }
 0x2fe   : > { %v8442_v58 = vpop.permute.xlu1 %2835  ;;  %v1559_v43 = vmul.f32 %v7669_v22, %v11019_v17  ;;  %v11021_v12 = vld [vmem:[#allocation10_spill] sm:$0xff]  ;;  %v8490_v37 = vpop.f32.mrf.mxu2 }
 0x2ff   : > { %4215 = vperm.xlu0 %6414, %v8447_v5   ;;  %v2030_v33 = vpack.c.bf16 %v2011_v15, %v2010_v2  ;;  %v2979_v45 = vadd.f32 %v2947_v9, %v2786_v48  ;;  %v2787_v2 = vadd.f32 %v8452_v41, %v2752_v11  ;;  %v3140_v48 = vmul.f32 %v8463_v49, %v11020_v16  ;;  %v6154_v16 = vld [vmem:[%s10702_s12 + $0x150] sm:$0xf] }
 0x300   : > { %v1755_v15 = vmul.f32 %v7676_v61, %v11021_v12  ;;  %v1788_v59 = vadd.f32 %v1756_v47, %v1595_v21  ;;  %11022 = vst [vmem:[#allocation43_spill] sm:$0xff] %v8490_v37  ;;  %v8502_v12 = vpop.f32.mrf.mxu3  ;;  %v6155_v47 = vor.u32 %v6333_v56, %v6154_v16  ;;  %v2753_v56 = vmul.f32 %v8429_v1, %v8062_v36  ;;  %v8518_v16 = vpop.f32.mrf.mxu0 }
 0x301   : > { %v8458_v63 = vpop.permute.xlu2 %3032  ;;  %v2980_v0 = vadd.f32 %v2948_v62, %v2787_v2  ;;  %v3172_v11 = vadd.f32 %v3140_v48, %v2979_v45  ;;  %11023 = vst [vmem:[#allocation76_spill] sm:$0xff] %v8502_v12  ;;  %v1594_v45 = vadd.f32 %v8335_v60, %v1559_v43  ;;  %v11024_v62 = vld [vmem:[#allocation77_spill] sm:$0xff]  ;;  %v1948_v2 = vmul.f32 %v7683_v14, %v7880_v10  ;;  %v8516_v43 = vpop.permute.xlu0 %2637  ;;  %v6218_v10 = vld [vmem:[%s10702_s12 + $0x1d0] sm:$0xf] }
 0x302   : > { %v1949_v21 = vmul.f32 %v7683_v14, %v11024_v62  ;;  %4736 = vmatpush.bf16.msrb.mxu0 %v6155_v47  ;;  %11025 = vst [vmem:[#allocation57_spill] sm:$0xff] %v8518_v16  ;;  %v2788_v47 = vadd.f32 %v8452_v41, %v2753_v56  ;;  %v11030_v56 = vld [vmem:[#allocation5_spill] sm:$0xff] }
 0x303   : > { %v3204_v12 = vmax.f32 %v3172_v11, 0.0 }
 0x304   : > { %6415 = vset.pattern.permute.xlu1 %v11017_v29  ;;  %v1981_v37 = vadd.f32 %v1949_v21, %v1788_v59 }
 0x305   : > { %6416 = vset.pattern.permute.xlu2 %v10920_v54  ;;  %3631 = vperm.xlu1 %6415, %v8325_v24  }
 0x306   : > { %3925 = vperm.xlu2 %6416, %v8191_v52   ;;  %5964 = vmatmul.msk.bf16.gmra.mxu0 %vm2082_vm1, %v2030_v33  ;;  %v2013_v11 = vmax.f32 %v1981_v37, 0.0 }
 0x307   : > { %5980 = vmatmul.msk.bf16.gmra.mxu1 %vm2082_vm1, %v2030_v33  ;;  %v3017_v9 = vpop.permute.xlu1 %3016  ;;  %6440 = vset.pattern.permute.xlu0 %v11017_v29 }
 0x308   : > { %v3141_v17 = vmul.f32 %v8463_v49, %v3017_v9  ;;  %3636 = vperm.xlu0 %6440, %v8500_v23   ;;  %v1787_v9 = vadd.f32 %v1755_v15, %v1594_v45  ;;  %v8528_v15 = vpop.f32.mrf.mxu1  ;;  %v8538_v45 = vpop.f32.mrf.mxu2 }
 0x309   : > { %v8504_v33 = vpop.permute.xlu2 %3040  ;;  %11026 = vst [vmem:[#allocation63_spill] sm:$0xff] %v8528_v15 }
 0x30a   : > { %v3173_v48 = vadd.f32 %v3141_v17, %v2980_v0  ;;  %v1980_v32 = vadd.f32 %v1948_v2, %v1787_v9  ;;  %v6349_v0 = vld [vmem:[%s10702_s12 + $0x1d4] sm:$0xf0]  ;;  %11027 = vst [vmem:[#allocation62_spill] sm:$0xff] %v8538_v45 }
 0x30b   : > { %v6219_v59 = vor.u32 %v6349_v0, %v6218_v10  ;;  %v11031_v10 = vld [vmem:[#allocation35_spill] sm:$0xff] }
 0x30c   : > { %v3205_v26 = vmax.f32 %v3173_v48, 0.0 }
 0x30d   : > { %6417 = vset.pattern.permute.xlu1 %v10920_v54  ;;  %4825 = vmatpush.bf16.msrb.mxu1 %v6219_v59  ;;  %v6521_v59 = vld [vmem:[%s6937_s23 + $0xa0] sm:$0xff] }
 0x30e   : > { %v3236_v62 = vpack.c.bf16 %v3205_v26, %v3204_v12  ;;  %6418 = vset.pattern.permute.xlu2 %v10842_v34  ;;  %3929 = vperm.xlu1 %6417, %v8325_v24   ;;  %v2754_v26 = vmul.f32 %v8429_v1, %v7973_v28  ;;  %v2949_v24 = vmul.f32 %v8438_v35, %v8407_v53  ;;  %v2012_v12 = vmax.f32 %v1980_v32, 0.0  ;;  %v11028_v28 = vld [vmem:[#allocation11_spill] sm:$0xff]  ;;  %v8545_v53 = vpop.f32.mrf.mxu3 }
 0x30f   : > { %4187 = vperm.xlu2 %6418, %v8191_v52   ;;  %v3021_v36 = vpop.permute.xlu1 %3020  ;;  %v2950_v52 = vmul.f32 %v8438_v35, %v8277_v44  ;;  %v1561_v21 = vmul.f32 %v7669_v22, %v11028_v28  ;;  %11029 = vst [vmem:[#allocation78_spill] sm:$0xff] %v8545_v53  ;;  %v3143_v32 = vmul.f32 %v8463_v49, %v8419_v18  ;;  %v11032_v18 = vld [vmem:[#allocation60_spill] sm:$0xff] }
 0x310   : > { %3356 = vmatmul.bf16.vlgmr.msrb.gmra.mxu2 %v3236_v62  ;;  %3445 = vmatmul.bf16.vlgmr.msrb.gmra.mxu3 %v3236_v62  ;;  %v3142_v37 = vmul.f32 %v8463_v49, %v3021_v36  ;;  %v2031_v2 = vpack.c.bf16 %v2013_v11, %v2012_v12  ;;  %v2789_v48 = vadd.f32 %v8452_v41, %v2754_v26  ;;  %v8568_v28 = vpop.f32.mrf.mxu1 }
 0x311   : > { %v8535_v17 = vpop.permute.xlu2 %3044  ;;  %v2981_v9 = vadd.f32 %v2949_v24, %v2788_v47  ;;  %v1562_v62 = vmul.f32 %v7669_v22, %v11030_v56  ;;  %v1757_v44 = vmul.f32 %v7676_v61, %v11031_v10  ;;  %v1596_v26 = vadd.f32 %v8335_v60, %v1561_v21  ;;  %v8563_v47 = vpop.permute.xlu0 %2652 }
 0x312   : > { %v2982_v0 = vadd.f32 %v2950_v52, %v2789_v48  ;;  %v1758_v24 = vmul.f32 %v7676_v61, %v11032_v18  ;;  %v1950_v12 = vmul.f32 %v7683_v14, %v7992_v27  ;;  %v1951_v21 = vmul.f32 %v7683_v14, %v7915_v42  ;;  %v8575_v18 = vpop.f32.mrf.mxu2 }
 0x313   : > { %v3174_v36 = vadd.f32 %v3142_v37, %v2981_v9  ;;  %v8565_v37 = vpop.f32.mrf.mxu0  ;;  %v1789_v48 = vadd.f32 %v1757_v44, %v1596_v26  ;;  %11033 = vst [vmem:[#allocation10_spill] sm:$0xff] %v8575_v18  ;;  %v2951_v42 = vmul.f32 %v8438_v35, %v8442_v58  ;;  %v2756_v26 = vmul.f32 %v8429_v1, %v8002_v6 }
 0x314   : > { %v3175_v52 = vadd.f32 %v3143_v32, %v2982_v0  ;;  %v2755_v0 = vmul.f32 %v8429_v1, %v8079_v30  ;;  %v2952_v58 = vmul.f32 %v8438_v35, %v8329_v31 }
 0x315   : > { %v3206_v9 = vmax.f32 %v3174_v36, 0.0  ;;  %v1982_v27 = vadd.f32 %v1950_v12, %v1789_v48 }
 0x316   : > { %2899 = vperm.xlu1 %6417, %v6521_v59   ;;  %5965 = vmatmul.msk.bf16.gmra.mxu0 %vm2082_vm1, %v2031_v2  ;;  %v3207_v32 = vmax.f32 %v3175_v52, 0.0  ;;  %v8579_v53 = vpop.f32.mrf.mxu3  ;;  %v2790_v30 = vadd.f32 %v8452_v41, %v2755_v0 }
 0x317   : > { %6419 = vset.pattern.permute.xlu2 %v10920_v54  ;;  %5981 = vmatmul.msk.bf16.gmra.mxu1 %vm2082_vm1, %v2031_v2  ;;  %v3029_v11 = vpop.permute.xlu1 %3028  ;;  %v1597_v2 = vadd.f32 %v8335_v60, %v1562_v62  ;;  %11034 = vst [vmem:[#allocation77_spill] sm:$0xff] %v8579_v53  ;;  %v2014_v36 = vmax.f32 %v1982_v27, 0.0  ;;  %v3145_v27 = vmul.f32 %v8463_v49, %v8458_v63 }
 0x318   : > { %2903 = vperm.xlu2 %6419, %v8076_v50   ;;  %v3237_v62 = vpack.c.bf16 %v3207_v32, %v3206_v9  ;;  %v2983_v48 = vadd.f32 %v2951_v42, %v2790_v30  ;;  %v11039_v32 = vld [vmem:[#allocation64_spill] sm:$0xff] }
 0x319   : > { %v1790_v10 = vadd.f32 %v1758_v24, %v1597_v2  ;;  %v3144_v24 = vmul.f32 %v8463_v49, %v3029_v11  ;;  %v8592_v52 = vpop.permute.xlu0 %2667  ;;  %v11036_v2 = vld [vmem:[#allocation59_spill] sm:$0xff]  ;;  %v11038_v11 = vld [vmem:[#allocation13_spill] sm:$0xff]  ;;  %v1760_v0 = vmul.f32 %v7676_v61, %v11039_v32 }
 0x31a   : > { %v8573_v56 = vpop.permute.xlu2 %2863  ;;  %v1563_v6 = vmul.f32 %v7669_v22, %v11036_v2  ;;  %v8613_v42 = vpop.f32.mrf.mxu2 }
 0x31b   : > { %v1983_v45 = vadd.f32 %v1951_v21, %v1790_v10  ;;  %v8600_v21 = vpop.f32.mrf.mxu1  ;;  %v3176_v31 = vadd.f32 %v3144_v24, %v2983_v48  ;;  %11040 = vst [vmem:[#allocation35_spill] sm:$0xff] %v8613_v42  ;;  %v11042_v48 = vld [vmem:[#allocation15_spill] sm:$0xff] }
 0x31c   : > { %11037 = vst [vmem:[#allocation5_spill] sm:$0xff] %v8600_v21 }
 0x31d   : > { %v2015_v12 = vmax.f32 %v1983_v45, 0.0  ;;  %v2791_v45 = vadd.f32 %v8452_v41, %v2756_v26 }
 0x31e   : > { %6420 = vset.pattern.permute.xlu1 %v10842_v34  ;;  %v8616_v2 = vpop.f32.mrf.mxu3 }
 0x31f   : > { %3092 = vperm.xlu1 %6420, %v6521_v59   ;;  %v8584_v44 = vpop.permute.xlu1 %3036  ;;  %v8596_v59 = vpop.f32.mrf.mxu0  ;;  %v2032_v10 = vpack.c.bf16 %v2015_v12, %v2014_v36  ;;  %v2984_v30 = vadd.f32 %v2952_v58, %v2791_v45  ;;  %11041 = vst [vmem:[#allocation60_spill] sm:$0xff] %v8616_v2  ;;  %v1953_v36 = vmul.f32 %v7683_v14, %v8032_v25  ;;  %v6331_v25 = vld [vmem:[%s10702_s12 + $0x144] sm:$0xf0] }
 0x320   : > { %6421 = vset.pattern.permute.xlu2 %v10842_v34  ;;  %3361 = vmatmul.bf16.gmra.mxu2 %v3237_v62  ;;  %11035 = vst [vmem:[#allocation11_spill] sm:$0xff] %v8596_v59  ;;  %v6347_v45 = vld [vmem:[%s10702_s12 + $0x1c4] sm:$0xf0]  ;;  %v11071_v59 = vld [vmem:[#allocation33_spill] sm:$0xff] }
 0x321   : > { %3096 = vperm.xlu2 %6421, %v8076_v50   ;;  %3450 = vmatmul.bf16.gmra.mxu3 %v3237_v62  ;;  %v1564_v50 = vmul.f32 %v7669_v22, %v11038_v11  ;;  %v1759_v62 = vmul.f32 %v7676_v61, %v8163_v46  ;;  %v1598_v22 = vadd.f32 %v8335_v60, %v1563_v6  ;;  %v3208_v61 = vmax.f32 %v3176_v31, 0.0  ;;  %v8629_v58 = vpop.permute.xlu0 %2682  ;;  %v6210_v6 = vld [vmem:[%s10702_s12 + $0x1c0] sm:$0xf] }
 0x322   : > { %v3177_v26 = vadd.f32 %v3145_v27, %v2984_v30  ;;  %v1952_v11 = vmul.f32 %v7683_v14, %v11042_v48  ;;  %v2757_v31 = vmul.f32 %v8429_v1, %v8470_v20  ;;  %v8652_v30 = vld [vmem:[%s8170_s21 + $0x20] sm:$0xff] }
 0x323   : > { %v8602_v9 = vpop.permute.xlu2 %3056  ;;  %v1599_v63 = vadd.f32 %v8335_v60, %v1564_v50  ;;  %v1791_v12 = vadd.f32 %v1759_v62, %v1598_v22  ;;  %v6146_v60 = vld [vmem:[%s10702_s12 + $0x140] sm:$0xf]  ;;  %v6211_v62 = vor.u32 %v6347_v45, %v6210_v6  ;;  %v8654_v22 = vpop.f32.mrf.mxu1  ;;  %3646 = vperm.xlu0 %6440, %v8652_v30  }
 0x324   : > { %v3209_v32 = vmax.f32 %v3177_v26, 0.0  ;;  %v2792_v20 = vadd.f32 %v8452_v41, %v2757_v31  ;;  %v8660_v26 = vpop.f32.mrf.mxu2 }
 0x325   : > { %v1792_v24 = vadd.f32 %v1760_v0, %v1599_v63  ;;  %v1984_v14 = vadd.f32 %v1952_v11, %v1791_v12  ;;  %v2758_v63 = vmul.f32 %v8429_v1, %v8105_v19  ;;  %4826 = vmatpush.bf16.msrb.mxu1 %v6211_v62  ;;  %11043 = vst [vmem:[#allocation59_spill] sm:$0xff] %v8660_v26 }
 0x326   : > { %5966 = vmatmul.msk.bf16.gmra.mxu0 %vm2082_vm1, %v2032_v10 }
 0x327   : > { %5982 = vmatmul.msk.bf16.gmra.mxu1 %vm2082_vm1, %v2032_v10  ;;  %6422 = vset.pattern.permute.xlu1 %v11017_v29  ;;  %v6147_v10 = vor.u32 %v6331_v25, %v6146_v60  ;;  %v1985_v27 = vadd.f32 %v1953_v36, %v1792_v24  ;;  %v8649_v0 = vpop.f32.mrf.mxu0  ;;  %v3238_v60 = vpack.c.bf16 %v3209_v32, %v3208_v61  ;;  %v8665_v25 = vpop.f32.mrf.mxu3  ;;  %v2016_v19 = vmax.f32 %v1984_v14, 0.0  ;;  %v6522_v32 = vld [vmem:[%s6937_s23 + $0xb0] sm:$0xff] }
 0x328   : > { %3641 = vperm.xlu1 %6422, %v8381_v8   ;;  %v2953_v24 = vmul.f32 %v8438_v35, %v8378_v40  ;;  %11044 = vst [vmem:[#allocation13_spill] sm:$0xff] %v8665_v25  ;;  %v2954_v61 = vmul.f32 %v8438_v35, %v8231_v38  ;;  %v2793_v6 = vadd.f32 %v8452_v41, %v2758_v63 }
 0x329   : > { %6423 = vset.pattern.permute.xlu2 %v10920_v54  ;;  %v8626_v46 = vpop.permute.xlu1 %2855  ;;  %4737 = vmatpush.bf16.msrb.mxu0 %v6147_v10  ;;  %v2017_v36 = vmax.f32 %v1985_v27, 0.0  ;;  %v3146_v40 = vmul.f32 %v8463_v49, %v8584_v44  ;;  %v8681_v45 = vpop.permute.xlu0 %2697 }
 0x32a   : > { %3933 = vperm.xlu2 %6423, %v8500_v23   ;;  %v2985_v11 = vadd.f32 %v2953_v24, %v2792_v20  ;;  %v2986_v38 = vadd.f32 %v2954_v61, %v2793_v6  ;;  %v6523_v20 = vld [vmem:[%s6937_s23 + $0xb8] sm:$0xff]  ;;  %v2956_v61 = vmul.f32 %v8438_v35, %v8626_v46 }
 0x32b   : > { %v8642_v50 = vpop.permute.xlu2 %3060  ;;  %v2033_v48 = vpack.c.bf16 %v2017_v36, %v2016_v19  ;;  %v8686_v44 = vpop.f32.mrf.mxu1 }
 0x32c   : > { %v3178_v31 = vadd.f32 %v3146_v40, %v2985_v11  ;;  %11046 = vst [vmem:[#allocation15_spill] sm:$0xff] %v8686_v44  ;;  %v8692_v62 = vpop.f32.mrf.mxu2  ;;  %v2759_v40 = vmul.f32 %v8429_v1, %v8042_v55 }
 0x32d   : > { %11047 = vst [vmem:[#allocation82_spill] sm:$0xff] %v8692_v62 }
 0x32e   : > { %v3210_v14 = vmax.f32 %v3178_v31, 0.0  ;;  %v11051_v31 = vld [vmem:[#allocation80_spill] sm:$0xff]  ;;  %v2794_v55 = vadd.f32 %v8452_v41, %v2759_v40 }
 0x32f   : > { %v8683_v27 = vpop.f32.mrf.mxu0  ;;  %v6138_v40 = vld [vmem:[%s10702_s12 + $0x130] sm:$0xf] }
 0x330   : > { %6424 = vset.pattern.permute.xlu1 %v10920_v54  ;;  %3366 = vmatmul.bf16.gmra.mxu2 %v3238_v60  ;;  %11045 = vst [vmem:[#allocation64_spill] sm:$0xff] %v8683_v27 }
 0x331   : > { %3937 = vperm.xlu1 %6424, %v8381_v8   ;;  %v8668_v12 = vpop.permute.xlu1 %2859  ;;  %3455 = vmatmul.bf16.gmra.mxu3 %v3238_v60  ;;  %v3147_v8 = vmul.f32 %v8463_v49, %v8504_v33  ;;  %v2760_v33 = vmul.f32 %v8429_v1, %v8516_v43  ;;  %v8694_v60 = vpop.f32.mrf.mxu3 }
 0x332   : > { %6425 = vset.pattern.permute.xlu2 %v10842_v34  ;;  %11048 = vst [vmem:[#allocation83_spill] sm:$0xff] %v8694_v60  ;;  %v8703_v6 = vpop.permute.xlu0 %2712 }
 0x333   : > { %4195 = vperm.xlu2 %6425, %v8500_v23   ;;  %v3179_v23 = vadd.f32 %v3147_v8, %v2986_v38  ;;  %v2795_v19 = vadd.f32 %v8452_v41, %v2760_v33  ;;  %v8709_v11 = vpop.f32.mrf.mxu1  ;;  %v2955_v8 = vmul.f32 %v8438_v35, %v8275_v7 }
 0x334   : > { %v8679_v10 = vpop.permute.xlu2 %2875  ;;  %11050 = vst [vmem:[#allocation85_spill] sm:$0xff] %v8709_v11  ;;  %v8719_v33 = vpop.f32.mrf.mxu2 }
 0x335   : > { %v3211_v36 = vmax.f32 %v3179_v23, 0.0  ;;  %v2988_v38 = vadd.f32 %v2956_v61, %v2795_v19  ;;  %v3149_v23 = vmul.f32 %v8463_v49, %v11051_v31  ;;  %11052 = vst [vmem:[#allocation80_spill] sm:$0xff] %v8719_v33 }
 0x336   : > { %5967 = vmatmul.msk.bf16.gmra.mxu0 %vm2082_vm1, %v2033_v48 }
 0x337   : > { %5983 = vmatmul.msk.bf16.gmra.mxu1 %vm2082_vm1, %v2033_v48  ;;  %v3239_v43 = vpack.c.bf16 %v3211_v36, %v3210_v14  ;;  %v8707_v48 = vpop.f32.mrf.mxu0  ;;  %v3148_v14 = vmul.f32 %v8463_v49, %v8535_v17  ;;  %v3181_v19 = vadd.f32 %v3149_v23, %v2988_v38  ;;  %v6329_v17 = vld [vmem:[%s10702_s12 + $0x134] sm:$0xf0] }
 0x338   : > { %11049 = vst [vmem:[#allocation84_spill] sm:$0xff] %v8707_v48  ;;  %v6139_v31 = vor.u32 %v6329_v17, %v6138_v40  ;;  %v2761_v17 = vmul.f32 %v8429_v1, %v8126_v39 }
 0x339   : > { %2907 = vperm.xlu1 %6424, %v6522_v32   ;;  %v8724_v36 = vpop.f32.mrf.mxu3  ;;  %v3213_v23 = vmax.f32 %v3181_v19, 0.0 }
 0x33a   : > { %v3053_v63 = vpop.permute.xlu1 %3052  ;;  %11053 = vst [vmem:[#allocation86_spill] sm:$0xff] %v8724_v36  ;;  %4738 = vmatpush.bf16.msrb.mxu0 %v6139_v31  ;;  %v2762_v31 = vmul.f32 %v8429_v1, %v8066_v3  ;;  %v2796_v39 = vadd.f32 %v8452_v41, %v2761_v17 }
 0x33b   : > { %6426 = vset.pattern.permute.xlu2 %v10920_v54  ;;  %v3150_v62 = vmul.f32 %v8463_v49, %v3053_v63 }
 0x33c   : > { %2911 = vperm.xlu2 %6426, %v6523_v20   ;;  %v2797_v3 = vadd.f32 %v8452_v41, %v2762_v31 }
 0x33d   : > { %v8698_v24 = vpop.permute.xlu2 %3072 }
 0x33f   : > { %v8742_v38 = vpop.f32.mrf.mxu0 }
 0x340   : > { %3371 = vmatmul.bf16.gmra.mxu2 %v3239_v43  ;;  %11054 = vst [vmem:[#allocation87_spill] sm:$0xff] %v8742_v38 }
 0x341   : > { %6427 = vset.pattern.permute.xlu1 %v10842_v34  ;;  %3460 = vmatmul.bf16.gmra.mxu3 %v3239_v43  ;;  %v8728_v43 = vpop.permute.xlu0 %2727 }
 0x342   : > { %3100 = vperm.xlu1 %6427, %v6522_v32   ;;  %v2987_v32 = vadd.f32 %v2955_v8, %v2794_v55  ;;  %v6345_v8 = vld [vmem:[%s10702_s12 + $0x1b4] sm:$0xf0] }
 0x343   : > { %v8714_v46 = vpop.permute.xlu1 %2871 }
 0x344   : > { %6428 = vset.pattern.permute.xlu2 %v10842_v34  ;;  %v3180_v61 = vadd.f32 %v3148_v14, %v2987_v32  ;;  %v8745_v14 = vpop.f32.mrf.mxu1 }
 0x345   : > { %3104 = vperm.xlu2 %6428, %v6523_v20   ;;  %v8726_v7 = vpop.permute.xlu2 %3076  ;;  %v6202_v20 = vld [vmem:[%s10702_s12 + $0x1b0] sm:$0xf]  ;;  %11055 = vst [vmem:[#allocation88_spill] sm:$0xff] %v8745_v14  ;;  %v2764_v14 = vmul.f32 %v8429_v1, %v8156_v57 }
 0x346   : > { %v6203_v55 = vor.u32 %v6345_v8, %v6202_v20  ;;  %v3212_v32 = vmax.f32 %v3180_v61, 0.0  ;;  %v8756_v20 = vpop.f32.mrf.mxu2  ;;  %v8758_v8 = vpop.f32.mrf.mxu3  ;;  %v2957_v61 = vmul.f32 %v8438_v35, %v8668_v12  ;;  %v3151_v12 = vmul.f32 %v8463_v49, %v8602_v9  ;;  %v6327_v9 = vld [vmem:[%s10702_s12 + $0x124] sm:$0xf0] }
 0x347   : > { %11056 = vst [vmem:[#allocation89_spill] sm:$0xff] %v8756_v20  ;;  %v8778_v20 = vpop.f32.mrf.mxu0 }
 0x348   : > { %4827 = vmatpush.bf16.msrb.mxu1 %v6203_v55  ;;  %v3240_v19 = vpack.c.bf16 %v3213_v23, %v3212_v32  ;;  %11057 = vst [vmem:[#allocation90_spill] sm:$0xff] %v8758_v8  ;;  %v8765_v55 = vld [vmem:[%s8170_s21 + $0x30] sm:$0xff]  ;;  %v2958_v23 = vmul.f32 %v8438_v35, %v8573_v56  ;;  %v2989_v8 = vadd.f32 %v2957_v61, %v2796_v39  ;;  %v6130_v61 = vld [vmem:[%s10702_s12 + $0x120] sm:$0xf] }
 0x349   : > { %3656 = vperm.xlu0 %6440, %v8765_v55   ;;  %v8772_v32 = vpop.permute.xlu0 %2742  ;;  %11059 = vst [vmem:[#allocation92_spill] sm:$0xff] %v8778_v20  ;;  %v6131_v31 = vor.u32 %v6327_v9, %v6130_v61  ;;  %v6325_v61 = vld [vmem:[%s10702_s12 + $0x114] sm:$0xf0] }
 0x34a   : > { %6429 = vset.pattern.permute.xlu1 %v11017_v29  ;;  %11058 = vst [vmem:[#allocation91_spill] sm:$0xff] %v8772_v32  ;;  %v2990_v56 = vadd.f32 %v2958_v23, %v2797_v3  ;;  %v6341_v9 = vld [vmem:[%s10702_s12 + $0x194] sm:$0xf0] }
 0x34b   : > { %3651 = vperm.xlu1 %6429, %v8410_v13   ;;  %4739 = vmatpush.bf16.msrb.mxu0 %v6131_v31  ;;  %v6524_v31 = vld [vmem:[%s6937_s23 + $0xc0] sm:$0xff] }
 0x34c   : > { %v8748_v40 = vpop.permute.xlu1 %3064  ;;  %v8783_v17 = vpop.f32.mrf.mxu1 }
 0x34d   : > { %6430 = vset.pattern.permute.xlu2 %v10920_v54  ;;  %11060 = vst [vmem:[#allocation93_spill] sm:$0xff] %v8783_v17  ;;  %v3153_v44 = vmul.f32 %v8463_v49, %v8748_v40 }
 0x34e   : > { %3941 = vperm.xlu2 %6430, %v8652_v30   ;;  %v8754_v60 = vpop.permute.xlu2 %2895  ;;  %v8801_v3 = vpop.f32.mrf.mxu2 }
 0x34f   : > { %11061 = vst [vmem:[#allocation94_spill] sm:$0xff] %v8801_v3  ;;  %v8803_v2 = vpop.f32.mrf.mxu3 }
 0x350   : > { %3376 = vmatmul.bf16.gmra.mxu2 %v3240_v19  ;;  %11062 = vst [vmem:[#allocation95_spill] sm:$0xff] %v8803_v2 }
 0x351   : > { %3465 = vmatmul.bf16.gmra.mxu3 %v3240_v19  ;;  %v3182_v19 = vadd.f32 %v3150_v62, %v2989_v8  ;;  %v6343_v62 = vld [vmem:[%s10702_s12 + $0x1a4] sm:$0xf0]  ;;  %v3183_v8 = vadd.f32 %v3151_v12, %v2990_v56  ;;  %v6186_v12 = vld [vmem:[%s10702_s12 + $0x190] sm:$0xf] }
 0x353   : > { %6431 = vset.pattern.permute.xlu1 %v10920_v54  ;;  %v3214_v42 = vmax.f32 %v3182_v19, 0.0  ;;  %v3215_v19 = vmax.f32 %v3183_v8, 0.0  ;;  %v6114_v8 = vld [vmem:[%s10702_s12 + $0x100] sm:$0xf] }
 0x354   : > { %3945 = vperm.xlu1 %6431, %v8410_v13   ;;  %v8781_v63 = vpop.permute.xlu1 %3068  ;;  %v6194_v13 = vld [vmem:[%s10702_s12 + $0x1a0] sm:$0xf]  ;;  %v8837_v57 = vpop.f32.mrf.mxu1 }
 0x355   : > { %v6195_v23 = vor.u32 %v6343_v62, %v6194_v13  ;;  %v8817_v13 = vpop.permute.xlu0 %3626  ;;  %v6187_v62 = vor.u32 %v6341_v9, %v6186_v12  ;;  %v3241_v38 = vpack.c.bf16 %v3215_v19, %v3214_v42  ;;  %v6323_v12 = vld [vmem:[%s10702_s12 + $0x104] sm:$0xf0]  ;;  %11064 = vst [vmem:[#allocation97_spill] sm:$0xff] %v8837_v57  ;;  %v2960_v9 = vmul.f32 %v8438_v35, %v8714_v46  ;;  %v6106_v46 = vld [vmem:[%s10702_s12 + $0xf0] sm:$0xf] }
 0x356   : > { %6432 = vset.pattern.permute.xlu2 %v10842_v34  ;;  %v6339_v42 = vld [vmem:[%s10702_s12 + $0x184] sm:$0xf0]  ;;  %v2959_v57 = vmul.f32 %v8438_v35, %v8318_v4  ;;  %v6170_v4 = vld [vmem:[%s10702_s12 + $0x170] sm:$0xf] }
 0x357   : > { %4203 = vperm.xlu2 %6432, %v8652_v30   ;;  %v8799_v39 = vpop.permute.xlu2 %3088  ;;  %4828 = vmatpush.bf16.msrb.mxu1 %v6195_v23  ;;  %v6122_v30 = vld [vmem:[%s10702_s12 + $0x110] sm:$0xf]  ;;  %v6525_v19 = vld [vmem:[%s6937_s23 + $0xc8] sm:$0xff] }
 0x358   : > { %v6123_v56 = vor.u32 %v6325_v61, %v6122_v30  ;;  %v2763_v30 = vmul.f32 %v8429_v1, %v8563_v47  ;;  %v8826_v61 = vpop.f32.mrf.mxu0  ;;  %v6115_v47 = vor.u32 %v6323_v12, %v6114_v8  ;;  %v2799_v8 = vadd.f32 %v8452_v41, %v2764_v14  ;;  %v8865_v14 = vpop.f32.mrf.mxu3 }
 0x359   : > { %11063 = vst [vmem:[#allocation96_spill] sm:$0xff] %v8826_v61 }
 0x35a   : > { %4740 = vmatpush.bf16.msrb.mxu0 %v6123_v56  ;;  %v6178_v56 = vld [vmem:[%s10702_s12 + $0x180] sm:$0xf]  ;;  %v2798_v12 = vadd.f32 %v8452_v41, %v2763_v30  ;;  %11066 = vst [vmem:[#allocation99_spill] sm:$0xff] %v8865_v14 }
 0x35b   : > { %4829 = vmatpush.bf16.msrb.mxu1 %v6187_v62  ;;  %v6179_v61 = vor.u32 %v6339_v42, %v6178_v56  ;;  %v8863_v56 = vpop.f32.mrf.mxu2  ;;  %v8868_v30 = vld [vmem:[%s8170_s21 + $0x40] sm:$0xff]  ;;  %v2992_v42 = vadd.f32 %v2960_v9, %v2799_v8 }
 0x35c   : > { %2915 = vperm.xlu1 %6431, %v6524_v31   ;;  %11065 = vst [vmem:[#allocation98_spill] sm:$0xff] %v8863_v56  ;;  %3666 = vperm.xlu0 %6440, %v8868_v30   ;;  %v2991_v14 = vadd.f32 %v2959_v57, %v2798_v12  ;;  %v8896_v12 = vpop.f32.mrf.mxu1 }
 0x35d   : > { %v8820_v23 = vpop.permute.xlu1 %2887  ;;  %v3185_v21 = vadd.f32 %v3153_v44, %v2992_v42  ;;  %v6335_v44 = vld [vmem:[%s10702_s12 + $0x164] sm:$0xf0]  ;;  %11068 = vst [vmem:[#allocation101_spill] sm:$0xff] %v8896_v12  ;;  %v8906_v42 = vld [vmem:[%s8170_s21 + $0x50] sm:$0xff] }
 0x35e   : > { %4741 = vmatpush.bf16.msrb.mxu0 %v6115_v47  ;;  %v3152_v47 = vmul.f32 %v8463_v49, %v8642_v50  ;;  %v6319_v50 = vld [vmem:[%s10702_s12 + $0xe4] sm:$0xf0] }
 0x35f   : > { %6433 = vset.pattern.permute.xlu2 %v10920_v54  ;;  %4830 = vmatpush.bf16.msrb.mxu1 %v6179_v61  ;;  %v6337_v61 = vld [vmem:[%s10702_s12 + $0x174] sm:$0xf0] }
 0x360   : > { %2919 = vperm.xlu2 %6433, %v6525_v19   ;;  %3381 = vmatmul.bf16.gmra.mxu2 %v3241_v38  ;;  %v8846_v62 = vpop.permute.xlu2 %3925  ;;  %v6171_v27 = vor.u32 %v6337_v61, %v6170_v4  ;;  %v3184_v57 = vadd.f32 %v3152_v47, %v2991_v14  ;;  %v8903_v61 = vld [vmem:[%s10700_s10] sm:$0x77]  ;;  %v2765_v47 = vmul.f32 %v8429_v1, %v8089_v51 }
 0x361   : > { %3470 = vmatmul.bf16.gmra.mxu3 %v3241_v38  ;;  %v6321_v38 = vld [vmem:[%s10702_s12 + $0xf4] sm:$0xf0]  ;;  %v2961_v51 = vmul.f32 %v8438_v35, %v8679_v10  ;;  %v4052_v15 = vperm.slane %v8903_v61, 1  ;;  %v3623_v10 = vld [vmem:[%s10701_s11] sm:$0x3] }
 0x362   : > { %v6107_v40 = vor.u32 %v6321_v38, %v6106_v46  ;;  %v8879_v46 = vpop.permute.xlu0 %3080  ;;  %v6098_v38 = vld [vmem:[%s10702_s12 + $0xe0] sm:$0xf]  ;;  %v3216_v14 = vmax.f32 %v3184_v57, 0.0 }
 0x363   : > { %4831 = vmatpush.bf16.msrb.mxu1 %v6171_v27  ;;  %v6099_v9 = vor.u32 %v6319_v50, %v6098_v38  ;;  %v8893_v27 = vpop.f32.mrf.mxu0  ;;  %v8911_v38 = vpop.f32.mrf.mxu2  ;;  %v3785_v50 = vperm.slane %v8903_v61, 0  ;;  %v8960_v3 = vperm.slane %v4052_v15, 1  ;;  %v6348_v15 = vld [vmem:[%s10702_s12 + $0x1d4] sm:$0xf] }
 0x364   : > { %6434 = vset.pattern.permute.xlu1 %v10842_v34  ;;  %4742 = vmatpush.bf16.msrb.mxu0 %v6107_v40  ;;  %11067 = vst [vmem:[#allocation100_spill] sm:$0xff] %v8893_v27  ;;  %v3217_v40 = vmax.f32 %v3185_v21, 0.0  ;;  %v2766_v21 = vmul.f32 %v8429_v1, %v8592_v52  ;;  %v2962_v52 = vmul.f32 %v8438_v35, %v11071_v59 }
 0x365   : > { %3108 = vperm.xlu1 %6434, %v6524_v31   ;;  %v8877_v56 = vpop.permute.xlu1 %2891  ;;  %v6162_v31 = vld [vmem:[%s10702_s12 + $0x160] sm:$0xf]  ;;  %3676 = vperm.xlu0 %6440, %v8906_v42   ;;  %11069 = vst [vmem:[#allocation102_spill] sm:$0xff] %v8911_v38 }
 0x366   : > { %v6163_v8 = vor.u32 %v6335_v44, %v6162_v31  ;;  %v3786_v31 = vperm.slane %v8903_v61, 4  ;;  %v3242_v44 = vpack.c.bf16 %v3217_v40, %v3216_v14  ;;  %v3154_v14 = vmul.f32 %v8463_v49, %v8781_v63 }
 0x367   : > { %v3155_v63 = vmul.f32 %v8463_v49, %v8698_v24  ;;  %v6332_v24 = vld [vmem:[%s10702_s12 + $0x154] sm:$0xf] }
 0x368   : > { %6435 = vset.pattern.permute.xlu2 %v10842_v34  ;;  %4743 = vmatpush.bf16.msrb.mxu0 %v6099_v9  ;;  %v8942_v38 = vperm.slane %v3786_v31, 0  ;;  %v8958_v31 = vperm.slane %v3623_v10, 1 }
 0x369   : > { %3112 = vperm.xlu2 %6435, %v6525_v19   ;;  %v8898_v4 = vpop.permute.xlu2 %4187  ;;  %4832 = vmatpush.bf16.msrb.mxu1 %v6163_v8  ;;  %v8913_v19 = vpop.f32.mrf.mxu3  ;;  %v2800_v8 = vadd.f32 %v8452_v41, %v2765_v47  ;;  %v8940_v47 = vperm.slane %v3785_v50, 0  ;;  %v8956_v50 = vperm.slane %v3623_v10, 0  ;;  %v6220_v10 = vld [vmem:[%s10702_s12 + $0x1d8] sm:$0xf0] }
 0x36a   : > { %11070 = vst [vmem:[#allocation103_spill] sm:$0xff] %v8913_v19  ;;  %v8923_v57 = vpop.permute.xlu0 %4191  ;;  %v2801_v19 = vadd.f32 %v8452_v41, %v2766_v21  ;;  %v4053_v21 = vperm.slane %v8903_v61, 5  ;;  %v3792_v33 = vmul.f32 %v8942_v38, %v8817_v13 }
 0x36b   : > { %v8933_v40 = vpop.f32.mrf.mxu0  ;;  %v2993_v2 = vadd.f32 %v2961_v51, %v2800_v8  ;;  %v6156_v51 = vld [vmem:[%s10702_s12 + $0x158] sm:$0xf0]  ;;  %v4315_v8 = vperm.slane %v8903_v61, 6 }
 0x36c   : > { %11072 = vst [vmem:[#allocation33_spill] sm:$0xff] %v8933_v40  ;;  %v8951_v40 = vld [vmem:[%s8170_s21 + $0x60] sm:$0xff]  ;;  %v2994_v16 = vadd.f32 %v2962_v52, %v2801_v19  ;;  %v8978_v19 = vperm.slane %v4053_v21, 1 }
 0x36d   : > { %6436 = vset.pattern.permute.xlu1 %v11017_v29  ;;  %3686 = vperm.xlu0 %6440, %v8951_v40   ;;  %v3186_v36 = vadd.f32 %v3154_v14, %v2993_v2  ;;  %v8976_v2 = vpop.f32.mrf.mxu2  ;;  %v6159_v14 = vor.u32 %v6332_v24, %v6156_v51 }
 0x36e   : > { %3661 = vperm.xlu1 %6436, %v8447_v5   ;;  %v8921_v9 = vpop.permute.xlu1 %3084  ;;  %11074 = vst [vmem:[#allocation105_spill] sm:$0xff] %v8976_v2  ;;  %v3187_v26 = vadd.f32 %v3155_v63, %v2994_v16  ;;  %v6223_v2 = vor.u32 %v6348_v15, %v6220_v10  ;;  %v4059_v24 = vmul.f32 %v8978_v19, %v8846_v62  ;;  %v8999_v63 = vperm.slane %v4315_v8, 2 }
 0x36f   : > { %4914 = vmatpush.bf16.msra.mxu2 %v6159_v14  ;;  %v3218_v21 = vmax.f32 %v3186_v36, 0.0 }
 0x370   : > { %3386 = vmatmul.bf16.gmra.mxu2 %v3242_v44  ;;  %5003 = vmatpush.bf16.msra.mxu3 %v6223_v2  ;;  %v3219_v51 = vmax.f32 %v3187_v26, 0.0  ;;  %v9009_v2 = vld [vmem:[%s8170_s21 + $0x48] sm:$0xff]  ;;  %v2964_v26 = vmul.f32 %v8438_v35, %v8820_v23 }
 0x371   : > { %6437 = vset.pattern.permute.xlu2 %v10920_v54  ;;  %3475 = vmatmul.bf16.gmra.mxu3 %v3242_v44  ;;  %v8947_v44 = vpop.f32.mrf.mxu1  ;;  %v8986_v25 = vpop.f32.mrf.mxu3 }
 0x372   : > { %3949 = vperm.xlu2 %6437, %v8765_v55   ;;  %v8945_v59 = vpop.permute.xlu2 %2903  ;;  %11073 = vst [vmem:[#allocation104_spill] sm:$0xff] %v8947_v44  ;;  %v3791_v44 = vmul.f32 %v8940_v47, %v8817_v13  ;;  %v4314_v13 = vperm.slane %v8903_v61, 2  ;;  %v8988_v32 = vpop.permute.xlu0 %4199  ;;  %v3861_v61 = vadd.f32 %v8958_v31, %v3792_v33  ;;  %v3243_v10 = vpack.c.bf16 %v3219_v51, %v3218_v21 }
 0x373   : > { %11075 = vst [vmem:[#allocation106_spill] sm:$0xff] %v8986_v25  ;;  %v9006_v15 = vpop.f32.mrf.mxu0 }
 0x374   : > { %v3860_v53 = vadd.f32 %v8956_v50, %v3791_v44  ;;  %v8997_v16 = vperm.slane %v4314_v13, 2  ;;  %v11076_v44 = vld [vmem:[#allocation42_spill] sm:$0xff]  ;;  %v4123_v25 = vadd.f32 %v4059_v24, %v3861_v61  ;;  %v11081_v24 = vld [vmem:[#allocation75_spill] sm:$0xff] }
 0x375   : > { %v2768_v33 = vmul.f32 %v8429_v1, %v11076_v44  ;;  %11077 = vst [vmem:[#allocation42_spill] sm:$0xff] %v9006_v15  ;;  %6458 = vset.pattern.permute.xlu0 %v10842_v34  ;;  %v6526_v15 = vld [vmem:[%s6937_s23 + $0xd0] sm:$0xff] }
 0x376   : > { %6438 = vset.pattern.permute.xlu1 %v10920_v54  ;;  %4223 = vperm.xlu0 %6458, %v9009_v2   ;;  %v4320_v18 = vmul.f32 %v8997_v16, %v8898_v4  ;;  %v4322_v12 = vmul.f32 %v8997_v16, %v8923_v57 }
 0x377   : > { %3953 = vperm.xlu1 %6438, %v8447_v5   ;;  %v3632_v52 = vpop.permute.xlu1 %3631  ;;  %v4058_v5 = vmul.f32 %v8960_v3, %v8846_v62 }
 0x378   : > { %v3793_v13 = vmul.f32 %v8940_v47, %v3632_v52  ;;  %v3794_v8 = vmul.f32 %v8942_v38, %v3632_v52  ;;  %v2803_v52 = vadd.f32 %v8452_v41, %v2768_v33  ;;  %v2963_v33 = vmul.f32 %v8438_v35, %v11081_v24 }
 0x379   : > { %v9012_v62 = vpop.f32.mrf.mxu1  ;;  %v4122_v44 = vadd.f32 %v4058_v5, %v3860_v53  ;;  %v9031_v53 = vpop.f32.mrf.mxu2 }
 0x37a   : > { %6439 = vset.pattern.permute.xlu2 %v10842_v34  ;;  %11078 = vst [vmem:[#allocation107_spill] sm:$0xff] %v9012_v62  ;;  %v4321_v62 = vmul.f32 %v8999_v63, %v8898_v4  ;;  %v3862_v21 = vadd.f32 %v8956_v50, %v3793_v13  ;;  %v3863_v61 = vadd.f32 %v8958_v31, %v3794_v8  ;;  %v9044_v13 = vpop.permute.xlu0 %4207 }
 0x37b   : > { %4211 = vperm.xlu2 %6439, %v8765_v55   ;;  %v9002_v36 = vpop.permute.xlu2 %3096  ;;  %v11079_v55 = vld [vmem:[#allocation47_spill] sm:$0xff]  ;;  %v2996_v27 = vadd.f32 %v2964_v26, %v2803_v52  ;;  %v4384_v8 = vadd.f32 %v4320_v18, %v4122_v44 }
 0x37c   : > { %v2767_v14 = vmul.f32 %v8429_v1, %v11079_v55  ;;  %v4323_v55 = vmul.f32 %v8999_v63, %v8923_v57  ;;  %11080 = vst [vmem:[#allocation47_spill] sm:$0xff] %v9031_v53  ;;  %v9040_v57 = vpop.f32.mrf.mxu3  ;;  %v3157_v53 = vmul.f32 %v8463_v49, %v8879_v46  ;;  %v4385_v17 = vadd.f32 %v4321_v62, %v4123_v25 }
 0x37d   : > { %11082 = vst [vmem:[#allocation75_spill] sm:$0xff] %v9040_v57  ;;  %v9052_v57 = vpop.f32.mrf.mxu0  ;;  %v4448_v18 = vmax.f32 %v4384_v8, 0.0 }
 0x37e   : > { %v2802_v51 = vadd.f32 %v8452_v41, %v2767_v14  ;;  %11083 = vst [vmem:[#allocation108_spill] sm:$0xff] %v9052_v57  ;;  %v3189_v46 = vadd.f32 %v3157_v53, %v2996_v27  ;;  %v4449_v25 = vmax.f32 %v4385_v17, 0.0  ;;  %v2769_v27 = vmul.f32 %v8429_v1, %v8629_v58 }
 0x37f   : > { %2923 = vperm.xlu1 %6438, %v6526_v15  }
 0x380   : > { %v3930_v23 = vpop.permute.xlu1 %3929  ;;  %3391 = vmatmul.bf16.gmra.mxu2 %v3243_v10  ;;  %v2995_v52 = vadd.f32 %v2963_v33, %v2802_v51  ;;  %v2804_v51 = vadd.f32 %v8452_v41, %v2769_v27  ;;  %v2966_v41 = vmul.f32 %v8438_v35, %v8754_v60 }
 0x381   : > { %v4060_v4 = vmul.f32 %v8960_v3, %v3930_v23  ;;  %v4061_v5 = vmul.f32 %v8978_v19, %v3930_v23  ;;  %3480 = vmatmul.bf16.gmra.mxu3 %v3243_v10  ;;  %v3156_v10 = vmul.f32 %v8463_v49, %v8726_v7  ;;  %v6527_v23 = vld [vmem:[%s6937_s23 + $0xd8] sm:$0xff]  ;;  %v9054_v48 = vpop.f32.mrf.mxu1 }
 0x382   : > { %11084 = vst [vmem:[#allocation109_spill] sm:$0xff] %v9054_v48 }
 0x383   : > { %v4124_v20 = vadd.f32 %v4060_v4, %v3862_v21  ;;  %v4125_v11 = vadd.f32 %v4061_v5, %v3863_v61  ;;  %6441 = vset.pattern.permute.xlu2 %v10920_v54  ;;  %v3188_v21 = vadd.f32 %v3156_v10, %v2995_v52  ;;  %v11089_v5 = vld [vmem:[#allocation55_spill] sm:$0xff]  ;;  %v2965_v10 = vmul.f32 %v8438_v35, %v8877_v56 }
 0x384   : > { %2927 = vperm.xlu2 %6441, %v6527_v23   ;;  %v9050_v14 = vpop.permute.xlu2 %3933  ;;  %v9067_v17 = vpop.f32.mrf.mxu3  ;;  %v2770_v33 = vmul.f32 %v8429_v1, %v11089_v5  ;;  %v3158_v56 = vmul.f32 %v8463_v49, %v8921_v9 }
 0x385   : > { %v4386_v24 = vadd.f32 %v4322_v12, %v4124_v20  ;;  %v4387_v26 = vadd.f32 %v4323_v55, %v4125_v11  ;;  %v3221_v11 = vmax.f32 %v3189_v46, 0.0  ;;  %v9063_v12 = vpop.f32.mrf.mxu2  ;;  %11088 = vst [vmem:[#allocation113_spill] sm:$0xff] %v9067_v17  ;;  %v3220_v55 = vmax.f32 %v3188_v21, 0.0  ;;  %v9079_v8 = vpop.f32.mrf.mxu0  ;;  %v11092_v46 = vld [vmem:[#allocation73_spill] sm:$0xff] }
 0x386   : > { %11087 = vst [vmem:[#allocation112_spill] sm:$0xff] %v9063_v12  ;;  %v2997_v27 = vadd.f32 %v2965_v10, %v2804_v51 }
 0x387   : > { %v4450_v62 = vmax.f32 %v4386_v24, 0.0  ;;  %v4451_v44 = vmax.f32 %v4387_v26, 0.0  ;;  %6442 = vset.pattern.permute.xlu1 %v10842_v34  ;;  %v3244_v4 = vpack.c.bf16 %v3221_v11, %v3220_v55  ;;  %v11090_v24 = vld [vmem:[#allocation68_spill] sm:$0xff]  ;;  %v11091_v26 = vld [vmem:[#allocation27_spill] sm:$0xff]  ;;  %v3159_v11 = vmul.f32 %v8463_v49, %v8799_v39 }
 0x388   : > { %3116 = vperm.xlu1 %6442, %v6526_v15   ;;  %v9057_v7 = vpop.permute.xlu1 %2899  ;;  %v9072_v15 = vpop.permute.xlu0 %4215  ;;  %v2388_v52 = vadd.f32 %v11091_v26, %v11090_v24  ;;  %v3190_v24 = vadd.f32 %v3158_v56, %v2997_v27  ;;  %v6346_v56 = vld [vmem:[%s10702_s12 + $0x1c4] sm:$0xf] }
 0x389   : > { %v9059_v61 = vpack.c.bf16 %v4450_v62, %v4448_v18  ;;  %v9061_v20 = vpack.c.bf16 %v4451_v44, %v4449_v25  ;;  %v9084_v58 = vpop.f32.mrf.mxu1  ;;  %v11093_v18 = vld [vmem:[#allocation21_spill] sm:$0xff]  ;;  %v9100_v44 = vld [vmem:[%s10699_s9] ss:$0 sm:$0xff] }
 0x38a   : > { %v2477_v25 = vadd.f32 %v11093_v18, %v11092_v46  ;;  %v2805_v21 = vadd.f32 %v9100_v44, %v2770_v33  ;;  %v3222_v18 = vmax.f32 %v3190_v24, 0.0 }
 0x38b   : > { %11085 = vst [vmem:[#allocation110_spill] sm:$0xff] %v9059_v61  ;;  %4744 = vmatmul.bf16.vlgmr.msrb.gmra.mxu0 %v9059_v61  ;;  %4833 = vmatmul.bf16.vlgmr.msrb.gmra.mxu1 %v9061_v20 }
 0x38c   : > { %11086 = vst [vmem:[#allocation111_spill] sm:$0xff] %v9061_v20  ;;  %6443 = vset.pattern.permute.xlu2 %v10842_v34  ;;  %v2998_v5 = vadd.f32 %v2966_v41, %v2805_v21  ;;  %v6148_v41 = vld [vmem:[%s10702_s12 + $0x148] sm:$0xf0] }
 0x38d   : > { %3120 = vperm.xlu2 %6443, %v6527_v23   ;;  %v9074_v53 = vpop.permute.xlu2 %4195  ;;  %v9129_v46 = vpop.f32.mrf.mxu0  ;;  %v6212_v21 = vld [vmem:[%s10702_s12 + $0x1c8] sm:$0xf0] }
 0x38e   : > { %v3191_v39 = vadd.f32 %v3159_v11, %v2998_v5  ;;  %11095 = vst [vmem:[#allocation68_spill] sm:$0xff] %v9129_v46  ;;  %v2772_v11 = vmul.f32 %v8429_v1, %v8681_v45  ;;  %v6215_v5 = vor.u32 %v6346_v56, %v6212_v21 }
 0x390   : > { %6444 = vset.pattern.permute.xlu1 %v11017_v29  ;;  %3396 = vmatmul.bf16.gmra.mxu2 %v3244_v4  ;;  %v3637_v26 = vpop.permute.xlu0 %3636  ;;  %v3223_v24 = vmax.f32 %v3191_v39, 0.0  ;;  %v2807_v21 = vadd.f32 %v9100_v44, %v2772_v11  ;;  %v2968_v39 = vmul.f32 %v8438_v35, %v8945_v59  ;;  %v4325_v59 = vmul.f32 %v8999_v63, %v9074_v53 }
 0x391   : > { %3671 = vperm.xlu1 %6444, %v9009_v2   ;;  %v9087_v23 = vpop.permute.xlu1 %3092  ;;  %3485 = vmatmul.bf16.gmra.mxu3 %v3244_v4  ;;  %v9108_v4 = vld [vmem:[%s8170_s21 + $0x58] sm:$0xff]  ;;  %v3795_v51 = vmul.f32 %v8940_v47, %v3637_v26  ;;  %v3796_v10 = vmul.f32 %v8942_v38, %v3637_v26  ;;  %v9137_v27 = vpop.f32.mrf.mxu1  ;;  %v11097_v26 = vld [vmem:[#allocation44_spill] sm:$0xff] }
 0x392   : > { %4231 = vperm.xlu0 %6458, %v9108_v4   ;;  %11096 = vst [vmem:[#allocation27_spill] sm:$0xff] %v9137_v27  ;;  %v2771_v46 = vmul.f32 %v8429_v1, %v11097_v26  ;;  %5004 = vmatpush.bf16.msra.mxu3 %v6215_v5  ;;  %v3245_v56 = vpack.c.bf16 %v3223_v24, %v3222_v18  ;;  %v11099_v26 = vld [vmem:[#allocation8_spill] sm:$0xff]  ;;  %v11102_v27 = vld [vmem:[#allocation14_spill] sm:$0xff] }
 0x393   : > { %v3357_v62 = vpop.f32.mrf.mxu2  ;;  %v3446_v60 = vpop.f32.mrf.mxu3  ;;  %v3864_v45 = vadd.f32 %v8956_v50, %v3795_v51  ;;  %v4324_v18 = vmul.f32 %v8997_v16, %v9074_v53  ;;  %v3000_v17 = vadd.f32 %v2968_v39, %v2807_v21  ;;  %v3161_v53 = vmul.f32 %v8463_v49, %v9002_v36 }
 0x394   : > { %v9105_v55 = vadd.f32 %v3357_v62, %v2388_v52  ;;  %v9111_v9 = vadd.f32 %v3446_v60, %v2477_v25  ;;  %v6330_v52 = vld [vmem:[%s10702_s12 + $0x144] sm:$0xf] }
 0x395   : > { %6445 = vset.pattern.permute.xlu2 %v10920_v54  ;;  %v6151_v62 = vor.u32 %v6330_v52, %v6148_v41  ;;  %v4063_v52 = vmul.f32 %v8978_v19, %v9050_v14  ;;  %v3865_v41 = vadd.f32 %v8958_v31, %v3796_v10 }
 0x396   : > { %11094 = vst [vmem:[#allocation55_spill] sm:$0xff] %v9111_v9  ;;  %3957 = vperm.xlu2 %6445, %v8868_v30   ;;  %v9115_v33 = vpop.permute.xlu2 %2911  ;;  %v6529_v9 = vld [vmem:[%s6937_s23 + $0xe0] sm:$0xff] }
 0x397   : > { %4915 = vmatpush.bf16.msra.mxu2 %v6151_v62  ;;  %v2967_v62 = vmul.f32 %v8438_v35, %v9057_v7  ;;  %v4127_v7 = vadd.f32 %v4063_v52, %v3865_v41  ;;  %v9180_v41 = vpop.f32.mrf.mxu0 }
 0x398   : > { %11103 = vst [vmem:[#allocation21_spill] sm:$0xff] %v9180_v41  ;;  %v6530_v41 = vld [vmem:[%s6937_s23 + $0xe8] sm:$0xff] }
 0x399   : > { %6446 = vset.pattern.permute.xlu1 %v10920_v54  ;;  %v9186_v39 = vpop.f32.mrf.mxu1 }
 0x39a   : > { %3961 = vperm.xlu1 %6446, %v9009_v2   ;;  %v3642_v25 = vpop.permute.xlu1 %3641  ;;  %v4062_v2 = vmul.f32 %v8960_v3, %v9050_v14  ;;  %v2806_v14 = vadd.f32 %v9100_v44, %v2771_v46  ;;  %v11101_v46 = vld [vmem:[#allocation79_spill] sm:$0xff]  ;;  %11104 = vst [vmem:[#allocation44_spill] sm:$0xff] %v9186_v39 }
 0x39b   : > { %v9139_v60 = vpop.f32.mrf.mxu2  ;;  %v9143_v48 = vpop.f32.mrf.mxu3  ;;  %v3797_v51 = vmul.f32 %v8940_v47, %v3642_v25  ;;  %v3798_v10 = vmul.f32 %v8942_v38, %v3642_v25  ;;  %v2482_v57 = vadd.f32 %v11102_v27, %v11101_v46  ;;  %v4326_v25 = vmul.f32 %v8997_v16, %v8988_v32 }
 0x39c   : > { %11098 = vst [vmem:[#allocation73_spill] sm:$0xff] %v9143_v48  ;;  %v4126_v11 = vadd.f32 %v4062_v2, %v3864_v45  ;;  %v3160_v48 = vmul.f32 %v8463_v49, %v9087_v23  ;;  %v4327_v2 = vmul.f32 %v8999_v63, %v8988_v32  ;;  %v2999_v52 = vadd.f32 %v2967_v62, %v2806_v14 }
 0x39d   : > { %v3866_v27 = vadd.f32 %v8956_v50, %v3797_v51  ;;  %v4389_v62 = vadd.f32 %v4325_v59, %v4127_v7  ;;  %v3193_v51 = vadd.f32 %v3161_v53, %v3000_v17 }
 0x39e   : > { %6447 = vset.pattern.permute.xlu2 %v10842_v34  ;;  %v4388_v32 = vadd.f32 %v4324_v18, %v4126_v11  ;;  %v3192_v14 = vadd.f32 %v3160_v48, %v2999_v52 }
 0x39f   : > { %4219 = vperm.xlu2 %6447, %v8868_v30   ;;  %v9161_v5 = vpop.permute.xlu2 %3104  ;;  %v11100_v30 = vld [vmem:[#allocation30_spill] sm:$0xff]  ;;  %v4453_v59 = vmax.f32 %v4389_v62, 0.0 }
 0x3a0   : > { %3401 = vmatmul.bf16.gmra.mxu2 %v3245_v56  ;;  %v2393_v24 = vadd.f32 %v11100_v30, %v11099_v26  ;;  %v4452_v39 = vmax.f32 %v4388_v32, 0.0  ;;  %v11111_v32 = vld [vmem:[#allocation7_spill] sm:$0xff]  ;;  %v11112_v62 = vld [vmem:[#allocation22_spill] sm:$0xff] }
 0x3a1   : > { %3490 = vmatmul.bf16.gmra.mxu3 %v3245_v56  ;;  %v3867_v56 = vadd.f32 %v8958_v31, %v3798_v10 }
 0x3a2   : > { %2931 = vperm.xlu1 %6446, %v6529_v9  }
 0x3a3   : > { %v3938_v45 = vpop.permute.xlu1 %3937  ;;  %v3362_v21 = vpop.f32.mrf.mxu2 }
 0x3a4   : > { %v4064_v26 = vmul.f32 %v8960_v3, %v3938_v45  ;;  %v4065_v23 = vmul.f32 %v8978_v19, %v3938_v45  ;;  %v9188_v36 = vadd.f32 %v3362_v21, %v2393_v24  ;;  %v3451_v30 = vpop.f32.mrf.mxu3  ;;  %v3224_v24 = vmax.f32 %v3192_v14, 0.0 }
 0x3a5   : > { %v9190_v20 = vadd.f32 %v3451_v30, %v2482_v57  ;;  %v3225_v57 = vmax.f32 %v3193_v51, 0.0  ;;  %v2970_v21 = vmul.f32 %v8438_v35, %v9115_v33  ;;  %v2398_v14 = vadd.f32 %v11112_v62, %v11111_v32  ;;  %v11114_v51 = vld [vmem:[#allocation16_spill] sm:$0xff] }
 0x3a6   : > { %v4128_v46 = vadd.f32 %v4064_v26, %v3866_v27  ;;  %v4129_v12 = vadd.f32 %v4065_v23, %v3867_v56  ;;  %v11110_v27 = vld [vmem:[#allocation26_spill] sm:$0xff]  ;;  %v6328_v33 = vld [vmem:[%s10702_s12 + $0x134] sm:$0xf] }
 0x3a7   : > { %11105 = vst [vmem:[#allocation8_spill] sm:$0xff] %v9190_v20  ;;  %6448 = vset.pattern.permute.xlu2 %v10920_v54  ;;  %v3246_v53 = vpack.c.bf16 %v3225_v57, %v3224_v24  ;;  %v2774_v56 = vmul.f32 %v8429_v1, %v11110_v27 }
 0x3a8   : > { %v4390_v10 = vadd.f32 %v4326_v25, %v4128_v46  ;;  %v4391_v61 = vadd.f32 %v4327_v2, %v4129_v12  ;;  %2935 = vperm.xlu2 %6448, %v6530_v41   ;;  %v9194_v45 = vpop.permute.xlu2 %3941  ;;  %v9205_v25 = vpop.f32.mrf.mxu0  ;;  %v11108_v2 = vld [vmem:[#allocation23_spill] sm:$0xff]  ;;  %v11113_v46 = vld [vmem:[#allocation54_spill] sm:$0xff] }
 0x3a9   : > { %11107 = vst [vmem:[#allocation79_spill] sm:$0xff] %v9205_v25  ;;  %v2809_v30 = vadd.f32 %v9100_v44, %v2774_v56 }
 0x3aa   : > { %6449 = vset.pattern.permute.xlu1 %v10842_v34  ;;  %v4454_v18 = vmax.f32 %v4390_v10, 0.0  ;;  %v4455_v48 = vmax.f32 %v4391_v61, 0.0  ;;  %v2773_v61 = vmul.f32 %v8429_v1, %v11108_v2  ;;  %v2487_v10 = vadd.f32 %v11114_v51, %v11113_v46  ;;  %v6204_v2 = vld [vmem:[%s10702_s12 + $0x1b8] sm:$0xf0]  ;;  %v9247_v46 = vld [vmem:[%s8170_s21 + $0x68] sm:$0xff] }
 0x3ab   : > { %3124 = vperm.xlu1 %6449, %v6529_v9   ;;  %v2908_v11 = vpop.permute.xlu1 %2907  ;;  %v9197_v7 = vpop.f32.mrf.mxu2  ;;  %4239 = vperm.xlu0 %6458, %v9247_v46  }
 0x3ac   : > { %v9199_v52 = vpack.c.bf16 %v4454_v18, %v4452_v39  ;;  %v9201_v17 = vpack.c.bf16 %v4455_v48, %v4453_v59  ;;  %v9203_v12 = vpop.f32.mrf.mxu3  ;;  %v9211_v9 = vpop.f32.mrf.mxu1  ;;  %v2969_v26 = vmul.f32 %v8438_v35, %v2908_v11  ;;  %v2808_v39 = vadd.f32 %v9100_v44, %v2773_v61  ;;  %v6140_v18 = vld [vmem:[%s10702_s12 + $0x138] sm:$0xf0]  ;;  %v6344_v59 = vld [vmem:[%s10702_s12 + $0x1b4] sm:$0xf] }
 0x3ad   : > { %11106 = vst [vmem:[#allocation30_spill] sm:$0xff] %v9203_v12  ;;  %v3002_v61 = vadd.f32 %v2970_v21, %v2809_v30  ;;  %v6207_v62 = vor.u32 %v6344_v59, %v6204_v2  ;;  %v9300_v12 = vld [vmem:[%s8170_s21 + $0x70] sm:$0xff] }
 0x3ae   : > { %4749 = vmatmul.bf16.gmra.mxu0 %v9199_v52  ;;  %4838 = vmatmul.bf16.gmra.mxu1 %v9201_v17  ;;  %11109 = vst [vmem:[#allocation14_spill] sm:$0xff] %v9211_v9  ;;  %v3001_v48 = vadd.f32 %v2969_v26, %v2808_v39 }
 0x3af   : > { %5005 = vmatpush.bf16.msra.mxu3 %v6207_v62  ;;  %v11119_v62 = vld [vmem:[#allocation69_spill] sm:$0xff] }
 0x3b0   : > { %6450 = vset.pattern.permute.xlu2 %v10842_v34  ;;  %3406 = vmatmul.bf16.gmra.mxu2 %v3246_v53  ;;  %v9249_v26 = vpop.f32.mrf.mxu0 }
 0x3b1   : > { %3128 = vperm.xlu2 %6450, %v6530_v41   ;;  %3495 = vmatmul.bf16.gmra.mxu3 %v3246_v53  ;;  %v4204_v23 = vpop.permute.xlu2 %4203  ;;  %v3163_v41 = vmul.f32 %v8463_v49, %v9161_v5  ;;  %v6143_v53 = vor.u32 %v6328_v33, %v6140_v18 }
 0x3b3   : > { %6451 = vset.pattern.permute.xlu1 %v11017_v29  ;;  %v3367_v5 = vpop.f32.mrf.mxu2  ;;  %4916 = vmatpush.bf16.msra.mxu2 %v6143_v53  ;;  %v3195_v39 = vadd.f32 %v3163_v41, %v3002_v61 }
 0x3b4   : > { %3681 = vperm.xlu1 %6451, %v9108_v4   ;;  %v3101_v24 = vpop.permute.xlu1 %3100  ;;  %v3456_v57 = vpop.f32.mrf.mxu3  ;;  %v9242_v27 = vadd.f32 %v3367_v5, %v2398_v14  ;;  %v4067_v5 = vmul.f32 %v8978_v19, %v9194_v45  ;;  %4243 = vperm.xlu0 %6458, %v9300_v12  }
 0x3b5   : > { %v3162_v11 = vmul.f32 %v8463_v49, %v3101_v24  ;;  %v9244_v56 = vadd.f32 %v3456_v57, %v2487_v10  ;;  %v9252_v51 = vpop.f32.mrf.mxu1  ;;  %v3647_v14 = vpop.permute.xlu0 %3646  ;;  %v3227_v10 = vmax.f32 %v3195_v39, 0.0 }
 0x3b6   : > { %v3799_v41 = vmul.f32 %v8940_v47, %v3647_v14  ;;  %v3800_v18 = vmul.f32 %v8942_v38, %v3647_v14 }
 0x3b7   : > { %11115 = vst [vmem:[#allocation23_spill] sm:$0xff] %v9244_v56  ;;  %v3194_v32 = vadd.f32 %v3162_v11, %v3001_v48  ;;  %v4066_v11 = vmul.f32 %v8960_v3, %v9194_v45  ;;  %v11120_v45 = vld [vmem:[#allocation9_spill] sm:$0xff] }
 0x3b8   : > { %v3868_v57 = vadd.f32 %v8956_v50, %v3799_v41  ;;  %v3869_v53 = vadd.f32 %v8958_v31, %v3800_v18  ;;  %v4328_v18 = vmul.f32 %v8997_v16, %v4204_v23 }
 0x3b9   : > { %6452 = vset.pattern.permute.xlu2 %v10920_v54  ;;  %v3226_v21 = vmax.f32 %v3194_v32, 0.0  ;;  %v11118_v32 = vld [vmem:[#allocation56_spill] sm:$0xff] }
 0x3ba   : > { %3965 = vperm.xlu2 %6452, %v8906_v42   ;;  %v9256_v30 = vpop.permute.xlu2 %2919  ;;  %v2403_v39 = vadd.f32 %v11119_v62, %v11118_v32  ;;  %v4131_v9 = vadd.f32 %v4067_v5, %v3869_v53  ;;  %v4331_v32 = vmul.f32 %v8999_v63, %v9044_v13 }
 0x3bb   : > { %v9259_v24 = vpop.f32.mrf.mxu2  ;;  %v3247_v48 = vpack.c.bf16 %v3227_v10, %v3226_v21  ;;  %v11121_v21 = vld [vmem:[#allocation66_spill] sm:$0xff] }
 0x3bc   : > { %6453 = vset.pattern.permute.xlu1 %v10920_v54  ;;  %v9261_v33 = vpop.f32.mrf.mxu3  ;;  %v2492_v14 = vadd.f32 %v11121_v21, %v11120_v45  ;;  %6469 = vset.pattern.permute.xlu0 %v11017_v29 }
 0x3bd   : > { %11116 = vst [vmem:[#allocation26_spill] sm:$0xff] %v9261_v33  ;;  %3969 = vperm.xlu1 %6453, %v9108_v4   ;;  %v3652_v59 = vpop.permute.xlu1 %3651  ;;  %v9272_v4 = vpop.f32.mrf.mxu0 }
 0x3be   : > { %11117 = vst [vmem:[#allocation7_spill] sm:$0xff] %v9272_v4  ;;  %v3801_v2 = vmul.f32 %v8940_v47, %v3652_v59  ;;  %v3802_v61 = vmul.f32 %v8942_v38, %v3652_v59  ;;  %v9282_v10 = vpop.f32.mrf.mxu1  ;;  %v4130_v4 = vadd.f32 %v4066_v11, %v3868_v57  ;;  %v6531_v59 = vld [vmem:[%s6937_s23 + $0xf0] sm:$0xff] }
 0x3bf   : > { %11122 = vst [vmem:[#allocation22_spill] sm:$0xff] %v9282_v10 }
 0x3c0   : > { %3411 = vmatmul.bf16.gmra.mxu2 %v3247_v48  ;;  %v3871_v11 = vadd.f32 %v8958_v31, %v3802_v61  ;;  %v4392_v56 = vadd.f32 %v4328_v18, %v4130_v4 }
 0x3c1   : > { %3500 = vmatmul.bf16.gmra.mxu3 %v3247_v48  ;;  %v4329_v48 = vmul.f32 %v8999_v63, %v4204_v23  ;;  %v3870_v23 = vadd.f32 %v8956_v50, %v3801_v2  ;;  %v6532_v2 = vld [vmem:[%s6937_s23 + $0xf8] sm:$0xff] }
 0x3c2   : > { %6454 = vset.pattern.permute.xlu2 %v10842_v34 }
 0x3c3   : > { %4227 = vperm.xlu2 %6454, %v8906_v42   ;;  %v3113_v41 = vpop.permute.xlu2 %3112  ;;  %v3372_v25 = vpop.f32.mrf.mxu2  ;;  %v4330_v42 = vmul.f32 %v8997_v16, %v9044_v13  ;;  %v4393_v20 = vadd.f32 %v4329_v48, %v4131_v9  ;;  %v4456_v9 = vmax.f32 %v4392_v56, 0.0  ;;  %v2775_v56 = vmul.f32 %v8429_v1, %v8703_v6 }
 0x3c4   : > { %v3461_v33 = vpop.f32.mrf.mxu3  ;;  %v9291_v62 = vadd.f32 %v3372_v25, %v2403_v39 }
 0x3c5   : > { %2939 = vperm.xlu1 %6453, %v6531_v59   ;;  %v9293_v45 = vadd.f32 %v3461_v33, %v2492_v14  ;;  %v9304_v33 = vpop.f32.mrf.mxu0  ;;  %v4457_v18 = vmax.f32 %v4393_v20, 0.0  ;;  %v2972_v20 = vmul.f32 %v8438_v35, %v9256_v30  ;;  %v2810_v30 = vadd.f32 %v9100_v44, %v2775_v56  ;;  %v6196_v56 = vld [vmem:[%s10702_s12 + $0x1a8] sm:$0xf0] }
 0x3c6   : > { %v3946_v21 = vpop.permute.xlu1 %3945  ;;  %11124 = vst [vmem:[#allocation16_spill] sm:$0xff] %v9304_v33 }
 0x3c7   : > { %11123 = vst [vmem:[#allocation54_spill] sm:$0xff] %v9293_v45  ;;  %v4068_v5 = vmul.f32 %v8960_v3, %v3946_v21  ;;  %v4069_v57 = vmul.f32 %v8978_v19, %v3946_v21 }
 0x3c9   : > { %v4132_v53 = vadd.f32 %v4068_v5, %v3870_v23  ;;  %v4133_v10 = vadd.f32 %v4069_v57, %v3871_v11  ;;  %v11131_v5 = vld [vmem:[#allocation51_spill] sm:$0xff] }
 0x3ca   : > { %v2408_v57 = vadd.f32 %v11131_v5, %v8565_v37 }
 0x3cb   : > { %v4394_v13 = vadd.f32 %v4330_v42, %v4132_v53  ;;  %v4395_v25 = vadd.f32 %v4331_v32, %v4133_v10  ;;  %6455 = vset.pattern.permute.xlu2 %v10920_v54  ;;  %v9309_v39 = vpop.f32.mrf.mxu2  ;;  %v9314_v42 = vpop.f32.mrf.mxu1  ;;  %v11128_v32 = vld [vmem:[#allocation4_spill] sm:$0xff]  ;;  %v11132_v53 = vld [vmem:[#allocation70_spill] sm:$0xff] }
 0x3cc   : > { %2943 = vperm.xlu2 %6455, %v6532_v2   ;;  %v9307_v61 = vpop.permute.xlu2 %3949  ;;  %11125 = vst [vmem:[#allocation56_spill] sm:$0xff] %v9309_v39  ;;  %v9311_v14 = vpop.f32.mrf.mxu3  ;;  %v2776_v21 = vmul.f32 %v8429_v1, %v11128_v32 }
 0x3cd   : > { %11126 = vst [vmem:[#allocation69_spill] sm:$0xff] %v9311_v14  ;;  %6456 = vset.pattern.permute.xlu1 %v10842_v34  ;;  %v4458_v4 = vmax.f32 %v4394_v13, 0.0  ;;  %v4459_v48 = vmax.f32 %v4395_v25, 0.0  ;;  %v2497_v13 = vadd.f32 %v11132_v53, %v8568_v28  ;;  %v3165_v25 = vmul.f32 %v8463_v49, %v3113_v41  ;;  %v6326_v28 = vld [vmem:[%s10702_s12 + $0x124] sm:$0xf]  ;;  %v3657_v14 = vpop.permute.xlu0 %3656 }
 0x3ce   : > { %11127 = vst [vmem:[#allocation9_spill] sm:$0xff] %v9314_v42  ;;  %3132 = vperm.xlu1 %6456, %v6531_v59   ;;  %v2916_v10 = vpop.permute.xlu1 %2915  ;;  %v2811_v59 = vadd.f32 %v9100_v44, %v2776_v21  ;;  %v6132_v41 = vld [vmem:[%s10702_s12 + $0x128] sm:$0xf0] }
 0x3cf   : > { %v9318_v23 = vpack.c.bf16 %v4458_v4, %v4456_v9  ;;  %v9320_v11 = vpack.c.bf16 %v4459_v48, %v4457_v18  ;;  %v2971_v9 = vmul.f32 %v8438_v35, %v2916_v10  ;;  %v6135_v21 = vor.u32 %v6326_v28, %v6132_v41 }
 0x3d0   : > { %v3004_v18 = vadd.f32 %v2972_v20, %v2811_v59  ;;  %v9356_v20 = vpop.f32.mrf.mxu0 }
 0x3d1   : > { %11129 = vst [vmem:[#allocation66_spill] sm:$0xff] %v9318_v23  ;;  %4754 = vmatmul.bf16.gmra.mxu0 %v9318_v23  ;;  %4843 = vmatmul.bf16.gmra.mxu1 %v9320_v11 }
 0x3d2   : > { %11130 = vst [vmem:[#allocation4_spill] sm:$0xff] %v9320_v11  ;;  %v3197_v5 = vadd.f32 %v3165_v25, %v3004_v18  ;;  %4917 = vmatpush.bf16.msra.mxu2 %v6135_v21  ;;  %v3804_v18 = vmul.f32 %v8942_v38, %v3657_v14  ;;  %v11141_v21 = vld [vmem:[#allocation45_spill] sm:$0xff] }
 0x3d3   : > { %v3377_v6 = vpop.f32.mrf.mxu2  ;;  %11135 = vst [vmem:[#allocation114_spill] sm:$0xff] %v9356_v20  ;;  %v9358_v59 = vpop.f32.mrf.mxu1 }
 0x3d4   : > { %6457 = vset.pattern.permute.xlu2 %v10842_v34  ;;  %v3466_v4 = vpop.f32.mrf.mxu3  ;;  %v9338_v48 = vadd.f32 %v3377_v6, %v2408_v57  ;;  %11136 = vst [vmem:[#allocation115_spill] sm:$0xff] %v9358_v59  ;;  %v3003_v57 = vadd.f32 %v2971_v9, %v2810_v30  ;;  %v3803_v30 = vmul.f32 %v8940_v47, %v3657_v14 }
 0x3d5   : > { %3136 = vperm.xlu2 %6457, %v6532_v2   ;;  %v9340_v32 = vadd.f32 %v3466_v4, %v2497_v13  ;;  %v4212_v37 = vpop.permute.xlu2 %4211  ;;  %v6342_v2 = vld [vmem:[%s10702_s12 + $0x1a4] sm:$0xf]  ;;  %v3229_v4 = vmax.f32 %v3197_v5, 0.0 }
 0x3d6   : > { %11133 = vst [vmem:[#allocation51_spill] sm:$0xff] %v9338_v48  ;;  %6459 = vset.pattern.permute.xlu1 %v11017_v29  ;;  %v6199_v13 = vor.u32 %v6342_v2, %v6196_v56  ;;  %v2413_v56 = vadd.f32 %v11141_v21, %v8649_v0  ;;  %v3872_v14 = vadd.f32 %v8956_v50, %v3803_v30 }
 0x3d7   : > { %11134 = vst [vmem:[#allocation70_spill] sm:$0xff] %v9340_v32  ;;  %3691 = vperm.xlu1 %6459, %v9247_v46   ;;  %v3109_v10 = vpop.permute.xlu1 %3108  ;;  %v4333_v30 = vmul.f32 %v8999_v63, %v4212_v37 }
 0x3d8   : > { %v3164_v53 = vmul.f32 %v8463_v49, %v3109_v10  ;;  %5006 = vmatpush.bf16.msra.mxu3 %v6199_v13  ;;  %v9373_v2 = vpop.f32.mrf.mxu0 }
 0x3d9   : > { %11139 = vst [vmem:[#allocation118_spill] sm:$0xff] %v9373_v2 }
 0x3da   : > { %v3196_v6 = vadd.f32 %v3164_v53, %v3003_v57  ;;  %v4071_v57 = vmul.f32 %v8978_v19, %v9307_v61  ;;  %v3873_v53 = vadd.f32 %v8958_v31, %v3804_v18 }
 0x3db   : > { %v9362_v28 = vpop.f32.mrf.mxu2  ;;  %v9375_v10 = vpop.f32.mrf.mxu1 }
 0x3dc   : > { %v3228_v32 = vmax.f32 %v3196_v6, 0.0  ;;  %11137 = vst [vmem:[#allocation116_spill] sm:$0xff] %v9362_v28  ;;  %v9364_v41 = vpop.f32.mrf.mxu3 }
 0x3dd   : > { %6460 = vset.pattern.permute.xlu2 %v10920_v54  ;;  %11138 = vst [vmem:[#allocation117_spill] sm:$0xff] %v9364_v41 }
 0x3de   : > { %3973 = vperm.xlu2 %6460, %v8951_v40   ;;  %v9367_v59 = vpop.permute.xlu2 %2927  ;;  %v3248_v25 = vpack.c.bf16 %v3229_v4, %v3228_v32  ;;  %11140 = vst [vmem:[#allocation119_spill] sm:$0xff] %v9375_v10  ;;  %v11142_v32 = vld [vmem:[#allocation67_spill] sm:$0xff] }
 0x3df   : > { %6461 = vset.pattern.permute.xlu1 %v10920_v54  ;;  %v2502_v5 = vadd.f32 %v11142_v32, %v8654_v22  ;;  %v9395_v22 = vld [vmem:[%s8170_s21 + $0x88] sm:$0xff]  ;;  %v4135_v32 = vadd.f32 %v4071_v57, %v3873_v53 }
 0x3e0   : > { %3977 = vperm.xlu1 %6461, %v9247_v46   ;;  %v3662_v9 = vpop.permute.xlu1 %3661  ;;  %3416 = vmatmul.bf16.gmra.mxu2 %v3248_v25  ;;  %v4070_v46 = vmul.f32 %v8960_v3, %v9307_v61  ;;  %v4332_v61 = vmul.f32 %v8997_v16, %v4212_v37 }
 0x3e1   : > { %3505 = vmatmul.bf16.gmra.mxu3 %v3248_v25  ;;  %v3805_v4 = vmul.f32 %v8940_v47, %v3662_v9  ;;  %v3806_v25 = vmul.f32 %v8942_v38, %v3662_v9  ;;  %3711 = vperm.xlu0 %6469, %v9395_v22   ;;  %v9402_v9 = vpop.permute.xlu0 %3666 }
 0x3e2   : > { %v4134_v18 = vadd.f32 %v4070_v46, %v3872_v14  ;;  %v9413_v14 = vpop.f32.mrf.mxu0 }
 0x3e3   : > { %v3382_v13 = vpop.f32.mrf.mxu2  ;;  %v3875_v37 = vadd.f32 %v8958_v31, %v3806_v25  ;;  %11145 = vst [vmem:[#allocation120_spill] sm:$0xff] %v9413_v14  ;;  %v9415_v53 = vpop.f32.mrf.mxu1  ;;  %v9424_v25 = vld [vmem:[%s8170_s21 + $0x90] sm:$0xff] }
 0x3e4   : > { %v3471_v6 = vpop.f32.mrf.mxu3  ;;  %v9389_v0 = vadd.f32 %v3382_v13, %v2413_v56  ;;  %v4334_v56 = vmul.f32 %v8997_v16, %v9072_v15  ;;  %v3874_v13 = vadd.f32 %v8956_v50, %v3805_v4  ;;  %11146 = vst [vmem:[#allocation121_spill] sm:$0xff] %v9415_v53  ;;  %v4396_v41 = vadd.f32 %v4332_v61, %v4134_v18  ;;  %v3605_v4 = vld [vmem:[%s8170_s21 + $0x78] sm:$0xff] }
 0x3e5   : > { %v9391_v21 = vadd.f32 %v3471_v6, %v2502_v5 }
 0x3e6   : > { %11143 = vst [vmem:[#allocation45_spill] sm:$0xff] %v9389_v0  ;;  %6462 = vset.pattern.permute.xlu2 %v10842_v34  ;;  %v4460_v14 = vmax.f32 %v4396_v41, 0.0  ;;  %v2778_v41 = vmul.f32 %v8429_v1, %v8728_v43 }
 0x3e7   : > { %11144 = vst [vmem:[#allocation67_spill] sm:$0xff] %v9391_v21  ;;  %4235 = vperm.xlu2 %6462, %v8951_v40   ;;  %v3121_v20 = vpop.permute.xlu2 %3120  ;;  %v4335_v40 = vmul.f32 %v8999_v63, %v9072_v15  ;;  %v4397_v15 = vadd.f32 %v4333_v30, %v4135_v32  ;;  %v11152_v32 = vld [vmem:[#allocation36_spill] sm:$0xff] }
 0x3e8   : > { %6463 = vset.pattern.permute.xlu1 %v11017_v29 }
 0x3e9   : > { %3696 = vperm.xlu1 %6463, %v9300_v12   ;;  %v3954_v5 = vpop.permute.xlu1 %3953  ;;  %v4461_v53 = vmax.f32 %v4397_v15, 0.0  ;;  %3716 = vperm.xlu0 %6469, %v9424_v25   ;;  %v9435_v18 = vpop.permute.xlu0 %3676 }
 0x3ea   : > { %v4072_v46 = vmul.f32 %v8960_v3, %v3954_v5  ;;  %v4073_v57 = vmul.f32 %v8978_v19, %v3954_v5  ;;  %v9449_v43 = vpop.f32.mrf.mxu0 }
 0x3eb   : > { %v9417_v28 = vpop.f32.mrf.mxu2 }
 0x3ec   : > { %v4136_v6 = vadd.f32 %v4072_v46, %v3874_v13  ;;  %v4137_v21 = vadd.f32 %v4073_v57, %v3875_v37  ;;  %11147 = vst [vmem:[#allocation122_spill] sm:$0xff] %v9417_v28  ;;  %v9419_v45 = vpop.f32.mrf.mxu3  ;;  %v2974_v46 = vmul.f32 %v8438_v35, %v9367_v59 }
 0x3ed   : > { %11148 = vst [vmem:[#allocation123_spill] sm:$0xff] %v9419_v45 }
 0x3ee   : > { %v4398_v0 = vadd.f32 %v4334_v56, %v4136_v6  ;;  %v4399_v10 = vadd.f32 %v4335_v40, %v4137_v21  ;;  %v11153_v56 = vld [vmem:[#allocation85_spill] sm:$0xff] }
 0x3ef   : > { %6464 = vset.pattern.permute.xlu2 %v11017_v29  ;;  %v11154_v40 = vld [vmem:[#allocation29_spill] sm:$0xff] }
 0x3f0   : > { %v9426_v5 = vpop.permute.xlu2 %3957  ;;  %v4462_v2 = vmax.f32 %v4398_v0, 0.0  ;;  %v4463_v13 = vmax.f32 %v4399_v10, 0.0  ;;  %3701 = vperm.xlu2 %6464, %v3605_v4   ;;  %v11151_v0 = vld [vmem:[#allocation84_spill] sm:$0xff]  ;;  %v2507_v37 = vadd.f32 %v11154_v40, %v11153_v56  ;;  %v9462_v56 = vld [vmem:[%s8170_s21 + $0x98] sm:$0xff] }
 0x3f1   : > { %6465 = vset.pattern.permute.xlu1 %v10920_v54  ;;  %v2924_v61 = vpop.permute.xlu1 %2923  ;;  %v2418_v10 = vadd.f32 %v11152_v32, %v11151_v0  ;;  %11156 = vst [vmem:[#allocation84_spill] sm:$0xff] %v9449_v43  ;;  %v3167_v0 = vmul.f32 %v8463_v49, %v3121_v20  ;;  %6476 = vset.pattern.permute.xlu0 %v10920_v54  ;;  %v6124_v20 = vld [vmem:[%s10702_s12 + $0x118] sm:$0xf0] }
 0x3f2   : > { %3981 = vperm.xlu1 %6465, %v9300_v12   ;;  %v9431_v30 = vpack.c.bf16 %v4462_v2, %v4460_v14  ;;  %v9433_v21 = vpack.c.bf16 %v4463_v13, %v4461_v53  ;;  %v11155_v12 = vld [vmem:[#allocation71_spill] sm:$0xff]  ;;  %v9451_v53 = vpop.f32.mrf.mxu1  ;;  %v2813_v13 = vadd.f32 %v9100_v44, %v2778_v41  ;;  %v2973_v32 = vmul.f32 %v8438_v35, %v2924_v61  ;;  %v6324_v41 = vld [vmem:[%s10702_s12 + $0x114] sm:$0xf] }
 0x3f3   : > { %v2777_v2 = vmul.f32 %v8429_v1, %v11155_v12  ;;  %v3387_v57 = vpop.f32.mrf.mxu2  ;;  %11157 = vst [vmem:[#allocation36_spill] sm:$0xff] %v9451_v53  ;;  %v6340_v61 = vld [vmem:[%s10702_s12 + $0x194] sm:$0xf]  ;;  %4001 = vperm.xlu0 %6476, %v9462_v56   ;;  %v9489_v53 = vpop.f32.mrf.mxu0 }
 0x3f4   : > { %11149 = vst [vmem:[#allocation124_spill] sm:$0xff] %v9431_v30  ;;  %4759 = vmatmul.bf16.gmra.mxu0 %v9431_v30  ;;  %4848 = vmatmul.bf16.gmra.mxu1 %v9433_v21  ;;  %v3476_v14 = vpop.f32.mrf.mxu3  ;;  %v9453_v6 = vadd.f32 %v3387_v57, %v2418_v10  ;;  %v3006_v40 = vadd.f32 %v2974_v46, %v2813_v13 }
 0x3f5   : > { %11150 = vst [vmem:[#allocation125_spill] sm:$0xff] %v9433_v21  ;;  %v9455_v15 = vadd.f32 %v3476_v14, %v2507_v37  ;;  %v2812_v59 = vadd.f32 %v9100_v44, %v2777_v2  ;;  %v6127_v37 = vor.u32 %v6324_v41, %v6124_v20  ;;  %v6188_v2 = vld [vmem:[%s10702_s12 + $0x198] sm:$0xf0] }
 0x3f6   : > { %11158 = vst [vmem:[#allocation85_spill] sm:$0xff] %v9453_v6  ;;  %v3199_v46 = vadd.f32 %v3167_v0, %v3006_v40  ;;  %v6191_v13 = vor.u32 %v6340_v61, %v6188_v2  ;;  %v3807_v40 = vmul.f32 %v8940_v47, %v9402_v9  ;;  %v11166_v2 = vld [vmem:[#allocation93_spill] sm:$0xff] }
 0x3f7   : > { %11159 = vst [vmem:[#allocation29_spill] sm:$0xff] %v9455_v15  ;;  %v3005_v57 = vadd.f32 %v2973_v32, %v2812_v59  ;;  %v9483_v15 = vpop.permute.xlu0 %3686  ;;  %4918 = vmatpush.bf16.msra.mxu2 %v6127_v37  ;;  %v3606_v59 = vld [vmem:[%s8170_s21 + $0x80] sm:$0xff] }
 0x3f8   : > { %6466 = vset.pattern.permute.xlu2 %v10920_v54  ;;  %5007 = vmatpush.bf16.msra.mxu3 %v6191_v13  ;;  %v3231_v41 = vmax.f32 %v3199_v46, 0.0  ;;  %11162 = vst [vmem:[#allocation127_spill] sm:$0xff] %v9489_v53  ;;  %v11167_v46 = vld [vmem:[#allocation2_spill] sm:$0xff] }
 0x3f9   : > { %v9466_v12 = vpop.permute.xlu2 %4219  ;;  %3985 = vperm.xlu2 %6466, %v3605_v4   ;;  %v5156_v53 = vld [vmem:[%s10703_s13] sm:$0x3] }
 0x3fa   : > { %6467 = vset.pattern.permute.xlu1 %v10842_v34  ;;  %v3117_v10 = vpop.permute.xlu1 %3116  ;;  %v9491_v0 = vpop.f32.mrf.mxu1  ;;  %v9551_v21 = vperm.slane %v5156_v53, 0 }
 0x3fb   : > { %v3166_v14 = vmul.f32 %v8463_v49, %v3117_v10  ;;  %4247 = vperm.xlu1 %6467, %v3605_v4   ;;  %v9485_v28 = vpop.f32.mrf.mxu2  ;;  %11163 = vst [vmem:[#allocation128_spill] sm:$0xff] %v9491_v0  ;;  %v11164_v10 = vld [vmem:[#allocation92_spill] sm:$0xff]  ;;  %v9517_v0 = vld [vmem:[%s8170_s21 + $0xa0] sm:$0xff] }
 0x3fc   : > { %11160 = vst [vmem:[#allocation71_spill] sm:$0xff] %v9485_v28  ;;  %v9487_v6 = vpop.f32.mrf.mxu3  ;;  %v4074_v28 = vmul.f32 %v8960_v3, %v9426_v5  ;;  %4005 = vperm.xlu0 %6476, %v9517_v0  }
 0x3fd   : > { %v3198_v45 = vadd.f32 %v3166_v14, %v3005_v57  ;;  %11161 = vst [vmem:[#allocation126_spill] sm:$0xff] %v9487_v6  ;;  %v2512_v57 = vadd.f32 %v11167_v46, %v11166_v2  ;;  %v3808_v14 = vmul.f32 %v8942_v38, %v9402_v9  ;;  %v4075_v2 = vmul.f32 %v8978_v19, %v9426_v5  ;;  %v6365_v5 = vld [vmem:[%s10704_s14 + $0x78] sm:$0xff] }
 0x3fe   : > { %5543 = vmatpush.bf16.msra.mxu1 %v6365_v5 }
 0x3ff   : > { %v3230_v20 = vmax.f32 %v3198_v45, 0.0  ;;  %v11165_v45 = vld [vmem:[#allocation28_spill] sm:$0xff]  ;;  %v3877_v46 = vadd.f32 %v8958_v31, %v3808_v14 }
 0x400   : > { %v2423_v37 = vadd.f32 %v11165_v45, %v11164_v10  ;;  %v3876_v10 = vadd.f32 %v8956_v50, %v3807_v40  ;;  %v4224_v45 = vpop.permute.xlu0 %4223 }
 0x401   : > { %v3249_v32 = vpack.c.bf16 %v3231_v41, %v3230_v20  ;;  %6468 = vset.pattern.permute.xlu2 %v11017_v29  ;;  %v4338_v40 = vmul.f32 %v8997_v16, %v4224_v45 }
 0x402   : > { %v9495_v4 = vpop.permute.xlu2 %2935  ;;  %3706 = vperm.xlu2 %6468, %v3606_v59   ;;  %v4138_v14 = vadd.f32 %v4074_v28, %v3876_v10 }
 0x403   : > { %6470 = vset.pattern.permute.xlu1 %v10920_v54  ;;  %v3672_v61 = vpop.permute.xlu1 %3671  ;;  %3421 = vmatmul.bf16.gmra.mxu2 %v3249_v32  ;;  %v3392_v13 = vpop.f32.mrf.mxu2 }
 0x404   : > { %3510 = vmatmul.bf16.gmra.mxu3 %v3249_v32  ;;  %3989 = vperm.xlu1 %6470, %v3606_v59   ;;  %v3481_v41 = vpop.f32.mrf.mxu3  ;;  %v9506_v20 = vadd.f32 %v3392_v13, %v2423_v37  ;;  %v3809_v37 = vmul.f32 %v8940_v47, %v3672_v61 }
 0x405   : > { %v9508_v6 = vadd.f32 %v3481_v41, %v2512_v57  ;;  %v3810_v57 = vmul.f32 %v8942_v38, %v3672_v61  ;;  %v6357_v41 = vld [vmem:[%s10704_s14 + $0x38] sm:$0xff]  ;;  %v4339_v61 = vmul.f32 %v8999_v63, %v4224_v45  ;;  %6483 = vset.pattern.permute.xlu0 %v10842_v34 }
 0x406   : > { %11168 = vst [vmem:[#allocation92_spill] sm:$0xff] %v9506_v20  ;;  %5454 = vmatpush.bf16.msra.mxu0 %v6357_v41  ;;  %v4337_v20 = vmul.f32 %v8999_v63, %v9466_v12  ;;  %v3878_v28 = vadd.f32 %v8956_v50, %v3809_v37  ;;  %v11173_v41 = vld [vmem:[#allocation46_spill] sm:$0xff] }
 0x407   : > { %11169 = vst [vmem:[#allocation28_spill] sm:$0xff] %v9508_v6  ;;  %v3879_v10 = vadd.f32 %v8958_v31, %v3810_v57 }
 0x408   : > { %v4745_v9 = vpop.f32.mrf.mxu0  ;;  %v4834_v32 = vpop.f32.mrf.mxu1 }
 0x409   : > { %v4835_v13 = vadd.f32 %v4834_v32, %v4745_v9  ;;  %v4139_v9 = vadd.f32 %v4075_v2, %v3877_v46  ;;  %v4336_v32 = vmul.f32 %v8997_v16, %v9466_v12 }
 0x40a   : > { %6471 = vset.pattern.permute.xlu2 %v10920_v54 }
 0x40b   : > { %v5092_v6 = vadd.f32 %v4835_v13, %v9105_v55  ;;  %3993 = vperm.xlu2 %6471, %v9395_v22   ;;  %v3129_v43 = vpop.permute.xlu2 %3128  ;;  %v9545_v46 = vpop.f32.mrf.mxu2  ;;  %v11172_v13 = vld [vmem:[#allocation72_spill] sm:$0xff]  ;;  %v4400_v37 = vadd.f32 %v4336_v32, %v4138_v14  ;;  %v4401_v42 = vadd.f32 %v4337_v20, %v4139_v9  ;;  %v11175_v14 = vld [vmem:[#allocation31_spill] sm:$0xff] }
 0x40c   : > { %6472 = vset.pattern.permute.xlu1 %v10842_v34  ;;  %v3962_v55 = vpop.permute.xlu1 %3961  ;;  %11170 = vst [vmem:[#allocation93_spill] sm:$0xff] %v9545_v46  ;;  %v9547_v12 = vpop.f32.mrf.mxu3  ;;  %v2390_v48 = vadd.f32 %v11173_v41, %v11172_v13  ;;  %v9555_v46 = vld [vmem:[%s8170_s21 + $0xa8] sm:$0xff]  ;;  %v11174_v20 = vld [vmem:[#allocation100_spill] sm:$0xff]  ;;  %v11179_v13 = vld [vmem:[#allocation74_spill] sm:$0xff] }
 0x40d   : > { %v4076_v45 = vmul.f32 %v8960_v3, %v3962_v55  ;;  %v4077_v2 = vmul.f32 %v8978_v19, %v3962_v55  ;;  %11171 = vst [vmem:[#allocation2_spill] sm:$0xff] %v9547_v12  ;;  %4251 = vperm.xlu1 %6472, %v3606_v59   ;;  %4271 = vperm.xlu0 %6483, %v9555_v46  }
 0x40e   : > { %v3528_v11 = vadd.f32 %v9139_v60, %v2390_v48  ;;  %v5162_v53 = vadd.f32 %v9551_v21, %v5092_v6  ;;  %v2428_v9 = vadd.f32 %v11175_v14, %v11174_v20  ;;  %v11176_v60 = vld [vmem:[#allocation101_spill] sm:$0xff]  ;;  %v2780_v41 = vmul.f32 %v8429_v1, %v11179_v13  ;;  %v6180_v14 = vld [vmem:[%s10702_s12 + $0x188] sm:$0xf0] }
 0x40f   : > { %v4140_v5 = vadd.f32 %v4076_v45, %v3878_v28  ;;  %v4141_v30 = vadd.f32 %v4077_v2, %v3879_v10  ;;  %v11177_v48 = vld [vmem:[#allocation17_spill] sm:$0xff] }
 0x410   : > { %v4747_v57 = vpop.f32.mrf.mxu0  ;;  %v4836_v33 = vpop.f32.mrf.mxu1 }
 0x411   : > { %v4402_v55 = vadd.f32 %v4338_v40, %v4140_v5  ;;  %v4403_v23 = vadd.f32 %v4339_v61, %v4141_v30  ;;  %v4837_v39 = vadd.f32 %v4836_v33, %v4747_v57  ;;  %v2517_v30 = vadd.f32 %v11177_v48, %v11176_v60  ;;  %v6116_v57 = vld [vmem:[%s10702_s12 + $0x108] sm:$0xf0] }
 0x412   : > { %v4464_v33 = vmax.f32 %v4400_v37, 0.0  ;;  %v4465_v40 = vmax.f32 %v4401_v42, 0.0  ;;  %v6322_v37 = vld [vmem:[%s10702_s12 + $0x104] sm:$0xf]  ;;  %v2815_v60 = vadd.f32 %v9100_v44, %v2780_v41  ;;  %v3169_v48 = vmul.f32 %v8463_v49, %v3129_v43 }
 0x413   : > { %v4466_v59 = vmax.f32 %v4402_v55, 0.0  ;;  %v4467_v28 = vmax.f32 %v4403_v23, 0.0  ;;  %v5094_v10 = vadd.f32 %v4837_v39, %v3528_v11  ;;  %6473 = vset.pattern.permute.xlu2 %v10842_v34  ;;  %v3397_v45 = vpop.f32.mrf.mxu2  ;;  %v6338_v55 = vld [vmem:[%s10702_s12 + $0x184] sm:$0xf]  ;;  %v6119_v20 = vor.u32 %v6322_v37, %v6116_v57  ;;  %v11184_v57 = vld [vmem:[#allocation43_spill] sm:$0xff] }
 0x414   : > { %v2932_v61 = vpop.permute.xlu1 %2931  ;;  %v9565_v32 = vpop.permute.xlu2 %3965  ;;  %4255 = vperm.xlu2 %6473, %v9395_v22   ;;  %v9570_v39 = vadd.f32 %v3397_v45, %v2428_v9  ;;  %v5226_v22 = vmax.f32 %v5162_v53, 0.0  ;;  %v6183_v9 = vor.u32 %v6338_v55, %v6180_v14  ;;  %v11183_v37 = vld [vmem:[#allocation42_spill] sm:$0xff]  ;;  %v3812_v14 = vmul.f32 %v8942_v38, %v9435_v18 }
 0x415   : > { %v5164_v6 = vadd.f32 %v9551_v21, %v5094_v10  ;;  %v3486_v23 = vpop.f32.mrf.mxu3  ;;  %6474 = vset.pattern.permute.xlu1 %v11017_v29  ;;  %v9575_v2 = vpack.c.bf16 %v4466_v59, %v4464_v33  ;;  %v9577_v42 = vpack.c.bf16 %v4467_v28, %v4465_v40  ;;  %v11180_v59 = vld [vmem:[#allocation37_spill] sm:$0xff]  ;;  %v2976_v28 = vmul.f32 %v8438_v35, %v9495_v4  ;;  %v9606_v33 = vld [vmem:[%s8170_s21 + $0xb0] sm:$0xff] }
 0x416   : > { %v9572_v11 = vadd.f32 %v3486_v23, %v2517_v30  ;;  %3721 = vperm.xlu1 %6474, %v9462_v56   ;;  %v2779_v53 = vmul.f32 %v8429_v1, %v11180_v59  ;;  %v2975_v30 = vmul.f32 %v8438_v35, %v2932_v61  ;;  %4919 = vmatpush.bf16.msra.mxu2 %v6119_v20  ;;  %v11185_v59 = vld [vmem:[#allocation107_spill] sm:$0xff] }
 0x417   : > { %v5228_v5 = vmax.f32 %v5164_v6, 0.0  ;;  %4764 = vmatmul.bf16.gmra.mxu0 %v9575_v2  ;;  %4853 = vmatmul.bf16.gmra.mxu1 %v9577_v42  ;;  %v3008_v40 = vadd.f32 %v2976_v28, %v2815_v60  ;;  %v2433_v55 = vadd.f32 %v11184_v57, %v11183_v37  ;;  %v3811_v20 = vmul.f32 %v8940_v47, %v9435_v18  ;;  %v6356_v18 = vld [vmem:[%s10704_s14 + $0x30] sm:$0xff]  ;;  %v4232_v57 = vpop.permute.xlu0 %4231 }
 0x418   : > { %11178 = vst [vmem:[#allocation72_spill] sm:$0xff] %v9572_v11  ;;  %5008 = vmatpush.bf16.msra.mxu3 %v6183_v9  ;;  %v2814_v4 = vadd.f32 %v9100_v44, %v2779_v53  ;;  %4275 = vperm.xlu0 %6483, %v9606_v33   ;;  %v11186_v53 = vld [vmem:[#allocation76_spill] sm:$0xff] }
 0x419   : > { %v9596_v10 = vpack.c.bf16 %v5228_v5, %v5226_v22  ;;  %v3201_v61 = vadd.f32 %v3169_v48, %v3008_v40  ;;  %v2522_v28 = vadd.f32 %v11186_v53, %v11185_v59  ;;  %5455 = vmatpush.bf16.msra.mxu0 %v6356_v18  ;;  %v4343_v18 = vmul.f32 %v8999_v63, %v4232_v57 }
 0x41a   : > { %v3007_v13 = vadd.f32 %v2975_v30, %v2814_v4 }
 0x41b   : > { %v9609_v6 = vpop.f32.mrf.mxu2  ;;  %v3233_v22 = vmax.f32 %v3201_v61, 0.0  ;;  %v3881_v61 = vadd.f32 %v8958_v31, %v3812_v14 }
 0x41c   : > { %6475 = vset.pattern.permute.xlu2 %v10920_v54  ;;  %11181 = vst [vmem:[#allocation46_spill] sm:$0xff] %v9609_v6 }
 0x41d   : > { %v9611_v45 = vpop.f32.mrf.mxu3  ;;  %3997 = vperm.xlu2 %6475, %v9424_v25   ;;  %v3125_v43 = vpop.permute.xlu1 %3124 }
 0x41e   : > { %11182 = vst [vmem:[#allocation100_spill] sm:$0xff] %v9611_v45  ;;  %v4228_v23 = vpop.permute.xlu2 %4227  ;;  %6477 = vset.pattern.permute.xlu1 %v10842_v34  ;;  %v3168_v41 = vmul.f32 %v8463_v49, %v3125_v43  ;;  %v3880_v43 = vadd.f32 %v8956_v50, %v3811_v20 }
 0x41f   : > { %4259 = vperm.xlu1 %6477, %v9424_v25  }
 0x420   : > { %v3200_v44 = vadd.f32 %v3168_v41, %v3007_v13  ;;  %6490 = vset.pattern.permute.xlu0 %v11017_v29  ;;  %v4078_v13 = vmul.f32 %v8960_v3, %v9565_v32  ;;  %v4079_v41 = vmul.f32 %v8978_v19, %v9565_v32  ;;  %v4341_v32 = vmul.f32 %v8999_v63, %v4228_v23 }
 0x422   : > { %v3232_v5 = vmax.f32 %v3200_v44, 0.0  ;;  %v4142_v59 = vadd.f32 %v4078_v13, %v3880_v43  ;;  %v4143_v53 = vadd.f32 %v4079_v41, %v3881_v61 }
 0x423   : > { %v3402_v9 = vpop.f32.mrf.mxu2 }
 0x424   : > { %v3250_v48 = vpack.c.bf16 %v3233_v22, %v3232_v5  ;;  %v9628_v25 = vadd.f32 %v3402_v9, %v2433_v55  ;;  %v6364_v55 = vld [vmem:[%s10704_s14 + $0x70] sm:$0xff]  ;;  %v4405_v41 = vadd.f32 %v4341_v32, %v4143_v53  ;;  %v6172_v53 = vld [vmem:[%s10702_s12 + $0x178] sm:$0xf0] }
 0x425   : > { %v3491_v60 = vpop.f32.mrf.mxu3  ;;  %6478 = vset.pattern.permute.xlu2 %v10842_v34  ;;  %5544 = vmatpush.bf16.msra.mxu1 %v6364_v55 }
 0x426   : > { %v9630_v30 = vadd.f32 %v3491_v60, %v2522_v28  ;;  %v9632_v4 = vpop.permute.xlu2 %2943  ;;  %v3682_v40 = vpop.permute.xlu1 %3681  ;;  %4263 = vperm.xlu2 %6478, %v9462_v56   ;;  %3426 = vmatmul.bf16.gmra.mxu2 %v3250_v48  ;;  %v4340_v28 = vmul.f32 %v8997_v16, %v4228_v23 }
 0x427   : > { %3515 = vmatmul.bf16.gmra.mxu3 %v3250_v48  ;;  %6479 = vset.pattern.permute.xlu1 %v11017_v29  ;;  %v3813_v22 = vmul.f32 %v8940_v47, %v3682_v40  ;;  %v3814_v5 = vmul.f32 %v8942_v38, %v3682_v40  ;;  %v4342_v40 = vmul.f32 %v8997_v16, %v4232_v57 }
 0x428   : > { %11187 = vst [vmem:[#allocation31_spill] sm:$0xff] %v9630_v30  ;;  %3726 = vperm.xlu1 %6479, %v9517_v0   ;;  %v4404_v13 = vadd.f32 %v4340_v28, %v4142_v59  ;;  %v11192_v28 = vld [vmem:[#allocation10_spill] sm:$0xff] }
 0x429   : > { %v3882_v23 = vadd.f32 %v8956_v50, %v3813_v22  ;;  %v3883_v43 = vadd.f32 %v8958_v31, %v3814_v5  ;;  %v6336_v22 = vld [vmem:[%s10702_s12 + $0x174] sm:$0xf]  ;;  %v11190_v5 = vld [vmem:[#allocation25_spill] sm:$0xff]  ;;  %v2438_v32 = vadd.f32 %v11192_v28, %v9079_v8  ;;  %v6318_v8 = vld [vmem:[%s10702_s12 + $0xe4] sm:$0xf] }
 0x42b   : > { %v4750_v56 = vpop.f32.mrf.mxu0  ;;  %v4839_v44 = vpop.f32.mrf.mxu1 }
 0x42c   : > { %v4840_v37 = vadd.f32 %v4839_v44, %v4750_v56  ;;  %v9653_v20 = vpop.f32.mrf.mxu2  ;;  %v6320_v56 = vld [vmem:[%s10702_s12 + $0xf4] sm:$0xf]  ;;  %v6108_v44 = vld [vmem:[%s10702_s12 + $0xf8] sm:$0xf0] }
 0x42d   : > { %11188 = vst [vmem:[#allocation101_spill] sm:$0xff] %v9653_v20  ;;  %v9655_v14 = vpop.f32.mrf.mxu3  ;;  %v6175_v20 = vor.u32 %v6336_v22, %v6172_v53  ;;  %v11196_v53 = vld [vmem:[#allocation91_spill] sm:$0xff] }
 0x42e   : > { %11189 = vst [vmem:[#allocation17_spill] sm:$0xff] %v9655_v14  ;;  %v5096_v9 = vadd.f32 %v4840_v37, %v9188_v36  ;;  %6480 = vset.pattern.permute.xlu2 %v11017_v29  ;;  %v11191_v37 = vld [vmem:[#allocation38_spill] sm:$0xff]  ;;  %v6111_v14 = vor.u32 %v6320_v56, %v6108_v44  ;;  %v11195_v56 = vld [vmem:[#allocation3_spill] sm:$0xff]  ;;  %v2781_v28 = vmul.f32 %v8429_v1, %v11196_v53 }
 0x42f   : > { %v9659_v60 = vpop.permute.xlu2 %3136  ;;  %v3970_v48 = vpop.permute.xlu1 %3969  ;;  %3731 = vperm.xlu2 %6480, %v9555_v46   ;;  %v2395_v57 = vadd.f32 %v11191_v37, %v11190_v5  ;;  %5009 = vmatpush.bf16.msra.mxu3 %v6175_v20  ;;  %v6164_v20 = vld [vmem:[%s10702_s12 + $0x168] sm:$0xf0]  ;;  %v2782_v44 = vmul.f32 %v8429_v1, %v11195_v56 }
 0x430   : > { %v4080_v61 = vmul.f32 %v8960_v3, %v3970_v48  ;;  %v4081_v36 = vmul.f32 %v8978_v19, %v3970_v48  ;;  %6481 = vset.pattern.permute.xlu1 %v10920_v54  ;;  %4920 = vmatpush.bf16.msra.mxu2 %v6111_v14  ;;  %v3171_v1 = vmul.f32 %v8463_v49, %v9659_v60 }
 0x431   : > { %4009 = vperm.xlu1 %6481, %v9555_v46   ;;  %v3532_v11 = vadd.f32 %v9197_v7, %v2395_v57  ;;  %v4468_v46 = vmax.f32 %v4404_v13, 0.0  ;;  %v6100_v7 = vld [vmem:[%s10702_s12 + $0xe8] sm:$0xf0] }
 0x432   : > { %v4144_v55 = vadd.f32 %v4080_v61, %v3882_v23  ;;  %v4145_v59 = vadd.f32 %v4081_v36, %v3883_v43  ;;  %v11193_v23 = vld [vmem:[#allocation77_spill] sm:$0xff]  ;;  %v4469_v61 = vmax.f32 %v4405_v41, 0.0  ;;  %v5166_v36 = vadd.f32 %v9551_v21, %v5096_v9  ;;  %v6334_v9 = vld [vmem:[%s10702_s12 + $0x164] sm:$0xf] }
 0x433   : > { %v4752_v48 = vpop.f32.mrf.mxu0  ;;  %v4841_v30 = vpop.f32.mrf.mxu1  ;;  %v2527_v43 = vadd.f32 %v11193_v23, %v9084_v58  ;;  %v6103_v41 = vor.u32 %v6318_v8, %v6100_v7  ;;  %v6167_v57 = vor.u32 %v6334_v9, %v6164_v20  ;;  %v11200_v9 = vld [vmem:[#allocation59_spill] sm:$0xff] }
 0x434   : > { %v4406_v45 = vadd.f32 %v4342_v40, %v4144_v55  ;;  %v4407_v6 = vadd.f32 %v4343_v18, %v4145_v59  ;;  %v4842_v5 = vadd.f32 %v4841_v30, %v4752_v48  ;;  %v3407_v37 = vpop.f32.mrf.mxu2  ;;  %v5230_v55 = vmax.f32 %v5166_v36, 0.0  ;;  %v6533_v48 = vld [vmem:[%s10699_s9] ss:$0 sm:$0xff] }
 0x435   : > { %v3496_v12 = vpop.f32.mrf.mxu3  ;;  %v9696_v58 = vadd.f32 %v3407_v37, %v2438_v32  ;;  %4921 = vmatpush.bf16.msra.mxu2 %v6103_v41  ;;  %5010 = vmatpush.bf16.msra.mxu3 %v6167_v57  ;;  %v11202_v41 = vld [vmem:[#allocation13_spill] sm:$0xff] }
 0x436   : > { %v4470_v30 = vmax.f32 %v4406_v45, 0.0  ;;  %v4471_v40 = vmax.f32 %v4407_v6, 0.0  ;;  %v5098_v18 = vadd.f32 %v4842_v5, %v3532_v11  ;;  %v9704_v14 = vadd.f32 %v3496_v12, %v2527_v43  ;;  %v9716_v12 = vld [vmem:[%s8170_s21 + $0xc8] sm:$0xff] }
 0x437   : > { %v2940_v13 = vpop.permute.xlu1 %2939  ;;  %6482 = vset.pattern.permute.xlu2 %v10842_v34  ;;  %3751 = vperm.xlu0 %6490, %v9716_v12   ;;  %v2817_v5 = vadd.f32 %v6533_v48, %v2782_v44 }
 0x438   : > { %11194 = vst [vmem:[#allocation74_spill] sm:$0xff] %v9704_v14  ;;  %v5168_v6 = vadd.f32 %v9551_v21, %v5098_v18  ;;  %v9708_v11 = vpack.c.bf16 %v4470_v30, %v4468_v46  ;;  %v9710_v45 = vpack.c.bf16 %v4471_v40, %v4469_v61  ;;  %4267 = vperm.xlu2 %6482, %v9517_v0   ;;  %v3974_v22 = vpop.permute.xlu2 %3973  ;;  %v3613_v46 = vld [vmem:[%s8170_s21 + $0xb8] sm:$0xff]  ;;  %v9743_v40 = vld [vmem:[%s8170_s21 + $0xd0] sm:$0xff] }
 0x439   : > { %6484 = vset.pattern.permute.xlu1 %v11017_v29  ;;  %v2978_v0 = vmul.f32 %v8438_v35, %v9632_v4  ;;  %v2977_v4 = vmul.f32 %v8438_v35, %v2940_v13  ;;  %v2816_v61 = vadd.f32 %v6533_v48, %v2781_v28  ;;  %v11199_v35 = vld [vmem:[#allocation21_spill] sm:$0xff]  ;;  %v11201_v13 = vld [vmem:[#allocation44_spill] sm:$0xff] }
 0x43a   : > { %4769 = vmatmul.bf16.gmra.mxu0 %v9708_v11  ;;  %v5232_v59 = vmax.f32 %v5168_v6, 0.0  ;;  %3736 = vperm.xlu1 %6484, %v9606_v33   ;;  %v2443_v20 = vadd.f32 %v11200_v9, %v11199_v35  ;;  %v2532_v6 = vadd.f32 %v11202_v41, %v11201_v13 }
 0x43b   : > { %4858 = vmatmul.bf16.gmra.mxu1 %v9710_v45  ;;  %v3010_v36 = vadd.f32 %v2978_v0, %v2817_v5  ;;  %v3009_v7 = vadd.f32 %v2977_v4, %v2816_v61  ;;  %v6355_v0 = vld [vmem:[%s10704_s14 + $0x28] sm:$0xff]  ;;  %v3815_v5 = vmul.f32 %v8940_v47, %v9483_v15  ;;  %v9771_v4 = vld [vmem:[%s8170_s21 + $0xd8] sm:$0xff]  ;;  %v4082_v61 = vmul.f32 %v8960_v3, %v3974_v22 }
 0x43c   : > { %v9727_v32 = vpack.c.bf16 %v5232_v59, %v5230_v55  ;;  %v9735_v23 = vpop.f32.mrf.mxu2  ;;  %5456 = vmatpush.bf16.msra.mxu0 %v6355_v0  ;;  %v3614_v0 = vld [vmem:[%s8170_s21 + $0xc0] sm:$0xff] }
 0x43d   : > { %11197 = vst [vmem:[#allocation37_spill] sm:$0xff] %v9735_v23  ;;  %v9737_v43 = vpop.f32.mrf.mxu3  ;;  %v3203_v8 = vadd.f32 %v3171_v1, %v3010_v36  ;;  %v3816_v1 = vmul.f32 %v8942_v38, %v9483_v15  ;;  %v4083_v36 = vmul.f32 %v8978_v19, %v3974_v22  ;;  %v3884_v35 = vadd.f32 %v8956_v50, %v3815_v5  ;;  %v11205_v5 = vld [vmem:[#allocation49_spill] sm:$0xff] }
 0x43e   : > { %11198 = vst [vmem:[#allocation42_spill] sm:$0xff] %v9737_v43 }
 0x43f   : > { %3756 = vperm.xlu0 %6490, %v9743_v40   ;;  %v3235_v56 = vmax.f32 %v3203_v8, 0.0  ;;  %v4146_v13 = vadd.f32 %v4082_v61, %v3884_v35 }
 0x440   : > { %v3133_v37 = vpop.permute.xlu1 %3132  ;;  %6485 = vset.pattern.permute.xlu2 %v11017_v29 }
 0x441   : > { %v3170_v30 = vmul.f32 %v8463_v49, %v3133_v37  ;;  %3741 = vperm.xlu2 %6485, %v3613_v46   ;;  %v4236_v18 = vpop.permute.xlu2 %4235 }
 0x442   : > { %6486 = vset.pattern.permute.xlu1 %v10920_v54  ;;  %v4344_v9 = vmul.f32 %v8997_v16, %v4236_v18 }
 0x443   : > { %v3202_v60 = vadd.f32 %v3170_v30, %v3009_v7  ;;  %4013 = vperm.xlu1 %6486, %v9606_v33   ;;  %v6363_v33 = vld [vmem:[%s10704_s14 + $0x68] sm:$0xff] }
 0x444   : > { %v3412_v49 = vpop.f32.mrf.mxu2  ;;  %5545 = vmatpush.bf16.msra.mxu1 %v6363_v33  ;;  %v11204_v33 = vld [vmem:[#allocation6_spill] sm:$0xff] }
 0x445   : > { %v3234_v44 = vmax.f32 %v3202_v60, 0.0  ;;  %v3501_v57 = vpop.f32.mrf.mxu3  ;;  %v9752_v55 = vadd.f32 %v3412_v49, %v2443_v20  ;;  %v4240_v60 = vpop.permute.xlu0 %4239  ;;  %v4345_v20 = vmul.f32 %v8999_v63, %v4236_v18  ;;  %v4408_v18 = vadd.f32 %v4344_v9, %v4146_v13 }
 0x446   : > { %v9754_v59 = vadd.f32 %v3501_v57, %v2532_v6 }
 0x447   : > { %v3251_v53 = vpack.c.bf16 %v3235_v56, %v3234_v44  ;;  %6497 = vset.pattern.permute.xlu0 %v10920_v54  ;;  %v4346_v56 = vmul.f32 %v8997_v16, %v4240_v60  ;;  %v4347_v44 = vmul.f32 %v8999_v63, %v4240_v60 }
 0x448   : > { %11203 = vst [vmem:[#allocation43_spill] sm:$0xff] %v9754_v59  ;;  %4033 = vperm.xlu0 %6497, %v9771_v4  }
 0x449   : > { %v3692_v28 = vpop.permute.xlu1 %3691  ;;  %3431 = vmatmul.bf16.gmra.mxu2 %v3251_v53  ;;  %3520 = vmatmul.bf16.gmra.mxu3 %v3251_v53 }
 0x44a   : > { %6487 = vset.pattern.permute.xlu2 %v10920_v54  ;;  %v9763_v48 = vpop.permute.xlu2 %3701  ;;  %v3817_v7 = vmul.f32 %v8940_v47, %v3692_v28  ;;  %v3818_v15 = vmul.f32 %v8942_v38, %v3692_v28 }
 0x44b   : > { %4017 = vperm.xlu2 %6487, %v3613_v46   ;;  %6488 = vset.pattern.permute.xlu1 %v10842_v34 }
 0x44c   : > { %4279 = vperm.xlu1 %6488, %v3613_v46   ;;  %v3885_v46 = vadd.f32 %v8958_v31, %v3816_v1  ;;  %v3886_v49 = vadd.f32 %v8956_v50, %v3817_v7  ;;  %v3887_v57 = vadd.f32 %v8958_v31, %v3818_v15  ;;  %v2400_v1 = vadd.f32 %v11205_v5, %v11204_v33 }
 0x44e   : > { %v4755_v37 = vpop.f32.mrf.mxu0  ;;  %v4844_v8 = vpop.f32.mrf.mxu1  ;;  %v4147_v41 = vadd.f32 %v4083_v36, %v3885_v46  ;;  %v3536_v15 = vadd.f32 %v9259_v24, %v2400_v1  ;;  %v4472_v46 = vmax.f32 %v4408_v18, 0.0 }
 0x44f   : > { %v4845_v30 = vadd.f32 %v4844_v8, %v4755_v37 }
 0x451   : > { %v5100_v22 = vadd.f32 %v4845_v30, %v9242_v27  ;;  %v4409_v27 = vadd.f32 %v4345_v20, %v4147_v41 }
 0x452   : > { %v3978_v6 = vpop.permute.xlu1 %3977 }
 0x453   : > { %v4084_v53 = vmul.f32 %v8960_v3, %v3978_v6  ;;  %v4085_v28 = vmul.f32 %v8978_v19, %v3978_v6  ;;  %6489 = vset.pattern.permute.xlu2 %v11017_v29  ;;  %v9795_v37 = vpop.permute.xlu2 %3985  ;;  %v4473_v9 = vmax.f32 %v4409_v27, 0.0  ;;  %v5170_v20 = vadd.f32 %v9551_v21, %v5100_v22  ;;  %v9812_v22 = vpop.f32.mrf.mxu3 }
 0x454   : > { %3746 = vperm.xlu2 %6489, %v3614_v0   ;;  %6491 = vset.pattern.permute.xlu1 %v10920_v54  ;;  %11209 = vst [vmem:[#allocation76_spill] sm:$0xff] %v9812_v22 }
 0x455   : > { %v4148_v61 = vadd.f32 %v4084_v53, %v3886_v49  ;;  %v4149_v36 = vadd.f32 %v4085_v28, %v3887_v57  ;;  %4021 = vperm.xlu1 %6491, %v3614_v0   ;;  %v11206_v49 = vld [vmem:[#allocation110_spill] sm:$0xff]  ;;  %v11207_v57 = vld [vmem:[#allocation111_spill] sm:$0xff]  ;;  %v9805_v28 = vpop.f32.mrf.mxu2  ;;  %v5234_v27 = vmax.f32 %v5170_v20, 0.0 }
 0x456   : > { %v4757_v8 = vpop.f32.mrf.mxu0  ;;  %v4846_v7 = vpop.f32.mrf.mxu1  ;;  %v9802_v53 = vld [vmem:[%s8170_s21 + $0xe0] sm:$0xff]  ;;  %11208 = vst [vmem:[#allocation107_spill] sm:$0xff] %v9805_v28 }
 0x457   : > { %v4410_v30 = vadd.f32 %v4346_v56, %v4148_v61  ;;  %v4411_v60 = vadd.f32 %v4347_v44, %v4149_v36  ;;  %v4847_v35 = vadd.f32 %v4846_v7, %v4757_v8  ;;  %4037 = vperm.xlu0 %6497, %v9802_v53   ;;  %v11210_v61 = vld [vmem:[#allocation80_spill] sm:$0xff]  ;;  %v11211_v8 = vld [vmem:[#allocation86_spill] sm:$0xff] }
 0x458   : > { %v2448_v36 = vadd.f32 %v11210_v61, %v9249_v26  ;;  %v2537_v7 = vadd.f32 %v11211_v8, %v9252_v51  ;;  %v3821_v26 = vmul.f32 %v8940_v47, %v9763_v48  ;;  %v6354_v8 = vld [vmem:[%s10704_s14 + $0x20] sm:$0xff] }
 0x459   : > { %v4474_v13 = vmax.f32 %v4410_v30, 0.0  ;;  %v4475_v41 = vmax.f32 %v4411_v60, 0.0  ;;  %v5102_v6 = vadd.f32 %v4847_v35, %v3536_v15  ;;  %4922 = vmatmul.bf16.vlgmr.msra.gmra.mxu2 %v11206_v49  ;;  %5011 = vmatmul.bf16.vlgmr.msra.gmra.mxu3 %v11207_v57  ;;  %v9830_v60 = vld [vmem:[%s8170_s21 + $0xe8] sm:$0xff] }
 0x45a   : > { %5457 = vmatpush.bf16.msra.mxu0 %v6354_v8 }
 0x45b   : > { %v5172_v24 = vadd.f32 %v9551_v21, %v5102_v6  ;;  %v3697_v56 = vpop.permute.xlu1 %3696  ;;  %v9808_v44 = vpack.c.bf16 %v4474_v13, %v4472_v46  ;;  %v9810_v18 = vpack.c.bf16 %v4475_v41, %v4473_v9  ;;  %v3822_v13 = vmul.f32 %v8942_v38, %v9763_v48  ;;  %v4244_v41 = vpop.permute.xlu0 %4243 }
 0x45c   : > { %6492 = vset.pattern.permute.xlu2 %v10920_v54  ;;  %v9819_v5 = vpop.permute.xlu2 %3706  ;;  %v3819_v15 = vmul.f32 %v8940_v47, %v3697_v56  ;;  %v3820_v35 = vmul.f32 %v8942_v38, %v3697_v56  ;;  %v4088_v48 = vmul.f32 %v8960_v3, %v9795_v37 }
 0x45d   : > { %4774 = vmatmul.bf16.gmra.mxu0 %v9808_v44  ;;  %4863 = vmatmul.bf16.gmra.mxu1 %v9810_v18  ;;  %v5236_v33 = vmax.f32 %v5172_v24, 0.0  ;;  %v3890_v24 = vadd.f32 %v8956_v50, %v3821_v26 }
 0x45e   : > { %6493 = vset.pattern.permute.xlu1 %v10842_v34  ;;  %4025 = vperm.xlu2 %6492, %v9716_v12   ;;  %v3888_v49 = vadd.f32 %v8956_v50, %v3819_v15  ;;  %v3889_v57 = vadd.f32 %v8958_v31, %v3820_v35  ;;  %v9864_v15 = vld [vmem:[%s8170_s21 + $0xf0] sm:$0xff]  ;;  %v6362_v35 = vld [vmem:[%s10704_s14 + $0x60] sm:$0xff] }
 0x45f   : > { %4283 = vperm.xlu1 %6493, %v3614_v0   ;;  %v9821_v1 = vpack.c.bf16 %v5236_v33, %v5234_v27  ;;  %6504 = vset.pattern.permute.xlu0 %v10842_v34  ;;  %v3891_v33 = vadd.f32 %v8958_v31, %v3822_v13 }
 0x460   : > { %4303 = vperm.xlu0 %6504, %v9830_v60   ;;  %5546 = vmatpush.bf16.msra.mxu1 %v6362_v35 }
 0x463   : > { %v3417_v30 = vpop.f32.mrf.mxu2 }
 0x464   : > { %v9833_v0 = vadd.f32 %v3417_v30, %v2448_v36  ;;  %v3506_v46 = vpop.f32.mrf.mxu3  ;;  %v3982_v9 = vpop.permute.xlu1 %3981  ;;  %v4348_v36 = vmul.f32 %v8997_v16, %v4244_v41  ;;  %v4152_v30 = vadd.f32 %v4088_v48, %v3890_v24 }
 0x465   : > { %v9838_v20 = vadd.f32 %v3506_v46, %v2537_v7  ;;  %v4086_v51 = vmul.f32 %v8960_v3, %v3982_v9  ;;  %v4087_v6 = vmul.f32 %v8978_v19, %v3982_v9  ;;  %v3994_v27 = vpop.permute.xlu2 %3993  ;;  %v4349_v7 = vmul.f32 %v8999_v63, %v4244_v41 }
 0x466   : > { %6494 = vset.pattern.permute.xlu2 %v10842_v34 }
 0x467   : > { %11212 = vst [vmem:[#allocation25_spill] sm:$0xff] %v9838_v20  ;;  %6495 = vset.pattern.permute.xlu1 %v11017_v29  ;;  %4287 = vperm.xlu2 %6494, %v9716_v12   ;;  %v4150_v56 = vadd.f32 %v4086_v51, %v3888_v49  ;;  %v4151_v61 = vadd.f32 %v4087_v6, %v3889_v57  ;;  %v3712_v51 = vpop.permute.xlu0 %3711 }
 0x468   : > { %3761 = vperm.xlu1 %6495, %v9771_v4   ;;  %v4089_v12 = vmul.f32 %v8978_v19, %v9795_v37  ;;  %4307 = vperm.xlu0 %6504, %v9864_v15   ;;  %v3825_v24 = vmul.f32 %v8940_v47, %v3712_v51 }
 0x469   : > { %4927 = vmatmul.bf16.gmra.mxu2 %v9199_v52  ;;  %5016 = vmatmul.bf16.gmra.mxu3 %v9201_v17  ;;  %v4412_v52 = vadd.f32 %v4348_v36, %v4150_v56  ;;  %v4413_v37 = vadd.f32 %v4349_v7, %v4151_v61  ;;  %v3826_v56 = vmul.f32 %v8942_v38, %v3712_v51 }
 0x46a   : > { %v4153_v46 = vadd.f32 %v4089_v12, %v3891_v33  ;;  %v3824_v51 = vmul.f32 %v8942_v38, %v9819_v5 }
 0x46b   : > { %v4476_v57 = vmax.f32 %v4412_v52, 0.0  ;;  %v4477_v12 = vmax.f32 %v4413_v37, 0.0  ;;  %v4093_v52 = vmul.f32 %v8978_v19, %v3994_v27  ;;  %v3895_v37 = vadd.f32 %v8958_v31, %v3826_v56 }
 0x46d   : > { %v4248_v17 = vpop.permute.xlu1 %4247 }
 0x46e   : > { %v4350_v9 = vmul.f32 %v8997_v16, %v4248_v17  ;;  %v4351_v26 = vmul.f32 %v8999_v63, %v4248_v17  ;;  %v4256_v36 = vpop.permute.xlu2 %4255  ;;  %v3894_v17 = vadd.f32 %v8956_v50, %v3825_v24 }
 0x46f   : > { %6496 = vset.pattern.permute.xlu2 %v10920_v54  ;;  %v4354_v24 = vmul.f32 %v8997_v16, %v4256_v36 }
 0x470   : > { %v4414_v13 = vadd.f32 %v4350_v9, %v4152_v30  ;;  %v4415_v41 = vadd.f32 %v4351_v26, %v4153_v46  ;;  %6498 = vset.pattern.permute.xlu1 %v10842_v34  ;;  %4029 = vperm.xlu2 %6496, %v9743_v40   ;;  %v11213_v46 = vld [vmem:[#allocation57_spill] sm:$0xff]  ;;  %v11214_v9 = vld [vmem:[#allocation32_spill] sm:$0xff]  ;;  %v3823_v26 = vmul.f32 %v8940_v47, %v9819_v5 }
 0x471   : > { %4291 = vperm.xlu1 %6498, %v9743_v40   ;;  %v4760_v6 = vpop.f32.mrf.mxu0  ;;  %v4849_v49 = vpop.f32.mrf.mxu1  ;;  %v4092_v40 = vmul.f32 %v8960_v3, %v3994_v27  ;;  %v4355_v5 = vmul.f32 %v8999_v63, %v4256_v36 }
 0x472   : > { %v4478_v48 = vmax.f32 %v4414_v13, 0.0  ;;  %v4479_v33 = vmax.f32 %v4415_v41, 0.0  ;;  %v4850_v61 = vadd.f32 %v4849_v49, %v4760_v6  ;;  %v11215_v13 = vld [vmem:[#allocation56_spill] sm:$0xff]  ;;  %v11216_v49 = vld [vmem:[#allocation66_spill] sm:$0xff] }
 0x474   : > { %v5104_v8 = vadd.f32 %v4850_v61, %v9291_v62  ;;  %v9879_v7 = vpack.c.bf16 %v4478_v48, %v4476_v57  ;;  %v9881_v30 = vpack.c.bf16 %v4479_v33, %v4477_v12  ;;  %v2405_v62 = vadd.f32 %v11214_v9, %v11213_v46  ;;  %v11217_v48 = vld [vmem:[#allocation4_spill] sm:$0xff] }
 0x475   : > { %v4156_v57 = vadd.f32 %v4092_v40, %v3894_v17  ;;  %v4157_v33 = vadd.f32 %v4093_v52, %v3895_v37  ;;  %v3892_v61 = vadd.f32 %v8956_v50, %v3823_v26  ;;  %v3893_v40 = vadd.f32 %v8958_v31, %v3824_v51  ;;  %v9912_v37 = vpop.f32.mrf.mxu3 }
 0x476   : > { %v3990_v35 = vpop.permute.xlu1 %3989  ;;  %4779 = vmatmul.bf16.gmra.mxu0 %v9879_v7  ;;  %4868 = vmatmul.bf16.gmra.mxu1 %v9881_v30  ;;  %v3540_v27 = vadd.f32 %v11215_v13, %v2405_v62  ;;  %v5174_v12 = vadd.f32 %v9551_v21, %v5104_v8  ;;  %v3717_v62 = vpop.permute.xlu0 %3716  ;;  %11219 = vst [vmem:[#allocation10_spill] sm:$0xff] %v9912_v37 }
 0x477   : > { %v4090_v46 = vmul.f32 %v8960_v3, %v3990_v35  ;;  %v4091_v17 = vmul.f32 %v8978_v19, %v3990_v35  ;;  %v4418_v13 = vadd.f32 %v4354_v24, %v4156_v57  ;;  %v4419_v52 = vadd.f32 %v4355_v5, %v4157_v33 }
 0x478   : > { %6499 = vset.pattern.permute.xlu2 %v10842_v34  ;;  %v5238_v8 = vmax.f32 %v5174_v12, 0.0  ;;  %v11221_v12 = vld [vmem:[#allocation94_spill] sm:$0xff] }
 0x479   : > { %6500 = vset.pattern.permute.xlu1 %v11017_v29  ;;  %v4762_v41 = vpop.f32.mrf.mxu0  ;;  %v4851_v6 = vpop.f32.mrf.mxu1  ;;  %4932 = vmatmul.bf16.gmra.mxu2 %v11216_v49  ;;  %v4154_v26 = vadd.f32 %v4090_v46, %v3892_v61  ;;  %v11220_v61 = vld [vmem:[#allocation16_spill] sm:$0xff] }
 0x47a   : > { %3766 = vperm.xlu1 %6500, %v9802_v53   ;;  %v4852_v56 = vadd.f32 %v4851_v6, %v4762_v41  ;;  %5021 = vmatmul.bf16.gmra.mxu3 %v11217_v48  ;;  %v3998_v41 = vpop.permute.xlu2 %3997  ;;  %v9909_v6 = vpop.f32.mrf.mxu2  ;;  %v4155_v48 = vadd.f32 %v4091_v17, %v3893_v40  ;;  %v2453_v46 = vadd.f32 %v11221_v12, %v11220_v61  ;;  %v11222_v40 = vld [vmem:[#allocation9_spill] sm:$0xff]  ;;  %v11223_v17 = vld [vmem:[#allocation95_spill] sm:$0xff] }
 0x47b   : > { %4295 = vperm.xlu2 %6499, %v9771_v4   ;;  %11218 = vst [vmem:[#allocation38_spill] sm:$0xff] %v9909_v6 }
 0x47c   : > { %v5106_v9 = vadd.f32 %v4852_v56, %v3540_v27  ;;  %v4482_v27 = vmax.f32 %v4418_v13, 0.0  ;;  %v4483_v56 = vmax.f32 %v4419_v52, 0.0 }
 0x47e   : > { %v5176_v36 = vadd.f32 %v9551_v21, %v5106_v9  ;;  %v2542_v9 = vadd.f32 %v11223_v17, %v11222_v40  ;;  %v6361_v40 = vld [vmem:[%s10704_s14 + $0x58] sm:$0xff] }
 0x47f   : > { %v4252_v49 = vpop.permute.xlu1 %4251  ;;  %5547 = vmatpush.bf16.msra.mxu1 %v6361_v40 }
 0x480   : > { %v4352_v4 = vmul.f32 %v8997_v16, %v4252_v49  ;;  %v4353_v51 = vmul.f32 %v8999_v63, %v4252_v49  ;;  %v5240_v35 = vmax.f32 %v5176_v36, 0.0 }
 0x482   : > { %v4416_v57 = vadd.f32 %v4352_v4, %v4154_v26  ;;  %v4417_v24 = vadd.f32 %v4353_v51, %v4155_v48  ;;  %6502 = vset.pattern.permute.xlu1 %v10920_v54  ;;  %v9917_v20 = vpack.c.bf16 %v5240_v35, %v5238_v8  ;;  %v4002_v8 = vpop.permute.xlu0 %4001  ;;  %v3827_v26 = vmul.f32 %v8940_v47, %v3717_v62  ;;  %v4264_v4 = vpop.permute.xlu2 %4263 }
 0x483   : > { %4041 = vperm.xlu1 %6502, %v9830_v60   ;;  %6501 = vset.pattern.permute.xlu2 %v11017_v29 }
 0x484   : > { %v4480_v33 = vmax.f32 %v4416_v57, 0.0  ;;  %v4481_v5 = vmax.f32 %v4417_v24, 0.0  ;;  %3771 = vperm.xlu2 %6501, %v9830_v60   ;;  %v3828_v60 = vmul.f32 %v8942_v38, %v3717_v62  ;;  %v11225_v57 = vld [vmem:[#allocation124_spill] sm:$0xff]  ;;  %v4096_v24 = vmul.f32 %v8960_v3, %v4002_v8 }
 0x485   : > { %v3896_v62 = vadd.f32 %v8956_v50, %v3827_v26  ;;  %v4358_v26 = vmul.f32 %v8997_v16, %v4264_v4 }
 0x486   : > { %v3422_v13 = vpop.f32.mrf.mxu2  ;;  %v9926_v36 = vpack.c.bf16 %v4482_v27, %v4480_v33  ;;  %v9928_v52 = vpack.c.bf16 %v4483_v56, %v4481_v5  ;;  %v11226_v33 = vld [vmem:[#allocation125_spill] sm:$0xff]  ;;  %v4097_v5 = vmul.f32 %v8978_v19, %v4002_v8  ;;  %v3897_v17 = vadd.f32 %v8958_v31, %v3828_v60 }
 0x487   : > { %v9931_v49 = vadd.f32 %v3422_v13, %v2453_v46  ;;  %v3511_v48 = vpop.f32.mrf.mxu3  ;;  %v6353_v46 = vld [vmem:[%s10704_s14 + $0x18] sm:$0xff]  ;;  %v4095_v13 = vmul.f32 %v8978_v19, %v3998_v41 }
 0x488   : > { %v9934_v51 = vadd.f32 %v3511_v48, %v2542_v9  ;;  %v3722_v35 = vpop.permute.xlu1 %3721  ;;  %4784 = vmatmul.bf16.gmra.mxu0 %v9926_v36  ;;  %4873 = vmatmul.bf16.gmra.mxu1 %v9928_v52  ;;  %v4094_v9 = vmul.f32 %v8960_v3, %v3998_v41 }
 0x489   : > { %v3829_v27 = vmul.f32 %v8940_v47, %v3722_v35  ;;  %v3830_v56 = vmul.f32 %v8942_v38, %v3722_v35  ;;  %4937 = vmatmul.bf16.gmra.mxu2 %v11225_v57  ;;  %5458 = vmatpush.bf16.msra.mxu0 %v6353_v46  ;;  %v4359_v35 = vmul.f32 %v8999_v63, %v4264_v4 }
 0x48a   : > { %11224 = vst [vmem:[#allocation77_spill] sm:$0xff] %v9934_v51  ;;  %5026 = vmatmul.bf16.gmra.mxu3 %v11226_v33  ;;  %v3732_v60 = vpop.permute.xlu2 %3731 }
 0x48b   : > { %v3898_v61 = vadd.f32 %v8956_v50, %v3829_v27  ;;  %v3899_v12 = vadd.f32 %v8958_v31, %v3830_v56  ;;  %6505 = vset.pattern.permute.xlu1 %v11017_v29  ;;  %v4158_v27 = vadd.f32 %v4094_v9, %v3896_v62  ;;  %v4159_v56 = vadd.f32 %v4095_v13, %v3897_v17  ;;  %v4006_v9 = vpop.permute.xlu0 %4005  ;;  %v11227_v13 = vld [vmem:[#allocation51_spill] sm:$0xff] }
 0x48c   : > { %3776 = vperm.xlu1 %6505, %v9864_v15   ;;  %6503 = vset.pattern.permute.xlu2 %v10842_v34 }
 0x48d   : > { %v4160_v8 = vadd.f32 %v4096_v24, %v3898_v61  ;;  %4299 = vperm.xlu2 %6503, %v9802_v53   ;;  %v4161_v48 = vadd.f32 %v4097_v5, %v3899_v12  ;;  %v3621_v12 = vld [vmem:[%s8170_s21 + $0xf8] sm:$0xff] }
 0x48f   : > { %v4422_v57 = vadd.f32 %v4358_v26, %v4160_v8  ;;  %v4423_v33 = vadd.f32 %v4359_v35, %v4161_v48  ;;  %v4098_v35 = vmul.f32 %v8960_v3, %v4006_v9 }
 0x491   : > { %v4260_v41 = vpop.permute.xlu1 %4259  ;;  %v4486_v53 = vmax.f32 %v4422_v57, 0.0  ;;  %v4487_v62 = vmax.f32 %v4423_v33, 0.0  ;;  %v3834_v57 = vmul.f32 %v8942_v38, %v3732_v60 }
 0x492   : > { %v4356_v51 = vmul.f32 %v8997_v16, %v4260_v41  ;;  %v4357_v24 = vmul.f32 %v8999_v63, %v4260_v41 }
 0x493   : > { %v4272_v41 = vpop.permute.xlu0 %4271 }
 0x494   : > { %v4420_v61 = vadd.f32 %v4356_v51, %v4158_v27  ;;  %v4421_v37 = vadd.f32 %v4357_v24, %v4159_v56  ;;  %6507 = vset.pattern.permute.xlu1 %v10920_v54  ;;  %v4765_v4 = vpop.f32.mrf.mxu0  ;;  %v4854_v5 = vpop.f32.mrf.mxu1  ;;  %v4099_v56 = vmul.f32 %v8978_v19, %v4006_v9 }
 0x495   : > { %4045 = vperm.xlu1 %6507, %v9864_v15   ;;  %6506 = vset.pattern.permute.xlu2 %v11017_v29  ;;  %v4855_v17 = vadd.f32 %v4854_v5, %v4765_v4  ;;  %v4268_v15 = vpop.permute.xlu2 %4267  ;;  %v9989_v24 = vpop.f32.mrf.mxu2 }
 0x496   : > { %v4484_v46 = vmax.f32 %v4420_v61, 0.0  ;;  %v4485_v40 = vmax.f32 %v4421_v37, 0.0  ;;  %3781 = vperm.xlu2 %6506, %v3621_v12   ;;  %11228 = vst [vmem:[#allocation3_spill] sm:$0xff] %v9989_v24  ;;  %v4360_v4 = vmul.f32 %v8997_v16, %v4268_v15  ;;  %v4361_v5 = vmul.f32 %v8999_v63, %v4268_v15 }
 0x497   : > { %v9969_v8 = vadd.f32 %v4855_v17, %v11227_v13  ;;  %v4363_v17 = vmul.f32 %v8999_v63, %v4272_v41 }
 0x498   : > { %v9971_v51 = vpack.c.bf16 %v4486_v53, %v4484_v46  ;;  %v9973_v26 = vpack.c.bf16 %v4487_v62, %v4485_v40  ;;  %v4362_v40 = vmul.f32 %v8997_v16, %v4272_v41 }
 0x499   : > { %4942 = vmatmul.bf16.gmra.mxu2 %v9575_v2 }
 0x49a   : > { %5031 = vmatmul.bf16.gmra.mxu3 %v9577_v42  ;;  %4789 = vmatmul.bf16.gmra.mxu0 %v9971_v51  ;;  %v3727_v29 = vpop.permute.xlu1 %3726  ;;  %v3833_v42 = vmul.f32 %v8940_v47, %v3732_v60 }
 0x49b   : > { %4878 = vmatmul.bf16.gmra.mxu1 %v9973_v26  ;;  %v3831_v37 = vmul.f32 %v8940_v47, %v3727_v29  ;;  %v3832_v48 = vmul.f32 %v8942_v38, %v3727_v29 }
 0x49c   : > { %v3902_v62 = vadd.f32 %v8956_v50, %v3833_v42 }
 0x49d   : > { %6509 = vset.pattern.permute.xlu1 %v10842_v34  ;;  %v3900_v27 = vadd.f32 %v8956_v50, %v3831_v37  ;;  %v3901_v2 = vadd.f32 %v8958_v31, %v3832_v48  ;;  %v3742_v33 = vpop.permute.xlu2 %3741  ;;  %v9991_v34 = vpop.f32.mrf.mxu3  ;;  %v11230_v48 = vld [vmem:[#allocation118_spill] sm:$0xff] }
 0x49e   : > { %4311 = vperm.xlu1 %6509, %v3621_v12   ;;  %6508 = vset.pattern.permute.xlu2 %v10920_v54  ;;  %11229 = vst [vmem:[#allocation91_spill] sm:$0xff] %v9991_v34  ;;  %v3903_v54 = vadd.f32 %v8958_v31, %v3834_v57 }
 0x49f   : > { %4049 = vperm.xlu2 %6508, %v3621_v12   ;;  %v4162_v61 = vadd.f32 %v4098_v35, %v3900_v27  ;;  %v4163_v53 = vadd.f32 %v4099_v56, %v3901_v2  ;;  %v11231_v35 = vld [vmem:[#allocation102_spill] sm:$0xff]  ;;  %v11232_v27 = vld [vmem:[#allocation119_spill] sm:$0xff] }
 0x4a0   : > { %v2458_v15 = vadd.f32 %v11231_v35, %v11230_v48  ;;  %v11233_v2 = vld [vmem:[#allocation103_spill] sm:$0xff]  ;;  %v4276_v35 = vpop.permute.xlu0 %4275 }
 0x4a1   : > { %v4424_v9 = vadd.f32 %v4360_v4, %v4162_v61  ;;  %v4425_v13 = vadd.f32 %v4361_v5, %v4163_v53  ;;  %v2547_v56 = vadd.f32 %v11233_v2, %v11232_v27 }
 0x4a3   : > { %v4010_v46 = vpop.permute.xlu1 %4009  ;;  %v4488_v34 = vmax.f32 %v4424_v9, 0.0 }
 0x4a4   : > { %v4100_v60 = vmul.f32 %v8960_v3, %v4010_v46  ;;  %v4101_v12 = vmul.f32 %v8978_v19, %v4010_v46  ;;  %v4489_v46 = vmax.f32 %v4425_v13, 0.0  ;;  %v3838_v13 = vmul.f32 %v8942_v38, %v3742_v33 }
 0x4a5   : > { %v4018_v5 = vpop.permute.xlu2 %4017 }
 0x4a6   : > { %v4164_v29 = vadd.f32 %v4100_v60, %v3902_v62  ;;  %v4165_v37 = vadd.f32 %v4101_v12, %v3903_v54  ;;  %v6352_v62 = vld [vmem:[%s10704_s14 + $0x10] sm:$0xff] }
 0x4a7   : > { %5459 = vmatpush.bf16.msra.mxu0 %v6352_v62 }
 0x4a8   : > { %v4426_v42 = vadd.f32 %v4362_v40, %v4164_v29  ;;  %v4427_v57 = vadd.f32 %v4363_v17, %v4165_v37 }
 0x4a9   : > { %4947 = vmatmul.bf16.gmra.mxu2 %v9708_v11  ;;  %v3427_v24 = vpop.f32.mrf.mxu2  ;;  %v6360_v11 = vld [vmem:[%s10704_s14 + $0x50] sm:$0xff] }
 0x4aa   : > { %v3516_v6 = vpop.f32.mrf.mxu3  ;;  %5036 = vmatmul.bf16.gmra.mxu3 %v9710_v45  ;;  %v4490_v41 = vmax.f32 %v4426_v42, 0.0  ;;  %v4491_v61 = vmax.f32 %v4427_v57, 0.0  ;;  %v10007_v53 = vadd.f32 %v3427_v24, %v2458_v15  ;;  %5548 = vmatpush.bf16.msra.mxu1 %v6360_v11  ;;  %v10021_v45 = vpop.f32.mrf.mxu0  ;;  %v4104_v57 = vmul.f32 %v8960_v3, %v4018_v5 }
 0x4ab   : > { %v10009_v4 = vadd.f32 %v3516_v6, %v2547_v56  ;;  %v10025_v6 = vpop.f32.mrf.mxu1 }
 0x4ac   : > { %11234 = vst [vmem:[#allocation21_spill] sm:$0xff] %v10007_v53  ;;  %v3737_v54 = vpop.permute.xlu1 %3736  ;;  %v10017_v60 = vpack.c.bf16 %v4490_v41, %v4488_v34  ;;  %v10019_v12 = vpack.c.bf16 %v4491_v61, %v4489_v46  ;;  %v3837_v34 = vmul.f32 %v8940_v47, %v3742_v33  ;;  %v3907_v33 = vadd.f32 %v8958_v31, %v3838_v13  ;;  %v11236_v41 = vld [vmem:[#allocation45_spill] sm:$0xff] }
 0x4ad   : > { %11235 = vst [vmem:[#allocation59_spill] sm:$0xff] %v10009_v4  ;;  %v3835_v40 = vmul.f32 %v8940_v47, %v3737_v54  ;;  %v3836_v17 = vmul.f32 %v8942_v38, %v3737_v54  ;;  %v4105_v46 = vmul.f32 %v8978_v19, %v4018_v5  ;;  %v4365_v54 = vmul.f32 %v8999_v63, %v4276_v35  ;;  %v3752_v5 = vpop.permute.xlu0 %3751 }
 0x4ae   : > { %4794 = vmatmul.bf16.gmra.mxu0 %v10017_v60  ;;  %4883 = vmatmul.bf16.gmra.mxu1 %v10019_v12  ;;  %v3747_v24 = vpop.permute.xlu2 %3746  ;;  %v3906_v42 = vadd.f32 %v8956_v50, %v3837_v34 }
 0x4af   : > { %v3904_v2 = vadd.f32 %v8956_v50, %v3835_v40  ;;  %v3905_v56 = vadd.f32 %v8958_v31, %v3836_v17  ;;  %v4169_v17 = vadd.f32 %v4105_v46, %v3907_v33 }
 0x4b0   : > { %v4168_v40 = vadd.f32 %v4104_v57, %v3906_v42 }
 0x4b5   : > { %v4014_v9 = vpop.permute.xlu1 %4013 }
 0x4b6   : > { %v4102_v37 = vmul.f32 %v8960_v3, %v4014_v9  ;;  %v4103_v48 = vmul.f32 %v8978_v19, %v4014_v9 }
 0x4b7   : > { %v4770_v29 = vpop.f32.mrf.mxu0 }
 0x4b8   : > { %v4859_v15 = vpop.f32.mrf.mxu1  ;;  %v4166_v62 = vadd.f32 %v4102_v37, %v3904_v2  ;;  %v4167_v11 = vadd.f32 %v4103_v48, %v3905_v56  ;;  %v4026_v9 = vpop.permute.xlu2 %4025  ;;  %v3841_v37 = vmul.f32 %v8940_v47, %v3752_v5  ;;  %v3842_v48 = vmul.f32 %v8942_v38, %v3752_v5 }
 0x4b9   : > { %v4860_v27 = vadd.f32 %v4859_v15, %v4770_v29  ;;  %4952 = vmatmul.bf16.gmra.mxu2 %v9808_v44  ;;  %v4364_v44 = vmul.f32 %v8997_v16, %v4276_v35  ;;  %v10050_v2 = vpop.f32.mrf.mxu2  ;;  %v10052_v35 = vpop.f32.mrf.mxu3 }
 0x4ba   : > { %5041 = vmatmul.bf16.gmra.mxu3 %v9810_v18  ;;  %v4429_v29 = vadd.f32 %v4365_v54, %v4167_v11  ;;  %11237 = vst [vmem:[#allocation44_spill] sm:$0xff] %v10050_v2  ;;  %v4108_v11 = vmul.f32 %v8960_v3, %v4026_v9  ;;  %v11247_v2 = vld [vmem:[#allocation128_spill] sm:$0xff] }
 0x4bb   : > { %v10042_v61 = vadd.f32 %v4860_v27, %v11236_v41  ;;  %v4428_v18 = vadd.f32 %v4364_v44, %v4166_v62  ;;  %11238 = vst [vmem:[#allocation13_spill] sm:$0xff] %v10052_v35  ;;  %v3910_v62 = vadd.f32 %v8956_v50, %v3841_v37  ;;  %v4109_v44 = vmul.f32 %v8978_v19, %v4026_v9  ;;  %v11241_v9 = vld [vmem:[#allocation36_spill] sm:$0xff] }
 0x4bc   : > { %v4493_v42 = vmax.f32 %v4429_v29, 0.0  ;;  %v11240_v29 = vld [vmem:[#allocation47_spill] sm:$0xff] }
 0x4bd   : > { %v4492_v56 = vmax.f32 %v4428_v18, 0.0  ;;  %v11239_v18 = vld [vmem:[#allocation84_spill] sm:$0xff] }
 0x4be   : > { %v4280_v34 = vpop.permute.xlu1 %4279 }
 0x4bf   : > { %v4366_v13 = vmul.f32 %v8997_v16, %v4280_v34  ;;  %v4367_v15 = vmul.f32 %v8999_v63, %v4280_v34  ;;  %v3840_v34 = vmul.f32 %v8942_v38, %v3747_v24 }
 0x4c0   : > { %v10096_v59 = vpop.f32.mrf.mxu1 }
 0x4c1   : > { %v4430_v4 = vadd.f32 %v4366_v13, %v4168_v40  ;;  %v4431_v27 = vadd.f32 %v4367_v15, %v4169_v17  ;;  %v3911_v40 = vadd.f32 %v8958_v31, %v3842_v48  ;;  %v3839_v17 = vmul.f32 %v8940_v47, %v3747_v24  ;;  %v11242_v15 = vld [vmem:[#allocation75_spill] sm:$0xff] }
 0x4c2   : > { %v2463_v13 = vadd.f32 %v11240_v29, %v11239_v18  ;;  %v2552_v5 = vadd.f32 %v11242_v15, %v11241_v9  ;;  %v6359_v24 = vld [vmem:[%s10704_s14 + $0x48] sm:$0xff]  ;;  %v10088_v9 = vpop.f32.mrf.mxu0 }
 0x4c3   : > { %v4494_v33 = vmax.f32 %v4430_v4, 0.0  ;;  %v4495_v57 = vmax.f32 %v4431_v27, 0.0  ;;  %v4288_v4 = vpop.permute.xlu2 %4287  ;;  %v3908_v18 = vadd.f32 %v8956_v50, %v3839_v17  ;;  %5549 = vmatpush.bf16.msra.mxu1 %v6359_v24 }
 0x4c4   : > { %v4370_v48 = vmul.f32 %v8997_v16, %v4288_v4 }
 0x4c5   : > { %v10054_v46 = vpack.c.bf16 %v4494_v33, %v4492_v56  ;;  %v10056_v41 = vpack.c.bf16 %v4495_v57, %v4493_v42  ;;  %v4172_v56 = vadd.f32 %v4108_v11, %v3910_v62  ;;  %v4173_v42 = vadd.f32 %v4109_v44, %v3911_v40  ;;  %v3757_v40 = vpop.permute.xlu0 %3756 }
 0x4c6   : > { %v3909_v62 = vadd.f32 %v8958_v31, %v3840_v34  ;;  %v11246_v34 = vld [vmem:[#allocation112_spill] sm:$0xff] }
 0x4c7   : > { %v4022_v54 = vpop.permute.xlu1 %4021  ;;  %4799 = vmatmul.bf16.gmra.mxu0 %v10054_v46  ;;  %4888 = vmatmul.bf16.gmra.mxu1 %v10056_v41 }
 0x4c8   : > { %v4106_v11 = vmul.f32 %v8960_v3, %v4022_v54  ;;  %v4107_v44 = vmul.f32 %v8978_v19, %v4022_v54 }
 0x4c9   : > { %4957 = vmatmul.bf16.gmra.mxu2 %v9879_v7  ;;  %v4371_v7 = vmul.f32 %v8999_v63, %v4288_v4  ;;  %v4434_v4 = vadd.f32 %v4370_v48, %v4172_v56 }
 0x4ca   : > { %5046 = vmatmul.bf16.gmra.mxu3 %v9881_v30  ;;  %v6351_v30 = vld [vmem:[%s10704_s14 + $0x8] sm:$0xff]  ;;  %v4170_v15 = vadd.f32 %v4106_v11, %v3908_v18 }
 0x4cb   : > { %5460 = vmatpush.bf16.msra.mxu0 %v6351_v30  ;;  %v4435_v29 = vadd.f32 %v4371_v7, %v4173_v42  ;;  %v4030_v30 = vpop.permute.xlu2 %4029  ;;  %v4498_v56 = vmax.f32 %v4434_v4, 0.0 }
 0x4cc   : > { %v3432_v27 = vpop.f32.mrf.mxu2  ;;  %v3521_v37 = vpop.f32.mrf.mxu3 }
 0x4cd   : > { %v10074_v33 = vadd.f32 %v3432_v27, %v2463_v13  ;;  %v10076_v57 = vadd.f32 %v3521_v37, %v2552_v5  ;;  %v4171_v5 = vadd.f32 %v4107_v44, %v3909_v62  ;;  %v11245_v37 = vld [vmem:[#allocation127_spill] sm:$0xff]  ;;  %v4499_v42 = vmax.f32 %v4435_v29, 0.0 }
 0x4ce   : > { %v2465_v35 = vadd.f32 %v11246_v34, %v11245_v37  ;;  %v3844_v29 = vmul.f32 %v8942_v38, %v3757_v40 }
 0x4cf   : > { %11243 = vst [vmem:[#allocation6_spill] sm:$0xff] %v10074_v33  ;;  %v11260_v33 = vld [vmem:[#allocation30_spill] sm:$0xff] }
 0x4d0   : > { %11244 = vst [vmem:[#allocation49_spill] sm:$0xff] %v10076_v57  ;;  %v11248_v57 = vld [vmem:[#allocation113_spill] sm:$0xff] }
 0x4d1   : > { %v4284_v13 = vpop.permute.xlu1 %4283  ;;  %v2554_v54 = vadd.f32 %v11248_v57, %v11247_v2  ;;  %v4034_v2 = vpop.permute.xlu0 %4033  ;;  %v3843_v57 = vmul.f32 %v8940_v47, %v3757_v40 }
 0x4d2   : > { %v4368_v27 = vmul.f32 %v8997_v16, %v4284_v13  ;;  %v4369_v17 = vmul.f32 %v8999_v63, %v4284_v13  ;;  %v4113_v34 = vmul.f32 %v8978_v19, %v4034_v2 }
 0x4d3   : > { %v3912_v40 = vadd.f32 %v8956_v50, %v3843_v57 }
 0x4d4   : > { %v4432_v48 = vadd.f32 %v4368_v27, %v4170_v15  ;;  %v4433_v7 = vadd.f32 %v4369_v17, %v4171_v5  ;;  %v3434_v24 = vpop.f32.mrf.mxu2  ;;  %v3523_v18 = vpop.f32.mrf.mxu3 }
 0x4d5   : > { %v10098_v62 = vadd.f32 %v3434_v24, %v2465_v35  ;;  %v10100_v11 = vadd.f32 %v3523_v18, %v2554_v54  ;;  %v11251_v24 = vld [vmem:[#allocation85_spill] sm:$0xff] }
 0x4d6   : > { %v4496_v44 = vmax.f32 %v4432_v48, 0.0  ;;  %v4497_v13 = vmax.f32 %v4433_v7, 0.0  ;;  %v4296_v7 = vpop.permute.xlu2 %4295 }
 0x4d7   : > { %11249 = vst [vmem:[#allocation110_spill] sm:$0xff] %v10098_v62 }
 0x4d8   : > { %11250 = vst [vmem:[#allocation111_spill] sm:$0xff] %v10100_v11  ;;  %v10102_v22 = vpack.c.bf16 %v4498_v56, %v4496_v44  ;;  %v10104_v37 = vpack.c.bf16 %v4499_v42, %v4497_v13  ;;  %v4110_v44 = vmul.f32 %v8960_v3, %v4030_v30  ;;  %v4111_v13 = vmul.f32 %v8978_v19, %v4030_v30  ;;  %v11254_v11 = vld [vmem:[#allocation39_spill] sm:$0xff] }
 0x4d9   : > { %4962 = vmatmul.bf16.gmra.mxu2 %v9926_v36  ;;  %v4112_v36 = vmul.f32 %v8960_v3, %v4034_v2 }
 0x4da   : > { %v3762_v4 = vpop.permute.xlu1 %3761  ;;  %4804 = vmatmul.bf16.gmra.mxu0 %v10102_v22  ;;  %4893 = vmatmul.bf16.gmra.mxu1 %v10104_v37  ;;  %v4775_v35 = vpop.f32.mrf.mxu0  ;;  %v4174_v57 = vadd.f32 %v4110_v44, %v3912_v40 }
 0x4db   : > { %v3845_v15 = vmul.f32 %v8940_v47, %v3762_v4  ;;  %v3846_v5 = vmul.f32 %v8942_v38, %v3762_v4  ;;  %5051 = vmatmul.bf16.gmra.mxu3 %v9928_v52  ;;  %v4864_v27 = vpop.f32.mrf.mxu1  ;;  %v3913_v52 = vadd.f32 %v8958_v31, %v3844_v29  ;;  %v6534_v29 = vld [vmem:[%s10703_s13] sm:$0x3] }
 0x4dc   : > { %v4865_v17 = vadd.f32 %v4864_v27, %v4775_v35  ;;  %v4923_v54 = vpop.f32.mrf.mxu2  ;;  %v5012_v56 = vpop.f32.mrf.mxu3  ;;  %v4374_v27 = vmul.f32 %v8997_v16, %v4296_v7  ;;  %v10133_v43 = vperm.slane %v6534_v29, 1 }
 0x4dd   : > { %v3914_v42 = vadd.f32 %v8956_v50, %v3845_v15  ;;  %v3915_v48 = vadd.f32 %v8958_v31, %v3846_v5  ;;  %v5013_v4 = vadd.f32 %v5012_v56, %v4923_v54  ;;  %v4375_v15 = vmul.f32 %v8999_v63, %v4296_v7  ;;  %v11253_v5 = vld [vmem:[#allocation48_spill] sm:$0xff] }
 0x4de   : > { %v10120_v18 = vadd.f32 %v4865_v17, %v11251_v24  ;;  %v2479_v28 = vadd.f32 %v11254_v11, %v11253_v5  ;;  %v4175_v14 = vadd.f32 %v4111_v13, %v3913_v52  ;;  %v11255_v17 = vld [vmem:[#allocation55_spill] sm:$0xff]  ;;  %v11256_v11 = vld [vmem:[#allocation73_spill] sm:$0xff]  ;;  %v3772_v13 = vpop.permute.xlu2 %3771 }
 0x4df   : > { %v4176_v2 = vadd.f32 %v4112_v36, %v3914_v42  ;;  %v4177_v35 = vadd.f32 %v4113_v34, %v3915_v48  ;;  %v5093_v24 = vadd.f32 %v5013_v4, %v11255_v17 }
 0x4e0   : > { %11252 = vst [vmem:[#allocation80_spill] sm:$0xff] %v10120_v18  ;;  %v3529_v7 = vadd.f32 %v11256_v11, %v2479_v28 }
 0x4e1   : > { %v4438_v36 = vadd.f32 %v4374_v27, %v4176_v2  ;;  %v4439_v34 = vadd.f32 %v4375_v15, %v4177_v35  ;;  %v5163_v4 = vadd.f32 %v10133_v43, %v5093_v24  ;;  %v4038_v35 = vpop.permute.xlu0 %4037 }
 0x4e3   : > { %v4292_v30 = vpop.permute.xlu1 %4291  ;;  %v4502_v17 = vmax.f32 %v4438_v36, 0.0  ;;  %v4503_v29 = vmax.f32 %v4439_v34, 0.0  ;;  %v5227_v28 = vmax.f32 %v5163_v4, 0.0 }
 0x4e4   : > { %v4372_v54 = vmul.f32 %v8997_v16, %v4292_v30  ;;  %v4373_v56 = vmul.f32 %v8999_v63, %v4292_v30  ;;  %v4925_v42 = vpop.f32.mrf.mxu2  ;;  %v5014_v48 = vpop.f32.mrf.mxu3 }
 0x4e5   : > { %v5015_v40 = vadd.f32 %v5014_v48, %v4925_v42  ;;  %v6350_v42 = vld [vmem:[%s10704_s14] sm:$0xff]  ;;  %v3849_v48 = vmul.f32 %v8940_v47, %v3772_v13 }
 0x4e6   : > { %v4436_v52 = vadd.f32 %v4372_v54, %v4174_v57  ;;  %v4437_v44 = vadd.f32 %v4373_v56, %v4175_v14  ;;  %v10145_v57 = vpop.f32.mrf.mxu0  ;;  %v10147_v14 = vpop.f32.mrf.mxu1  ;;  %5461 = vmatpush.bf16.msra.mxu0 %v6350_v42 }
 0x4e7   : > { %v5095_v5 = vadd.f32 %v5015_v40, %v3529_v7  ;;  %11257 = vst [vmem:[#allocation86_spill] sm:$0xff] %v10147_v14  ;;  %v4114_v7 = vmul.f32 %v8960_v3, %v4038_v35  ;;  %v3850_v40 = vmul.f32 %v8942_v38, %v3772_v13  ;;  %v4300_v4 = vpop.permute.xlu2 %4299 }
 0x4e8   : > { %v4500_v23 = vmax.f32 %v4436_v52, 0.0  ;;  %v4501_v2 = vmax.f32 %v4437_v44, 0.0  ;;  %v4115_v44 = vmul.f32 %v8978_v19, %v4038_v35 }
 0x4e9   : > { %v5165_v27 = vadd.f32 %v10133_v43, %v5095_v5  ;;  %4967 = vmatmul.bf16.gmra.mxu2 %v9971_v51 }
 0x4ea   : > { %v10141_v15 = vpack.c.bf16 %v4502_v17, %v4500_v23  ;;  %v10143_v30 = vpack.c.bf16 %v4503_v29, %v4501_v2  ;;  %v4304_v17 = vpop.permute.xlu0 %4303  ;;  %v11258_v29 = vld [vmem:[#allocation12_spill] sm:$0xff]  ;;  %v11259_v2 = vld [vmem:[#allocation65_spill] sm:$0xff] }
 0x4eb   : > { %v5229_v24 = vmax.f32 %v5165_v27, 0.0  ;;  %5056 = vmatmul.bf16.gmra.mxu3 %v9973_v26  ;;  %v6358_v26 = vld [vmem:[%s10704_s14 + $0x40] sm:$0xff]  ;;  %v2484_v27 = vadd.f32 %v11259_v2, %v11258_v29 }
 0x4ec   : > { %v3767_v36 = vpop.permute.xlu1 %3766  ;;  %4809 = vmatmul.bf16.gmra.mxu0 %v10141_v15  ;;  %4898 = vmatmul.bf16.gmra.mxu1 %v10143_v30  ;;  %v4928_v34 = vpop.f32.mrf.mxu2 }
 0x4ed   : > { %v10152_v54 = vpack.c.bf16 %v5229_v24, %v5227_v28  ;;  %v3847_v23 = vmul.f32 %v8940_v47, %v3767_v36  ;;  %v3848_v51 = vmul.f32 %v8942_v38, %v3767_v36  ;;  %v5017_v56 = vpop.f32.mrf.mxu3  ;;  %5550 = vmatpush.bf16.msra.mxu1 %v6358_v26  ;;  %v3918_v28 = vadd.f32 %v8956_v50, %v3849_v48 }
 0x4ee   : > { %v5018_v5 = vadd.f32 %v5017_v56, %v4928_v34  ;;  %v4376_v36 = vmul.f32 %v8997_v16, %v4300_v4  ;;  %v3919_v26 = vadd.f32 %v8958_v31, %v3850_v40  ;;  %v3533_v34 = vadd.f32 %v11260_v33, %v2484_v27  ;;  %v11261_v56 = vld [vmem:[#allocation8_spill] sm:$0xff] }
 0x4ef   : > { %v3916_v11 = vadd.f32 %v8956_v50, %v3847_v23  ;;  %v3917_v52 = vadd.f32 %v8958_v31, %v3848_v51  ;;  %v4377_v51 = vmul.f32 %v8999_v63, %v4300_v4  ;;  %v4378_v48 = vmul.f32 %v8997_v16, %v4304_v17 }
 0x4f0   : > { %v5097_v18 = vadd.f32 %v5018_v5, %v11261_v56 }
 0x4f1   : > { %v4178_v24 = vadd.f32 %v4114_v7, %v3916_v11  ;;  %v4179_v13 = vadd.f32 %v4115_v44, %v3917_v52  ;;  %v4379_v11 = vmul.f32 %v8999_v63, %v4304_v17  ;;  %v11262_v7 = vld [vmem:[#allocation92_spill] sm:$0xff] }
 0x4f2   : > { %v5167_v5 = vadd.f32 %v10133_v43, %v5097_v18 }
 0x4f3   : > { %v4780_v23 = vpop.f32.mrf.mxu0  ;;  %v4869_v42 = vpop.f32.mrf.mxu1  ;;  %v4440_v4 = vadd.f32 %v4376_v36, %v4178_v24 }
 0x4f4   : > { %v4870_v62 = vadd.f32 %v4869_v42, %v4780_v23  ;;  %v4930_v35 = vpop.f32.mrf.mxu2  ;;  %v4441_v23 = vadd.f32 %v4377_v51, %v4179_v13  ;;  %v5231_v36 = vmax.f32 %v5167_v5, 0.0 }
 0x4f5   : > { %v4042_v53 = vpop.permute.xlu1 %4041  ;;  %v5019_v29 = vpop.f32.mrf.mxu3 }
 0x4f6   : > { %v10179_v2 = vadd.f32 %v4870_v62, %v11262_v7  ;;  %v4116_v40 = vmul.f32 %v8960_v3, %v4042_v53  ;;  %v4117_v52 = vmul.f32 %v8978_v19, %v4042_v53  ;;  %v5020_v44 = vadd.f32 %v5019_v29, %v4930_v35 }
 0x4f7   : > { %v4504_v62 = vmax.f32 %v4440_v4, 0.0  ;;  %v4505_v7 = vmax.f32 %v4441_v23, 0.0 }
 0x4f8   : > { %11263 = vst [vmem:[#allocation57_spill] sm:$0xff] %v10179_v2  ;;  %v4180_v42 = vadd.f32 %v4116_v40, %v3918_v28  ;;  %v4181_v33 = vadd.f32 %v4117_v52, %v3919_v26  ;;  %v5099_v27 = vadd.f32 %v5020_v44, %v3533_v34  ;;  %v3782_v34 = vpop.permute.xlu2 %3781  ;;  %v11266_v40 = vld [vmem:[#allocation23_spill] sm:$0xff] }
 0x4f9   : > { %4972 = vmatmul.bf16.gmra.mxu2 %v10017_v60 }
 0x4fa   : > { %v5169_v56 = vadd.f32 %v10133_v43, %v5099_v27  ;;  %v4442_v17 = vadd.f32 %v4378_v48, %v4180_v42  ;;  %v4443_v14 = vadd.f32 %v4379_v11, %v4181_v33  ;;  %v11265_v48 = vld [vmem:[#allocation41_spill] sm:$0xff]  ;;  %v3853_v33 = vmul.f32 %v8940_v47, %v3782_v34 }
 0x4fb   : > { %5061 = vmatmul.bf16.gmra.mxu3 %v10019_v12  ;;  %v10187_v28 = vpop.f32.mrf.mxu0  ;;  %v10189_v13 = vpop.f32.mrf.mxu1 }
 0x4fc   : > { %v4506_v2 = vmax.f32 %v4442_v17, 0.0  ;;  %v4507_v53 = vmax.f32 %v4443_v14, 0.0  ;;  %v4933_v35 = vpop.f32.mrf.mxu2  ;;  %v5233_v24 = vmax.f32 %v5169_v56, 0.0  ;;  %v11264_v14 = vld [vmem:[#allocation58_spill] sm:$0xff] }
 0x4fd   : > { %v5022_v26 = vpop.f32.mrf.mxu3  ;;  %v2489_v11 = vadd.f32 %v11265_v48, %v11264_v14 }
 0x4fe   : > { %v3777_v18 = vpop.permute.xlu1 %3776  ;;  %v10191_v60 = vpack.c.bf16 %v4506_v2, %v4504_v62  ;;  %v10193_v51 = vpack.c.bf16 %v4507_v53, %v4505_v7  ;;  %v10195_v29 = vpack.c.bf16 %v5233_v24, %v5231_v36  ;;  %v5023_v12 = vadd.f32 %v5022_v26, %v4933_v35  ;;  %v11267_v2 = vld [vmem:[#allocation26_spill] sm:$0xff] }
 0x4ff   : > { %v3537_v42 = vadd.f32 %v11267_v2, %v2489_v11  ;;  %v3851_v56 = vmul.f32 %v8940_v47, %v3777_v18  ;;  %v3852_v17 = vmul.f32 %v8942_v38, %v3777_v18  ;;  %v3854_v62 = vmul.f32 %v8942_v38, %v3782_v34  ;;  %v4308_v11 = vpop.permute.xlu0 %4307 }
 0x500   : > { %4814 = vmatmul.bf16.gmra.mxu0 %v10191_v60  ;;  %4903 = vmatmul.bf16.gmra.mxu1 %v10193_v51  ;;  %v5101_v52 = vadd.f32 %v5023_v12, %v11266_v40  ;;  %v4050_v14 = vpop.permute.xlu2 %4049  ;;  %v3922_v34 = vadd.f32 %v8956_v50, %v3853_v33 }
 0x501   : > { %v3920_v18 = vadd.f32 %v8956_v50, %v3851_v56  ;;  %v3921_v38 = vadd.f32 %v8958_v31, %v3852_v17  ;;  %v3923_v48 = vadd.f32 %v8958_v31, %v3854_v62  ;;  %v4120_v40 = vmul.f32 %v8960_v3, %v4050_v14 }
 0x502   : > { %v5171_v35 = vadd.f32 %v10133_v43, %v5101_v52  ;;  %v4121_v52 = vmul.f32 %v8978_v19, %v4050_v14  ;;  %v4381_v50 = vmul.f32 %v8999_v63, %v4308_v11  ;;  %v11270_v14 = vld [vmem:[#allocation54_spill] sm:$0xff] }
 0x504   : > { %v4935_v44 = vpop.f32.mrf.mxu2  ;;  %v4185_v33 = vadd.f32 %v4121_v52, %v3923_v48 }
 0x505   : > { %v5024_v4 = vpop.f32.mrf.mxu3  ;;  %v4785_v23 = vpop.f32.mrf.mxu0 }
 0x506   : > { %v5025_v27 = vadd.f32 %v5024_v4, %v4935_v44  ;;  %v4874_v5 = vpop.f32.mrf.mxu1 }
 0x507   : > { %v4875_v7 = vadd.f32 %v4874_v5, %v4785_v23  ;;  %v4046_v53 = vpop.permute.xlu1 %4045 }
 0x508   : > { %v5103_v24 = vadd.f32 %v5025_v27, %v3537_v42  ;;  %v4118_v26 = vmul.f32 %v8960_v3, %v4046_v53  ;;  %v4119_v12 = vmul.f32 %v8978_v19, %v4046_v53  ;;  %v4380_v27 = vmul.f32 %v8997_v16, %v4308_v11 }
 0x509   : > { %v10209_v36 = vadd.f32 %v4875_v7, %v9570_v39  ;;  %4977 = vmatmul.bf16.gmra.mxu2 %v10054_v46  ;;  %v5235_v39 = vmax.f32 %v5171_v35, 0.0 }
 0x50a   : > { %v5173_v47 = vadd.f32 %v10133_v43, %v5103_v24  ;;  %v4182_v4 = vadd.f32 %v4118_v26, %v3920_v18  ;;  %v4183_v23 = vadd.f32 %v4119_v12, %v3921_v38  ;;  %v11268_v24 = vld [vmem:[#allocation63_spill] sm:$0xff]  ;;  %v11269_v26 = vld [vmem:[#allocation24_spill] sm:$0xff] }
 0x50b   : > { %5066 = vmatmul.bf16.gmra.mxu3 %v10056_v41  ;;  %v4184_v41 = vadd.f32 %v4120_v40, %v3922_v34  ;;  %v2494_v12 = vadd.f32 %v11269_v26, %v11268_v24  ;;  %v11271_v40 = vld [vmem:[#allocation69_spill] sm:$0xff] }
 0x50c   : > { %v4938_v44 = vpop.f32.mrf.mxu2  ;;  %v5237_v46 = vmax.f32 %v5173_v47, 0.0  ;;  %v4444_v19 = vadd.f32 %v4380_v27, %v4182_v4  ;;  %v4445_v17 = vadd.f32 %v4381_v50, %v4183_v23 }
 0x50d   : > { %v5027_v2 = vpop.f32.mrf.mxu3  ;;  %v10226_v31 = vpop.f32.mrf.mxu0  ;;  %v3541_v52 = vadd.f32 %v11271_v40, %v2494_v12 }
 0x50e   : > { %v10222_v42 = vpack.c.bf16 %v5237_v46, %v5235_v39  ;;  %v5028_v5 = vadd.f32 %v5027_v2, %v4938_v44  ;;  %v10228_v56 = vpop.f32.mrf.mxu1  ;;  %v4508_v39 = vmax.f32 %v4444_v19, 0.0  ;;  %v4509_v11 = vmax.f32 %v4445_v17, 0.0 }
 0x510   : > { %v4312_v3 = vpop.permute.xlu1 %4311  ;;  %v5105_v47 = vadd.f32 %v5028_v5, %v11270_v14 }
 0x511   : > { %v4382_v62 = vmul.f32 %v8997_v16, %v4312_v3  ;;  %v4383_v7 = vmul.f32 %v8999_v63, %v4312_v3 }
 0x512   : > { %v5175_v63 = vadd.f32 %v10133_v43, %v5105_v47 }
 0x513   : > { %v4446_v53 = vadd.f32 %v4382_v62, %v4184_v41  ;;  %v4447_v35 = vadd.f32 %v4383_v7, %v4185_v33 }
 0x514   : > { %v4940_v18 = vpop.f32.mrf.mxu2  ;;  %v5239_v33 = vmax.f32 %v5175_v63, 0.0 }
 0x515   : > { %v4510_v38 = vmax.f32 %v4446_v53, 0.0  ;;  %v4511_v34 = vmax.f32 %v4447_v35, 0.0  ;;  %v5029_v48 = vpop.f32.mrf.mxu3 }
 0x516   : > { %v5030_v44 = vadd.f32 %v5029_v48, %v4940_v18 }
 0x517   : > { %v4790_v46 = vpop.f32.mrf.mxu0  ;;  %v4542_v16 = vpack.c.bf16 %v4510_v38, %v4508_v39  ;;  %v4543_v4 = vpack.c.bf16 %v4511_v34, %v4509_v11 }
 0x518   : > { %v5107_v23 = vadd.f32 %v5030_v44, %v3541_v52  ;;  %v4879_v2 = vpop.f32.mrf.mxu1  ;;  %v11273_v52 = vld [vmem:[#allocation34_spill] sm:$0xff] }
 0x519   : > { %v4880_v27 = vadd.f32 %v4879_v2, %v4790_v46  ;;  %4819 = vmatmul.bf16.gmra.mxu0 %v4542_v16  ;;  %4908 = vmatmul.bf16.gmra.mxu1 %v4543_v4  ;;  %v11275_v46 = vld [vmem:[#allocation18_spill] sm:$0xff] }
 0x51a   : > { %v5177_v50 = vadd.f32 %v10133_v43, %v5107_v23  ;;  %4982 = vmatmul.bf16.gmra.mxu2 %v10102_v22 }
 0x51b   : > { %v10240_v41 = vadd.f32 %v4880_v27, %v9628_v25  ;;  %5071 = vmatmul.bf16.gmra.mxu3 %v10104_v37  ;;  %v11276_v27 = vld [vmem:[#allocation116_spill] sm:$0xff] }
 0x51c   : > { %v4943_v5 = vpop.f32.mrf.mxu2  ;;  %v5241_v3 = vmax.f32 %v5177_v50, 0.0 }
 0x51d   : > { %v5032_v19 = vpop.f32.mrf.mxu3 }
 0x51e   : > { %v5297_v17 = vpack.c.bf16 %v5241_v3, %v5239_v33  ;;  %v11277_v33 = vld [vmem:[#allocation117_spill] sm:$0xff] }
 0x51f   : > { %v10243_v62 = vpop.f32.mrf.mxu0 }
 0x520   : > { %v10245_v7 = vpop.f32.mrf.mxu1 }
 0x524   : > { %v4945_v53 = vpop.f32.mrf.mxu2 }
 0x525   : > { %v5034_v35 = vpop.f32.mrf.mxu3 }
 0x529   : > { %5462 = vmatmul.bf16.vlgmr.msra.gmra.mxu0 %v9596_v10  ;;  %5551 = vmatmul.bf16.vlgmr.msra.gmra.mxu1 %v10152_v54 }
 0x52a   : > { %4987 = vmatmul.bf16.gmra.mxu2 %v10141_v15 }
 0x52b   : > { %5076 = vmatmul.bf16.gmra.mxu3 %v10143_v30  ;;  %v4795_v25 = vpop.f32.mrf.mxu0  ;;  %v4884_v22 = vpop.f32.mrf.mxu1 }
 0x52c   : > { %v4885_v37 = vadd.f32 %v4884_v22, %v4795_v25  ;;  %v10251_v24 = vpop.f32.mrf.mxu2  ;;  %v5033_v25 = vadd.f32 %v5032_v19, %v4943_v5  ;;  %v5178_v5 = vadd.f32 %v9551_v21, %v9969_v8  ;;  %v4862_v8 = vadd.f32 %v10096_v59, %v10088_v9  ;;  %v11285_v59 = vld [vmem:[#allocation67_spill] sm:$0xff] }
 0x52d   : > { %v10253_v26 = vpop.f32.mrf.mxu3 }
 0x52e   : > { %v10256_v12 = vadd.f32 %v4885_v37, %v9696_v58 }
 0x533   : > { %v10262_v10 = vpop.f32.mrf.mxu0  ;;  %v10264_v15 = vpop.f32.mrf.mxu1 }
 0x534   : > { %v4950_v14 = vpop.f32.mrf.mxu2 }
 0x535   : > { %v5039_v47 = vpop.f32.mrf.mxu3 }
 0x539   : > { %5467 = vmatmul.bf16.gmra.mxu0 %v9727_v32  ;;  %5556 = vmatmul.bf16.gmra.mxu1 %v10195_v29 }
 0x53a   : > { %4992 = vmatmul.bf16.gmra.mxu2 %v10191_v60 }
 0x53b   : > { %5081 = vmatmul.bf16.gmra.mxu3 %v10193_v51 }
 0x53c   : > { %v10266_v30 = vpop.f32.mrf.mxu2 }
 0x53d   : > { %v10268_v54 = vpop.f32.mrf.mxu3 }
 0x544   : > { %v4800_v58 = vpop.f32.mrf.mxu0  ;;  %v4889_v18 = vpop.f32.mrf.mxu1 }
 0x545   : > { %v4890_v38 = vadd.f32 %v4889_v18, %v4800_v58  ;;  %v10270_v34 = vpop.f32.mrf.mxu2  ;;  %v10272_v32 = vpop.f32.mrf.mxu3  ;;  %v11278_v18 = vld [vmem:[#allocation70_spill] sm:$0xff] }
 0x547   : > { %v10275_v29 = vadd.f32 %v4890_v38, %v9752_v55  ;;  %v11272_v55 = vld [vmem:[#allocation11_spill] sm:$0xff]  ;;  %v5109_v38 = vadd.f32 %v5033_v25, %v11278_v18  ;;  %v5038_v18 = vadd.f32 %v10253_v26, %v10251_v24  ;;  %v5182_v26 = vadd.f32 %v9551_v21, %v10042_v61  ;;  %v11290_v61 = vld [vmem:[#allocation86_spill] sm:$0xff] }
 0x548   : > { %v2410_v44 = vadd.f32 %v11273_v52, %v11272_v55  ;;  %v5242_v52 = vmax.f32 %v5178_v5, 0.0 }
 0x549   : > { %5472 = vmatmul.bf16.gmra.mxu0 %v9821_v1  ;;  %5561 = vmatmul.bf16.gmra.mxu1 %v10222_v42  ;;  %v11274_v1 = vld [vmem:[#allocation5_spill] sm:$0xff]  ;;  %v5113_v9 = vadd.f32 %v5038_v18, %v11285_v59  ;;  %v5043_v59 = vadd.f32 %v10268_v54, %v10266_v30  ;;  %v11295_v30 = vld [vmem:[#allocation80_spill] sm:$0xff] }
 0x54a   : > { %4997 = vmatmul.bf16.gmra.mxu2 %v4542_v16  ;;  %v2499_v42 = vadd.f32 %v11275_v46, %v11274_v1  ;;  %v4857_v16 = vadd.f32 %v10025_v6, %v10021_v45  ;;  %v3544_v50 = vadd.f32 %v11276_v27, %v2410_v44  ;;  %v11279_v1 = vld [vmem:[#allocation64_spill] sm:$0xff]  ;;  %v5040_v27 = vadd.f32 %v5039_v47, %v4950_v14 }
 0x54b   : > { %5086 = vmatmul.bf16.gmra.mxu3 %v4543_v4  ;;  %v5035_v4 = vadd.f32 %v5034_v35, %v4945_v53  ;;  %v11280_v46 = vld [vmem:[#allocation20_spill] sm:$0xff]  ;;  %v5186_v54 = vadd.f32 %v9551_v21, %v11295_v30 }
 0x54c   : > { %v10283_v48 = vpop.f32.mrf.mxu0  ;;  %v10285_v39 = vpop.f32.mrf.mxu1  ;;  %v3545_v3 = vadd.f32 %v11277_v33, %v2499_v42  ;;  %v5110_v37 = vadd.f32 %v4857_v16, %v3544_v50  ;;  %v2415_v42 = vadd.f32 %v11280_v46, %v11279_v1  ;;  %v11281_v16 = vld [vmem:[#allocation15_spill] sm:$0xff]  ;;  %v5246_v46 = vmax.f32 %v5182_v26, 0.0 }
 0x54d   : > { %v10279_v60 = vpop.f32.mrf.mxu2  ;;  %v10281_v51 = vpop.f32.mrf.mxu3 }
 0x54e   : > { %v5111_v58 = vadd.f32 %v5035_v4, %v3545_v3  ;;  %v5180_v53 = vadd.f32 %v9551_v21, %v5110_v37  ;;  %v11282_v4 = vld [vmem:[#allocation53_spill] sm:$0xff]  ;;  %v11283_v3 = vld [vmem:[#allocation122_spill] sm:$0xff]  ;;  %v11284_v37 = vld [vmem:[#allocation123_spill] sm:$0xff] }
 0x54f   : > { %v3548_v25 = vadd.f32 %v11283_v3, %v2415_v42 }
 0x550   : > { %v5181_v35 = vadd.f32 %v10133_v43, %v5111_v58  ;;  %v5244_v55 = vmax.f32 %v5180_v53, 0.0 }
 0x551   : > { %v5114_v5 = vadd.f32 %v4862_v8, %v3548_v25 }
 0x552   : > { %v5298_v50 = vpack.c.bf16 %v5244_v55, %v5242_v52  ;;  %v5183_v55 = vadd.f32 %v10133_v43, %v5113_v9 }
 0x555   : > { %v10287_v11 = vpop.f32.mrf.mxu2  ;;  %v10289_v40 = vpop.f32.mrf.mxu3 }
 0x557   : > { %v4805_v63 = vpop.f32.mrf.mxu0  ;;  %v4894_v23 = vpop.f32.mrf.mxu1 }
 0x558   : > { %v4895_v2 = vadd.f32 %v4894_v23, %v4805_v63  ;;  %v2504_v63 = vadd.f32 %v11282_v4, %v11281_v16  ;;  %v11286_v4 = vld [vmem:[#allocation87_spill] sm:$0xff] }
 0x559   : > { %5477 = vmatmul.bf16.gmra.mxu0 %v9917_v20  ;;  %5566 = vmatmul.bf16.gmra.mxu1 %v5297_v17  ;;  %v5179_v20 = vadd.f32 %v10133_v43, %v5109_v38  ;;  %v5245_v17 = vmax.f32 %v5181_v35, 0.0 }
 0x55a   : > { %v10301_v22 = vadd.f32 %v4895_v2, %v9833_v0  ;;  %v3549_v58 = vadd.f32 %v11284_v37, %v2504_v63  ;;  %v11287_v63 = vld [vmem:[#allocation61_spill] sm:$0xff]  ;;  %v4867_v37 = vadd.f32 %v11290_v61, %v10145_v57  ;;  %v11296_v61 = vld [vmem:[#allocation96_spill] sm:$0xff] }
 0x55b   : > { %v5243_v44 = vmax.f32 %v5179_v20, 0.0  ;;  %v2420_v8 = vadd.f32 %v11287_v63, %v11286_v4 }
 0x55c   : > { %v5115_v20 = vadd.f32 %v5040_v27, %v3549_v58  ;;  %v11288_v27 = vld [vmem:[#allocation88_spill] sm:$0xff]  ;;  %v5045_v58 = vadd.f32 %v10272_v32, %v10270_v34 }
 0x55d   : > { %v10304_v45 = vpop.f32.mrf.mxu2  ;;  %v5299_v33 = vpack.c.bf16 %v5245_v17, %v5243_v44  ;;  %v5184_v17 = vadd.f32 %v9551_v21, %v5114_v5  ;;  %v11292_v5 = vld [vmem:[#allocation126_spill] sm:$0xff] }
 0x55e   : > { %v10306_v6 = vpop.f32.mrf.mxu3  ;;  %v5185_v24 = vadd.f32 %v10133_v43, %v5115_v20 }
 0x55f   : > { %v10313_v19 = vpop.f32.mrf.mxu0  ;;  %v10315_v0 = vpop.f32.mrf.mxu1  ;;  %v5248_v44 = vmax.f32 %v5184_v17, 0.0 }
 0x560   : > { %v5249_v52 = vmax.f32 %v5185_v24, 0.0  ;;  %v11293_v24 = vld [vmem:[#allocation29_spill] sm:$0xff] }
 0x561   : > { %v5300_v18 = vpack.c.bf16 %v5248_v44, %v5246_v46  ;;  %v5117_v26 = vadd.f32 %v5043_v59, %v11293_v24  ;;  %v11294_v44 = vld [vmem:[#allocation21_spill] sm:$0xff]  ;;  %v5050_v59 = vadd.f32 %v10289_v40, %v10287_v11 }
 0x562   : > { %v11300_v24 = vld [vmem:[#allocation93_spill] sm:$0xff] }
 0x565   : > { %v10321_v23 = vpop.f32.mrf.mxu2 }
 0x566   : > { %v10323_v2 = vpop.f32.mrf.mxu3 }
 0x569   : > { %v4810_v38 = vpop.f32.mrf.mxu0  ;;  %v4899_v53 = vpop.f32.mrf.mxu1  ;;  %5482 = vmatmul.bf16.gmra.mxu0 %v5298_v50  ;;  %5571 = vmatmul.bf16.gmra.mxu1 %v5299_v33  ;;  %v11289_v50 = vld [vmem:[#allocation50_spill] sm:$0xff] }
 0x56a   : > { %v4900_v35 = vadd.f32 %v4899_v53, %v4810_v38  ;;  %v2509_v33 = vadd.f32 %v11289_v50, %v11288_v27  ;;  %v11291_v53 = vld [vmem:[#allocation71_spill] sm:$0xff]  ;;  %v5250_v50 = vmax.f32 %v5186_v54, 0.0 }
 0x56c   : > { %v10332_v1 = vadd.f32 %v4900_v35, %v9931_v49  ;;  %v5247_v49 = vmax.f32 %v5183_v55, 0.0  ;;  %v3552_v35 = vadd.f32 %v11291_v53, %v2420_v8  ;;  %v3553_v20 = vadd.f32 %v11292_v5, %v2509_v33 }
 0x56d   : > { %v10335_v14 = vpop.f32.mrf.mxu2 }
 0x56e   : > { %v10337_v47 = vpop.f32.mrf.mxu3  ;;  %v5301_v38 = vpack.c.bf16 %v5249_v52, %v5247_v49  ;;  %v5118_v9 = vadd.f32 %v4867_v37, %v3552_v35  ;;  %v5119_v17 = vadd.f32 %v5045_v58, %v3553_v20  ;;  %v5187_v49 = vadd.f32 %v10133_v43, %v5117_v26  ;;  %v11297_v37 = vld [vmem:[#allocation81_spill] sm:$0xff] }
 0x56f   : > { %v2425_v58 = vadd.f32 %v11297_v37, %v11296_v61  ;;  %v4872_v20 = vadd.f32 %v10189_v13, %v10187_v28  ;;  %v11304_v37 = vld [vmem:[#allocation33_spill] sm:$0xff] }
 0x570   : > { %v5188_v32 = vadd.f32 %v9551_v21, %v5118_v9  ;;  %v5189_v52 = vadd.f32 %v10133_v43, %v5119_v17  ;;  %v5251_v33 = vmax.f32 %v5187_v49, 0.0 }
 0x571   : > { %v10344_v42 = vpop.f32.mrf.mxu0  ;;  %v10346_v16 = vpop.f32.mrf.mxu1  ;;  %v3556_v26 = vadd.f32 %v11300_v24, %v2425_v58  ;;  %v11305_v58 = vld [vmem:[#allocation19_spill] sm:$0xff]  ;;  %v5055_v24 = vadd.f32 %v10323_v2, %v10321_v23 }
 0x572   : > { %v5253_v8 = vmax.f32 %v5189_v52, 0.0  ;;  %v5252_v27 = vmax.f32 %v5188_v32, 0.0 }
 0x573   : > { %v5122_v32 = vadd.f32 %v4872_v20, %v3556_v26 }
 0x574   : > { %v5302_v9 = vpack.c.bf16 %v5252_v27, %v5250_v50  ;;  %v5303_v17 = vpack.c.bf16 %v5253_v8, %v5251_v33  ;;  %v11303_v8 = vld [vmem:[#allocation57_spill] sm:$0xff] }
 0x575   : > { %v10352_v3 = vpop.f32.mrf.mxu2  ;;  %v5192_v13 = vadd.f32 %v9551_v21, %v5122_v32 }
 0x576   : > { %v10354_v25 = vpop.f32.mrf.mxu3 }
 0x577   : > { %v5256_v50 = vmax.f32 %v5192_v13, 0.0 }
 0x579   : > { %5487 = vmatmul.bf16.gmra.mxu0 %v5300_v18  ;;  %5576 = vmatmul.bf16.gmra.mxu1 %v5301_v38  ;;  %v11298_v18 = vld [vmem:[#allocation97_spill] sm:$0xff]  ;;  %v11299_v38 = vld [vmem:[#allocation52_spill] sm:$0xff] }
 0x57a   : > { %v2514_v53 = vadd.f32 %v11299_v38, %v11298_v18  ;;  %v2430_v18 = vadd.f32 %v11305_v58, %v11304_v37  ;;  %v11306_v38 = vld [vmem:[#allocation104_spill] sm:$0xff] }
 0x57d   : > { %v4815_v55 = vpop.f32.mrf.mxu0  ;;  %v4904_v57 = vpop.f32.mrf.mxu1 }
 0x57e   : > { %v4905_v4 = vadd.f32 %v4904_v57, %v4815_v55  ;;  %v10365_v63 = vpop.f32.mrf.mxu2  ;;  %v10367_v34 = vpop.f32.mrf.mxu3  ;;  %v11301_v55 = vld [vmem:[#allocation2_spill] sm:$0xff] }
 0x57f   : > { %v3557_v57 = vadd.f32 %v11301_v55, %v2514_v53  ;;  %v11307_v53 = vld [vmem:[#allocation40_spill] sm:$0xff] }
 0x580   : > { %v10372_v46 = vadd.f32 %v4905_v4, %v11294_v44  ;;  %v5048_v4 = vadd.f32 %v10281_v51, %v10279_v60  ;;  %v11302_v44 = vld [vmem:[#allocation28_spill] sm:$0xff]  ;;  %v5190_v60 = vadd.f32 %v9551_v21, %v11303_v8  ;;  %v2519_v20 = vadd.f32 %v11307_v53, %v11306_v38  ;;  %v11310_v8 = vld [vmem:[#allocation6_spill] sm:$0xff] }
 0x581   : > { %v5123_v52 = vadd.f32 %v5050_v59, %v3557_v57  ;;  %v11312_v38 = vld [vmem:[#allocation110_spill] sm:$0xff] }
 0x582   : > { %v5121_v30 = vadd.f32 %v5048_v4, %v11302_v44  ;;  %v5254_v33 = vmax.f32 %v5190_v60, 0.0 }
 0x583   : > { %v5193_v11 = vadd.f32 %v10133_v43, %v5123_v52  ;;  %v11308_v52 = vld [vmem:[#allocation46_spill] sm:$0xff] }
 0x584   : > { %v5191_v51 = vadd.f32 %v10133_v43, %v5121_v30  ;;  %v5304_v57 = vpack.c.bf16 %v5256_v50, %v5254_v33  ;;  %v3560_v44 = vadd.f32 %v11308_v52, %v2430_v18  ;;  %v11309_v30 = vld [vmem:[#allocation100_spill] sm:$0xff]  ;;  %v11315_v52 = vld [vmem:[#allocation109_spill] sm:$0xff] }
 0x585   : > { %v10400_v40 = vpop.f32.mrf.mxu0  ;;  %v10402_v49 = vpop.f32.mrf.mxu1  ;;  %v5257_v27 = vmax.f32 %v5193_v11, 0.0  ;;  %v3561_v13 = vadd.f32 %v11309_v30, %v2519_v20  ;;  %v5053_v11 = vadd.f32 %v10306_v6, %v10304_v45  ;;  %v5194_v45 = vadd.f32 %v9551_v21, %v10209_v36 }
 0x586   : > { %v10381_v35 = vpop.f32.mrf.mxu2  ;;  %v10383_v5 = vpop.f32.mrf.mxu3  ;;  %v5255_v61 = vmax.f32 %v5191_v51, 0.0  ;;  %v11311_v51 = vld [vmem:[#allocation72_spill] sm:$0xff] }
 0x587   : > { %v5125_v23 = vadd.f32 %v5053_v11, %v11311_v51 }
 0x588   : > { %v5305_v4 = vpack.c.bf16 %v5257_v27, %v5255_v61 }
 0x589   : > { %5492 = vmatmul.bf16.gmra.mxu0 %v5302_v9  ;;  %5581 = vmatmul.bf16.gmra.mxu1 %v5303_v17  ;;  %v4877_v17 = vadd.f32 %v10228_v56, %v10226_v31  ;;  %v5127_v56 = vadd.f32 %v5055_v24, %v3561_v13  ;;  %v5195_v6 = vadd.f32 %v10133_v43, %v5125_v23 }
 0x58b   : > { %v5126_v31 = vadd.f32 %v4877_v17, %v3560_v44  ;;  %v5197_v33 = vadd.f32 %v10133_v43, %v5127_v56  ;;  %v11316_v44 = vld [vmem:[#allocation78_spill] sm:$0xff]  ;;  %v5060_v56 = vadd.f32 %v10354_v25, %v10352_v3  ;;  %v11319_v25 = vld [vmem:[#allocation31_spill] sm:$0xff] }
 0x58c   : > { %v2524_v30 = vadd.f32 %v11316_v44, %v11315_v52  ;;  %v5633_v44 = vld [vmem:[%s10465_s26 + $0x8] sm:$0xff] }
 0x58d   : > { %v5196_v27 = vadd.f32 %v9551_v21, %v5126_v31  ;;  %v5261_v20 = vmax.f32 %v5197_v33, 0.0  ;;  %v4882_v31 = vadd.f32 %v10245_v7, %v10243_v62 }
 0x58e   : > { %v10394_v54 = vpop.f32.mrf.mxu2  ;;  %v10396_v28 = vpop.f32.mrf.mxu3 }
 0x58f   : > { %v5260_v17 = vmax.f32 %v5196_v27, 0.0 }
 0x596   : > { %v10411_v59 = vpop.f32.mrf.mxu2  ;;  %v10413_v9 = vpop.f32.mrf.mxu3 }
 0x597   : > { %v4820_v26 = vpop.f32.mrf.mxu0  ;;  %v4909_v55 = vpop.f32.mrf.mxu1 }
 0x598   : > { %v4910_v32 = vadd.f32 %v4909_v55, %v4820_v26  ;;  %v10440_v26 = vld [vmem:[%s10705_s15] ss:$0 sm:$0xff]  ;;  %v5258_v55 = vmax.f32 %v5194_v45, 0.0 }
 0x599   : > { %5497 = vmatmul.bf16.gmra.mxu0 %v5304_v57  ;;  %5586 = vmatmul.bf16.gmra.mxu1 %v5305_v4  ;;  %v5259_v57 = vmax.f32 %v5195_v6, 0.0  ;;  %v11313_v4 = vld [vmem:[#allocation108_spill] sm:$0xff]  ;;  %v11318_v6 = vld [vmem:[#allocation17_spill] sm:$0xff] }
 0x59a   : > { %v5152_v60 = vadd.f32 %v4910_v32, %v11310_v8  ;;  %v11314_v32 = vld [vmem:[#allocation62_spill] sm:$0xff]  ;;  %v5306_v27 = vpack.c.bf16 %v5260_v17, %v5258_v55 }
 0x59b   : > { %v2435_v36 = vadd.f32 %v11314_v32, %v11313_v4  ;;  %v5307_v33 = vpack.c.bf16 %v5261_v20, %v5259_v57  ;;  %v5632_v20 = vld [vmem:[%s10465_s26] sm:$0xff] }
 0x59c   : > { %v5222_v18 = vadd.f32 %v9551_v21, %v5152_v60 }
 0x59e   : > { %v10425_v2 = vpop.f32.mrf.mxu2  ;;  %v10427_v50 = vpop.f32.mrf.mxu3  ;;  %v5286_v13 = vmax.f32 %v5222_v18, 0.0  ;;  %v3565_v18 = vadd.f32 %v11318_v6, %v2524_v30 }
 0x59f   : > { %v4822_v61 = vpop.f32.mrf.mxu0  ;;  %v4911_v37 = vpop.f32.mrf.mxu1 }
 0x5a0   : > { %v4912_v58 = vadd.f32 %v4911_v37, %v4822_v61  ;;  %v5131_v3 = vadd.f32 %v5060_v56, %v3565_v18 }
 0x5a2   : > { %v5154_v53 = vadd.f32 %v4912_v58, %v11312_v38  ;;  %v11317_v58 = vld [vmem:[#allocation101_spill] sm:$0xff]  ;;  %v5058_v38 = vadd.f32 %v10337_v47, %v10335_v14  ;;  %v5201_v47 = vadd.f32 %v10133_v43, %v5131_v3 }
 0x5a3   : > { %v3564_v45 = vadd.f32 %v11317_v58, %v2435_v36  ;;  %v5198_v36 = vadd.f32 %v9551_v21, %v10240_v41  ;;  %v11322_v58 = vld [vmem:[#allocation27_spill] sm:$0xff] }
 0x5a4   : > { %v5224_v24 = vadd.f32 %v9551_v21, %v5154_v53  ;;  %v5129_v53 = vadd.f32 %v5058_v38, %v11319_v25 }
 0x5a5   : > { %v5130_v7 = vadd.f32 %v4882_v31, %v3564_v45  ;;  %v11323_v45 = vld [vmem:[#allocation60_spill] sm:$0xff] }
 0x5a6   : > { %v10446_v11 = vpop.f32.mrf.mxu2  ;;  %v10448_v8 = vpop.f32.mrf.mxu3  ;;  %v5288_v60 = vmax.f32 %v5224_v24, 0.0  ;;  %v5199_v52 = vadd.f32 %v10133_v43, %v5129_v53  ;;  %v2529_v6 = vadd.f32 %v11323_v45, %v11322_v58  ;;  %v5202_v58 = vadd.f32 %v9551_v21, %v10256_v12 }
 0x5a7   : > { %v5463_v51 = vpop.f32.mrf.mxu0  ;;  %v5552_v23 = vpop.f32.mrf.mxu1  ;;  %v5200_v14 = vadd.f32 %v9551_v21, %v5130_v7  ;;  %v5065_v7 = vadd.f32 %v10383_v5, %v10381_v35 }
 0x5a8   : > { %v5464_v61 = vadd.f32 %v10440_v26, %v5463_v51  ;;  %v10455_v37 = vpack.c.bf16 %v5288_v60, %v5286_v13  ;;  %v5265_v13 = vmax.f32 %v5201_v47, 0.0  ;;  %v5262_v51 = vmax.f32 %v5198_v36, 0.0 }
 0x5a9   : > { %5502 = vmatmul.bf16.gmra.mxu0 %v5306_v27  ;;  %5591 = vmatmul.bf16.gmra.mxu1 %v5307_v33  ;;  %v5264_v60 = vmax.f32 %v5200_v14, 0.0  ;;  %v11320_v27 = vld [vmem:[#allocation68_spill] sm:$0xff]  ;;  %v11321_v33 = vld [vmem:[#allocation35_spill] sm:$0xff]  ;;  %v11324_v14 = vld [vmem:[#allocation37_spill] sm:$0xff] }
 0x5aa   : > { %v5553_v62 = vadd.f32 %v5552_v23, %v5464_v61  ;;  %v5263_v23 = vmax.f32 %v5199_v52, 0.0  ;;  %v2440_v61 = vadd.f32 %v11321_v33, %v11320_v27  ;;  %v5634_v52 = vld [vmem:[%s10465_s26 + $0x10] sm:$0xff] }
 0x5ab   : > { %v5308_v53 = vpack.c.bf16 %v5264_v60, %v5262_v51 }
 0x5ac   : > { %v5664_v4 = vsub.f32 %v5553_v62, %v5632_v20  ;;  %v4887_v62 = vadd.f32 %v10264_v15, %v10262_v10  ;;  %v5309_v20 = vpack.c.bf16 %v5265_v13, %v5263_v23  ;;  %v3568_v47 = vadd.f32 %v11324_v14, %v2440_v61  ;;  %v11326_v13 = vld [vmem:[#allocation74_spill] sm:$0xff]  ;;  %v11327_v14 = vld [vmem:[#allocation79_spill] sm:$0xff] }
 0x5ad   : > { %v5063_v10 = vadd.f32 %v10367_v34, %v10365_v63 }
 0x5ae   : > { %v10469_v17 = vpop.f32.mrf.mxu2  ;;  %v10471_v24 = vpop.f32.mrf.mxu3  ;;  %v5696_v31 = vmul.f32 %v5664_v4, %v5664_v4  ;;  %v5134_v5 = vadd.f32 %v4887_v62, %v3568_v47  ;;  %v11328_v47 = vld [vmem:[#allocation82_spill] sm:$0xff] }
 0x5af   : > { %v5465_v55 = vpop.f32.mrf.mxu0  ;;  %v5554_v57 = vpop.f32.mrf.mxu1  ;;  %v5133_v60 = vadd.f32 %v5063_v10, %v11326_v13  ;;  %v11330_v10 = vld [vmem:[#allocation83_spill] sm:$0xff] }
 0x5b0   : > { %v5466_v32 = vadd.f32 %v10440_v26, %v5465_v55  ;;  %v5729_v55 = vsel %vm5728_vm2, %v5696_v31, 0.0  ;;  %v5204_v23 = vadd.f32 %v9551_v21, %v5134_v5  ;;  %v11331_v13 = vld [vmem:[#allocation107_spill] sm:$0xff] }
 0x5b1   : > { %v5203_v45 = vadd.f32 %v10133_v43, %v5133_v60 }
 0x5b2   : > { %v5555_v30 = vadd.f32 %v5554_v57, %v5466_v32  ;;  %v11325_v32 = vld [vmem:[#allocation42_spill] sm:$0xff] }
 0x5b3   : > { %v3569_v36 = vadd.f32 %v11325_v32, %v2529_v6 }
 0x5b4   : > { %v5665_v56 = vsub.f32 %v5555_v30, %v5633_v44 }
 0x5b5   : > { %v5135_v44 = vadd.f32 %v5065_v7, %v3569_v36  ;;  %v11329_v36 = vld [vmem:[#allocation14_spill] sm:$0xff] }
 0x5b6   : > { %v5697_v18 = vmul.f32 %v5665_v56, %v5665_v56  ;;  %v10484_v41 = vpop.f32.mrf.mxu2  ;;  %v10486_v38 = vpop.f32.mrf.mxu3 }
 0x5b7   : > { %v5468_v3 = vpop.f32.mrf.mxu0  ;;  %v5557_v25 = vpop.f32.mrf.mxu1  ;;  %v5205_v63 = vadd.f32 %v10133_v43, %v5135_v44 }
 0x5b8   : > { %v5730_v57 = vsel %vm5728_vm2, %v5697_v18, 0.0  ;;  %v5469_v4 = vadd.f32 %v10440_v26, %v5468_v3  ;;  %v5635_v18 = vld [vmem:[%s10465_s26 + $0x18] sm:$0xff]  ;;  %v5268_v3 = vmax.f32 %v5204_v23, 0.0 }
 0x5b9   : > { %v5731_v15 = vadd.f32 %v5730_v57, %v5729_v55  ;;  %5507 = vmatmul.bf16.gmra.mxu0 %v5308_v53  ;;  %5596 = vmatmul.bf16.gmra.mxu1 %v5309_v20  ;;  %v5269_v7 = vmax.f32 %v5205_v63, 0.0  ;;  %v5266_v53 = vmax.f32 %v5202_v58, 0.0  ;;  %v5267_v20 = vmax.f32 %v5203_v45, 0.0  ;;  %v11333_v58 = vld [vmem:[#allocation43_spill] sm:$0xff] }
 0x5ba   : > { %v5558_v35 = vadd.f32 %v5557_v25, %v5469_v4  ;;  %v2445_v55 = vadd.f32 %v11328_v47, %v11327_v14  ;;  %v4892_v57 = vadd.f32 %v10285_v39, %v10283_v48  ;;  %v5068_v63 = vadd.f32 %v10396_v28, %v10394_v54 }
 0x5bb   : > { %v5310_v44 = vpack.c.bf16 %v5268_v3, %v5266_v53  ;;  %v5206_v28 = vadd.f32 %v9551_v21, %v10275_v29 }
 0x5bc   : > { %v5666_v30 = vsub.f32 %v5558_v35, %v5634_v52  ;;  %v5070_v52 = vadd.f32 %v10413_v9, %v10411_v59  ;;  %v3572_v60 = vadd.f32 %v11331_v13, %v2445_v55  ;;  %v5137_v45 = vadd.f32 %v5068_v63, %v11333_v58  ;;  %v11336_v13 = vld [vmem:[#allocation49_spill] sm:$0xff] }
 0x5be   : > { %v5698_v31 = vmul.f32 %v5666_v30, %v5666_v30  ;;  %v10501_v56 = vpop.f32.mrf.mxu2  ;;  %v10503_v51 = vpop.f32.mrf.mxu3  ;;  %v5311_v30 = vpack.c.bf16 %v5269_v7, %v5267_v20  ;;  %v5138_v59 = vadd.f32 %v4892_v57, %v3572_v60  ;;  %v5207_v14 = vadd.f32 %v10133_v43, %v5137_v45  ;;  %v5637_v57 = vld [vmem:[%s10465_s26 + $0x28] sm:$0xff]  ;;  %v11337_v60 = vld [vmem:[#allocation22_spill] sm:$0xff] }
 0x5bf   : > { %v5470_v34 = vpop.f32.mrf.mxu0  ;;  %v5559_v27 = vpop.f32.mrf.mxu1 }
 0x5c0   : > { %v5732_v33 = vsel %vm5728_vm2, %v5698_v31, 0.0  ;;  %v5471_v61 = vadd.f32 %v10440_v26, %v5470_v34  ;;  %v11332_v31 = vld [vmem:[#allocation76_spill] sm:$0xff] }
 0x5c1   : > { %v5733_v6 = vadd.f32 %v5732_v33, %v5731_v15  ;;  %v2534_v15 = vadd.f32 %v11330_v10, %v11329_v36 }
 0x5c2   : > { %v5560_v62 = vadd.f32 %v5559_v27, %v5471_v61  ;;  %v5636_v27 = vld [vmem:[%s10465_s26 + $0x20] sm:$0xff] }
 0x5c3   : > { %v3573_v23 = vadd.f32 %v11332_v31, %v2534_v15  ;;  %v11334_v15 = vld [vmem:[#allocation7_spill] sm:$0xff]  ;;  %v11339_v31 = vld [vmem:[#allocation38_spill] sm:$0xff] }
 0x5c4   : > { %v5667_v25 = vsub.f32 %v5560_v62, %v5635_v18  ;;  %v5208_v18 = vadd.f32 %v9551_v21, %v5138_v59 }
 0x5c5   : > { %v5139_v33 = vadd.f32 %v5070_v52, %v3573_v23  ;;  %v11335_v52 = vld [vmem:[#allocation89_spill] sm:$0xff] }
 0x5c6   : > { %v5699_v4 = vmul.f32 %v5667_v25, %v5667_v25  ;;  %v10517_v32 = vpop.f32.mrf.mxu2  ;;  %v10519_v12 = vpop.f32.mrf.mxu3  ;;  %v5272_v36 = vmax.f32 %v5208_v18, 0.0 }
 0x5c7   : > { %v5473_v35 = vpop.f32.mrf.mxu0  ;;  %v5562_v5 = vpop.f32.mrf.mxu1  ;;  %v5209_v25 = vadd.f32 %v10133_v43, %v5139_v33  ;;  %v5075_v33 = vadd.f32 %v10448_v8, %v10446_v11 }
 0x5c8   : > { %v5734_v48 = vsel %vm5728_vm2, %v5699_v4, 0.0  ;;  %v5474_v39 = vadd.f32 %v10440_v26, %v5473_v35  ;;  %v2450_v35 = vadd.f32 %v11335_v52, %v11334_v15 }
 0x5c9   : > { %v5735_v34 = vadd.f32 %v5734_v48, %v5733_v6  ;;  %5512 = vmatmul.bf16.gmra.mxu0 %v5310_v44  ;;  %5601 = vmatmul.bf16.gmra.mxu1 %v5311_v30  ;;  %v5273_v10 = vmax.f32 %v5209_v25, 0.0  ;;  %v5271_v30 = vmax.f32 %v5207_v14, 0.0  ;;  %v11338_v48 = vld [vmem:[#allocation90_spill] sm:$0xff] }
 0x5ca   : > { %v5563_v9 = vadd.f32 %v5562_v5, %v5474_v39  ;;  %v5270_v5 = vmax.f32 %v5206_v28, 0.0  ;;  %v2539_v39 = vadd.f32 %v11338_v48, %v11337_v60  ;;  %v3576_v23 = vadd.f32 %v11339_v31, %v2450_v35  ;;  %v5639_v60 = vld [vmem:[%s10465_s26 + $0x38] sm:$0xff] }
 0x5cb   : > { %v5313_v18 = vpack.c.bf16 %v5273_v10, %v5271_v30  ;;  %v5210_v30 = vadd.f32 %v9551_v21, %v10301_v22  ;;  %v4902_v22 = vadd.f32 %v10346_v16, %v10344_v42  ;;  %v5640_v42 = vld [vmem:[%s10465_s26 + $0x40] sm:$0xff] }
 0x5cc   : > { %v5668_v61 = vsub.f32 %v5563_v9, %v5636_v27  ;;  %v5312_v59 = vpack.c.bf16 %v5272_v36, %v5270_v5  ;;  %v4897_v9 = vadd.f32 %v10315_v0, %v10313_v19  ;;  %v11341_v19 = vld [vmem:[#allocation111_spill] sm:$0xff] }
 0x5ce   : > { %v5700_v62 = vmul.f32 %v5668_v61, %v5668_v61  ;;  %v4998_v7 = vpop.f32.mrf.mxu2  ;;  %v5087_v3 = vpop.f32.mrf.mxu3  ;;  %v5142_v8 = vadd.f32 %v4897_v9, %v3576_v23 }
 0x5cf   : > { %v5475_v53 = vpop.f32.mrf.mxu0  ;;  %v5564_v54 = vpop.f32.mrf.mxu1  ;;  %v5088_v55 = vadd.f32 %v5087_v3, %v4998_v7  ;;  %v5073_v3 = vadd.f32 %v10427_v50, %v10425_v2  ;;  %v11342_v2 = vld [vmem:[#allocation25_spill] sm:$0xff] }
 0x5d0   : > { %v5736_v6 = vsel %vm5728_vm2, %v5700_v62, 0.0  ;;  %v5476_v20 = vadd.f32 %v10440_v26, %v5475_v53  ;;  %v11340_v62 = vld [vmem:[#allocation10_spill] sm:$0xff]  ;;  %v5212_v10 = vadd.f32 %v9551_v21, %v5142_v8 }
 0x5d1   : > { %v5737_v47 = vadd.f32 %v5736_v6, %v5735_v34  ;;  %v5153_v29 = vadd.f32 %v5088_v55, %v11336_v13  ;;  %v3577_v7 = vadd.f32 %v11340_v62, %v2539_v39  ;;  %v5638_v6 = vld [vmem:[%s10465_s26 + $0x30] sm:$0xff]  ;;  %v5141_v50 = vadd.f32 %v5073_v3, %v11342_v2 }
 0x5d2   : > { %v5565_v4 = vadd.f32 %v5564_v54, %v5476_v20  ;;  %v5276_v31 = vmax.f32 %v5212_v10, 0.0  ;;  %v5214_v10 = vadd.f32 %v9551_v21, %v10332_v1  ;;  %v4907_v1 = vadd.f32 %v10402_v49, %v10400_v40  ;;  %v5642_v40 = vld [vmem:[%s10465_s26 + $0x50] sm:$0xff] }
 0x5d3   : > { %v5223_v54 = vadd.f32 %v10133_v43, %v5153_v29  ;;  %v5143_v20 = vadd.f32 %v5075_v33, %v3577_v7  ;;  %v5211_v13 = vadd.f32 %v10133_v43, %v5141_v50  ;;  %v11345_v33 = vld [vmem:[#allocation115_spill] sm:$0xff] }
 0x5d4   : > { %v5669_v44 = vsub.f32 %v5565_v4, %v5637_v57 }
 0x5d5   : > { %v5287_v57 = vmax.f32 %v5223_v54, 0.0 }
 0x5d6   : > { %v5701_v63 = vmul.f32 %v5669_v44, %v5669_v44  ;;  %v5000_v34 = vpop.f32.mrf.mxu2  ;;  %v5089_v27 = vpop.f32.mrf.mxu3 }
 0x5d7   : > { %v5090_v61 = vadd.f32 %v5089_v27, %v5000_v34  ;;  %v5478_v58 = vpop.f32.mrf.mxu0  ;;  %v5567_v45 = vpop.f32.mrf.mxu1  ;;  %v5275_v34 = vmax.f32 %v5211_v13, 0.0  ;;  %v11343_v27 = vld [vmem:[#allocation114_spill] sm:$0xff] }
 0x5d8   : > { %v5738_v25 = vsel %vm5728_vm2, %v5701_v63, 0.0  ;;  %v5479_v53 = vadd.f32 %v10440_v26, %v5478_v58  ;;  %v5274_v63 = vmax.f32 %v5210_v30, 0.0 }
 0x5d9   : > { %v5739_v28 = vadd.f32 %v5738_v25, %v5737_v47  ;;  %v5155_v0 = vadd.f32 %v5090_v61, %v11341_v19  ;;  %5517 = vmatmul.bf16.gmra.mxu0 %v5312_v59  ;;  %5606 = vmatmul.bf16.gmra.mxu1 %v5313_v18  ;;  %v5213_v47 = vadd.f32 %v10133_v43, %v5143_v20  ;;  %v11344_v59 = vld [vmem:[#allocation98_spill] sm:$0xff]  ;;  %v11346_v61 = vld [vmem:[#allocation99_spill] sm:$0xff] }
 0x5da   : > { %v5568_v11 = vadd.f32 %v5567_v45, %v5479_v53  ;;  %v2455_v9 = vadd.f32 %v11344_v59, %v11343_v27  ;;  %v2544_v58 = vadd.f32 %v11346_v61, %v11345_v33  ;;  %v5080_v18 = vadd.f32 %v10486_v38, %v10484_v41  ;;  %v11347_v53 = vld [vmem:[#allocation3_spill] sm:$0xff] }
 0x5db   : > { %v5225_v14 = vadd.f32 %v10133_v43, %v5155_v0  ;;  %v5277_v39 = vmax.f32 %v5213_v47, 0.0  ;;  %v5314_v3 = vpack.c.bf16 %v5276_v31, %v5274_v63  ;;  %v11348_v0 = vld [vmem:[#allocation91_spill] sm:$0xff]  ;;  %v11353_v63 = vld [vmem:[#allocation106_spill] sm:$0xff]  ;;  %v5085_v59 = vadd.f32 %v10519_v12, %v10517_v32 }
 0x5dc   : > { %v5670_v55 = vsub.f32 %v5568_v11, %v5638_v6  ;;  %v3580_v54 = vadd.f32 %v11347_v53, %v2455_v9  ;;  %v3581_v6 = vadd.f32 %v11348_v0, %v2544_v58  ;;  %v5078_v11 = vadd.f32 %v10471_v24, %v10469_v17 }
 0x5dd   : > { %v5289_v4 = vmax.f32 %v5225_v14, 0.0  ;;  %v5315_v25 = vpack.c.bf16 %v5277_v39, %v5275_v34  ;;  %v11349_v14 = vld [vmem:[#allocation77_spill] sm:$0xff] }
 0x5de   : > { %v5702_v36 = vmul.f32 %v5670_v55, %v5670_v55  ;;  %v5146_v41 = vadd.f32 %v4902_v22, %v3580_v54  ;;  %v5147_v38 = vadd.f32 %v5080_v18, %v3581_v6  ;;  %v5145_v55 = vadd.f32 %v5078_v11, %v11349_v14  ;;  %v11351_v39 = vld [vmem:[#allocation105_spill] sm:$0xff] }
 0x5df   : > { %v5480_v15 = vpop.f32.mrf.mxu0  ;;  %v5569_v52 = vpop.f32.mrf.mxu1  ;;  %v10563_v35 = vpack.c.bf16 %v5289_v4, %v5287_v57 }
 0x5e0   : > { %v5740_v5 = vsel %vm5728_vm2, %v5702_v36, 0.0  ;;  %v5481_v44 = vadd.f32 %v10440_v26, %v5480_v15  ;;  %v5216_v50 = vadd.f32 %v9551_v21, %v5146_v41  ;;  %v5217_v57 = vadd.f32 %v10133_v43, %v5147_v38 }
 0x5e1   : > { %v5741_v29 = vadd.f32 %v5740_v5, %v5739_v28  ;;  %v5215_v47 = vadd.f32 %v10133_v43, %v5145_v55 }
 0x5e2   : > { %v5570_v48 = vadd.f32 %v5569_v52, %v5481_v44  ;;  %v5641_v52 = vld [vmem:[%s10465_s26 + $0x48] sm:$0xff]  ;;  %v5281_v44 = vmax.f32 %v5217_v57, 0.0  ;;  %v5280_v30 = vmax.f32 %v5216_v50, 0.0 }
 0x5e4   : > { %v5671_v23 = vsub.f32 %v5570_v48, %v5639_v60  ;;  %v5279_v60 = vmax.f32 %v5215_v47, 0.0  ;;  %v11350_v48 = vld [vmem:[#allocation120_spill] sm:$0xff] }
 0x5e5   : > { %v2460_v31 = vadd.f32 %v11351_v39, %v11350_v48  ;;  %v5645_v39 = vld [vmem:[%s10465_s26 + $0x68] sm:$0xff] }
 0x5e6   : > { %v5703_v45 = vmul.f32 %v5671_v23, %v5671_v23  ;;  %v11352_v23 = vld [vmem:[#allocation121_spill] sm:$0xff]  ;;  %v5317_v58 = vpack.c.bf16 %v5281_v44, %v5279_v60 }
 0x5e7   : > { %v5483_v62 = vpop.f32.mrf.mxu0  ;;  %v5572_v7 = vpop.f32.mrf.mxu1  ;;  %v2549_v34 = vadd.f32 %v11353_v63, %v11352_v23 }
 0x5e8   : > { %v5742_v28 = vsel %vm5728_vm2, %v5703_v45, 0.0  ;;  %v5484_v19 = vadd.f32 %v10440_v26, %v5483_v62  ;;  %v11354_v45 = vld [vmem:[#allocation44_spill] sm:$0xff] }
 0x5e9   : > { %v5743_v8 = vadd.f32 %v5742_v28, %v5741_v29  ;;  %5522 = vmatmul.bf16.gmra.mxu0 %v5314_v3  ;;  %5611 = vmatmul.bf16.gmra.mxu1 %v5315_v25  ;;  %v5278_v29 = vmax.f32 %v5214_v10, 0.0  ;;  %v3584_v22 = vadd.f32 %v11354_v45, %v2460_v31  ;;  %v5083_v25 = vadd.f32 %v10503_v51, %v10501_v56  ;;  %v11356_v28 = vld [vmem:[#allocation59_spill] sm:$0xff] }
 0x5ea   : > { %v5573_v16 = vadd.f32 %v5572_v7, %v5484_v19  ;;  %v11355_v7 = vld [vmem:[#allocation13_spill] sm:$0xff] }
 0x5eb   : > { %v5316_v61 = vpack.c.bf16 %v5280_v30, %v5278_v29  ;;  %v3585_v3 = vadd.f32 %v11355_v7, %v2549_v34  ;;  %v5150_v32 = vadd.f32 %v4907_v1, %v3584_v22  ;;  %v5149_v19 = vadd.f32 %v5083_v25, %v11356_v28  ;;  %v5647_v25 = vld [vmem:[%s10465_s26 + $0x78] sm:$0xff]  ;;  %v5648_v28 = vld [vmem:[%s10465_s26 + $0x80] sm:$0xff] }
 0x5ec   : > { %v5672_v20 = vsub.f32 %v5573_v16, %v5640_v42  ;;  %v5218_v16 = vadd.f32 %v9551_v21, %v10372_v46  ;;  %v5644_v46 = vld [vmem:[%s10465_s26 + $0x60] sm:$0xff] }
 0x5ed   : > { %v5151_v12 = vadd.f32 %v5085_v59, %v3585_v3  ;;  %v5220_v6 = vadd.f32 %v9551_v21, %v5150_v32  ;;  %v5219_v41 = vadd.f32 %v10133_v43, %v5149_v19 }
 0x5ee   : > { %v5704_v2 = vmul.f32 %v5672_v20, %v5672_v20  ;;  %v5643_v20 = vld [vmem:[%s10465_s26 + $0x58] sm:$0xff]  ;;  %v5282_v57 = vmax.f32 %v5218_v16, 0.0  ;;  %v5649_v16 = vld [vmem:[%s10465_s26 + $0x88] sm:$0xff] }
 0x5ef   : > { %v5485_v4 = vpop.f32.mrf.mxu0  ;;  %v5574_v36 = vpop.f32.mrf.mxu1  ;;  %v5221_v11 = vadd.f32 %v10133_v43, %v5151_v12 }
 0x5f0   : > { %v5744_v17 = vsel %vm5728_vm2, %v5704_v2, 0.0  ;;  %v5486_v24 = vadd.f32 %v10440_v26, %v5485_v4  ;;  %v5284_v2 = vmax.f32 %v5220_v6, 0.0  ;;  %v5283_v4 = vmax.f32 %v5219_v41, 0.0 }
 0x5f1   : > { %v5745_v15 = vadd.f32 %v5744_v17, %v5743_v8  ;;  %v5285_v55 = vmax.f32 %v5221_v11, 0.0 }
 0x5f2   : > { %v5575_v5 = vadd.f32 %v5574_v36, %v5486_v24  ;;  %v5318_v10 = vpack.c.bf16 %v5284_v2, %v5282_v57 }
 0x5f3   : > { %v5319_v47 = vpack.c.bf16 %v5285_v55, %v5283_v4  ;;  %v5650_v4 = vld [vmem:[%s10465_s26 + $0x90] sm:$0xff] }
 0x5f4   : > { %v5673_v13 = vsub.f32 %v5575_v5, %v5641_v52 }
 0x5f6   : > { %v5705_v27 = vmul.f32 %v5673_v13, %v5673_v13 }
 0x5f7   : > { %v5488_v9 = vpop.f32.mrf.mxu0  ;;  %v5577_v33 = vpop.f32.mrf.mxu1 }
 0x5f8   : > { %v5746_v18 = vsel %vm5728_vm2, %v5705_v27, 0.0  ;;  %v5489_v62 = vadd.f32 %v10440_v26, %v5488_v9 }
 0x5f9   : > { %v5747_v53 = vadd.f32 %v5746_v18, %v5745_v15  ;;  %5527 = vmatmul.bf16.gmra.mxu0 %v5316_v61  ;;  %5616 = vmatmul.bf16.gmra.mxu1 %v5317_v58 }
 0x5fa   : > { %v5578_v49 = vadd.f32 %v5577_v33, %v5489_v62  ;;  %v5646_v33 = vld [vmem:[%s10465_s26 + $0x70] sm:$0xff] }
 0x5fc   : > { %v5674_v54 = vsub.f32 %v5578_v49, %v5642_v40 }
 0x5fe   : > { %v5706_v0 = vmul.f32 %v5674_v54, %v5674_v54 }
 0x5ff   : > { %v5490_v8 = vpop.f32.mrf.mxu0  ;;  %v5579_v42 = vpop.f32.mrf.mxu1 }
 0x600   : > { %v5748_v56 = vsel %vm5728_vm2, %v5706_v0, 0.0  ;;  %v5491_v51 = vadd.f32 %v10440_v26, %v5490_v8 }
 0x601   : > { %v5749_v38 = vadd.f32 %v5748_v56, %v5747_v53 }
 0x602   : > { %v5580_v14 = vadd.f32 %v5579_v42, %v5491_v51 }
 0x604   : > { %v5675_v50 = vsub.f32 %v5580_v14, %v5643_v20 }
 0x606   : > { %v5707_v36 = vmul.f32 %v5675_v50, %v5675_v50 }
 0x607   : > { %v5493_v17 = vpop.f32.mrf.mxu0  ;;  %v5582_v24 = vpop.f32.mrf.mxu1 }
 0x608   : > { %v5750_v15 = vsel %vm5728_vm2, %v5707_v36, 0.0  ;;  %v5494_v21 = vadd.f32 %v10440_v26, %v5493_v17 }
 0x609   : > { %v5751_v43 = vadd.f32 %v5750_v15, %v5749_v38  ;;  %5532 = vmatmul.bf16.gmra.mxu0 %v5318_v10  ;;  %5621 = vmatmul.bf16.gmra.mxu1 %v5319_v47 }
 0x60a   : > { %v5583_v52 = vadd.f32 %v5582_v24, %v5494_v21 }
 0x60c   : > { %v5676_v5 = vsub.f32 %v5583_v52, %v5644_v46  ;;  %v5651_v46 = vld [vmem:[%s10465_s26 + $0x98] sm:$0xff] }
 0x60e   : > { %v5708_v44 = vmul.f32 %v5676_v5, %v5676_v5 }
 0x60f   : > { %v5495_v30 = vpop.f32.mrf.mxu0  ;;  %v5584_v13 = vpop.f32.mrf.mxu1 }
 0x610   : > { %v5752_v29 = vsel %vm5728_vm2, %v5708_v44, 0.0  ;;  %v5496_v60 = vadd.f32 %v10440_v26, %v5495_v30 }
 0x611   : > { %v5753_v48 = vadd.f32 %v5752_v29, %v5751_v43 }
 0x612   : > { %v5585_v31 = vadd.f32 %v5584_v13, %v5496_v60 }
 0x614   : > { %v5677_v23 = vsub.f32 %v5585_v31, %v5645_v39  ;;  %v5652_v39 = vld [vmem:[%s10465_s26 + $0xa0] sm:$0xff] }
 0x616   : > { %v5709_v63 = vmul.f32 %v5677_v23, %v5677_v23 }
 0x617   : > { %v5498_v34 = vpop.f32.mrf.mxu0  ;;  %v5587_v27 = vpop.f32.mrf.mxu1 }
 0x618   : > { %v5754_v1 = vsel %vm5728_vm2, %v5709_v63, 0.0  ;;  %v5499_v59 = vadd.f32 %v10440_v26, %v5498_v34 }
 0x619   : > { %v5755_v9 = vadd.f32 %v5754_v1, %v5753_v48  ;;  %5537 = vmatmul.bf16.gmra.mxu0 %v10455_v37  ;;  %5626 = vmatmul.bf16.gmra.mxu1 %v10563_v35 }
 0x61a   : > { %v5588_v61 = vadd.f32 %v5587_v27, %v5499_v59 }
 0x61c   : > { %v5678_v58 = vsub.f32 %v5588_v61, %v5646_v33 }
 0x61e   : > { %v5710_v45 = vmul.f32 %v5678_v58, %v5678_v58 }
 0x61f   : > { %v5500_v22 = vpop.f32.mrf.mxu0  ;;  %v5589_v18 = vpop.f32.mrf.mxu1 }
 0x620   : > { %v5756_v62 = vsel %vm5728_vm2, %v5710_v45, 0.0  ;;  %v5501_v7 = vadd.f32 %v10440_v26, %v5500_v22 }
 0x621   : > { %v5757_v3 = vadd.f32 %v5756_v62, %v5755_v9 }
 0x622   : > { %v5590_v53 = vadd.f32 %v5589_v18, %v5501_v7 }
 0x624   : > { %v5679_v40 = vsub.f32 %v5590_v53, %v5647_v25 }
 0x626   : > { %v5711_v49 = vmul.f32 %v5679_v40, %v5679_v40 }
 0x627   : > { %v5503_v32 = vpop.f32.mrf.mxu0  ;;  %v5592_v37 = vpop.f32.mrf.mxu1 }
 0x628   : > { %v5758_v35 = vsel %vm5728_vm2, %v5711_v49, 0.0  ;;  %v5504_v12 = vadd.f32 %v10440_v26, %v5503_v32 }
 0x629   : > { %v5759_v54 = vadd.f32 %v5758_v35, %v5757_v3 }
 0x62a   : > { %v5593_v19 = vadd.f32 %v5592_v37, %v5504_v12  ;;  %v5653_v37 = vld [vmem:[%s10465_s26 + $0xa8] sm:$0xff] }
 0x62c   : > { %v5680_v0 = vsub.f32 %v5593_v19, %v5648_v28 }
 0x62e   : > { %v5712_v6 = vmul.f32 %v5680_v0, %v5680_v0 }
 0x62f   : > { %v5505_v11 = vpop.f32.mrf.mxu0  ;;  %v5594_v8 = vpop.f32.mrf.mxu1 }
 0x630   : > { %v5760_v42 = vsel %vm5728_vm2, %v5712_v6, 0.0  ;;  %v5506_v56 = vadd.f32 %v10440_v26, %v5505_v11  ;;  %v5654_v6 = vld [vmem:[%s10465_s26 + $0xb0] sm:$0xff] }
 0x631   : > { %v5761_v51 = vadd.f32 %v5760_v42, %v5759_v54  ;;  %v5655_v42 = vld [vmem:[%s10465_s26 + $0xb8] sm:$0xff] }
 0x632   : > { %v5595_v41 = vadd.f32 %v5594_v8, %v5506_v56 }
 0x634   : > { %v5681_v38 = vsub.f32 %v5595_v41, %v5649_v16 }
 0x636   : > { %v5713_v20 = vmul.f32 %v5681_v38, %v5681_v38  ;;  %v5656_v38 = vld [vmem:[%s10465_s26 + $0xc0] sm:$0xff] }
 0x637   : > { %v5508_v14 = vpop.f32.mrf.mxu0  ;;  %v5597_v55 = vpop.f32.mrf.mxu1 }
 0x638   : > { %v5762_v2 = vsel %vm5728_vm2, %v5713_v20, 0.0  ;;  %v5509_v50 = vadd.f32 %v10440_v26, %v5508_v14 }
 0x639   : > { %v5763_v57 = vadd.f32 %v5762_v2, %v5761_v51  ;;  %v5657_v2 = vld [vmem:[%s10465_s26 + $0xc8] sm:$0xff] }
 0x63a   : > { %v5598_v36 = vadd.f32 %v5597_v55, %v5509_v50 }
 0x63c   : > { %v5682_v17 = vsub.f32 %v5598_v36, %v5650_v4 }
 0x63e   : > { %v5714_v24 = vmul.f32 %v5682_v17, %v5682_v17 }
 0x63f   : > { %v5510_v10 = vpop.f32.mrf.mxu0  ;;  %v5599_v47 = vpop.f32.mrf.mxu1 }
 0x640   : > { %v5764_v15 = vsel %vm5728_vm2, %v5714_v24, 0.0  ;;  %v5511_v21 = vadd.f32 %v10440_v26, %v5510_v10 }
 0x641   : > { %v5765_v43 = vadd.f32 %v5764_v15, %v5763_v57 }
 0x642   : > { %v5600_v52 = vadd.f32 %v5599_v47, %v5511_v21  ;;  %v5658_v47 = vld [vmem:[%s10465_s26 + $0xd0] sm:$0xff] }
 0x644   : > { %v5683_v5 = vsub.f32 %v5600_v52, %v5651_v46  ;;  %v5659_v52 = vld [vmem:[%s10465_s26 + $0xd8] sm:$0xff] }
 0x646   : > { %v5715_v44 = vmul.f32 %v5683_v5, %v5683_v5 }
 0x647   : > { %v5513_v30 = vpop.f32.mrf.mxu0  ;;  %v5602_v13 = vpop.f32.mrf.mxu1 }
 0x648   : > { %v5766_v29 = vsel %vm5728_vm2, %v5715_v44, 0.0  ;;  %v5514_v60 = vadd.f32 %v10440_v26, %v5513_v30 }
 0x649   : > { %v5767_v48 = vadd.f32 %v5766_v29, %v5765_v43 }
 0x64a   : > { %v5603_v31 = vadd.f32 %v5602_v13, %v5514_v60  ;;  %v5660_v60 = vld [vmem:[%s10465_s26 + $0xe0] sm:$0xff] }
 0x64c   : > { %v5684_v23 = vsub.f32 %v5603_v31, %v5652_v39 }
 0x64e   : > { %v5716_v63 = vmul.f32 %v5684_v23, %v5684_v23 }
 0x64f   : > { %v5515_v34 = vpop.f32.mrf.mxu0  ;;  %v5604_v27 = vpop.f32.mrf.mxu1 }
 0x650   : > { %v5768_v1 = vsel %vm5728_vm2, %v5716_v63, 0.0  ;;  %v5516_v40 = vadd.f32 %v10440_v26, %v5515_v34  ;;  %v5661_v34 = vld [vmem:[%s10465_s26 + $0xe8] sm:$0xff] }
 0x651   : > { %v5769_v59 = vadd.f32 %v5768_v1, %v5767_v48 }
 0x652   : > { %v5605_v32 = vadd.f32 %v5604_v27, %v5516_v40 }
 0x654   : > { %v5685_v0 = vsub.f32 %v5605_v32, %v5653_v37 }
 0x656   : > { %v5717_v41 = vmul.f32 %v5685_v0, %v5685_v0 }
 0x657   : > { %v5518_v9 = vpop.f32.mrf.mxu0  ;;  %v5607_v33 = vpop.f32.mrf.mxu1 }
 0x658   : > { %v5519_v49 = vadd.f32 %v10440_v26, %v5518_v9  ;;  %v5770_v10 = vsel %vm5728_vm2, %v5717_v41, 0.0 }
 0x659   : > { %v5771_v29 = vadd.f32 %v5770_v10, %v5769_v59 }
 0x65a   : > { %v5608_v28 = vadd.f32 %v5607_v33, %v5519_v49 }
 0x65c   : > { %v5686_v56 = vsub.f32 %v5608_v28, %v5654_v6 }
 0x65e   : > { %v5718_v4 = vmul.f32 %v5686_v56, %v5686_v56 }
 0x65f   : > { %v5520_v61 = vpop.f32.mrf.mxu0  ;;  %v5609_v58 = vpop.f32.mrf.mxu1 }
 0x660   : > { %v5521_v35 = vadd.f32 %v10440_v26, %v5520_v61  ;;  %v5772_v5 = vsel %vm5728_vm2, %v5718_v4, 0.0 }
 0x661   : > { %v5773_v63 = vadd.f32 %v5772_v5, %v5771_v29 }
 0x662   : > { %v5610_v11 = vadd.f32 %v5609_v58, %v5521_v35 }
 0x664   : > { %v5687_v20 = vsub.f32 %v5610_v11, %v5655_v42  ;;  %v5663_v11 = vld [vmem:[%s10465_s26 + $0xf8] sm:$0xff] }
 0x666   : > { %v5719_v15 = vmul.f32 %v5687_v20, %v5687_v20 }
 0x667   : > { %v5523_v45 = vpop.f32.mrf.mxu0  ;;  %v5612_v22 = vpop.f32.mrf.mxu1 }
 0x668   : > { %v5524_v19 = vadd.f32 %v10440_v26, %v5523_v45  ;;  %v5774_v48 = vsel %vm5728_vm2, %v5719_v15, 0.0 }
 0x669   : > { %v5775_v45 = vadd.f32 %v5774_v48, %v5773_v63 }
 0x66a   : > { %v5613_v51 = vadd.f32 %v5612_v22, %v5524_v19  ;;  %v5662_v22 = vld [vmem:[%s10465_s26 + $0xf0] sm:$0xff] }
 0x66c   : > { %v5688_v36 = vsub.f32 %v5613_v51, %v5656_v38 }
 0x66e   : > { %v5720_v44 = vmul.f32 %v5688_v36, %v5688_v36 }
 0x66f   : > { %v5525_v18 = vpop.f32.mrf.mxu0  ;;  %v5614_v62 = vpop.f32.mrf.mxu1 }
 0x670   : > { %v5526_v8 = vadd.f32 %v10440_v26, %v5525_v18  ;;  %v5776_v9 = vsel %vm5728_vm2, %v5720_v44, 0.0 }
 0x672   : > { %v5615_v14 = vadd.f32 %v5614_v62, %v5526_v8 }
 0x674   : > { %v5689_v21 = vsub.f32 %v5615_v14, %v5657_v2 }
 0x676   : > { %v5721_v39 = vmul.f32 %v5689_v21, %v5689_v21 }
 0x677   : > { %v5528_v7 = vpop.f32.mrf.mxu0  ;;  %v5617_v3 = vpop.f32.mrf.mxu1 }
 0x678   : > { %v5529_v16 = vadd.f32 %v10440_v26, %v5528_v7  ;;  %v5778_v59 = vsel %vm5728_vm2, %v5721_v39, 0.0 }
 0x67a   : > { %v5618_v17 = vadd.f32 %v5617_v3, %v5529_v16  ;;  %v5777_v3 = vadd.f32 %v5776_v9, %v5775_v45 }
 0x67c   : > { %v5690_v30 = vsub.f32 %v5618_v17, %v5658_v47  ;;  %v5779_v49 = vadd.f32 %v5778_v59, %v5777_v3 }
 0x67e   : > { %v5722_v33 = vmul.f32 %v5690_v30, %v5690_v30 }
 0x67f   : > { %v5530_v25 = vpop.f32.mrf.mxu0  ;;  %v5619_v53 = vpop.f32.mrf.mxu1 }
 0x680   : > { %v5531_v55 = vadd.f32 %v10440_v26, %v5530_v25  ;;  %v5780_v25 = vsel %vm5728_vm2, %v5722_v33, 0.0 }
 0x681   : > { %v5781_v35 = vadd.f32 %v5780_v25, %v5779_v49 }
 0x682   : > { %v5620_v43 = vadd.f32 %v5619_v53, %v5531_v55 }
 0x684   : > { %v5691_v31 = vsub.f32 %v5620_v43, %v5659_v52 }
 0x686   : > { %v5723_v18 = vmul.f32 %v5691_v31, %v5691_v31 }
 0x687   : > { %v5533_v12 = vpop.f32.mrf.mxu0  ;;  %v5622_v54 = vpop.f32.mrf.mxu1 }
 0x688   : > { %v5534_v24 = vadd.f32 %v10440_v26, %v5533_v12  ;;  %v5782_v32 = vsel %vm5728_vm2, %v5723_v18, 0.0 }
 0x689   : > { %v5783_v0 = vadd.f32 %v5782_v32, %v5781_v35 }
 0x68a   : > { %v5623_v13 = vadd.f32 %v5622_v54, %v5534_v24 }
 0x68c   : > { %v5692_v61 = vsub.f32 %v5623_v13, %v5660_v60 }
 0x68e   : > { %v5724_v53 = vmul.f32 %v5692_v61, %v5692_v61 }
 0x68f   : > { %v5535_v50 = vpop.f32.mrf.mxu0  ;;  %v5624_v57 = vpop.f32.mrf.mxu1 }
 0x690   : > { %v5536_v46 = vadd.f32 %v10440_v26, %v5535_v50  ;;  %v5784_v54 = vsel %vm5728_vm2, %v5724_v53, 0.0 }
 0x691   : > { %v5785_v56 = vadd.f32 %v5784_v54, %v5783_v0 }
 0x692   : > { %v5625_v23 = vadd.f32 %v5624_v57, %v5536_v46 }
 0x694   : > { %v5693_v62 = vsub.f32 %v5625_v23, %v5661_v34 }
 0x696   : > { %v5725_v37 = vmul.f32 %v5693_v62, %v5693_v62 }
 0x697   : > { %v5538_v27 = vpop.f32.mrf.mxu0  ;;  %v5627_v1 = vpop.f32.mrf.mxu1 }
 0x698   : > { %v5539_v58 = vadd.f32 %v10440_v26, %v5538_v27  ;;  %v5786_v8 = vsel %vm5728_vm2, %v5725_v37, 0.0 }
 0x699   : > { %v5787_v41 = vadd.f32 %v5786_v8, %v5785_v56 }
 0x69a   : > { %v5628_v7 = vadd.f32 %v5627_v1, %v5539_v58 }
 0x69c   : > { %v5694_v40 = vsub.f32 %v5628_v7, %v5662_v22 }
 0x69e   : > { %v5726_v28 = vmul.f32 %v5694_v40, %v5694_v40 }
 0x69f   : > { %v5540_v12 = vpop.f32.mrf.mxu0  ;;  %v5629_v6 = vpop.f32.mrf.mxu1 }
 0x6a0   : > { %v5541_v19 = vadd.f32 %v10440_v26, %v5540_v12  ;;  %v5788_v51 = vsel %vm5728_vm2, %v5726_v28, 0.0 }
 0x6a1   : > { %v5789_v20 = vadd.f32 %v5788_v51, %v5787_v41 }
 0x6a2   : > { %v5630_v42 = vadd.f32 %v5629_v6, %v5541_v19 }
 0x6a4   : > { %v5695_v16 = vsub.f32 %v5630_v42, %v5663_v11 }
 0x6a6   : > { %v5727_v38 = vmul.f32 %v5695_v16, %v5695_v16 }
 0x6a8   : > { %v5790_v14 = vsel %vm5728_vm2, %v5727_v38, 0.0 }
 0x6a9   : > { %v5791_v55 = vadd.f32 %v5790_v14, %v5789_v20 }
 0x6ab   : > { %5792 = vadd.xlane.f32.xlu2 %v5791_v55 }
 0x71e   : > { %v5793_v26 = vpop.xlane.xlu2 %5792 }
 0x71f   : > { %v5794_v2 = vrot.slane %v5793_v26, 4 }
 0x721   : > { %v5795_v50 = vadd.f32 %v5794_v2, %v5793_v26 }
 0x723   : > { %v5796_v57 = vrot.slane %v5795_v50, 2 }
 0x725   : > { %v5797_v4 = vadd.f32 %v5796_v57, %v5795_v50 }
 0x727   : > { %v5798_v36 = vrot.slane %v5797_v4, 1 }
 0x729   : > { %v5799_v17 = vadd.f32 %v5798_v36, %v5797_v4 }
 0x72b   : > { %6366 = vpush %v5799_v17 }
 0x75c   : > { %s6367_s30 = spop %6366 }
 0x75d   : > { %v5801_v24 = vstv %s6367_s30 }
 0x75e   : > { %5802 = vst [vmem:[%s636_s0] sm:$0xff] %v5801_v24 }
 0x75f PF: > { %s27_s24 = sadd.s32 1, %s6541_s24  }
 0x760   : > { %p24_p5 = scmp.ge.s32.totalorder %s27_s24, 4  }
 0x762   :  { %26 = sbr.rel (!%p24_p5) target bundleno = 3 (0x3), region = 130 }

</bundles_post_ra>
